<compile_context>
chip_gen: v6e
topology: v6e:2x2x1
jax: 0.10.0
libtpu: 0.0.40
codegen_flags: <defaults>
</compile_context>

<pallas_src>
import jax
import jax.numpy as jnp
from jax.experimental import pallas as pl
from jax.experimental.pallas import tpu as pltpu

# Layer widths of the autoencoder (encoder then decoder).
DIMS = [28 * 28, 128, 64, 36, 18, 9, 18, 36, 64, 128, 28 * 28]
N_LAYERS = len(DIMS) - 1  # 10 linear layers


def _round_up(n, m):
    return ((n + m - 1) // m) * m


def _ae_kernel(x_ref, *refs):
    """Fused MLP forward for one batch tile: 10 matmuls + ReLU / final Sigmoid.

    refs = (w0, b0, w1, b1, ..., w9, b9, o_ref)
    Weights are bf16 (in, out); biases are f32 (1, out).  Every matmul runs on
    the MXU with f32 accumulation; all elementwise math stays in f32.
    """
    o_ref = refs[-1]
    p = refs[:-1]

    h = x_ref[...]  # (tile, 784) f32
    for layer in range(N_LAYERS):
        w = p[2 * layer][...]        # bf16 (in, out)
        b = p[2 * layer + 1][...]    # f32  (1, out)
        z = jnp.dot(h.astype(jnp.bfloat16), w,
                    preferred_element_type=jnp.float32) + b
        if layer < N_LAYERS - 1:
            h = jnp.maximum(z, 0.0)                          # ReLU (VPU, f32)
        else:
            # Sigmoid: exp + approximate reciprocal both ride the EUP slot,
            # freeing VALU issue slots on the widest activation in the kernel.
            h = pl.reciprocal(1.0 + jnp.exp(-z), approx=True)
    o_ref[...] = h.astype(o_ref.dtype)


def autoencoder_forward(x, params, *, batch_tile=256):
    """Run the fused autoencoder kernel.

    x:      (B, 784) float32
    params: list of (W, b) with W: (in, out) bf16, b: (1, out) f32
    """
    B, D_in = x.shape
    assert D_in == DIMS[0]
    assert batch_tile % 8 == 0, "batch_tile must be a multiple of 8 sublanes"

    # Clamp the tile to the batch (rounded to a sublane multiple) and pad
    # ragged batches with zero rows; the pad is sliced off after the call.
    tile = min(batch_tile, _round_up(B, 8))
    B_pad = _round_up(B, tile)
    if B_pad != B:
        x = jnp.pad(x, ((0, B_pad - B), (0, 0)))

    flat_params = []
    for w, b in params:
        flat_params.append(w)
        flat_params.append(b)

    grid = (B_pad // tile,)

    # x / out are tiled over the batch.  Parameters use a constant index_map,
    # so Pallas DMAs them into VMEM once and keeps them resident across all
    # grid steps (total bf16 params ~0.5 MB after tile padding).
    x_spec = pl.BlockSpec((tile, DIMS[0]), lambda i: (i, 0))
    out_spec = pl.BlockSpec((tile, DIMS[-1]), lambda i: (i, 0))
    param_specs = []
    for w, b in params:
        param_specs.append(pl.BlockSpec(w.shape, lambda i: (0, 0)))
        param_specs.append(pl.BlockSpec(b.shape, lambda i: (0, 0)))

    out = pl.pallas_call(
        _ae_kernel,
        out_shape=jax.ShapeDtypeStruct((B_pad, DIMS[-1]), x.dtype),
        grid_spec=pltpu.PrefetchScalarGridSpec(
            num_scalar_prefetch=0,
            grid=grid,
            in_specs=[x_spec] + param_specs,
            out_specs=out_spec,
        ),
        compiler_params=pltpu.CompilerParams(
            dimension_semantics=("parallel",),
            vmem_limit_bytes=64 * 1024 * 1024,
        ),
    )(x, *flat_params)

    return out[:B] if B_pad != B else out


def init_params(key):
    """Deterministic init mimicking nn.Linear default (uniform +-1/sqrt(fan_in)).

    Returns list of (W, b) with W transposed to (in, out) and cast to bf16;
    biases stay f32 (1, out).
    """
    params = []
    for layer in range(N_LAYERS):
        fan_in, fan_out = DIMS[layer], DIMS[layer + 1]
        key, kw, kb = jax.random.split(key, 3)
        bound = 1.0 / jnp.sqrt(jnp.float32(fan_in))
        w = jax.random.uniform(kw, (fan_in, fan_out), jnp.float32, -bound, bound)
        b = jax.random.uniform(kb, (1, fan_out), jnp.float32, -bound, bound)
        params.append((w.astype(jnp.bfloat16), b))
    return params


def reference_forward(x, params):
    """Plain-JAX reference mirroring the kernel math (bf16 dot, f32 accum)."""
    h = x
    for layer, (w, b) in enumerate(params):
        z = jnp.dot(h.astype(jnp.bfloat16), w,
                    preferred_element_type=jnp.float32) + b
        h = jnp.maximum(z, 0.0) if layer < N_LAYERS - 1 else jax.nn.sigmoid(z)
    return h


if __name__ == "__main__":
    key = jax.random.PRNGKey(0)
    key, kx = jax.random.split(key)

    params = init_params(key)

    # Main run: B=512 with batch_tile=256 -> grid=(2,), so both v7x
    # TensorCores get a parallel grid step.
    B = 512
    x = jax.random.uniform(kx, (B, DIMS[0]), jnp.float32)

    out = autoencoder_forward(x, params, batch_tile=256)
    out = jax.block_until_ready(out)
    ref = reference_forward(x, params)
    assert out.shape == (B, DIMS[-1])
    # bf16 matmul operands + approx reciprocal sigmoid -> loosened tolerance.
    assert jnp.allclose(out, ref, atol=1e-2, rtol=1e-2), "mismatch vs reference"

    # Ragged-batch path (pad to tile multiple, slice back).
    B2 = 20
    key, kx2 = jax.random.split(key)
    x2 = jax.random.uniform(kx2, (B2, DIMS[0]), jnp.float32)
    out2 = jax.block_until_ready(autoencoder_forward(x2, params, batch_tile=256))
    ref2 = reference_forward(x2, params)
    assert out2.shape == (B2, DIMS[-1])
    assert jnp.allclose(out2, ref2, atol=1e-2, rtol=1e-2), "ragged mismatch"

    print("KERNEL_OK")
</pallas_src>

<mosaic_0001>
module attributes {stable_mosaic.version = 11 : i64} {
  func.func @_ae_kernel(%arg0: i32, %arg1: memref<256x784xf32, #tpu.memory_space<vmem>>, %arg2: memref<784x128xbf16, #tpu.memory_space<vmem>>, %arg3: memref<1x128xf32, #tpu.memory_space<vmem>>, %arg4: memref<128x64xbf16, #tpu.memory_space<vmem>>, %arg5: memref<1x64xf32, #tpu.memory_space<vmem>>, %arg6: memref<64x36xbf16, #tpu.memory_space<vmem>>, %arg7: memref<1x36xf32, #tpu.memory_space<vmem>>, %arg8: memref<36x18xbf16, #tpu.memory_space<vmem>>, %arg9: memref<1x18xf32, #tpu.memory_space<vmem>>, %arg10: memref<18x9xbf16, #tpu.memory_space<vmem>>, %arg11: memref<1x9xf32, #tpu.memory_space<vmem>>, %arg12: memref<9x18xbf16, #tpu.memory_space<vmem>>, %arg13: memref<1x18xf32, #tpu.memory_space<vmem>>, %arg14: memref<18x36xbf16, #tpu.memory_space<vmem>>, %arg15: memref<1x36xf32, #tpu.memory_space<vmem>>, %arg16: memref<36x64xbf16, #tpu.memory_space<vmem>>, %arg17: memref<1x64xf32, #tpu.memory_space<vmem>>, %arg18: memref<64x128xbf16, #tpu.memory_space<vmem>>, %arg19: memref<1x128xf32, #tpu.memory_space<vmem>>, %arg20: memref<128x784xbf16, #tpu.memory_space<vmem>>, %arg21: memref<1x784xf32, #tpu.memory_space<vmem>>, %arg22: memref<256x784xf32, #tpu.memory_space<vmem>>) attributes {dimension_semantics = [#tpu.dimension_semantics<parallel>], iteration_bounds = array<i64: 2>, scalar_prefetch = 0 : i64, scratch_operands = 0 : i64, tpu.core_type = #tpu.core_type<tc>, window_params = [{transform_indices = @transform_0, window_bounds = array<i64: 256, 784>}, {pipeline_mode = #tpu.pipeline_mode<synchronous>, transform_indices = @transform_1, window_bounds = array<i64: 784, 128>}, {pipeline_mode = #tpu.pipeline_mode<synchronous>, transform_indices = @transform_2, window_bounds = array<i64: 1, 128>}, {pipeline_mode = #tpu.pipeline_mode<synchronous>, transform_indices = @transform_3, window_bounds = array<i64: 128, 64>}, {pipeline_mode = #tpu.pipeline_mode<synchronous>, transform_indices = @transform_4, window_bounds = array<i64: 1, 64>}, {pipeline_mode = #tpu.pipeline_mode<synchronous>, transform_indices = @transform_5, window_bounds = array<i64: 64, 36>}, {pipeline_mode = #tpu.pipeline_mode<synchronous>, transform_indices = @transform_6, window_bounds = array<i64: 1, 36>}, {pipeline_mode = #tpu.pipeline_mode<synchronous>, transform_indices = @transform_7, window_bounds = array<i64: 36, 18>}, {pipeline_mode = #tpu.pipeline_mode<synchronous>, transform_indices = @transform_8, window_bounds = array<i64: 1, 18>}, {pipeline_mode = #tpu.pipeline_mode<synchronous>, transform_indices = @transform_9, window_bounds = array<i64: 18, 9>}, {pipeline_mode = #tpu.pipeline_mode<synchronous>, transform_indices = @transform_10, window_bounds = array<i64: 1, 9>}, {pipeline_mode = #tpu.pipeline_mode<synchronous>, transform_indices = @transform_11, window_bounds = array<i64: 9, 18>}, {pipeline_mode = #tpu.pipeline_mode<synchronous>, transform_indices = @transform_12, window_bounds = array<i64: 1, 18>}, {pipeline_mode = #tpu.pipeline_mode<synchronous>, transform_indices = @transform_13, window_bounds = array<i64: 18, 36>}, {pipeline_mode = #tpu.pipeline_mode<synchronous>, transform_indices = @transform_14, window_bounds = array<i64: 1, 36>}, {pipeline_mode = #tpu.pipeline_mode<synchronous>, transform_indices = @transform_15, window_bounds = array<i64: 36, 64>}, {pipeline_mode = #tpu.pipeline_mode<synchronous>, transform_indices = @transform_16, window_bounds = array<i64: 1, 64>}, {pipeline_mode = #tpu.pipeline_mode<synchronous>, transform_indices = @transform_17, window_bounds = array<i64: 64, 128>}, {pipeline_mode = #tpu.pipeline_mode<synchronous>, transform_indices = @transform_18, window_bounds = array<i64: 1, 128>}, {pipeline_mode = #tpu.pipeline_mode<synchronous>, transform_indices = @transform_19, window_bounds = array<i64: 128, 784>}, {pipeline_mode = #tpu.pipeline_mode<synchronous>, transform_indices = @transform_20, window_bounds = array<i64: 1, 784>}, {transform_indices = @transform_21, window_bounds = array<i64: 256, 784>}]} {
    %c0 = arith.constant 0 : index
    %c0_0 = arith.constant 0 : index
    %0 = vector.load %arg1[%c0, %c0_0] : memref<256x784xf32, #tpu.memory_space<vmem>>, vector<256x784xf32>
    %c0_1 = arith.constant 0 : index
    %c0_2 = arith.constant 0 : index
    %1 = vector.load %arg2[%c0_1, %c0_2] : memref<784x128xbf16, #tpu.memory_space<vmem>>, vector<784x128xbf16>
    %c0_3 = arith.constant 0 : index
    %c0_4 = arith.constant 0 : index
    %2 = vector.load %arg3[%c0_3, %c0_4] : memref<1x128xf32, #tpu.memory_space<vmem>>, vector<1x128xf32>
    %3 = arith.truncf %0 : vector<256x784xf32> to vector<256x784xbf16>
    %cst = arith.constant dense<0.000000e+00> : vector<256x128xf32>
    %4 = tpu.matmul %3, %1, %cst {dimension_numbers = #tpu.dot_dimension_numbers<[1], [0], [0], [1], [0, 0, 1, 1], [], []>} : vector<256x784xbf16>, vector<784x128xbf16>, vector<256x128xf32> -> vector<256x128xf32>
    %5 = vector.broadcast %2 : vector<1x128xf32> to vector<256x128xf32>
    %6 = arith.addf %4, %5 : vector<256x128xf32>
    %cst_5 = arith.constant 0.000000e+00 : f32
    %7 = vector.broadcast %cst_5 : f32 to vector<256x128xf32>
    %8 = arith.maximumf %6, %7 : vector<256x128xf32>
    %c0_6 = arith.constant 0 : index
    %c0_7 = arith.constant 0 : index
    %9 = vector.load %arg4[%c0_6, %c0_7] : memref<128x64xbf16, #tpu.memory_space<vmem>>, vector<128x64xbf16>
    %c0_8 = arith.constant 0 : index
    %c0_9 = arith.constant 0 : index
    %10 = vector.load %arg5[%c0_8, %c0_9] : memref<1x64xf32, #tpu.memory_space<vmem>>, vector<1x64xf32>
    %11 = arith.truncf %8 : vector<256x128xf32> to vector<256x128xbf16>
    %cst_10 = arith.constant dense<0.000000e+00> : vector<256x64xf32>
    %12 = tpu.matmul %11, %9, %cst_10 {dimension_numbers = #tpu.dot_dimension_numbers<[1], [0], [0], [1], [0, 0, 1, 1], [], []>} : vector<256x128xbf16>, vector<128x64xbf16>, vector<256x64xf32> -> vector<256x64xf32>
    %13 = vector.broadcast %10 : vector<1x64xf32> to vector<256x64xf32>
    %14 = arith.addf %12, %13 : vector<256x64xf32>
    %cst_11 = arith.constant 0.000000e+00 : f32
    %15 = vector.broadcast %cst_11 : f32 to vector<256x64xf32>
    %16 = arith.maximumf %14, %15 : vector<256x64xf32>
    %c0_12 = arith.constant 0 : index
    %c0_13 = arith.constant 0 : index
    %17 = vector.load %arg6[%c0_12, %c0_13] : memref<64x36xbf16, #tpu.memory_space<vmem>>, vector<64x36xbf16>
    %c0_14 = arith.constant 0 : index
    %c0_15 = arith.constant 0 : index
    %18 = vector.load %arg7[%c0_14, %c0_15] : memref<1x36xf32, #tpu.memory_space<vmem>>, vector<1x36xf32>
    %19 = arith.truncf %16 : vector<256x64xf32> to vector<256x64xbf16>
    %cst_16 = arith.constant dense<0.000000e+00> : vector<256x36xf32>
    %20 = tpu.matmul %19, %17, %cst_16 {dimension_numbers = #tpu.dot_dimension_numbers<[1], [0], [0], [1], [0, 0, 1, 1], [], []>} : vector<256x64xbf16>, vector<64x36xbf16>, vector<256x36xf32> -> vector<256x36xf32>
    %21 = vector.broadcast %18 : vector<1x36xf32> to vector<256x36xf32>
    %22 = arith.addf %20, %21 : vector<256x36xf32>
    %cst_17 = arith.constant 0.000000e+00 : f32
    %23 = vector.broadcast %cst_17 : f32 to vector<256x36xf32>
    %24 = arith.maximumf %22, %23 : vector<256x36xf32>
    %c0_18 = arith.constant 0 : index
    %c0_19 = arith.constant 0 : index
    %25 = vector.load %arg8[%c0_18, %c0_19] : memref<36x18xbf16, #tpu.memory_space<vmem>>, vector<36x18xbf16>
    %c0_20 = arith.constant 0 : index
    %c0_21 = arith.constant 0 : index
    %26 = vector.load %arg9[%c0_20, %c0_21] : memref<1x18xf32, #tpu.memory_space<vmem>>, vector<1x18xf32>
    %27 = arith.truncf %24 : vector<256x36xf32> to vector<256x36xbf16>
    %cst_22 = arith.constant dense<0.000000e+00> : vector<256x18xf32>
    %28 = tpu.matmul %27, %25, %cst_22 {dimension_numbers = #tpu.dot_dimension_numbers<[1], [0], [0], [1], [0, 0, 1, 1], [], []>} : vector<256x36xbf16>, vector<36x18xbf16>, vector<256x18xf32> -> vector<256x18xf32>
    %29 = vector.broadcast %26 : vector<1x18xf32> to vector<256x18xf32>
    %30 = arith.addf %28, %29 : vector<256x18xf32>
    %cst_23 = arith.constant 0.000000e+00 : f32
    %31 = vector.broadcast %cst_23 : f32 to vector<256x18xf32>
    %32 = arith.maximumf %30, %31 : vector<256x18xf32>
    %c0_24 = arith.constant 0 : index
    %c0_25 = arith.constant 0 : index
    %33 = vector.load %arg10[%c0_24, %c0_25] : memref<18x9xbf16, #tpu.memory_space<vmem>>, vector<18x9xbf16>
    %c0_26 = arith.constant 0 : index
    %c0_27 = arith.constant 0 : index
    %34 = vector.load %arg11[%c0_26, %c0_27] : memref<1x9xf32, #tpu.memory_space<vmem>>, vector<1x9xf32>
    %35 = arith.truncf %32 : vector<256x18xf32> to vector<256x18xbf16>
    %cst_28 = arith.constant dense<0.000000e+00> : vector<256x9xf32>
    %36 = tpu.matmul %35, %33, %cst_28 {dimension_numbers = #tpu.dot_dimension_numbers<[1], [0], [0], [1], [0, 0, 1, 1], [], []>} : vector<256x18xbf16>, vector<18x9xbf16>, vector<256x9xf32> -> vector<256x9xf32>
    %37 = vector.broadcast %34 : vector<1x9xf32> to vector<256x9xf32>
    %38 = arith.addf %36, %37 : vector<256x9xf32>
    %cst_29 = arith.constant 0.000000e+00 : f32
    %39 = vector.broadcast %cst_29 : f32 to vector<256x9xf32>
    %40 = arith.maximumf %38, %39 : vector<256x9xf32>
    %c0_30 = arith.constant 0 : index
    %c0_31 = arith.constant 0 : index
    %41 = vector.load %arg12[%c0_30, %c0_31] : memref<9x18xbf16, #tpu.memory_space<vmem>>, vector<9x18xbf16>
    %c0_32 = arith.constant 0 : index
    %c0_33 = arith.constant 0 : index
    %42 = vector.load %arg13[%c0_32, %c0_33] : memref<1x18xf32, #tpu.memory_space<vmem>>, vector<1x18xf32>
    %43 = arith.truncf %40 : vector<256x9xf32> to vector<256x9xbf16>
    %cst_34 = arith.constant dense<0.000000e+00> : vector<256x18xf32>
    %44 = tpu.matmul %43, %41, %cst_34 {dimension_numbers = #tpu.dot_dimension_numbers<[1], [0], [0], [1], [0, 0, 1, 1], [], []>} : vector<256x9xbf16>, vector<9x18xbf16>, vector<256x18xf32> -> vector<256x18xf32>
    %45 = vector.broadcast %42 : vector<1x18xf32> to vector<256x18xf32>
    %46 = arith.addf %44, %45 : vector<256x18xf32>
    %cst_35 = arith.constant 0.000000e+00 : f32
    %47 = vector.broadcast %cst_35 : f32 to vector<256x18xf32>
    %48 = arith.maximumf %46, %47 : vector<256x18xf32>
    %c0_36 = arith.constant 0 : index
    %c0_37 = arith.constant 0 : index
    %49 = vector.load %arg14[%c0_36, %c0_37] : memref<18x36xbf16, #tpu.memory_space<vmem>>, vector<18x36xbf16>
    %c0_38 = arith.constant 0 : index
    %c0_39 = arith.constant 0 : index
    %50 = vector.load %arg15[%c0_38, %c0_39] : memref<1x36xf32, #tpu.memory_space<vmem>>, vector<1x36xf32>
    %51 = arith.truncf %48 : vector<256x18xf32> to vector<256x18xbf16>
    %cst_40 = arith.constant dense<0.000000e+00> : vector<256x36xf32>
    %52 = tpu.matmul %51, %49, %cst_40 {dimension_numbers = #tpu.dot_dimension_numbers<[1], [0], [0], [1], [0, 0, 1, 1], [], []>} : vector<256x18xbf16>, vector<18x36xbf16>, vector<256x36xf32> -> vector<256x36xf32>
    %53 = vector.broadcast %50 : vector<1x36xf32> to vector<256x36xf32>
    %54 = arith.addf %52, %53 : vector<256x36xf32>
    %cst_41 = arith.constant 0.000000e+00 : f32
    %55 = vector.broadcast %cst_41 : f32 to vector<256x36xf32>
    %56 = arith.maximumf %54, %55 : vector<256x36xf32>
    %c0_42 = arith.constant 0 : index
    %c0_43 = arith.constant 0 : index
    %57 = vector.load %arg16[%c0_42, %c0_43] : memref<36x64xbf16, #tpu.memory_space<vmem>>, vector<36x64xbf16>
    %c0_44 = arith.constant 0 : index
    %c0_45 = arith.constant 0 : index
    %58 = vector.load %arg17[%c0_44, %c0_45] : memref<1x64xf32, #tpu.memory_space<vmem>>, vector<1x64xf32>
    %59 = arith.truncf %56 : vector<256x36xf32> to vector<256x36xbf16>
    %cst_46 = arith.constant dense<0.000000e+00> : vector<256x64xf32>
    %60 = tpu.matmul %59, %57, %cst_46 {dimension_numbers = #tpu.dot_dimension_numbers<[1], [0], [0], [1], [0, 0, 1, 1], [], []>} : vector<256x36xbf16>, vector<36x64xbf16>, vector<256x64xf32> -> vector<256x64xf32>
    %61 = vector.broadcast %58 : vector<1x64xf32> to vector<256x64xf32>
    %62 = arith.addf %60, %61 : vector<256x64xf32>
    %cst_47 = arith.constant 0.000000e+00 : f32
    %63 = vector.broadcast %cst_47 : f32 to vector<256x64xf32>
    %64 = arith.maximumf %62, %63 : vector<256x64xf32>
    %c0_48 = arith.constant 0 : index
    %c0_49 = arith.constant 0 : index
    %65 = vector.load %arg18[%c0_48, %c0_49] : memref<64x128xbf16, #tpu.memory_space<vmem>>, vector<64x128xbf16>
    %c0_50 = arith.constant 0 : index
    %c0_51 = arith.constant 0 : index
    %66 = vector.load %arg19[%c0_50, %c0_51] : memref<1x128xf32, #tpu.memory_space<vmem>>, vector<1x128xf32>
    %67 = arith.truncf %64 : vector<256x64xf32> to vector<256x64xbf16>
    %cst_52 = arith.constant dense<0.000000e+00> : vector<256x128xf32>
    %68 = tpu.matmul %67, %65, %cst_52 {dimension_numbers = #tpu.dot_dimension_numbers<[1], [0], [0], [1], [0, 0, 1, 1], [], []>} : vector<256x64xbf16>, vector<64x128xbf16>, vector<256x128xf32> -> vector<256x128xf32>
    %69 = vector.broadcast %66 : vector<1x128xf32> to vector<256x128xf32>
    %70 = arith.addf %68, %69 : vector<256x128xf32>
    %cst_53 = arith.constant 0.000000e+00 : f32
    %71 = vector.broadcast %cst_53 : f32 to vector<256x128xf32>
    %72 = arith.maximumf %70, %71 : vector<256x128xf32>
    %c0_54 = arith.constant 0 : index
    %c0_55 = arith.constant 0 : index
    %73 = vector.load %arg20[%c0_54, %c0_55] : memref<128x784xbf16, #tpu.memory_space<vmem>>, vector<128x784xbf16>
    %c0_56 = arith.constant 0 : index
    %c0_57 = arith.constant 0 : index
    %74 = vector.load %arg21[%c0_56, %c0_57] : memref<1x784xf32, #tpu.memory_space<vmem>>, vector<1x784xf32>
    %75 = arith.truncf %72 : vector<256x128xf32> to vector<256x128xbf16>
    %cst_58 = arith.constant dense<0.000000e+00> : vector<256x784xf32>
    %76 = tpu.matmul %75, %73, %cst_58 {dimension_numbers = #tpu.dot_dimension_numbers<[1], [0], [0], [1], [0, 0, 1, 1], [], []>} : vector<256x128xbf16>, vector<128x784xbf16>, vector<256x784xf32> -> vector<256x784xf32>
    %77 = vector.broadcast %74 : vector<1x784xf32> to vector<256x784xf32>
    %78 = arith.addf %76, %77 : vector<256x784xf32>
    %cst_59 = arith.constant 0.000000e+00 : f32
    %79 = vector.broadcast %cst_59 : f32 to vector<256x784xf32>
    %80 = arith.subf %79, %78 : vector<256x784xf32>
    %81 = math.exp %80 : vector<256x784xf32>
    %cst_60 = arith.constant 1.000000e+00 : f32
    %82 = vector.broadcast %cst_60 : f32 to vector<256x784xf32>
    %83 = arith.addf %82, %81 : vector<256x784xf32>
    %84 = tpu.reciprocal %83 {approx = true} : vector<256x784xf32> -> vector<256x784xf32>
    %c0_61 = arith.constant 0 : index
    %c0_62 = arith.constant 0 : index
    %85 = vector.load %arg22[%c0_61, %c0_62] : memref<256x784xf32, #tpu.memory_space<vmem>>, vector<256x784xf32>
    tpu.vector_store %arg22[%c0_61, %c0_62], %84 {strides = array<i32>} : memref<256x784xf32, #tpu.memory_space<vmem>>, vector<256x784xf32>,
    return
  }
  func.func @transform_0(%arg0: i32) -> (i32, i32) {
    %c0_i32 = arith.constant 0 : i32
    %c0_i32_0 = arith.constant 0 : i32
    return %arg0, %c0_i32 : i32, i32
  }
  func.func @transform_1(%arg0: i32) -> (i32, i32) {
    %c0_i32 = arith.constant 0 : i32
    %c0_i32_0 = arith.constant 0 : i32
    %c0_i32_1 = arith.constant 0 : i32
    return %c0_i32, %c0_i32_0 : i32, i32
  }
  func.func @transform_2(%arg0: i32) -> (i32, i32) {
    %c0_i32 = arith.constant 0 : i32
    %c0_i32_0 = arith.constant 0 : i32
    %c0_i32_1 = arith.constant 0 : i32
    return %c0_i32, %c0_i32_0 : i32, i32
  }
  func.func @transform_3(%arg0: i32) -> (i32, i32) {
    %c0_i32 = arith.constant 0 : i32
    %c0_i32_0 = arith.constant 0 : i32
    %c0_i32_1 = arith.constant 0 : i32
    return %c0_i32, %c0_i32_0 : i32, i32
  }
  func.func @transform_4(%arg0: i32) -> (i32, i32) {
    %c0_i32 = arith.constant 0 : i32
    %c0_i32_0 = arith.constant 0 : i32
    %c0_i32_1 = arith.constant 0 : i32
    return %c0_i32, %c0_i32_0 : i32, i32
  }
  func.func @transform_5(%arg0: i32) -> (i32, i32) {
    %c0_i32 = arith.constant 0 : i32
    %c0_i32_0 = arith.constant 0 : i32
    %c0_i32_1 = arith.constant 0 : i32
    return %c0_i32, %c0_i32_0 : i32, i32
  }
  func.func @transform_6(%arg0: i32) -> (i32, i32) {
    %c0_i32 = arith.constant 0 : i32
    %c0_i32_0 = arith.constant 0 : i32
    %c0_i32_1 = arith.constant 0 : i32
    return %c0_i32, %c0_i32_0 : i32, i32
  }
  func.func @transform_7(%arg0: i32) -> (i32, i32) {
    %c0_i32 = arith.constant 0 : i32
    %c0_i32_0 = arith.constant 0 : i32
    %c0_i32_1 = arith.constant 0 : i32
    return %c0_i32, %c0_i32_0 : i32, i32
  }
  func.func @transform_8(%arg0: i32) -> (i32, i32) {
    %c0_i32 = arith.constant 0 : i32
    %c0_i32_0 = arith.constant 0 : i32
    %c0_i32_1 = arith.constant 0 : i32
    return %c0_i32, %c0_i32_0 : i32, i32
  }
  func.func @transform_9(%arg0: i32) -> (i32, i32) {
    %c0_i32 = arith.constant 0 : i32
    %c0_i32_0 = arith.constant 0 : i32
    %c0_i32_1 = arith.constant 0 : i32
    return %c0_i32, %c0_i32_0 : i32, i32
  }
  func.func @transform_10(%arg0: i32) -> (i32, i32) {
    %c0_i32 = arith.constant 0 : i32
    %c0_i32_0 = arith.constant 0 : i32
    %c0_i32_1 = arith.constant 0 : i32
    return %c0_i32, %c0_i32_0 : i32, i32
  }
  func.func @transform_11(%arg0: i32) -> (i32, i32) {
    %c0_i32 = arith.constant 0 : i32
    %c0_i32_0 = arith.constant 0 : i32
    %c0_i32_1 = arith.constant 0 : i32
    return %c0_i32, %c0_i32_0 : i32, i32
  }
  func.func @transform_12(%arg0: i32) -> (i32, i32) {
    %c0_i32 = arith.constant 0 : i32
    %c0_i32_0 = arith.constant 0 : i32
    %c0_i32_1 = arith.constant 0 : i32
    return %c0_i32, %c0_i32_0 : i32, i32
  }
  func.func @transform_13(%arg0: i32) -> (i32, i32) {
    %c0_i32 = arith.constant 0 : i32
    %c0_i32_0 = arith.constant 0 : i32
    %c0_i32_1 = arith.constant 0 : i32
    return %c0_i32, %c0_i32_0 : i32, i32
  }
  func.func @transform_14(%arg0: i32) -> (i32, i32) {
    %c0_i32 = arith.constant 0 : i32
    %c0_i32_0 = arith.constant 0 : i32
    %c0_i32_1 = arith.constant 0 : i32
    return %c0_i32, %c0_i32_0 : i32, i32
  }
  func.func @transform_15(%arg0: i32) -> (i32, i32) {
    %c0_i32 = arith.constant 0 : i32
    %c0_i32_0 = arith.constant 0 : i32
    %c0_i32_1 = arith.constant 0 : i32
    return %c0_i32, %c0_i32_0 : i32, i32
  }
  func.func @transform_16(%arg0: i32) -> (i32, i32) {
    %c0_i32 = arith.constant 0 : i32
    %c0_i32_0 = arith.constant 0 : i32
    %c0_i32_1 = arith.constant 0 : i32
    return %c0_i32, %c0_i32_0 : i32, i32
  }
  func.func @transform_17(%arg0: i32) -> (i32, i32) {
    %c0_i32 = arith.constant 0 : i32
    %c0_i32_0 = arith.constant 0 : i32
    %c0_i32_1 = arith.constant 0 : i32
    return %c0_i32, %c0_i32_0 : i32, i32
  }
  func.func @transform_18(%arg0: i32) -> (i32, i32) {
    %c0_i32 = arith.constant 0 : i32
    %c0_i32_0 = arith.constant 0 : i32
    %c0_i32_1 = arith.constant 0 : i32
    return %c0_i32, %c0_i32_0 : i32, i32
  }
  func.func @transform_19(%arg0: i32) -> (i32, i32) {
    %c0_i32 = arith.constant 0 : i32
    %c0_i32_0 = arith.constant 0 : i32
    %c0_i32_1 = arith.constant 0 : i32
    return %c0_i32, %c0_i32_0 : i32, i32
  }
  func.func @transform_20(%arg0: i32) -> (i32, i32) {
    %c0_i32 = arith.constant 0 : i32
    %c0_i32_0 = arith.constant 0 : i32
    %c0_i32_1 = arith.constant 0 : i32
    return %c0_i32, %c0_i32_0 : i32, i32
  }
  func.func @transform_21(%arg0: i32) -> (i32, i32) {
    %c0_i32 = arith.constant 0 : i32
    %c0_i32_0 = arith.constant 0 : i32
    return %arg0, %c0_i32 : i32, i32
  }
}

</mosaic_0001>

<bundles_post_ra>
// kernel: tpu_custom_call.1
= control target key start
LH: loop header
LB: loop body
LE: loop exit
PB: predicated region body
PF: predicated region fallthrough
CT: control target
= control target key end

     0   :  { %s11554_s0 = inlined_call_operand.vmem [shape: f32[512,784], index: 0, kind: input, shape index: {}]   ;;  %s11555_s1 = inlined_call_operand.vmem [shape: bf16[784,128], index: 1, kind: input, shape index: {}]   ;;  %s11556_s2 = inlined_call_operand.vmem [shape: f32[1,128], index: 2, kind: input, shape index: {}]   ;;  %s11557_s3 = inlined_call_operand.vmem [shape: bf16[128,64], index: 3, kind: input, shape index: {}]   ;;  %s11558_s4 = inlined_call_operand.vmem [shape: f32[1,64], index: 4, kind: input, shape index: {}]   ;;  %s11559_s5 = inlined_call_operand.vmem [shape: bf16[64,36], index: 5, kind: input, shape index: {}]   ;;  %s11560_s6 = inlined_call_operand.vmem [shape: f32[1,36], index: 6, kind: input, shape index: {}]   ;;  %s11561_s7 = inlined_call_operand.vmem [shape: bf16[36,18], index: 7, kind: input, shape index: {}]   ;;  %s11562_s8 = inlined_call_operand.vmem [shape: f32[1,18], index: 8, kind: input, shape index: {}]   ;;  %s11563_s9 = inlined_call_operand.vmem [shape: bf16[18,9], index: 9, kind: input, shape index: {}]   ;;  %s11564_s10 = inlined_call_operand.vmem [shape: f32[1,9], index: 10, kind: input, shape index: {}]   ;;  %s11565_s11 = inlined_call_operand.vmem [shape: bf16[9,18], index: 11, kind: input, shape index: {}]   ;;  %s11566_s12 = inlined_call_operand.vmem [shape: f32[1,18], index: 12, kind: input, shape index: {}]   ;;  %s11567_s13 = inlined_call_operand.vmem [shape: bf16[18,36], index: 13, kind: input, shape index: {}]   ;;  %s11568_s14 = inlined_call_operand.vmem [shape: f32[1,36], index: 14, kind: input, shape index: {}]   ;;  %s11569_s15 = inlined_call_operand.vmem [shape: bf16[36,64], index: 15, kind: input, shape index: {}]   ;;  %s11570_s16 = inlined_call_operand.vmem [shape: f32[1,64], index: 16, kind: input, shape index: {}]   ;;  %s11571_s17 = inlined_call_operand.vmem [shape: bf16[64,128], index: 17, kind: input, shape index: {}]   ;;  %s11572_s18 = inlined_call_operand.vmem [shape: f32[1,128], index: 18, kind: input, shape index: {}]   ;;  %s11573_s19 = inlined_call_operand.vmem [shape: bf16[128,784], index: 19, kind: input, shape index: {}]   ;;  %s11574_s20 = inlined_call_operand.vmem [shape: f32[1,784], index: 20, kind: input, shape index: {}]   ;;  %s11575_s21 = inlined_call_operand.vmem [shape: f32[512,784], index: 21, kind: output, shape index: {}]  }
   0x1   :  { %11580 = sst [smem:[#allocation2_spill]] %s11554_s0 }
   0x2   :  { %11581 = sst [smem:[#allocation3_spill]] %s11555_s1 }
   0x3   :  { %11582 = sst [smem:[#allocation4_spill]] %s11556_s2  ;;  %s9353_s2 = smov 0  }
   0x4   :  { %11583 = sst [smem:[#allocation5_spill]] %s11557_s3 }
   0x5   :  { %11584 = sst [smem:[#allocation6_spill]] %s11558_s4 }
   0x6   :  { %11585 = sst [smem:[#allocation7_spill]] %s11559_s5 }
   0x7 LB: > { %s6961_s25 = sadd.s32 4294967295, %s9239_s2   ;;  %p6965_p0 = scmp.ge.s32.totalorder %s9239_s2, 1  ;;  %s9239_s2 = sphi %s9353_s2, %s31_s2  }
   0x8   : > { %p589_p1 = scmp.lt.s32.totalorder %s9239_s2, 3 }
   0xa   : > { %p590_p2 = pnand %p6965_p0, %p589_p1 }
   0xb   : > { %s11586_s3 = sld [smem:[#allocation3_spill]] (!%p590_p2)  ;;  %s6966_s0 = sshll.u32 (!%p590_p2), %s6961_s25, 5 }
   0xc   : > { %593 = sbr.rel (%p590_p2) target bundleno = 2708 (0xa94), region = 104  ;;  %p652_p3 = scmp.lt.s32.totalorder (!%p590_p2), %s6966_s0, 63 }
   0xd   : > { %s11587_s27 = sld [smem:[#allocation2_spill]] (!%p590_p2) }
   0xe   : > { %s11588_s5 = sld [smem:[#allocation5_spill]] (!%p590_p2) }
   0xf   : > { %s11589_s23 = sld [smem:[#allocation4_spill]] (!%p590_p2) }
  0x10   : > { %s11590_s22 = sld [smem:[#allocation7_spill]] (!%p590_p2) }
  0x11   : > { %v8180_v0 = vld [vmem:[%s11586_s3 + $0x78] sm:$0xff]   ;;  %v8184_v4 = vld [vmem:[%s11586_s3 + $0x70] sm:$0xff]   ;;  %v8188_v8 = vld [vmem:[%s11586_s3 + $0x68] sm:$0xff]   ;;  %s11594_s0 = smov (!%p652_p3, %s6966_s0), 63  ;;  %vm1401_vm0 = vcmask 130048   ;;  %vm2795_vm1 = vcmask 1041408  }
  0x12   : > { %v8181_v1 = vld [vmem:[%s11586_s3 + $0x38] sm:$0xff]   ;;  %7241 = vmatprep.subr.bf16.mxu0 %v8180_v0  ;;  %v8185_v5 = vld [vmem:[%s11586_s3 + $0x30] sm:$0xff]   ;;  %v8189_v9 = vld [vmem:[%s11586_s3 + $0x28] sm:$0xff]   ;;  %s11579_s28 = smul.u32 56, %s11594_s0  ;;  %vm2461_vm2 = vcmask 523264   ;;  %vm3076_vm3 = vcmask 1040384  }
  0x13   : > { %v8182_v2 = vld [vmem:[%s11586_s3 + $0xf8] sm:$0xff]   ;;  %7242 = vmatpush3.bf16.msra.mxu0 %v8181_v1  ;;  %v8186_v6 = vld [vmem:[%s11586_s3 + $0xf0] sm:$0xff]   ;;  %v8190_v10 = vld [vmem:[%s11586_s3 + $0xe8] sm:$0xff]   ;;  %vm2746_vm4 = vcmask 293888   ;;  %vm3352_vm5 = vcmask 1043456   ;;  %vm3353_vm6 = vcmask 1044480  }
  0x14   : > { %v8183_v3 = vld [vmem:[%s11586_s3 + $0xb8] sm:$0xff]   ;;  %7353 = vmatprep.subr.bf16.mxu1 %v8182_v2  ;;  %7243 = vmatprep.subr.bf16.mxu0 %v8184_v4  ;;  %v8187_v7 = vld [vmem:[%s11586_s3 + $0xb0] sm:$0xff]   ;;  %v8191_v11 = vld [vmem:[%s11586_s3 + $0xa8] sm:$0xff]   ;;  %s9458_s29 = scalar_lea.vmem %s11587_s27, %s11579_s28  ;;  %s11591_s27 = sld [smem:[#allocation6_spill]]  ;;  %vm3027_vm7 = vcmask 146432   ;;  %vm3303_vm8 = vcmask 72704  }
  0x15   : > { %7354 = vmatpush3.bf16.msra.mxu1 %v8183_v3  ;;  %v8192_v12 = vld [vmem:[%s11586_s3 + $0x60] sm:$0xff]   ;;  %v8196_v16 = vld [vmem:[%s11586_s3 + $0x58] sm:$0xff]   ;;  %v8200_v20 = vld [vmem:[%s11586_s3 + $0x50] sm:$0xff]   ;;  %s11592_s24 = smul.u32 56, %s11594_s0 }
  0x16   : > { %7355 = vmatprep.subr.bf16.mxu1 %v8186_v6  ;;  %v8193_v13 = vld [vmem:[%s11586_s3 + $0x20] sm:$0xff]   ;;  %v8197_v17 = vld [vmem:[%s11586_s3 + $0x18] sm:$0xff]   ;;  %v8201_v21 = vld [vmem:[%s11586_s3 + $0x10] sm:$0xff]  }
  0x17   : > { %7244 = vmatpush3.bf16.msra.mxu0 %v8185_v5  ;;  %v8194_v14 = vld [vmem:[%s11586_s3 + $0xe0] sm:$0xff]   ;;  %v8198_v18 = vld [vmem:[%s11586_s3 + $0xd8] sm:$0xff]   ;;  %v8202_v22 = vld [vmem:[%s11586_s3 + $0xd0] sm:$0xff]  }
  0x18   : > { %7245 = vmatprep.subr.bf16.mxu0 %v8188_v8  ;;  %v8195_v15 = vld [vmem:[%s11586_s3 + $0xa0] sm:$0xff]   ;;  %v8199_v19 = vld [vmem:[%s11586_s3 + $0x98] sm:$0xff]   ;;  %v8203_v23 = vld [vmem:[%s11586_s3 + $0x90] sm:$0xff]  }
  0x19   : > { %7356 = vmatpush3.bf16.msra.mxu1 %v8187_v7  ;;  %v8204_v24 = vld [vmem:[%s11586_s3 + $0x48] sm:$0xff]   ;;  %v8208_v28 = vld [vmem:[%s11586_s3 + $0x40] sm:$0xff]   ;;  %v673_v36 = vld [vmem:[%s9458_s29 + $0x38] sm:$0xff] }
  0x1a   : > { %7357 = vmatprep.subr.bf16.mxu1 %v8190_v10  ;;  %v8205_v25 = vld [vmem:[%s11586_s3 + $0x8] sm:$0xff]   ;;  %v8209_v29 = vld [vmem:[%s11586_s3] sm:$0xff]   ;;  %v8212_v38 = vld [vmem:[%s11586_s3 + $0x178] sm:$0xff]  }
  0x1b   : > { %7246 = vmatpush3.bf16.msra.mxu0 %v8189_v9  ;;  %v8206_v26 = vld [vmem:[%s11586_s3 + $0xc8] sm:$0xff]   ;;  %v8210_v30 = vld [vmem:[%s11586_s3 + $0xc0] sm:$0xff]   ;;  %v669_v39 = vld [vmem:[%s9458_s29 + $0x18] sm:$0xff] }
  0x1c   : > { %7247 = vmatprep.subr.bf16.mxu0 %v8192_v12  ;;  %v8207_v27 = vld [vmem:[%s11586_s3 + $0x88] sm:$0xff]   ;;  %v674_v32 = vld [vmem:[%s9458_s29 + $0x40] sm:$0xff]  ;;  %v676_v40 = vld [vmem:[%s9458_s29 + $0x50] sm:$0xff] }
  0x1d   : > { %7358 = vmatpush3.bf16.msra.mxu1 %v8191_v11  ;;  %v667_v31 = vld [vmem:[%s9458_s29 + $0x8] sm:$0xff]  ;;  %v8211_v34 = vld [vmem:[%s11586_s3 + $0x80] sm:$0xff]   ;;  %v992_v41 = vpack.c.bf16 %v676_v40, %v669_v39  ;;  %v8213_v42 = vld [vmem:[%s11586_s3 + $0x138] sm:$0xff]  }
  0x1e   : > { %7359 = vmatprep.subr.bf16.mxu1 %v8194_v14  ;;  %v990_v33 = vpack.c.bf16 %v674_v32, %v667_v31  ;;  %v666_v35 = vld [vmem:[%s9458_s29] sm:$0xff]  ;;  %v668_v43 = vld [vmem:[%s9458_s29 + $0x10] sm:$0xff]  ;;  %v675_v44 = vld [vmem:[%s9458_s29 + $0x48] sm:$0xff] }
  0x1f   : > { %7248 = vmatpush3.bf16.msra.mxu0 %v8193_v13  ;;  %v989_v37 = vpack.c.bf16 %v673_v36, %v666_v35  ;;  %v681_v45 = vld [vmem:[%s9458_s29 + $0x78] sm:$0xff]  ;;  %1643 = vmatprep.mubr.bf16.mxu1 %v992_v41  ;;  %v991_v46 = vpack.c.bf16 %v675_v44, %v668_v43  ;;  %v688_v47 = vld [vmem:[%s9458_s29 + $0xb0] sm:$0xff]  ;;  %v687_v49 = vld [vmem:[%s9458_s29 + $0xa8] sm:$0xff] }
  0x20   : > { %7249 = vmatprep.subr.bf16.mxu0 %v8196_v16  ;;  %1482 = vmatprep.mubr.bf16.mxu0 %v990_v33  ;;  %v680_v48 = vld [vmem:[%s9458_s29 + $0x70] sm:$0xff]  ;;  %v997_v50 = vpack.c.bf16 %v688_v47, %v681_v45  ;;  %v683_v51 = vld [vmem:[%s9458_s29 + $0x88] sm:$0xff]  ;;  %v690_v52 = vld [vmem:[%s9458_s29 + $0xc0] sm:$0xff] }
  0x21   : > { %7360 = vmatpush3.bf16.msra.mxu1 %v8195_v15  ;;  %v682_v53 = vld [vmem:[%s9458_s29 + $0x80] sm:$0xff]  ;;  %v999_v54 = vpack.c.bf16 %v690_v52, %v683_v51  ;;  %v689_v55 = vld [vmem:[%s9458_s29 + $0xb8] sm:$0xff]  ;;  %v996_v56 = vpack.c.bf16 %v687_v49, %v680_v48  ;;  %v695_v58 = vld [vmem:[%s9458_s29 + $0xe8] sm:$0xff] }
  0x22   : > { %7361 = vmatprep.subr.bf16.mxu1 %v8198_v18  ;;  %v8214_v57 = vld [vmem:[%s11586_s3 + $0x180] sm:$0xff]   ;;  %v8215_v61 = vld [vmem:[%s11586_s3 + $0x170] sm:$0xff]   ;;  %v697_v62 = vld [vmem:[%s9458_s29 + $0xf8] sm:$0xff]  ;;  %v998_v63 = vpack.c.bf16 %v689_v55, %v682_v53 }
  0x23   : > { %7250 = vmatpush3.bf16.msra.mxu0 %v8197_v17  ;;  %v702_v59 = vld [vmem:[%s9458_s29 + $0x120] sm:$0xff]  ;;  %v704_v0 = vld [vmem:[%s9458_s29 + $0x130] sm:$0xff]  ;;  %v701_v4 = vld [vmem:[%s9458_s29 + $0x118] sm:$0xff] }
  0x24   : > { %7251 = vmatprep.subr.bf16.mxu0 %v8200_v20  ;;  %v1004_v60 = vpack.c.bf16 %v702_v59, %v695_v58  ;;  %v1006_v1 = vpack.c.bf16 %v704_v0, %v697_v62  ;;  %v8216_v2 = vld [vmem:[%s11586_s3 + $0x130] sm:$0xff]   ;;  %v694_v3 = vld [vmem:[%s9458_s29 + $0xe0] sm:$0xff]  ;;  %v709_v5 = vld [vmem:[%s9458_s29 + $0x158] sm:$0xff] }
  0x25   : > { %7362 = vmatpush3.bf16.msra.mxu1 %v8199_v19  ;;  %v716_v6 = vld [vmem:[%s9458_s29 + $0x190] sm:$0xff]  ;;  %v1003_v8 = vpack.c.bf16 %v701_v4, %v694_v3  ;;  %v703_v9 = vld [vmem:[%s9458_s29 + $0x128] sm:$0xff]  ;;  %v718_v11 = vld [vmem:[%s9458_s29 + $0x1a0] sm:$0xff] }
  0x26   : > { %7363 = vmatprep.subr.bf16.mxu1 %v8202_v22  ;;  %v696_v7 = vld [vmem:[%s9458_s29 + $0xf0] sm:$0xff]  ;;  %v711_v10 = vld [vmem:[%s9458_s29 + $0x168] sm:$0xff]  ;;  %v1011_v12 = vpack.c.bf16 %v716_v6, %v709_v5  ;;  %v730_v20 = vld [vmem:[%s9458_s29 + $0x200] sm:$0xff] }
  0x27   : > { %7252 = vmatpush3.bf16.msra.mxu0 %v8201_v21  ;;  %v8217_v13 = vld [vmem:[%s11586_s3 + $0x168] sm:$0xff]   ;;  %v1005_v14 = vpack.c.bf16 %v703_v9, %v696_v7  ;;  %v1013_v16 = vpack.c.bf16 %v718_v11, %v711_v10  ;;  %v708_v17 = vld [vmem:[%s9458_s29 + $0x150] sm:$0xff]  ;;  %v710_v21 = vld [vmem:[%s9458_s29 + $0x160] sm:$0xff] }
  0x28   : > { %7253 = vmatprep.subr.bf16.mxu0 %v8204_v24  ;;  %v8218_v15 = vld [vmem:[%s11586_s3 + $0x128] sm:$0xff]   ;;  %v722_v31 = vld [vmem:[%s9458_s29 + $0x1c0] sm:$0xff]  ;;  %v729_v32 = vld [vmem:[%s9458_s29 + $0x1f8] sm:$0xff] }
  0x29   : > { %7364 = vmatpush3.bf16.msra.mxu1 %v8203_v23  ;;  %v715_v18 = vld [vmem:[%s9458_s29 + $0x188] sm:$0xff]  ;;  %v717_v23 = vld [vmem:[%s9458_s29 + $0x198] sm:$0xff]  ;;  %v724_v35 = vld [vmem:[%s9458_s29 + $0x1d0] sm:$0xff] }
  0x2a   : > { %7365 = vmatprep.subr.bf16.mxu1 %v8206_v26  ;;  %v723_v19 = vld [vmem:[%s9458_s29 + $0x1c8] sm:$0xff]  ;;  %v1010_v22 = vpack.c.bf16 %v715_v18, %v708_v17  ;;  %v732_v26 = vld [vmem:[%s9458_s29 + $0x210] sm:$0xff]  ;;  %v737_v33 = vld [vmem:[%s9458_s29 + $0x238] sm:$0xff] }
  0x2b   : > { %7254 = vmatpush3.bf16.msra.mxu0 %v8205_v25  ;;  %v1018_v24 = vpack.c.bf16 %v730_v20, %v723_v19  ;;  %v725_v25 = vld [vmem:[%s9458_s29 + $0x1d8] sm:$0xff]  ;;  %v731_v36 = vld [vmem:[%s9458_s29 + $0x208] sm:$0xff]  ;;  %v746_v41 = vld [vmem:[%s9458_s29 + $0x280] sm:$0xff] }
  0x2c   : > { %7255 = vmatprep.subr.bf16.mxu0 %v8208_v28  ;;  %v8220_v28 = vld [vmem:[%s11586_s3 + $0x120] sm:$0xff]   ;;  %v8221_v39 = vld [vmem:[%s11586_s3 + $0x158] sm:$0xff]   ;;  %v1019_v43 = vpack.c.bf16 %v731_v36, %v724_v35  ;;  %v736_v45 = vld [vmem:[%s9458_s29 + $0x230] sm:$0xff] }
  0x2d   : > { %7366 = vmatpush3.bf16.msra.mxu1 %v8207_v27  ;;  %v8219_v27 = vld [vmem:[%s11586_s3 + $0x160] sm:$0xff]   ;;  %v751_v48 = vld [vmem:[%s9458_s29 + $0x2a8] sm:$0xff]  ;;  %v745_v52 = vld [vmem:[%s9458_s29 + $0x278] sm:$0xff] }
  0x2e   : > { %7367 = vmatprep.subr.bf16.mxu1 %v8210_v30  ;;  %v1020_v30 = vpack.c.bf16 %v732_v26, %v725_v25  ;;  %v738_v47 = vld [vmem:[%s9458_s29 + $0x240] sm:$0xff]  ;;  %v753_v53 = vld [vmem:[%s9458_s29 + $0x2b8] sm:$0xff]  ;;  %v760_v55 = vld [vmem:[%s9458_s29 + $0x2f0] sm:$0xff] }
  0x2f   : > { %7256 = vmatpush3.bf16.msra.mxu0 %v8209_v29  ;;  %v1012_v29 = vpack.c.bf16 %v717_v23, %v710_v21  ;;  %v758_v49 = vld [vmem:[%s9458_s29 + $0x2e0] sm:$0xff]  ;;  %v1034_v58 = vpack.c.bf16 %v760_v55, %v753_v53  ;;  %v772_v62 = vld [vmem:[%s9458_s29 + $0x350] sm:$0xff]  ;;  %v759_v0 = vld [vmem:[%s9458_s29 + $0x2e8] sm:$0xff] }
  0x30   : > { %7465 = vmatprep.subr.bf16.mxu0 %v8212_v38  ;;  %v739_v38 = vld [vmem:[%s9458_s29 + $0x248] sm:$0xff]  ;;  %v750_v59 = vld [vmem:[%s9458_s29 + $0x2a0] sm:$0xff]  ;;  %v781_v19 = vld [vmem:[%s9458_s29 + $0x398] sm:$0xff] }
  0x31   : > { %7368 = vmatpush3.bf16.msra.mxu1 %v8211_v34  ;;  %v744_v34 = vld [vmem:[%s9458_s29 + $0x270] sm:$0xff]  ;;  %v1027_v44 = vpack.c.bf16 %v746_v41, %v739_v38  ;;  %v8226_v3 = vld [vmem:[%s11586_s3 + $0x108] sm:$0xff]   ;;  %v774_v6 = vld [vmem:[%s9458_s29 + $0x360] sm:$0xff] }
  0x32   : > { %1483 = vmatmul.mubr.bf16.vlgmr.msra.gmra.mxu0 %v989_v37  ;;  %7773 = vmatprep.subr.bf16.mxu1 %v8214_v57  ;;  %v1017_v37 = vpack.c.bf16 %v729_v32, %v722_v31  ;;  %v1025_v40 = vpack.c.bf16 %v744_v34, %v737_v33  ;;  %v767_v5 = vld [vmem:[%s9458_s29 + $0x328] sm:$0xff]  ;;  %v8228_v17 = vld [vmem:[%s11586_s3 + $0x100] sm:$0xff]   ;;  %v788_v20 = vld [vmem:[%s9458_s29 + $0x3d0] sm:$0xff] }
  0x33   : > { %7466 = vmatpush3.bf16.msra.mxu0 %v8213_v42  ;;  %1490 = vmatprep.mubr.bf16.mxu0 %v997_v50  ;;  %v8222_v42 = vld [vmem:[%s11586_s3 + $0x118] sm:$0xff]   ;;  %v8223_v50 = vld [vmem:[%s11586_s3 + $0x150] sm:$0xff]   ;;  %v1041_v9 = vpack.c.bf16 %v774_v6, %v767_v5  ;;  %v771_v10 = vld [vmem:[%s9458_s29 + $0x348] sm:$0xff] }
  0x34   : > { %1644 = vmatmul.mubr.bf16.vlgmr.msra.gmra.mxu1 %v991_v46  ;;  %7467 = vmatprep.subr.bf16.mxu0 %v8215_v61  ;;  %v743_v46 = vld [vmem:[%s9458_s29 + $0x268] sm:$0xff]  ;;  %v765_v61 = vld [vmem:[%s9458_s29 + $0x318] sm:$0xff]  ;;  %v778_v23 = vld [vmem:[%s9458_s29 + $0x380] sm:$0xff] }
  0x35   : > { %1651 = vmatprep.mubr.bf16.mxu1 %v999_v54  ;;  %7774 = vmatpush3.bf16.msra.mxu1 %v8214_v57  ;;  %v1024_v51 = vpack.c.bf16 %v743_v46, %v736_v45  ;;  %v1032_v54 = vpack.c.bf16 %v758_v49, %v751_v48  ;;  %v1026_v57 = vpack.c.bf16 %v745_v52, %v738_v47  ;;  %v779_v11 = vld [vmem:[%s9458_s29 + $0x388] sm:$0xff]  ;;  %v793_v25 = vld [vmem:[%s9458_s29 + $0x3f8] sm:$0xff]  ;;  %v800_v26 = vld [vmem:[%s9458_s29 + $0x430] sm:$0xff] }
  0x36   : > { %v1039_v4 = vpack.c.bf16 %v772_v62, %v765_v61  ;;  %v795_v31 = vld [vmem:[%s9458_s29 + $0x408] sm:$0xff]  ;;  %v802_v32 = vld [vmem:[%s9458_s29 + $0x440] sm:$0xff]  ;;  %v792_v35 = vld [vmem:[%s9458_s29 + $0x3f0] sm:$0xff] }
  0x37   : > { %7468 = vmatpush3.bf16.msra.mxu0 %v8216_v2  ;;  %v1055_v34 = vpack.c.bf16 %v802_v32, %v795_v31  ;;  %v799_v36 = vld [vmem:[%s9458_s29 + $0x428] sm:$0xff]  ;;  %v814_v38 = vld [vmem:[%s9458_s29 + $0x4a0] sm:$0xff]  ;;  %v801_v41 = vld [vmem:[%s9458_s29 + $0x438] sm:$0xff] }
  0x38   : > { %7469 = vmatprep.subr.bf16.mxu0 %v8217_v13  ;;  %v8227_v13 = vld [vmem:[%s11586_s3 + $0x140] sm:$0xff]   ;;  %v813_v48 = vld [vmem:[%s9458_s29 + $0x498] sm:$0xff]  ;;  %v815_v52 = vld [vmem:[%s9458_s29 + $0x4a8] sm:$0xff] }
  0x39   : > { %v806_v47 = vld [vmem:[%s9458_s29 + $0x460] sm:$0xff]  ;;  %v821_v49 = vld [vmem:[%s9458_s29 + $0x4d8] sm:$0xff]  ;;  %v823_v55 = vld [vmem:[%s9458_s29 + $0x4e8] sm:$0xff] }
  0x3a   : > { %1491 = vmatmul.mubr.bf16.gmra.mxu0 %v996_v56  ;;  %v8224_v56 = vld [vmem:[%s11586_s3 + $0x110] sm:$0xff]   ;;  %v1059_v53 = vpack.c.bf16 %v813_v48, %v806_v47  ;;  %v822_v61 = vld [vmem:[%s9458_s29 + $0x4e0] sm:$0xff]  ;;  %v829_v62 = vld [vmem:[%s9458_s29 + $0x518] sm:$0xff] }
  0x3b   : > { %1498 = vmatprep.mubr.bf16.mxu0 %v1004_v60  ;;  %7470 = vmatpush3.bf16.msra.mxu0 %v8218_v15  ;;  %v757_v60 = vld [vmem:[%s9458_s29 + $0x2d8] sm:$0xff]  ;;  %v766_v15 = vld [vmem:[%s9458_s29 + $0x320] sm:$0xff]  ;;  %v1068_v5 = vpack.c.bf16 %v829_v62, %v822_v61  ;;  %v671_v47 = vld [vmem:[%s9458_s29 + $0x28] sm:$0xff] }
  0x3c   : > { %1652 = vmatmul.mubr.bf16.gmra.mxu1 %v998_v63  ;;  %7471 = vmatprep.subr.bf16.mxu0 %v8219_v27  ;;  %v752_v63 = vld [vmem:[%s9458_s29 + $0x2b0] sm:$0xff]  ;;  %v1031_v2 = vpack.c.bf16 %v757_v60, %v750_v59  ;;  %v827_v60 = vld [vmem:[%s9458_s29 + $0x508] sm:$0xff]  ;;  %v834_v6 = vld [vmem:[%s9458_s29 + $0x540] sm:$0xff] }
  0x3d   : > { %1659 = vmatprep.mubr.bf16.mxu1 %v1006_v1  ;;  %v8225_v1 = vld [vmem:[%s11586_s3 + $0x148] sm:$0xff]   ;;  %v1033_v7 = vpack.c.bf16 %v759_v0, %v752_v63  ;;  %v820_v59 = vld [vmem:[%s9458_s29 + $0x4d0] sm:$0xff]  ;;  %v842_v0 = vld [vmem:[%s9458_s29 + $0x580] sm:$0xff] }
  0x3e   : > { %v835_v63 = vld [vmem:[%s9458_s29 + $0x548] sm:$0xff]  ;;  %v869_v31 = vld [vmem:[%s9458_s29 + $0x658] sm:$0xff]  ;;  %v678_v48 = vld [vmem:[%s9458_s29 + $0x60] sm:$0xff] }
  0x3f   : > { %7472 = vmatpush3.bf16.msra.mxu0 %v8220_v28  ;;  %v780_v28 = vld [vmem:[%s9458_s29 + $0x390] sm:$0xff]  ;;  %v707_v62 = vld [vmem:[%s9458_s29 + $0x148] sm:$0xff] }
  0x40   : > { %7473 = vmatprep.subr.bf16.mxu0 %v8221_v39  ;;  %v1052_v39 = vpack.c.bf16 %v799_v36, %v792_v35  ;;  %v864_v35 = vld [vmem:[%s9458_s29 + $0x630] sm:$0xff]  ;;  %v871_v36 = vld [vmem:[%s9458_s29 + $0x668] sm:$0xff] }
  0x41   : > { %v700_v61 = vld [vmem:[%s9458_s29 + $0x110] sm:$0xff] }
  0x42   : > { %1499 = vmatmul.mubr.bf16.gmra.mxu0 %v1003_v8  ;;  %v764_v8 = vld [vmem:[%s9458_s29 + $0x310] sm:$0xff] }
  0x43   : > { %1506 = vmatprep.mubr.bf16.mxu0 %v1011_v12  ;;  %7474 = vmatpush3.bf16.msra.mxu0 %v8222_v42  ;;  %v786_v12 = vld [vmem:[%s9458_s29 + $0x3c0] sm:$0xff] }
  0x44   : > { %1660 = vmatmul.mubr.bf16.gmra.mxu1 %v1005_v14  ;;  %7475 = vmatprep.subr.bf16.mxu0 %v8223_v50  ;;  %v1038_v14 = vpack.c.bf16 %v771_v10, %v764_v8  ;;  %v1046_v18 = vpack.c.bf16 %v786_v12, %v779_v11  ;;  %v828_v50 = vld [vmem:[%s9458_s29 + $0x510] sm:$0xff]  ;;  %v843_v12 = vld [vmem:[%s9458_s29 + $0x588] sm:$0xff] }
  0x45   : > { %1667 = vmatprep.mubr.bf16.mxu1 %v1013_v16  ;;  %v773_v16 = vld [vmem:[%s9458_s29 + $0x358] sm:$0xff]  ;;  %v856_v10 = vld [vmem:[%s9458_s29 + $0x5f0] sm:$0xff] }
  0x46   : > { %v1040_v21 = vpack.c.bf16 %v773_v16, %v766_v15  ;;  %v836_v11 = vld [vmem:[%s9458_s29 + $0x550] sm:$0xff]  ;;  %v851_v15 = vld [vmem:[%s9458_s29 + $0x5c8] sm:$0xff]  ;;  %v858_v16 = vld [vmem:[%s9458_s29 + $0x600] sm:$0xff] }
  0x47   : > { %7476 = vmatpush3.bf16.msra.mxu0 %v8224_v56  ;;  %v830_v56 = vld [vmem:[%s9458_s29 + $0x520] sm:$0xff] }
  0x48   : > { %7477 = vmatprep.subr.bf16.mxu0 %v8225_v1  ;;  %v1066_v1 = vpack.c.bf16 %v827_v60, %v820_v59  ;;  %v686_v59 = vld [vmem:[%s9458_s29 + $0xa0] sm:$0xff]  ;;  %v693_v60 = vld [vmem:[%s9458_s29 + $0xd8] sm:$0xff] }
  0x4a   : > { %1507 = vmatmul.mubr.bf16.gmra.mxu0 %v1010_v22  ;;  %v1048_v22 = vpack.c.bf16 %v788_v20, %v781_v19  ;;  %v848_v19 = vld [vmem:[%s9458_s29 + $0x5b0] sm:$0xff]  ;;  %v855_v20 = vld [vmem:[%s9458_s29 + $0x5e8] sm:$0xff] }
  0x4b   : > { %1514 = vmatprep.mubr.bf16.mxu0 %v1018_v24  ;;  %7478 = vmatpush3.bf16.msra.mxu0 %v8226_v3  ;;  %v785_v24 = vld [vmem:[%s9458_s29 + $0x3b8] sm:$0xff] }
  0x4c   : > { %1668 = vmatmul.mubr.bf16.gmra.mxu1 %v1012_v29  ;;  %7479 = vmatprep.subr.bf16.mxu0 %v8227_v13  ;;  %v1045_v27 = vpack.c.bf16 %v785_v24, %v778_v23  ;;  %v787_v29 = vld [vmem:[%s9458_s29 + $0x3c8] sm:$0xff]  ;;  %v837_v3 = vld [vmem:[%s9458_s29 + $0x558] sm:$0xff]  ;;  %v870_v24 = vld [vmem:[%s9458_s29 + $0x660] sm:$0xff] }
  0x4d   : > { %1675 = vmatprep.mubr.bf16.mxu1 %v1020_v30  ;;  %v1053_v30 = vpack.c.bf16 %v800_v26, %v793_v25  ;;  %v1047_v33 = vpack.c.bf16 %v787_v29, %v780_v28  ;;  %v863_v23 = vld [vmem:[%s9458_s29 + $0x628] sm:$0xff]  ;;  %v1080_v25 = vpack.c.bf16 %v855_v20, %v848_v19  ;;  %v872_v28 = vld [vmem:[%s9458_s29 + $0x670] sm:$0xff]  ;;  %v742_v20 = vld [vmem:[%s9458_s29 + $0x260] sm:$0xff] }
  0x4e   : > { %v1088_v26 = vpack.c.bf16 %v870_v24, %v863_v23  ;;  %v756_v23 = vld [vmem:[%s9458_s29 + $0x2d0] sm:$0xff]  ;;  %v763_v24 = vld [vmem:[%s9458_s29 + $0x308] sm:$0xff] }
  0x4f   : > { %7480 = vmatpush3.bf16.msra.mxu0 %v8228_v17  ;;  %v1075_v17 = vpack.c.bf16 %v843_v12, %v836_v11  ;;  %v728_v11 = vld [vmem:[%s9458_s29 + $0x1f0] sm:$0xff]  ;;  %v735_v12 = vld [vmem:[%s9458_s29 + $0x228] sm:$0xff] }
  0x52   : > { %1515 = vmatmul.mubr.bf16.gmra.mxu0 %v1017_v37  ;;  %v807_v37 = vld [vmem:[%s9458_s29 + $0x468] sm:$0xff] }
  0x53   : > { %1522 = vmatprep.mubr.bf16.mxu0 %v1025_v40  ;;  %v794_v40 = vld [vmem:[%s9458_s29 + $0x400] sm:$0xff]  ;;  %v1060_v42 = vpack.c.bf16 %v814_v38, %v807_v37 }
  0x54   : > { %1676 = vmatmul.mubr.bf16.gmra.mxu1 %v1019_v43  ;;  %v809_v43 = vld [vmem:[%s9458_s29 + $0x478] sm:$0xff]  ;;  %v1054_v45 = vpack.c.bf16 %v801_v41, %v794_v40  ;;  %v886_v40 = vld [vmem:[%s9458_s29 + $0x6e0] sm:$0xff]  ;;  %v1089_v41 = vpack.c.bf16 %v871_v36, %v864_v35  ;;  %v784_v35 = vld [vmem:[%s9458_s29 + $0x3b0] sm:$0xff] }
  0x55   : > { %1683 = vmatprep.mubr.bf16.mxu1 %v1027_v44  ;;  %v816_v44 = vld [vmem:[%s9458_s29 + $0x4b0] sm:$0xff]  ;;  %v791_v36 = vld [vmem:[%s9458_s29 + $0x3e8] sm:$0xff] }
  0x56   : > { %v1062_v46 = vpack.c.bf16 %v816_v44, %v809_v43  ;;  %v876_v43 = vld [vmem:[%s9458_s29 + $0x690] sm:$0xff]  ;;  %v883_v44 = vld [vmem:[%s9458_s29 + $0x6c8] sm:$0xff] }
  0x5a   : > { %1523 = vmatmul.mubr.bf16.gmra.mxu0 %v1024_v51  ;;  %v808_v51 = vld [vmem:[%s9458_s29 + $0x470] sm:$0xff] }
  0x5b   : > { %1530 = vmatprep.mubr.bf16.mxu0 %v1032_v54  ;;  %v1067_v54 = vpack.c.bf16 %v828_v50, %v821_v49  ;;  %v1094_v49 = vpack.c.bf16 %v883_v44, %v876_v43  ;;  %v994_v50 = vpack.c.bf16 %v678_v48, %v671_v47  ;;  %v798_v44 = vld [vmem:[%s9458_s29 + $0x420] sm:$0xff]  ;;  %v812_v48 = vld [vmem:[%s9458_s29 + $0x490] sm:$0xff] }
  0x5c   : > { %1684 = vmatmul.mubr.bf16.gmra.mxu1 %v1026_v57  ;;  %v1061_v57 = vpack.c.bf16 %v815_v52, %v808_v51  ;;  %v672_v51 = vld [vmem:[%s9458_s29 + $0x30] sm:$0xff]  ;;  %v679_v52 = vld [vmem:[%s9458_s29 + $0x68] sm:$0xff] }
  0x5d   : > { %1691 = vmatprep.mubr.bf16.mxu1 %v1034_v58  ;;  %v1069_v58 = vpack.c.bf16 %v830_v56, %v823_v55  ;;  %v677_v55 = vld [vmem:[%s9458_s29 + $0x58] sm:$0xff]  ;;  %v995_v56 = vpack.c.bf16 %v679_v52, %v672_v51  ;;  %v740_v52 = vld [vmem:[%s9458_s29 + $0x250] sm:$0xff] }
  0x62   : > { %1531 = vmatmul.mubr.bf16.gmra.mxu0 %v1031_v2  ;;  %v1074_v2 = vpack.c.bf16 %v842_v0, %v835_v63 }
  0x63   : > { %1538 = vmatprep.mubr.bf16.mxu0 %v1039_v4  ;;  %v844_v4 = vld [vmem:[%s9458_s29 + $0x590] sm:$0xff] }
  0x64   : > { %1692 = vmatmul.mubr.bf16.gmra.mxu1 %v1033_v7  ;;  %v841_v7 = vld [vmem:[%s9458_s29 + $0x578] sm:$0xff]  ;;  %v1076_v8 = vpack.c.bf16 %v844_v4, %v837_v3  ;;  %v684_v3 = vld [vmem:[%s9458_s29 + $0x90] sm:$0xff]  ;;  %v691_v4 = vld [vmem:[%s9458_s29 + $0xc8] sm:$0xff] }
  0x65   : > { %1699 = vmatprep.mubr.bf16.mxu1 %v1041_v9  ;;  %v849_v9 = vld [vmem:[%s9458_s29 + $0x5b8] sm:$0xff]  ;;  %v1073_v13 = vpack.c.bf16 %v841_v7, %v834_v6  ;;  %v706_v6 = vld [vmem:[%s9458_s29 + $0x140] sm:$0xff]  ;;  %v1000_v7 = vpack.c.bf16 %v691_v4, %v684_v3  ;;  %v776_v4 = vld [vmem:[%s9458_s29 + $0x370] sm:$0xff] }
  0x66   : > { %v769_v3 = vld [vmem:[%s9458_s29 + $0x338] sm:$0xff] }
  0x6a   : > { %1539 = vmatmul.mubr.bf16.gmra.mxu0 %v1038_v14  ;;  %v1081_v14 = vpack.c.bf16 %v856_v10, %v849_v9  ;;  %v721_v9 = vld [vmem:[%s9458_s29 + $0x1b8] sm:$0xff] }
  0x6b   : > { %1546 = vmatprep.mubr.bf16.mxu0 %v1046_v18  ;;  %v1083_v18 = vpack.c.bf16 %v858_v16, %v851_v15  ;;  %v698_v15 = vld [vmem:[%s9458_s29 + $0x100] sm:$0xff]  ;;  %v705_v16 = vld [vmem:[%s9458_s29 + $0x138] sm:$0xff] }
  0x6c   : > { %1700 = vmatmul.mubr.bf16.gmra.mxu1 %v1040_v21  ;;  %v850_v21 = vld [vmem:[%s9458_s29 + $0x5c0] sm:$0xff]  ;;  %v1007_v19 = vpack.c.bf16 %v705_v16, %v698_v15  ;;  %v775_v15 = vld [vmem:[%s9458_s29 + $0x368] sm:$0xff] }
  0x6d   : > { %1707 = vmatprep.mubr.bf16.mxu1 %v1048_v22  ;;  %v857_v22 = vld [vmem:[%s9458_s29 + $0x5f8] sm:$0xff]  ;;  %v783_v16 = vld [vmem:[%s9458_s29 + $0x3a8] sm:$0xff] }
  0x6e   : > { %v1082_v29 = vpack.c.bf16 %v857_v22, %v850_v21  ;;  %v749_v21 = vld [vmem:[%s9458_s29 + $0x298] sm:$0xff] }
  0x72   : > { %1547 = vmatmul.mubr.bf16.gmra.mxu0 %v1045_v27  ;;  %v865_v27 = vld [vmem:[%s9458_s29 + $0x638] sm:$0xff] }
  0x73   : > { %1554 = vmatprep.mubr.bf16.mxu0 %v1053_v30  ;;  %v862_v30 = vld [vmem:[%s9458_s29 + $0x620] sm:$0xff]  ;;  %v1090_v32 = vpack.c.bf16 %v872_v28, %v865_v27  ;;  %v712_v27 = vld [vmem:[%s9458_s29 + $0x170] sm:$0xff]  ;;  %v719_v28 = vld [vmem:[%s9458_s29 + $0x1a8] sm:$0xff] }
  0x74   : > { %1708 = vmatmul.mubr.bf16.gmra.mxu1 %v1047_v33  ;;  %v877_v33 = vld [vmem:[%s9458_s29 + $0x698] sm:$0xff]  ;;  %v1087_v37 = vpack.c.bf16 %v869_v31, %v862_v30  ;;  %v734_v30 = vld [vmem:[%s9458_s29 + $0x220] sm:$0xff]  ;;  %v1014_v31 = vpack.c.bf16 %v719_v28, %v712_v27  ;;  %v804_v27 = vld [vmem:[%s9458_s29 + $0x450] sm:$0xff] }
  0x75   : > { %1715 = vmatprep.mubr.bf16.mxu1 %v1055_v34  ;;  %v884_v34 = vld [vmem:[%s9458_s29 + $0x6d0] sm:$0xff] }
  0x76   : > { %v1095_v38 = vpack.c.bf16 %v884_v34, %v877_v33  ;;  %v777_v33 = vld [vmem:[%s9458_s29 + $0x378] sm:$0xff] }
  0x7a   : > { %1555 = vmatmul.mubr.bf16.gmra.mxu0 %v1052_v39  ;;  %v879_v39 = vld [vmem:[%s9458_s29 + $0x6a8] sm:$0xff] }
  0x7b   : > { %1562 = vmatprep.mubr.bf16.mxu0 %v1060_v42  ;;  %v1097_v42 = vpack.c.bf16 %v886_v40, %v879_v39  ;;  %v726_v39 = vld [vmem:[%s9458_s29 + $0x1e0] sm:$0xff]  ;;  %v733_v40 = vld [vmem:[%s9458_s29 + $0x218] sm:$0xff] }
  0x7c   : > { %1716 = vmatmul.mubr.bf16.gmra.mxu1 %v1054_v45  ;;  %v878_v45 = vld [vmem:[%s9458_s29 + $0x6a0] sm:$0xff]  ;;  %v1021_v43 = vpack.c.bf16 %v733_v40, %v726_v39 }
  0x7d   : > { %1723 = vmatprep.mubr.bf16.mxu1 %v1062_v46  ;;  %v885_v46 = vld [vmem:[%s9458_s29 + $0x6d8] sm:$0xff] }
  0x82   : > { %1563 = vmatmul.mubr.bf16.gmra.mxu0 %v1059_v53  ;;  %v1096_v53 = vpack.c.bf16 %v885_v46, %v878_v45  ;;  %v805_v45 = vld [vmem:[%s9458_s29 + $0x458] sm:$0xff] }
  0x83   : > { %1570 = vmatprep.mubr.bf16.mxu0 %v1067_v54  ;;  %v670_v54 = vld [vmem:[%s9458_s29 + $0x20] sm:$0xff]  ;;  %v8229_v46 = vld [vmem:[%s11588_s5 + $0x38] sm:$0xff]  }
  0x84   : > { %1724 = vmatmul.mubr.bf16.gmra.mxu1 %v1061_v57  ;;  %v685_v57 = vld [vmem:[%s9458_s29 + $0x98] sm:$0xff]  ;;  %v993_v63 = vpack.c.bf16 %v677_v55, %v670_v54  ;;  %7807 = vmatprep.subr.bf16.mxu1 %v8229_v46  ;;  %v755_v54 = vld [vmem:[%s9458_s29 + $0x2c8] sm:$0xff]  ;;  %v762_v55 = vld [vmem:[%s9458_s29 + $0x300] sm:$0xff] }
  0x85   : > { %1731 = vmatprep.mubr.bf16.mxu1 %v1069_v58  ;;  %v692_v58 = vld [vmem:[%s9458_s29 + $0xd0] sm:$0xff] }
  0x86   : > { %v1001_v0 = vpack.c.bf16 %v692_v58, %v685_v57  ;;  %v826_v57 = vld [vmem:[%s9458_s29 + $0x500] sm:$0xff]  ;;  %v833_v58 = vld [vmem:[%s9458_s29 + $0x538] sm:$0xff] }
  0x8a   : > { %1571 = vmatmul.mubr.bf16.gmra.mxu0 %v1066_v1  ;;  %v1002_v1 = vpack.c.bf16 %v693_v60, %v686_v59  ;;  %v8230_v59 = vld [vmem:[%s11588_s5 + $0x30] sm:$0xff]   ;;  %v1036_v60 = vpack.c.bf16 %v762_v55, %v755_v54  ;;  %v810_v54 = vld [vmem:[%s9458_s29 + $0x480] sm:$0xff]  ;;  %v817_v55 = vld [vmem:[%s9458_s29 + $0x4b8] sm:$0xff] }
  0x8b   : > { %1578 = vmatprep.mubr.bf16.mxu0 %v1074_v2  ;;  %v1009_v2 = vpack.c.bf16 %v707_v62, %v700_v61  ;;  %v840_v61 = vld [vmem:[%s9458_s29 + $0x570] sm:$0xff]  ;;  %v847_v62 = vld [vmem:[%s9458_s29 + $0x5a8] sm:$0xff] }
  0x8c   : > { %1732 = vmatmul.mubr.bf16.gmra.mxu1 %v1068_v5  ;;  %v699_v5 = vld [vmem:[%s9458_s29 + $0x108] sm:$0xff] }
  0x8d   : > { %1739 = vmatprep.mubr.bf16.mxu1 %v1076_v8  ;;  %v714_v8 = vld [vmem:[%s9458_s29 + $0x180] sm:$0xff]  ;;  %v1008_v10 = vpack.c.bf16 %v706_v6, %v699_v5 }
  0x8e   : > { %v854_v6 = vld [vmem:[%s9458_s29 + $0x5e0] sm:$0xff] }
  0x92   : > { %1579 = vmatmul.mubr.bf16.gmra.mxu0 %v1073_v13  ;;  %v1016_v13 = vpack.c.bf16 %v721_v9, %v714_v8  ;;  %v8231_v8 = vld [vmem:[%s11588_s5 + $0x28] sm:$0xff]   ;;  %v1043_v9 = vpack.c.bf16 %v776_v4, %v769_v3 }
  0x93   : > { %1586 = vmatprep.mubr.bf16.mxu0 %v1081_v14  ;;  %v1023_v14 = vpack.c.bf16 %v735_v12, %v728_v11  ;;  %v875_v11 = vld [vmem:[%s9458_s29 + $0x688] sm:$0xff] }
  0x94   : > { %1740 = vmatmul.mubr.bf16.gmra.mxu1 %v1075_v17  ;;  %v713_v17 = vld [vmem:[%s9458_s29 + $0x178] sm:$0xff] }
  0x95   : > { %1747 = vmatprep.mubr.bf16.mxu1 %v1083_v18  ;;  %v720_v18 = vld [vmem:[%s9458_s29 + $0x1b0] sm:$0xff] }
  0x96   : > { %v1015_v22 = vpack.c.bf16 %v720_v18, %v713_v17  ;;  %v790_v17 = vld [vmem:[%s9458_s29 + $0x3e0] sm:$0xff] }
  0x9a   : > { %1587 = vmatmul.mubr.bf16.gmra.mxu0 %v1080_v25  ;;  %v1030_v25 = vpack.c.bf16 %v749_v21, %v742_v20  ;;  %v889_v20 = vld [vmem:[%s9458_s29 + $0x6f8] sm:$0xff]  ;;  %v8232_v21 = vld [vmem:[%s11588_s5 + $0x20] sm:$0xff]  }
  0x9b   : > { %1594 = vmatprep.mubr.bf16.mxu0 %v1088_v26  ;;  %v1037_v26 = vpack.c.bf16 %v763_v24, %v756_v23  ;;  %v782_v24 = vld [vmem:[%s9458_s29 + $0x3a0] sm:$0xff] }
  0x9c   : > { %1748 = vmatmul.mubr.bf16.gmra.mxu1 %v1082_v29  ;;  %v727_v29 = vld [vmem:[%s9458_s29 + $0x1e8] sm:$0xff] }
  0x9d   : > { %1755 = vmatprep.mubr.bf16.mxu1 %v1090_v32  ;;  %v770_v32 = vld [vmem:[%s9458_s29 + $0x340] sm:$0xff]  ;;  %v1022_v34 = vpack.c.bf16 %v734_v30, %v727_v29  ;;  %v8233_v29 = vld [vmem:[%s11588_s5 + $0x18] sm:$0xff]  }
  0xa2   : > { %1595 = vmatmul.mubr.bf16.gmra.mxu0 %v1087_v37  ;;  %v1044_v37 = vpack.c.bf16 %v777_v33, %v770_v32  ;;  %v796_v32 = vld [vmem:[%s9458_s29 + $0x410] sm:$0xff]  ;;  %v803_v33 = vld [vmem:[%s9458_s29 + $0x448] sm:$0xff] }
  0xa3   : > { %1602 = vmatprep.mubr.bf16.mxu0 %v1095_v38  ;;  %v1051_v38 = vpack.c.bf16 %v791_v36, %v784_v35  ;;  %v811_v36 = vld [vmem:[%s9458_s29 + $0x488] sm:$0xff] }
  0xa4   : > { %1756 = vmatmul.mubr.bf16.gmra.mxu1 %v1089_v41  ;;  %v741_v41 = vld [vmem:[%s9458_s29 + $0x258] sm:$0xff] }
  0xa5   : > { %1763 = vmatprep.mubr.bf16.mxu1 %v1097_v42  ;;  %v748_v42 = vld [vmem:[%s9458_s29 + $0x290] sm:$0xff] }
  0xa6   : > { %v1029_v47 = vpack.c.bf16 %v748_v42, %v741_v41  ;;  %v1056_v41 = vpack.c.bf16 %v803_v33, %v796_v32  ;;  %v8234_v42 = vld [vmem:[%s11588_s5 + $0x10] sm:$0xff]  }
  0xaa   : > { %1603 = vmatmul.mubr.bf16.gmra.mxu0 %v1094_v49  ;;  %v819_v49 = vld [vmem:[%s9458_s29 + $0x4c8] sm:$0xff] }
  0xab   : > { %1804 = vmatprep.mubr.bf16.mxu0 %v994_v50  ;;  %v1058_v50 = vpack.c.bf16 %v805_v45, %v798_v44  ;;  %v1065_v51 = vpack.c.bf16 %v819_v49, %v812_v48 }
  0xac   : > { %1764 = vmatmul.mubr.bf16.gmra.mxu1 %v1096_v53  ;;  %v747_v53 = vld [vmem:[%s9458_s29 + $0x288] sm:$0xff] }
  0xad   : > { %7775 = vmatprep.mubr.msk.bf16.mxu1 %vm1401_vm0, %v995_v56  ;;  %v1028_v56 = vpack.c.bf16 %v747_v53, %v740_v52 }
  0xb2   : > { %1805 = vmatmul.mubr.bf16.vlgmr.msra.gmra.mxu0 %v993_v63  ;;  %v1072_v63 = vpack.c.bf16 %v833_v58, %v826_v57 }
  0xb3   : > { %1812 = vmatprep.mubr.bf16.mxu0 %v1001_v0  ;;  %v1079_v0 = vpack.c.bf16 %v847_v62, %v840_v61 }
  0xb4   : > { %7776 = vmatmul.mubr.msk.bf16.vlgmr.msra.gmra.mxu1 %vm1401_vm0, %v1002_v1  ;;  %v754_v1 = vld [vmem:[%s9458_s29 + $0x2c0] sm:$0xff] }
  0xb5   : > { %7779 = vmatprep.mubr.msk.bf16.mxu1 %vm1401_vm0, %v1009_v2  ;;  %7808 = vmatpush3.bf16.msra.mxu1 %v8229_v46  ;;  %v761_v2 = vld [vmem:[%s9458_s29 + $0x2f8] sm:$0xff] }
  0xb6   : > { %7809 = vmatprep.subr.bf16.mxu1 %v8230_v59  ;;  %v1035_v5 = vpack.c.bf16 %v761_v2, %v754_v1  ;;  %v1063_v1 = vpack.c.bf16 %v817_v55, %v810_v54 }
  0xb9   : > { %7810 = vmatpush3.bf16.msra.mxu1 %v8230_v59  ;;  %v825_v59 = vld [vmem:[%s9458_s29 + $0x4f8] sm:$0xff] }
  0xba   : > { %1813 = vmatmul.mubr.bf16.gmra.mxu0 %v1000_v7  ;;  %v861_v7 = vld [vmem:[%s9458_s29 + $0x618] sm:$0xff]  ;;  %7811 = vmatprep.subr.bf16.mxu1 %v8231_v8 }
  0xbb   : > { %1820 = vmatprep.mubr.bf16.mxu0 %v1008_v10  ;;  %v868_v10 = vld [vmem:[%s9458_s29 + $0x650] sm:$0xff]  ;;  %v1086_v12 = vpack.c.bf16 %v861_v7, %v854_v6 }
  0xbc   : > { %7780 = vmatmul.mubr.msk.bf16.gmra.mxu1 %vm1401_vm0, %v1016_v13  ;;  %v1093_v13 = vpack.c.bf16 %v875_v11, %v868_v10 }
  0xbd   : > { %7783 = vmatprep.mubr.msk.bf16.mxu1 %vm1401_vm0, %v1023_v14  ;;  %7812 = vmatpush3.bf16.msra.mxu1 %v8231_v8  ;;  %v768_v14 = vld [vmem:[%s9458_s29 + $0x330] sm:$0xff] }
  0xbe   : > { %v1042_v18 = vpack.c.bf16 %v775_v15, %v768_v14  ;;  %7813 = vmatprep.subr.bf16.mxu1 %v8232_v21  ;;  %v831_v14 = vld [vmem:[%s9458_s29 + $0x528] sm:$0xff] }
  0xc1   : > { %7814 = vmatpush3.bf16.msra.mxu1 %v8232_v21 }
  0xc2   : > { %1821 = vmatmul.mubr.bf16.gmra.mxu0 %v1007_v19  ;;  %v882_v19 = vld [vmem:[%s9458_s29 + $0x6c0] sm:$0xff]  ;;  %7815 = vmatprep.subr.bf16.mxu1 %v8233_v29 }
  0xc3   : > { %1828 = vmatprep.mubr.bf16.mxu0 %v1015_v22  ;;  %v1050_v22 = vpack.c.bf16 %v790_v17, %v783_v16  ;;  %v1100_v23 = vpack.c.bf16 %v889_v20, %v882_v19  ;;  %v839_v17 = vld [vmem:[%s9458_s29 + $0x568] sm:$0xff] }
  0xc4   : > { %7784 = vmatmul.mubr.msk.bf16.gmra.mxu1 %vm1401_vm0, %v1030_v25  ;;  %v789_v25 = vld [vmem:[%s9458_s29 + $0x3d8] sm:$0xff] }
  0xc5   : > { %7787 = vmatprep.mubr.msk.bf16.mxu1 %vm1401_vm0, %v1037_v26  ;;  %v797_v26 = vld [vmem:[%s9458_s29 + $0x418] sm:$0xff]  ;;  %v1049_v28 = vpack.c.bf16 %v789_v25, %v782_v24  ;;  %7816 = vmatpush3.bf16.msra.mxu1 %v8233_v29  ;;  %v8236_v24 = vld [vmem:[%s11588_s5] sm:$0xff]  }
  0xc6   : > { %v1057_v30 = vpack.c.bf16 %v804_v27, %v797_v26  ;;  %7817 = vmatprep.subr.bf16.mxu1 %v8234_v42 }
  0xc9   : > { %7818 = vmatpush3.bf16.msra.mxu1 %v8234_v42  ;;  %v860_v42 = vld [vmem:[%s9458_s29 + $0x610] sm:$0xff] }
  0xca   : > { %1829 = vmatmul.mubr.bf16.gmra.mxu0 %v1014_v31 }
  0xcb   : > { %1836 = vmatprep.mubr.bf16.mxu0 %v1022_v34  ;;  %v9754_v34 = vld [vmem:[%s11589_s23] ss:$0 sm:$0xff] }
  0xcc   : > { %7788 = vmatmul.mubr.msk.bf16.gmra.mxu1 %vm1401_vm0, %v1044_v37  ;;  %v818_v37 = vld [vmem:[%s9458_s29 + $0x4c0] sm:$0xff] }
  0xcd   : > { %7791 = vmatprep.mubr.msk.bf16.mxu1 %vm1401_vm0, %v1051_v38  ;;  %v1064_v45 = vpack.c.bf16 %v818_v37, %v811_v36  ;;  %v838_v37 = vld [vmem:[%s9458_s29 + $0x560] sm:$0xff] }
  0xd2   : > { %1837 = vmatmul.mubr.bf16.gmra.mxu0 %v1021_v43 }
  0xd3   : > { %1844 = vmatprep.mubr.bf16.mxu0 %v1029_v47 }
  0xd4   : > { %7792 = vmatmul.mubr.msk.bf16.gmra.mxu1 %vm1401_vm0, %v1058_v50 }
  0xd5   : > { %7795 = vmatprep.mubr.msk.bf16.mxu1 %vm1401_vm0, %v1065_v51 }
  0xda   : > { %1845 = vmatmul.mubr.bf16.gmra.mxu0 %v1028_v56  ;;  %v8235_v56 = vld [vmem:[%s11588_s5 + $0x8] sm:$0xff]  }
  0xdb   : > { %1852 = vmatprep.mubr.bf16.mxu0 %v1036_v60  ;;  %v832_v60 = vld [vmem:[%s9458_s29 + $0x530] sm:$0xff]  ;;  %7819 = vmatprep.subr.bf16.mxu1 %v8235_v56 }
  0xdc   : > { %7796 = vmatmul.mubr.msk.bf16.gmra.mxu1 %vm1401_vm0, %v1072_v63  ;;  %v1071_v4 = vpack.c.bf16 %v832_v60, %v825_v59  ;;  %v852_v60 = vld [vmem:[%s9458_s29 + $0x5d0] sm:$0xff] }
  0xdd   : > { %7799 = vmatprep.mubr.msk.bf16.mxu1 %vm1401_vm0, %v1079_v0  ;;  %7820 = vmatpush3.bf16.msra.mxu1 %v8235_v56 }
  0xde   : > { %7821 = vmatprep.subr.bf16.mxu1 %v8236_v24 }
  0xe1   : > { %7822 = vmatpush3.bf16.msra.mxu1 %v8236_v24 }
  0xe2   : > { %1853 = vmatmul.mubr.bf16.gmra.mxu0 %v1035_v5 }
  0xe3   : > { %1860 = vmatprep.mubr.bf16.mxu0 %v1043_v9 }
  0xe4   : > { %7800 = vmatmul.mubr.msk.bf16.gmra.mxu1 %vm1401_vm0, %v1086_v12 }
  0xe5   : > { %7803 = vmatprep.mubr.msk.bf16.mxu1 %vm1401_vm0, %v1093_v13  ;;  %v824_v13 = vld [vmem:[%s9458_s29 + $0x4f0] sm:$0xff] }
  0xea   : > { %1861 = vmatmul.mubr.bf16.gmra.mxu0 %v1042_v18  ;;  %v846_v18 = vld [vmem:[%s9458_s29 + $0x5a0] sm:$0xff] }
  0xeb   : > { %1868 = vmatprep.mubr.bf16.mxu0 %v1050_v22  ;;  %v1078_v27 = vpack.c.bf16 %v846_v18, %v839_v17 }
  0xec   : > { %7804 = vmatmul.mubr.msk.bf16.gmra.mxu1 %vm1401_vm0, %v1100_v23  ;;  %v1070_v23 = vpack.c.bf16 %v831_v14, %v824_v13 }
  0xf2   : > { %v7257_v31 = vpop.f32.mrf.mxu0  ;;  %1869 = vmatmul.mubr.bf16.gmra.mxu0 %v1049_v28 }
  0xf3   : > { %1876 = vmatprep.mubr.bf16.mxu0 %v1057_v30 }
  0xf4   : > { %v7258_v35 = vpop.f32.mrf.mxu0  ;;  %v7369_v39 = vpop.f32.mrf.mxu1 }
  0xf5   : > { %v7259_v38 = vadd.f32 %v7258_v35, %v7257_v31 }
  0xf6   : > { %v7260_v40 = vpop.f32.mrf.mxu0  ;;  %v7370_v44 = vpop.f32.mrf.mxu1 }
  0xf7   : > { %v1485_v43 = vadd.f32 %v7259_v38, %v9754_v34  ;;  %v7371_v46 = vadd.f32 %v7370_v44, %v7369_v39  ;;  %v845_v38 = vld [vmem:[%s9458_s29 + $0x598] sm:$0xff] }
  0xf8   : > { %v7261_v47 = vpop.f32.mrf.mxu0  ;;  %v7372_v49 = vpop.f32.mrf.mxu1 }
  0xf9   : > { %v7262_v48 = vadd.f32 %v7261_v47, %v7260_v40  ;;  %v9762_v50 = vadd.f32 %v7371_v46, %v1485_v43  ;;  %v1077_v47 = vpack.c.bf16 %v845_v38, %v838_v37 }
  0xfa   : > { %v7263_v51 = vpop.f32.mrf.mxu0  ;;  %1877 = vmatmul.mubr.bf16.gmra.mxu0 %v1056_v41  ;;  %v7373_v53 = vpop.f32.mrf.mxu1  ;;  %v853_v41 = vld [vmem:[%s9458_s29 + $0x5d8] sm:$0xff] }
  0xfb   : > { %v1488_v52 = vadd.f32 %v7262_v48, %v9754_v34  ;;  %1884 = vmatprep.mubr.bf16.mxu0 %v1064_v45  ;;  %v7374_v57 = vadd.f32 %v7373_v53, %v7372_v49 }
  0xfc   : > { %v7264_v58 = vpop.f32.mrf.mxu0  ;;  %v7375_v62 = vpop.f32.mrf.mxu1 }
  0xfd   : > { %v7265_v61 = vadd.f32 %v7264_v58, %v7263_v51  ;;  %v9772_v63 = vadd.f32 %v7374_v57, %v1488_v52  ;;  %v1085_v51 = vpack.c.bf16 %v860_v42, %v853_v41 }
  0xfe   : > { %v7266_v0 = vpop.f32.mrf.mxu0  ;;  %v7376_v3 = vpop.f32.mrf.mxu1 }
  0xff   : > { %v1493_v2 = vadd.f32 %v7265_v61, %v9754_v34  ;;  %v7377_v5 = vadd.f32 %v7376_v3, %v7375_v62  ;;  %v859_v61 = vld [vmem:[%s9458_s29 + $0x608] sm:$0xff] }
 0x100   : > { %v7267_v6 = vpop.f32.mrf.mxu0  ;;  %v7378_v8 = vpop.f32.mrf.mxu1 }
 0x101   : > { %v7268_v7 = vadd.f32 %v7267_v6, %v7266_v0  ;;  %v9775_v9 = vadd.f32 %v7377_v5, %v1493_v2  ;;  %v874_v2 = vld [vmem:[%s9458_s29 + $0x680] sm:$0xff] }
 0x102   : > { %v7269_v10 = vpop.f32.mrf.mxu0  ;;  %1885 = vmatmul.mubr.bf16.gmra.mxu0 %v1063_v1  ;;  %v7379_v12 = vpop.f32.mrf.mxu1  ;;  %v867_v1 = vld [vmem:[%s9458_s29 + $0x648] sm:$0xff] }
 0x103   : > { %v1496_v11 = vadd.f32 %v7268_v7, %v9754_v34  ;;  %1892 = vmatprep.mubr.bf16.mxu0 %v1071_v4  ;;  %v7380_v15 = vadd.f32 %v7379_v12, %v7378_v8  ;;  %v1084_v7 = vpack.c.bf16 %v859_v61, %v852_v60 }
 0x104   : > { %v7270_v16 = vpop.f32.mrf.mxu0  ;;  %v7381_v20 = vpop.f32.mrf.mxu1 }
 0x105   : > { %v7271_v19 = vadd.f32 %v7270_v16, %v7269_v10  ;;  %v9782_v21 = vadd.f32 %v7380_v15, %v1496_v11  ;;  %v1092_v11 = vpack.c.bf16 %v874_v2, %v867_v1 }
 0x106   : > { %v7272_v22 = vpop.f32.mrf.mxu0  ;;  %v7382_v26 = vpop.f32.mrf.mxu1 }
 0x107   : > { %v1501_v25 = vadd.f32 %v7271_v19, %v9754_v34  ;;  %v7383_v28 = vadd.f32 %v7382_v26, %v7381_v20  ;;  %v866_v20 = vld [vmem:[%s9458_s29 + $0x640] sm:$0xff]  ;;  %v888_v26 = vld [vmem:[%s9458_s29 + $0x6f0] sm:$0xff] }
 0x108   : > { %v7273_v29 = vpop.f32.mrf.mxu0  ;;  %v7384_v31 = vpop.f32.mrf.mxu1 }
 0x109   : > { %v7274_v30 = vadd.f32 %v7273_v29, %v7272_v22  ;;  %v9788_v32 = vadd.f32 %v7383_v28, %v1501_v25  ;;  %v873_v22 = vld [vmem:[%s9458_s29 + $0x678] sm:$0xff] }
 0x10a   : > { %v7275_v33 = vpop.f32.mrf.mxu0  ;;  %1893 = vmatmul.mubr.bf16.gmra.mxu0 %v1070_v23  ;;  %v7385_v36 = vpop.f32.mrf.mxu1  ;;  %v881_v25 = vld [vmem:[%s9458_s29 + $0x6b8] sm:$0xff] }
 0x10b   : > { %v1504_v35 = vadd.f32 %v7274_v30, %v9754_v34  ;;  %1900 = vmatprep.mubr.bf16.mxu0 %v1078_v27  ;;  %v7386_v39 = vadd.f32 %v7385_v36, %v7384_v31  ;;  %v1091_v31 = vpack.c.bf16 %v873_v22, %v866_v20  ;;  %v1099_v36 = vpack.c.bf16 %v888_v26, %v881_v25 }
 0x10c   : > { %v7276_v40 = vpop.f32.mrf.mxu0  ;;  %v7387_v44 = vpop.f32.mrf.mxu1 }
 0x10d   : > { %v7277_v43 = vadd.f32 %v7276_v40, %v7275_v33  ;;  %v9795_v45 = vadd.f32 %v7386_v39, %v1504_v35 }
 0x10e   : > { %v7278_v46 = vpop.f32.mrf.mxu0  ;;  %v7388_v49 = vpop.f32.mrf.mxu1 }
 0x10f   : > { %v1509_v48 = vadd.f32 %v7277_v43, %v9754_v34  ;;  %v7389_v52 = vadd.f32 %v7388_v49, %v7387_v44 }
 0x110   : > { %v7279_v53 = vpop.f32.mrf.mxu0  ;;  %v7390_v55 = vpop.f32.mrf.mxu1 }
 0x111   : > { %v7280_v54 = vadd.f32 %v7279_v53, %v7278_v46  ;;  %v9798_v56 = vadd.f32 %v7389_v52, %v1509_v48  ;;  %v880_v46 = vld [vmem:[%s9458_s29 + $0x6b0] sm:$0xff] }
 0x112   : > { %v7281_v57 = vpop.f32.mrf.mxu0  ;;  %1901 = vmatmul.mubr.bf16.gmra.mxu0 %v1077_v47  ;;  %v7391_v59 = vpop.f32.mrf.mxu1  ;;  %v887_v47 = vld [vmem:[%s9458_s29 + $0x6e8] sm:$0xff] }
 0x113   : > { %v1512_v58 = vadd.f32 %v7280_v54, %v9754_v34  ;;  %1908 = vmatprep.mubr.bf16.mxu0 %v1085_v51  ;;  %v7392_v62 = vadd.f32 %v7391_v59, %v7390_v55  ;;  %v1098_v55 = vpack.c.bf16 %v887_v47, %v880_v46 }
 0x114   : > { %v7282_v0 = vpop.f32.mrf.mxu0  ;;  %v7393_v4 = vpop.f32.mrf.mxu1 }
 0x115   : > { %v7283_v3 = vadd.f32 %v7282_v0, %v7281_v57  ;;  %v9805_v5 = vadd.f32 %v7392_v62, %v1512_v58 }
 0x116   : > { %v7284_v6 = vpop.f32.mrf.mxu0  ;;  %v7394_v10 = vpop.f32.mrf.mxu1 }
 0x117   : > { %v1517_v8 = vadd.f32 %v7283_v3, %v9754_v34  ;;  %v7395_v12 = vadd.f32 %v7394_v10, %v7393_v4 }
 0x118   : > { %v7285_v13 = vpop.f32.mrf.mxu0  ;;  %v7396_v15 = vpop.f32.mrf.mxu1 }
 0x119   : > { %v7286_v14 = vadd.f32 %v7285_v13, %v7284_v6  ;;  %v9808_v16 = vadd.f32 %v7395_v12, %v1517_v8 }
 0x11a   : > { %v7287_v17 = vpop.f32.mrf.mxu0  ;;  %1909 = vmatmul.mubr.bf16.gmra.mxu0 %v1084_v7  ;;  %v7397_v19 = vpop.f32.mrf.mxu1 }
 0x11b   : > { %v1520_v18 = vadd.f32 %v7286_v14, %v9754_v34  ;;  %1916 = vmatprep.mubr.bf16.mxu0 %v1092_v11  ;;  %v7398_v23 = vadd.f32 %v7397_v19, %v7396_v15 }
 0x11c   : > { %v7288_v24 = vpop.f32.mrf.mxu0  ;;  %v7399_v28 = vpop.f32.mrf.mxu1 }
 0x11d   : > { %v7289_v27 = vadd.f32 %v7288_v24, %v7287_v17  ;;  %v9815_v29 = vadd.f32 %v7398_v23, %v1520_v18 }
 0x11e   : > { %v7290_v30 = vpop.f32.mrf.mxu0  ;;  %v7400_v35 = vpop.f32.mrf.mxu1 }
 0x11f   : > { %v1525_v33 = vadd.f32 %v7289_v27, %v9754_v34  ;;  %v7401_v37 = vadd.f32 %v7400_v35, %v7399_v28 }
 0x120   : > { %v7291_v38 = vpop.f32.mrf.mxu0  ;;  %v7402_v40 = vpop.f32.mrf.mxu1 }
 0x121   : > { %v7292_v39 = vadd.f32 %v7291_v38, %v7290_v30  ;;  %v9818_v41 = vadd.f32 %v7401_v37, %v1525_v33 }
 0x122   : > { %v7293_v42 = vpop.f32.mrf.mxu0  ;;  %1917 = vmatmul.mubr.bf16.gmra.mxu0 %v1091_v31  ;;  %v7403_v44 = vpop.f32.mrf.mxu1 }
 0x123   : > { %v1528_v43 = vadd.f32 %v7292_v39, %v9754_v34  ;;  %1924 = vmatprep.mubr.bf16.mxu0 %v1099_v36  ;;  %v7404_v48 = vadd.f32 %v7403_v44, %v7402_v40 }
 0x124   : > { %v7294_v49 = vpop.f32.mrf.mxu0  ;;  %v7405_v52 = vpop.f32.mrf.mxu1 }
 0x125   : > { %v7295_v51 = vadd.f32 %v7294_v49, %v7293_v42  ;;  %v9823_v53 = vadd.f32 %v7404_v48, %v1528_v43 }
 0x126   : > { %v7296_v54 = vpop.f32.mrf.mxu0  ;;  %v7406_v58 = vpop.f32.mrf.mxu1 }
 0x127   : > { %v1533_v57 = vadd.f32 %v7295_v51, %v9754_v34  ;;  %v7407_v59 = vadd.f32 %v7406_v58, %v7405_v52 }
 0x128   : > { %v7297_v60 = vpop.f32.mrf.mxu0  ;;  %v7408_v62 = vpop.f32.mrf.mxu1 }
 0x129   : > { %v7298_v61 = vadd.f32 %v7297_v60, %v7296_v54  ;;  %v9826_v0 = vadd.f32 %v7407_v59, %v1533_v57 }
 0x12a   : > { %v7299_v1 = vpop.f32.mrf.mxu0  ;;  %1925 = vmatmul.mubr.bf16.gmra.mxu0 %v1098_v55  ;;  %v7409_v3 = vpop.f32.mrf.mxu1 }
 0x12b   : > { %v1536_v2 = vadd.f32 %v7298_v61, %v9754_v34  ;;  %v7410_v4 = vadd.f32 %v7409_v3, %v7408_v62 }
 0x12c   : > { %v7300_v6 = vpop.f32.mrf.mxu0  ;;  %v7411_v8 = vpop.f32.mrf.mxu1 }
 0x12d   : > { %v7301_v7 = vadd.f32 %v7300_v6, %v7299_v1  ;;  %v9829_v10 = vadd.f32 %v7410_v4, %v1536_v2 }
 0x12e   : > { %v7302_v11 = vpop.f32.mrf.mxu0  ;;  %v7412_v13 = vpop.f32.mrf.mxu1 }
 0x12f   : > { %v1541_v12 = vadd.f32 %v7301_v7, %v9754_v34  ;;  %v7413_v14 = vadd.f32 %v7412_v13, %v7411_v8 }
 0x130   : > { %v7303_v15 = vpop.f32.mrf.mxu0  ;;  %v7414_v18 = vpop.f32.mrf.mxu1 }
 0x131   : > { %v7304_v17 = vadd.f32 %v7303_v15, %v7302_v11  ;;  %v9832_v19 = vadd.f32 %v7413_v14, %v1541_v12 }
 0x132   : > { %v7305_v20 = vpop.f32.mrf.mxu0  ;;  %v7415_v23 = vpop.f32.mrf.mxu1 }
 0x133   : > { %v1544_v22 = vadd.f32 %v7304_v17, %v9754_v34  ;;  %v7416_v24 = vadd.f32 %v7415_v23, %v7414_v18 }
 0x134   : > { %v7306_v25 = vpop.f32.mrf.mxu0  ;;  %v7417_v27 = vpop.f32.mrf.mxu1 }
 0x135   : > { %v7307_v26 = vadd.f32 %v7306_v25, %v7305_v20  ;;  %v9835_v28 = vadd.f32 %v7416_v24, %v1544_v22 }
 0x136   : > { %v7308_v30 = vpop.f32.mrf.mxu0  ;;  %v7418_v33 = vpop.f32.mrf.mxu1 }
 0x137   : > { %v1549_v31 = vadd.f32 %v7307_v26, %v9754_v34  ;;  %v7419_v35 = vadd.f32 %v7418_v33, %v7417_v27 }
 0x138   : > { %v7309_v36 = vpop.f32.mrf.mxu0  ;;  %v7420_v38 = vpop.f32.mrf.mxu1 }
 0x139   : > { %v7310_v37 = vadd.f32 %v7309_v36, %v7308_v30  ;;  %v9838_v39 = vadd.f32 %v7419_v35, %v1549_v31 }
 0x13a   : > { %v7311_v40 = vpop.f32.mrf.mxu0  ;;  %v7421_v43 = vpop.f32.mrf.mxu1 }
 0x13b   : > { %v1552_v42 = vadd.f32 %v7310_v37, %v9754_v34  ;;  %v7422_v44 = vadd.f32 %v7421_v43, %v7420_v38 }
 0x13c   : > { %v7312_v46 = vpop.f32.mrf.mxu0  ;;  %v7423_v48 = vpop.f32.mrf.mxu1 }
 0x13d   : > { %v7313_v47 = vadd.f32 %v7312_v46, %v7311_v40  ;;  %v9841_v49 = vadd.f32 %v7422_v44, %v1552_v42 }
 0x13e   : > { %v7314_v51 = vpop.f32.mrf.mxu0  ;;  %v7424_v54 = vpop.f32.mrf.mxu1 }
 0x13f   : > { %v1557_v52 = vadd.f32 %v7313_v47, %v9754_v34  ;;  %v7425_v55 = vadd.f32 %v7424_v54, %v7423_v48 }
 0x140   : > { %v7315_v57 = vpop.f32.mrf.mxu0  ;;  %v7426_v59 = vpop.f32.mrf.mxu1 }
 0x141   : > { %v7316_v58 = vadd.f32 %v7315_v57, %v7314_v51  ;;  %v9844_v60 = vadd.f32 %v7425_v55, %v1557_v52 }
 0x142   : > { %v7317_v61 = vpop.f32.mrf.mxu0  ;;  %v7427_v1 = vpop.f32.mrf.mxu1 }
 0x143   : > { %v1560_v62 = vadd.f32 %v7316_v58, %v9754_v34  ;;  %v7428_v2 = vadd.f32 %v7427_v1, %v7426_v59 }
 0x144   : > { %v7318_v3 = vpop.f32.mrf.mxu0  ;;  %v7429_v6 = vpop.f32.mrf.mxu1 }
 0x145   : > { %v7319_v4 = vadd.f32 %v7318_v3, %v7317_v61  ;;  %v9847_v7 = vadd.f32 %v7428_v2, %v1560_v62 }
 0x146   : > { %v7320_v8 = vpop.f32.mrf.mxu0  ;;  %v7430_v12 = vpop.f32.mrf.mxu1 }
 0x147   : > { %v1565_v11 = vadd.f32 %v7319_v4, %v9754_v34  ;;  %v7431_v13 = vadd.f32 %v7430_v12, %v7429_v6 }
 0x148   : > { %v7321_v14 = vpop.f32.mrf.mxu0  ;;  %v7432_v17 = vpop.f32.mrf.mxu1 }
 0x149   : > { %v7322_v15 = vadd.f32 %v7321_v14, %v7320_v8  ;;  %v9850_v18 = vadd.f32 %v7431_v13, %v1565_v11  ;;  %v8237_v8 = vld [vmem:[%s11590_s22 + $0x18] sm:$0xff]  }
 0x14a   : > { %v7323_v20 = vpop.f32.mrf.mxu0  ;;  %v7433_v23 = vpop.f32.mrf.mxu1  ;;  %7855 = vmatprep.subr.bf16.mxu0 %v8237_v8 }
 0x14b   : > { %v1568_v22 = vadd.f32 %v7322_v15, %v9754_v34  ;;  %v7434_v24 = vadd.f32 %v7433_v23, %v7432_v17  ;;  %7856 = vmatpush3.bf16.msra.mxu0 %v8237_v8 }
 0x14c   : > { %v7324_v25 = vpop.f32.mrf.mxu0  ;;  %v7435_v27 = vpop.f32.mrf.mxu1 }
 0x14d   : > { %v7325_v26 = vadd.f32 %v7324_v25, %v7323_v20  ;;  %v9853_v30 = vadd.f32 %v7434_v24, %v1568_v22 }
 0x14e   : > { %v7326_v31 = vpop.f32.mrf.mxu0  ;;  %v7436_v35 = vpop.f32.mrf.mxu1 }
 0x14f   : > { %v1573_v33 = vadd.f32 %v7325_v26, %v9754_v34  ;;  %v7437_v36 = vadd.f32 %v7436_v35, %v7435_v27 }
 0x150   : > { %v7327_v37 = vpop.f32.mrf.mxu0  ;;  %v7438_v40 = vpop.f32.mrf.mxu1 }
 0x151   : > { %v7328_v38 = vadd.f32 %v7327_v37, %v7326_v31  ;;  %v9856_v42 = vadd.f32 %v7437_v36, %v1573_v33 }
 0x152   : > { %v7329_v43 = vpop.f32.mrf.mxu0  ;;  %v7439_v46 = vpop.f32.mrf.mxu1 }
 0x153   : > { %v1576_v44 = vadd.f32 %v7328_v38, %v9754_v34  ;;  %v7440_v47 = vadd.f32 %v7439_v46, %v7438_v40 }
 0x154   : > { %v7330_v48 = vpop.f32.mrf.mxu0  ;;  %v7441_v52 = vpop.f32.mrf.mxu1 }
 0x155   : > { %v7331_v51 = vadd.f32 %v7330_v48, %v7329_v43  ;;  %v9859_v54 = vadd.f32 %v7440_v47, %v1576_v44 }
 0x156   : > { %v7332_v55 = vpop.f32.mrf.mxu0  ;;  %v7442_v58 = vpop.f32.mrf.mxu1 }
 0x157   : > { %v1581_v57 = vadd.f32 %v7331_v51, %v9754_v34  ;;  %v7443_v59 = vadd.f32 %v7442_v58, %v7441_v52 }
 0x158   : > { %v7333_v61 = vpop.f32.mrf.mxu0  ;;  %v7444_v1 = vpop.f32.mrf.mxu1 }
 0x159   : > { %v7334_v62 = vadd.f32 %v7333_v61, %v7332_v55  ;;  %v9862_v2 = vadd.f32 %v7443_v59, %v1581_v57 }
 0x15a   : > { %v7335_v3 = vpop.f32.mrf.mxu0  ;;  %v7445_v6 = vpop.f32.mrf.mxu1 }
 0x15b   : > { %v1584_v4 = vadd.f32 %v7334_v62, %v9754_v34  ;;  %v7446_v11 = vadd.f32 %v7445_v6, %v7444_v1 }
 0x15c   : > { %v7336_v12 = vpop.f32.mrf.mxu0  ;;  %v7447_v14 = vpop.f32.mrf.mxu1 }
 0x15d   : > { %v7337_v13 = vadd.f32 %v7336_v12, %v7335_v3  ;;  %v9868_v15 = vadd.f32 %v7446_v11, %v1584_v4 }
 0x15e   : > { %v7338_v17 = vpop.f32.mrf.mxu0  ;;  %v7448_v22 = vpop.f32.mrf.mxu1 }
 0x15f   : > { %v1589_v20 = vadd.f32 %v7337_v13, %v9754_v34  ;;  %v7449_v23 = vadd.f32 %v7448_v22, %v7447_v14 }
 0x160   : > { %v7339_v24 = vpop.f32.mrf.mxu0  ;;  %v7450_v26 = vpop.f32.mrf.mxu1 }
 0x161   : > { %v7340_v25 = vadd.f32 %v7339_v24, %v7338_v17  ;;  %v9871_v27 = vadd.f32 %v7449_v23, %v1589_v20 }
 0x162   : > { %v7341_v31 = vpop.f32.mrf.mxu0  ;;  %v7451_v35 = vpop.f32.mrf.mxu1 }
 0x163   : > { %v1592_v33 = vadd.f32 %v7340_v25, %v9754_v34  ;;  %v7452_v36 = vadd.f32 %v7451_v35, %v7450_v26 }
 0x164   : > { %v7342_v37 = vpop.f32.mrf.mxu0  ;;  %v7453_v40 = vpop.f32.mrf.mxu1 }
 0x165   : > { %v7343_v38 = vadd.f32 %v7342_v37, %v7341_v31  ;;  %v9874_v43 = vadd.f32 %v7452_v36, %v1592_v33 }
 0x166   : > { %v7344_v44 = vpop.f32.mrf.mxu0  ;;  %v7454_v47 = vpop.f32.mrf.mxu1 }
 0x167   : > { %v1597_v46 = vadd.f32 %v7343_v38, %v9754_v34  ;;  %v7455_v48 = vadd.f32 %v7454_v47, %v7453_v40 }
 0x168   : > { %v7345_v51 = vpop.f32.mrf.mxu0  ;;  %v7456_v55 = vpop.f32.mrf.mxu1 }
 0x169   : > { %v7346_v52 = vadd.f32 %v7345_v51, %v7344_v44  ;;  %v9877_v57 = vadd.f32 %v7455_v48, %v1597_v46  ;;  %v8238_v44 = vld [vmem:[%s11590_s22 + $0x10] sm:$0xff]  }
 0x16a   : > { %v7347_v58 = vpop.f32.mrf.mxu0  ;;  %v7457_v61 = vpop.f32.mrf.mxu1  ;;  %7857 = vmatprep.subr.bf16.mxu0 %v8238_v44 }
 0x16b   : > { %v1600_v59 = vadd.f32 %v7346_v52, %v9754_v34  ;;  %v7458_v62 = vadd.f32 %v7457_v61, %v7456_v55  ;;  %7858 = vmatpush3.bf16.msra.mxu0 %v8238_v44 }
 0x16c   : > { %v7348_v1 = vpop.f32.mrf.mxu0  ;;  %v7459_v4 = vpop.f32.mrf.mxu1 }
 0x16d   : > { %v7349_v3 = vadd.f32 %v7348_v1, %v7347_v58  ;;  %v9880_v6 = vadd.f32 %v7458_v62, %v1600_v59  ;;  %v8239_v58 = vld [vmem:[%s11590_s22 + $0x8] sm:$0xff]  }
 0x16e   : > { %v7350_v8 = vpop.f32.mrf.mxu0  ;;  %v7460_v12 = vpop.f32.mrf.mxu1  ;;  %7859 = vmatprep.subr.bf16.mxu0 %v8239_v58 }
 0x16f   : > { %v1605_v11 = vadd.f32 %v7349_v3, %v9754_v34  ;;  %v7461_v13 = vadd.f32 %v7460_v12, %v7459_v4  ;;  %7860 = vmatpush3.bf16.msra.mxu0 %v8239_v58 }
 0x170   : > { %v7351_v14 = vpop.f32.mrf.mxu0  ;;  %v7462_v20 = vpop.f32.mrf.mxu1 }
 0x171   : > { %v7352_v17 = vadd.f32 %v7351_v14, %v7350_v8  ;;  %v9883_v22 = vadd.f32 %v7461_v13, %v1605_v11 }
 0x172   : > { %v7481_v23 = vpop.f32.mrf.mxu0  ;;  %v7463_v25 = vpop.f32.mrf.mxu1 }
 0x173   : > { %v1608_v24 = vadd.f32 %v7352_v17, %v9754_v34  ;;  %v7464_v26 = vadd.f32 %v7463_v25, %v7462_v20 }
 0x174   : > { %v7482_v31 = vpop.f32.mrf.mxu0  ;;  %v7777_v35 = vpop.f32.mrf.mxu1 }
 0x175   : > { %v7483_v33 = vadd.f32 %v7482_v31, %v7481_v23  ;;  %v9886_v36 = vadd.f32 %v7464_v26, %v1608_v24 }
 0x176   : > { %v7484_v37 = vpop.f32.mrf.mxu0  ;;  %v1967_v40 = vpop.f32.mrf.mxu1 }
 0x177   : > { %v1807_v38 = vadd.f32 %v7483_v33, %v9762_v50  ;;  %v8240_v50 = vld [vmem:[%s11590_s22] sm:$0xff]  }
 0x178   : > { %v7485_v46 = vpop.f32.mrf.mxu0  ;;  %v7778_v48 = vpop.f32.mrf.mxu1  ;;  %7861 = vmatprep.subr.bf16.mxu0 %v8240_v50 }
 0x179   : > { %v7486_v47 = vadd.f32 %v7485_v46, %v7484_v37  ;;  %v1968_v51 = vadd.f32 %v1967_v40, %v1807_v38  ;;  %7862 = vmatpush3.bf16.msra.mxu0 %v8240_v50 }
 0x17a   : > { %v7487_v34 = vpop.f32.mrf.mxu0  ;;  %v1970_v55 = vpop.f32.mrf.mxu1 }
 0x17b   : > { %v1810_v52 = vadd.f32 %v7486_v47, %v9772_v63  ;;  %v2094_v4 = vmax.f32 %v1968_v51, 0.0 }
 0x17c   : > { %v7488_v59 = vpop.f32.mrf.mxu0  ;;  %v7781_v3 = vpop.f32.mrf.mxu1 }
 0x17d   : > { %v7489_v61 = vadd.f32 %v7488_v59, %v7487_v34  ;;  %v1971_v62 = vadd.f32 %v1970_v55, %v1810_v52 }
 0x17e   : > { %v7490_v1 = vpop.f32.mrf.mxu0  ;;  %v1983_v17 = vpop.f32.mrf.mxu1 }
 0x17f   : > { %v1815_v8 = vadd.f32 %v7489_v61, %v9775_v9  ;;  %v2095_v63 = vmax.f32 %v1971_v62, 0.0 }
 0x180   : > { %v7491_v11 = vpop.f32.mrf.mxu0  ;;  %v7782_v33 = vpop.f32.mrf.mxu1 }
 0x181   : > { %v7492_v12 = vadd.f32 %v7491_v11, %v7490_v1  ;;  %v2143_v13 = vpack.c.bf16 %v2095_v63, %v2094_v4  ;;  %v1976_v20 = vadd.f32 %v7777_v35, %v1815_v8 }
 0x182   : > { %v7493_v14 = vpop.f32.mrf.mxu0  ;;  %v1986_v34 = vpop.f32.mrf.mxu1 }
 0x183   : > { %v1818_v23 = vadd.f32 %v7492_v12, %v9782_v21  ;;  %7823 = vmatprep.mubr.bf16.mxu1 %v2143_v13  ;;  %v2096_v37 = vmax.f32 %v1976_v20, 0.0 }
 0x184   : > { %v7494_v24 = vpop.f32.mrf.mxu0  ;;  %v7785_v58 = vpop.f32.mrf.mxu1 }
 0x185   : > { %v1979_v25 = vadd.f32 %v7778_v48, %v1818_v23  ;;  %v7495_v26 = vadd.f32 %v7494_v24, %v7493_v14 }
 0x186   : > { %v7496_v31 = vpop.f32.mrf.mxu0  ;;  %v1999_v8 = vpop.f32.mrf.mxu1 }
 0x187   : > { %v2097_v38 = vmax.f32 %v1979_v25, 0.0  ;;  %v1823_v9 = vadd.f32 %v7495_v26, %v9788_v32 }
 0x188   : > { %v7497_v40 = vpop.f32.mrf.mxu0 }
 0x189   : > { %v2144_v44 = vpack.c.bf16 %v2097_v38, %v2096_v37  ;;  %v7498_v46 = vadd.f32 %v7497_v40, %v7496_v31  ;;  %v1984_v51 = vadd.f32 %v1983_v17, %v1823_v9  ;;  %v7786_v17 = vpop.f32.mrf.mxu1 }
 0x18a   : > { %v7499_v47 = vpop.f32.mrf.mxu0 }
 0x18b   : > { %7824 = vmatmul.mubr.bf16.vlgmr.msra.gmra.mxu1 %v2144_v44  ;;  %v1826_v35 = vadd.f32 %v7498_v46, %v9795_v45  ;;  %v2098_v50 = vmax.f32 %v1984_v51, 0.0  ;;  %v2002_v37 = vpop.f32.mrf.mxu1 }
 0x18c   : > { %v7500_v21 = vpop.f32.mrf.mxu0 }
 0x18d   : > { %v7501_v52 = vadd.f32 %v7500_v21, %v7499_v47  ;;  %v1987_v55 = vadd.f32 %v1986_v34, %v1826_v35  ;;  %v7789_v44 = vpop.f32.mrf.mxu1 }
 0x18e   : > { %v7502_v48 = vpop.f32.mrf.mxu0 }
 0x18f   : > { %v1831_v59 = vadd.f32 %v7501_v52, %v9798_v56  ;;  %v2099_v61 = vmax.f32 %v1987_v55, 0.0  ;;  %v2015_v52 = vpop.f32.mrf.mxu1 }
 0x190   : > { %v7503_v62 = vpop.f32.mrf.mxu0 }
 0x191   : > { %v7504_v32 = vadd.f32 %v7503_v62, %v7502_v48  ;;  %v2145_v1 = vpack.c.bf16 %v2099_v61, %v2098_v50  ;;  %v1992_v63 = vadd.f32 %v7781_v3, %v1831_v59  ;;  %v7790_v62 = vpop.f32.mrf.mxu1 }
 0x192   : > { %v7505_v4 = vpop.f32.mrf.mxu0 }
 0x193   : > { %v1834_v11 = vadd.f32 %v7504_v32, %v9805_v5  ;;  %7827 = vmatprep.mubr.bf16.mxu1 %v2145_v1  ;;  %v2100_v20 = vmax.f32 %v1992_v63, 0.0 }
 0x194   : > { %v7506_v12 = vpop.f32.mrf.mxu0 }
 0x195   : > { %v1995_v45 = vadd.f32 %v7782_v33, %v1834_v11  ;;  %v7507_v13 = vadd.f32 %v7506_v12, %v7505_v4  ;;  %v2018_v12 = vpop.f32.mrf.mxu1 }
 0x196   : > { %v7508_v14 = vpop.f32.mrf.mxu0 }
 0x197   : > { %v1839_v23 = vadd.f32 %v7507_v13, %v9808_v16  ;;  %v2101_v24 = vmax.f32 %v1995_v45, 0.0 }
 0x198   : > { %v7509_v56 = vpop.f32.mrf.mxu0 }
 0x199   : > { %v7510_v25 = vadd.f32 %v7509_v56, %v7508_v14  ;;  %v2146_v26 = vpack.c.bf16 %v2101_v24, %v2100_v20  ;;  %v2000_v38 = vadd.f32 %v1999_v8, %v1839_v23  ;;  %v7793_v20 = vpop.f32.mrf.mxu1 }
 0x19a   : > { %v7511_v31 = vpop.f32.mrf.mxu0 }
 0x19b   : > { %7828 = vmatmul.mubr.bf16.gmra.mxu1 %v2146_v26  ;;  %v1842_v3 = vadd.f32 %v7510_v25, %v9815_v29  ;;  %v2102_v46 = vmax.f32 %v2000_v38, 0.0 }
 0x19c   : > { %v7512_v5 = vpop.f32.mrf.mxu0 }
 0x19d   : > { %v7513_v9 = vadd.f32 %v7512_v5, %v7511_v31  ;;  %v2003_v40 = vadd.f32 %v2002_v37, %v1842_v3  ;;  %v2031_v37 = vpop.f32.mrf.mxu1 }
 0x19e   : > { %v7514_v33 = vpop.f32.mrf.mxu0 }
 0x19f   : > { %v1847_v47 = vadd.f32 %v7513_v9, %v9818_v41  ;;  %v2103_v34 = vmax.f32 %v2003_v40, 0.0 }
 0x1a0   : > { %v7515_v16 = vpop.f32.mrf.mxu0 }
 0x1a1   : > { %v7516_v51 = vadd.f32 %v7515_v16, %v7514_v33  ;;  %v2147_v35 = vpack.c.bf16 %v2103_v34, %v2102_v46  ;;  %v2008_v55 = vadd.f32 %v7785_v58, %v1847_v47  ;;  %v7794_v33 = vpop.f32.mrf.mxu1 }
 0x1a2   : > { %v7517_v21 = vpop.f32.mrf.mxu0 }
 0x1a3   : > { %v1850_v48 = vadd.f32 %v7516_v51, %v9823_v53  ;;  %7831 = vmatprep.mubr.bf16.mxu1 %v2147_v35  ;;  %v2104_v32 = vmax.f32 %v2008_v55, 0.0 }
 0x1a4   : > { %v7518_v50 = vpop.f32.mrf.mxu0 }
 0x1a5   : > { %v2011_v29 = vadd.f32 %v7786_v17, %v1850_v48  ;;  %v7519_v59 = vadd.f32 %v7518_v50, %v7517_v21  ;;  %v2034_v21 = vpop.f32.mrf.mxu1 }
 0x1a6   : > { %v7520_v61 = vpop.f32.mrf.mxu0 }
 0x1a7   : > { %v1855_v1 = vadd.f32 %v7519_v59, %v9826_v0  ;;  %v2105_v4 = vmax.f32 %v2011_v29, 0.0  ;;  %v7797_v29 = vpop.f32.mrf.mxu1 }
 0x1a8   : > { %v7521_v41 = vpop.f32.mrf.mxu0 }
 0x1a9   : > { %v7522_v8 = vadd.f32 %v7521_v41, %v7520_v61  ;;  %v2148_v63 = vpack.c.bf16 %v2105_v4, %v2104_v32  ;;  %v2016_v45 = vadd.f32 %v2015_v52, %v1855_v1  ;;  %v2047_v41 = vpop.f32.mrf.mxu1 }
 0x1aa   : > { %v7523_v11 = vpop.f32.mrf.mxu0 }
 0x1ab   : > { %7832 = vmatmul.mubr.bf16.gmra.mxu1 %v2148_v63  ;;  %v1858_v58 = vadd.f32 %v7522_v8, %v9829_v10  ;;  %v2106_v23 = vmax.f32 %v2016_v45, 0.0 }
 0x1ac   : > { %v7524_v53 = vpop.f32.mrf.mxu0 }
 0x1ad   : > { %v7525_v13 = vadd.f32 %v7524_v53, %v7523_v11  ;;  %v2019_v14 = vadd.f32 %v2018_v12, %v1858_v58  ;;  %v7798_v58 = vpop.f32.mrf.mxu1 }
 0x1ae   : > { %v7526_v17 = vpop.f32.mrf.mxu0 }
 0x1af   : > { %v1863_v24 = vadd.f32 %v7525_v13, %v9832_v19  ;;  %v2107_v56 = vmax.f32 %v2019_v14, 0.0 }
 0x1b0   : > { %v7527_v0 = vpop.f32.mrf.mxu0 }
 0x1b1   : > { %v7528_v25 = vadd.f32 %v7527_v0, %v7526_v17  ;;  %v2149_v26 = vpack.c.bf16 %v2107_v56, %v2106_v23  ;;  %v2024_v38 = vadd.f32 %v7789_v44, %v1863_v24  ;;  %v2050_v56 = vpop.f32.mrf.mxu1 }
 0x1b2   : > { %v7529_v31 = vpop.f32.mrf.mxu0 }
 0x1b3   : > { %v1866_v3 = vadd.f32 %v7528_v25, %v9835_v28  ;;  %7835 = vmatprep.mubr.bf16.mxu1 %v2149_v26  ;;  %v2108_v46 = vmax.f32 %v2024_v38, 0.0 }
 0x1b4   : > { %v7530_v5 = vpop.f32.mrf.mxu0 }
 0x1b5   : > { %v2027_v10 = vadd.f32 %v7790_v62, %v1866_v3  ;;  %v7531_v9 = vadd.f32 %v7530_v5, %v7529_v31 }
 0x1b6   : > { %v7532_v40 = vpop.f32.mrf.mxu0 }
 0x1b7   : > { %v1871_v47 = vadd.f32 %v7531_v9, %v9838_v39  ;;  %v2109_v34 = vmax.f32 %v2027_v10, 0.0 }
 0x1b8   : > { %v7533_v19 = vpop.f32.mrf.mxu0 }
 0x1b9   : > { %v7534_v16 = vadd.f32 %v7533_v19, %v7532_v40  ;;  %v2150_v51 = vpack.c.bf16 %v2109_v34, %v2108_v46  ;;  %v2032_v52 = vadd.f32 %v2031_v37, %v1871_v47  ;;  %v7801_v37 = vpop.f32.mrf.mxu1 }
 0x1ba   : > { %v7535_v35 = vpop.f32.mrf.mxu0 }
 0x1bb   : > { %7836 = vmatmul.mubr.bf16.gmra.mxu1 %v2150_v51  ;;  %v1874_v44 = vadd.f32 %v7534_v16, %v9841_v49  ;;  %v2110_v59 = vmax.f32 %v2032_v52, 0.0 }
 0x1bc   : > { %v7536_v28 = vpop.f32.mrf.mxu0 }
 0x1bd   : > { %v7537_v55 = vadd.f32 %v7536_v28, %v7535_v35  ;;  %v2035_v48 = vadd.f32 %v2034_v21, %v1874_v44 }
 0x1be   : > { %v7538_v50 = vpop.f32.mrf.mxu0 }
 0x1bf   : > { %v1879_v61 = vadd.f32 %v7537_v55, %v9844_v60  ;;  %v2111_v62 = vmax.f32 %v2035_v48, 0.0 }
 0x1c0   : > { %v7539_v39 = vpop.f32.mrf.mxu0 }
 0x1c1   : > { %v7540_v32 = vadd.f32 %v7539_v39, %v7538_v50  ;;  %v2151_v1 = vpack.c.bf16 %v2111_v62, %v2110_v59  ;;  %v2040_v8 = vadd.f32 %v7793_v20, %v1879_v61 }
 0x1c2   : > { %v7541_v4 = vpop.f32.mrf.mxu0 }
 0x1c3   : > { %v1882_v63 = vadd.f32 %v7540_v32, %v9847_v7  ;;  %7839 = vmatprep.mubr.bf16.mxu1 %v2151_v1  ;;  %v2112_v53 = vmax.f32 %v2040_v8, 0.0 }
 0x1c4   : > { %v7542_v11 = vpop.f32.mrf.mxu0 }
 0x1c5   : > { %v2043_v49 = vadd.f32 %v7794_v33, %v1882_v63  ;;  %v7543_v12 = vadd.f32 %v7542_v11, %v7541_v4  ;;  %v2063_v33 = vpop.f32.mrf.mxu1 }
 0x1c6   : > { %v7544_v45 = vpop.f32.mrf.mxu0 }
 0x1c7   : > { %v2113_v13 = vmax.f32 %v2043_v49, 0.0  ;;  %v1887_v14 = vadd.f32 %v7543_v12, %v9850_v18  ;;  %v7802_v51 = vpop.f32.mrf.mxu1 }
 0x1c8   : > { %v7545_v60 = vpop.f32.mrf.mxu0 }
 0x1c9   : > { %v7546_v17 = vadd.f32 %v7545_v60, %v7544_v45  ;;  %v2152_v23 = vpack.c.bf16 %v2113_v13, %v2112_v53  ;;  %v2048_v0 = vadd.f32 %v2047_v41, %v1887_v14  ;;  %v2066_v48 = vpop.f32.mrf.mxu1 }
 0x1ca   : > { %v7547_v24 = vpop.f32.mrf.mxu0 }
 0x1cb   : > { %7840 = vmatmul.mubr.bf16.gmra.mxu1 %v2152_v23  ;;  %v1890_v20 = vadd.f32 %v7546_v17, %v9853_v30  ;;  %v2114_v38 = vmax.f32 %v2048_v0, 0.0  ;;  %v7805_v39 = vpop.f32.mrf.mxu1 }
 0x1cc   : > { %v7548_v7 = vpop.f32.mrf.mxu0 }
 0x1cd   : > { %v7549_v25 = vadd.f32 %v7548_v7, %v7547_v24  ;;  %v2051_v26 = vadd.f32 %v2050_v56, %v1890_v20  ;;  %v2079_v11 = vpop.f32.mrf.mxu1 }
 0x1ce   : > { %v7550_v31 = vpop.f32.mrf.mxu0 }
 0x1cf   : > { %v1895_v3 = vadd.f32 %v7549_v25, %v9856_v42  ;;  %v2115_v5 = vmax.f32 %v2051_v26, 0.0  ;;  %v7806_v13 = vpop.f32.mrf.mxu1 }
 0x1d0   : > { %v7551_v10 = vpop.f32.mrf.mxu0 }
 0x1d1   : > { %v7552_v18 = vadd.f32 %v7551_v10, %v7550_v31  ;;  %v2153_v9 = vpack.c.bf16 %v2115_v5, %v2114_v38  ;;  %v2056_v46 = vadd.f32 %v7797_v29, %v1895_v3  ;;  %v2082_v0 = vpop.f32.mrf.mxu1 }
 0x1d2   : > { %v7553_v40 = vpop.f32.mrf.mxu0 }
 0x1d3   : > { %v1898_v47 = vadd.f32 %v7552_v18, %v9859_v54  ;;  %7843 = vmatprep.mubr.bf16.mxu1 %v2153_v9  ;;  %v2116_v35 = vmax.f32 %v2056_v46, 0.0 }
 0x1d4   : > { %v7554_v34 = vpop.f32.mrf.mxu0 }
 0x1d5   : > { %v2059_v30 = vadd.f32 %v7798_v58, %v1898_v47  ;;  %v7555_v19 = vadd.f32 %v7554_v34, %v7553_v40 }
 0x1d6   : > { %v7556_v16 = vpop.f32.mrf.mxu0 }
 0x1d7   : > { %v2117_v21 = vmax.f32 %v2059_v30, 0.0  ;;  %v1903_v52 = vadd.f32 %v7555_v19, %v9862_v2  ;;  %v8243_v19 = vld [vmem:[%s11561_s7] sm:$0xff]  }
 0x1d8   : > { %v7557_v42 = vpop.f32.mrf.mxu0 }
 0x1d9   : > { %v7558_v44 = vadd.f32 %v7557_v42, %v7556_v16  ;;  %v2154_v28 = vpack.c.bf16 %v2117_v21, %v2116_v35  ;;  %v2064_v50 = vadd.f32 %v2063_v33, %v1903_v52  ;;  %v9943_v16 = vld [vmem:[%s11591_s27] ss:$0 sm:$0xff]  ;;  %s10751_s27 = scalar_lea.vmem %s11575_s21, %s11592_s24 }
 0x1da   : > { %v7559_v55 = vpop.f32.mrf.mxu0 }
 0x1db   : > { %7844 = vmatmul.mubr.bf16.gmra.mxu1 %v2154_v28  ;;  %v1906_v29 = vadd.f32 %v7558_v44, %v9868_v15  ;;  %v2118_v32 = vmax.f32 %v2064_v50, 0.0 }
 0x1dc   : > { %v7560_v54 = vpop.f32.mrf.mxu0 }
 0x1dd   : > { %v7561_v59 = vadd.f32 %v7560_v54, %v7559_v55  ;;  %v2067_v61 = vadd.f32 %v2066_v48, %v1906_v29 }
 0x1de   : > { %v7562_v62 = vpop.f32.mrf.mxu0 }
 0x1df   : > { %v1911_v1 = vadd.f32 %v7561_v59, %v9871_v27  ;;  %v2119_v4 = vmax.f32 %v2067_v61, 0.0 }
 0x1e0   : > { %v7563_v41 = vpop.f32.mrf.mxu0 }
 0x1e1   : > { %v7564_v2 = vadd.f32 %v7563_v41, %v7562_v62  ;;  %v2155_v8 = vpack.c.bf16 %v2119_v4, %v2118_v32  ;;  %v2072_v49 = vadd.f32 %v7801_v37, %v1911_v1 }
 0x1e2   : > { %v7565_v63 = vpop.f32.mrf.mxu0 }
 0x1e3   : > { %v1914_v12 = vadd.f32 %v7564_v2, %v9874_v43  ;;  %7847 = vmatprep.mubr.bf16.mxu1 %v2155_v8  ;;  %v2120_v14 = vmax.f32 %v2072_v49, 0.0 }
 0x1e4   : > { %v7566_v45 = vpop.f32.mrf.mxu0 }
 0x1e5   : > { %v2075_v15 = vadd.f32 %v7802_v51, %v1914_v12  ;;  %v7567_v58 = vadd.f32 %v7566_v45, %v7565_v63 }
 0x1e6   : > { %v7568_v53 = vpop.f32.mrf.mxu0 }
 0x1e7   : > { %v2121_v60 = vmax.f32 %v2075_v15, 0.0  ;;  %v1919_v17 = vadd.f32 %v7567_v58, %v9877_v57 }
 0x1e8   : > { %v7569_v27 = vpop.f32.mrf.mxu0 }
 0x1e9   : > { %v7570_v23 = vadd.f32 %v7569_v27, %v7568_v53  ;;  %v2156_v24 = vpack.c.bf16 %v2121_v60, %v2120_v14  ;;  %v2080_v20 = vadd.f32 %v2079_v11, %v1919_v17 }
 0x1ea   : > { %v7571_v56 = vpop.f32.mrf.mxu0 }
 0x1eb   : > { %7848 = vmatmul.mubr.bf16.gmra.mxu1 %v2156_v24  ;;  %v1922_v7 = vadd.f32 %v7570_v23, %v9880_v6  ;;  %v2122_v37 = vmax.f32 %v2080_v20, 0.0  ;;  %v8241_v6 = vld [vmem:[%s11561_s7 + $0x10] ss:$0 sps:$4 sm:$0x33]  }
 0x1ec   : > { %v7572_v43 = vpop.f32.mrf.mxu0  ;;  %8165 = vmatprep.subr.msk.bf16.mxu1 %vm2795_vm1, %v8241_v6 }
 0x1ed   : > { %v7573_v25 = vadd.f32 %v7572_v43, %v7571_v56  ;;  %v2083_v26 = vadd.f32 %v2082_v0, %v1922_v7 }
 0x1ee   : > { %v7574_v31 = vpop.f32.mrf.mxu0 }
 0x1ef   : > { %v1927_v38 = vadd.f32 %v7573_v25, %v9883_v22  ;;  %v2123_v3 = vmax.f32 %v2083_v26, 0.0  ;;  %v8242_v22 = vld [vmem:[%s11561_s7 + $0x8] sm:$0xff]  }
 0x1f0   : > { %v7575_v5 = vpop.f32.mrf.mxu0 }
 0x1f1   : > { %v7576_v10 = vadd.f32 %v7575_v5, %v7574_v31  ;;  %v2157_v57 = vpack.c.bf16 %v2123_v3, %v2122_v37  ;;  %v2088_v18 = vadd.f32 %v7805_v39, %v1927_v38 }
 0x1f3   : > { %v1930_v9 = vadd.f32 %v7576_v10, %v9886_v36  ;;  %7851 = vmatprep.mubr.bf16.mxu1 %v2157_v57  ;;  %v2124_v33 = vmax.f32 %v2088_v18, 0.0  ;;  %v2797_v36 = vsel %vm2795_vm1, %v8241_v6, 0 }
 0x1f4   : > { %7896 = vmatpush3.bf16.msra.mxu1 %v2797_v36 }
 0x1f5   : > { %v2091_v40 = vadd.f32 %v7806_v13, %v1930_v9  ;;  %7897 = vmatprep.subr.bf16.mxu1 %v8242_v22 }
 0x1f7   : > { %v2125_v46 = vmax.f32 %v2091_v40, 0.0 }
 0x1f8   : > { %7898 = vmatpush3.bf16.msra.mxu1 %v8242_v22 }
 0x1f9   : > { %v2158_v47 = vpack.c.bf16 %v2125_v46, %v2124_v33  ;;  %7899 = vmatprep.subr.bf16.mxu1 %v8243_v19 }
 0x1fb   : > { %7852 = vmatmul.mubr.bf16.gmra.mxu1 %v2158_v47 }
 0x1fc   : > { %7900 = vmatpush3.bf16.msra.mxu1 %v8243_v19 }
 0x24b   : > { %v7825_v34 = vpop.f32.mrf.mxu1 }
 0x24c   : > { %v2256_v52 = vadd.f32 %v7825_v34, %v9943_v16 }
 0x24d   : > { %v2247_v30 = vpop.f32.mrf.mxu1 }
 0x24e   : > { %v2248_v35 = vadd.f32 %v9943_v16, %v2247_v30  ;;  %v2376_v50 = vmax.f32 %v2256_v52, 0.0 }
 0x24f   : > { %v7826_v51 = vpop.f32.mrf.mxu1 }
 0x250   : > { %v2259_v21 = vadd.f32 %v7826_v51, %v9943_v16  ;;  %v2374_v55 = vmax.f32 %v2248_v35, 0.0 }
 0x251   : > { %v2250_v42 = vpop.f32.mrf.mxu1 }
 0x252   : > { %v2251_v44 = vadd.f32 %v9943_v16, %v2250_v42  ;;  %v2377_v28 = vmax.f32 %v2259_v21, 0.0 }
 0x254   : > { %v2375_v48 = vmax.f32 %v2251_v44, 0.0  ;;  %v2416_v54 = vpack.c.bf16 %v2377_v28, %v2376_v50 }
 0x256   : > { %v2415_v29 = vpack.c.bf16 %v2375_v48, %v2374_v55 }
 0x258   : > { %7863 = vmatprep.mubr.msk.bf16.mxu0 %vm2461_vm2, %v2415_v29 }
 0x259   : > { %7864 = vmatmul.mubr.msk.bf16.vlgmr.msra.gmra.mxu0 %vm2461_vm2, %v2416_v54 }
 0x25b   : > { %v7829_v59 = vpop.f32.mrf.mxu1 }
 0x25c   : > { %v2272_v1 = vadd.f32 %v7829_v59, %v9943_v16 }
 0x25d   : > { %v2263_v61 = vpop.f32.mrf.mxu1 }
 0x25e   : > { %v2264_v39 = vadd.f32 %v9943_v16, %v2263_v61  ;;  %v2380_v11 = vmax.f32 %v2272_v1, 0.0 }
 0x25f   : > { %v7830_v62 = vpop.f32.mrf.mxu1 }
 0x260   : > { %v2275_v32 = vadd.f32 %v7830_v62, %v9943_v16  ;;  %v2378_v8 = vmax.f32 %v2264_v39, 0.0 }
 0x261   : > { %v2266_v4 = vpop.f32.mrf.mxu1 }
 0x262   : > { %v2267_v41 = vadd.f32 %v9943_v16, %v2266_v4  ;;  %v2381_v2 = vmax.f32 %v2275_v32, 0.0 }
 0x264   : > { %v2379_v63 = vmax.f32 %v2267_v41, 0.0  ;;  %v2418_v12 = vpack.c.bf16 %v2381_v2, %v2380_v11 }
 0x266   : > { %v2417_v49 = vpack.c.bf16 %v2379_v63, %v2378_v8 }
 0x268   : > { %7867 = vmatprep.mubr.msk.bf16.mxu0 %vm2461_vm2, %v2417_v49 }
 0x269   : > { %7868 = vmatmul.mubr.msk.bf16.gmra.mxu0 %vm2461_vm2, %v2418_v12 }
 0x26b   : > { %v7833_v45 = vpop.f32.mrf.mxu1 }
 0x26c   : > { %v2288_v14 = vadd.f32 %v7833_v45, %v9943_v16 }
 0x26d   : > { %v2279_v15 = vpop.f32.mrf.mxu1 }
 0x26e   : > { %v2280_v53 = vadd.f32 %v9943_v16, %v2279_v15  ;;  %v2384_v56 = vmax.f32 %v2288_v14, 0.0 }
 0x26f   : > { %v7834_v58 = vpop.f32.mrf.mxu1 }
 0x270   : > { %v2291_v13 = vadd.f32 %v7834_v58, %v9943_v16  ;;  %v2382_v23 = vmax.f32 %v2280_v53, 0.0 }
 0x271   : > { %v2282_v60 = vpop.f32.mrf.mxu1 }
 0x272   : > { %v2283_v17 = vadd.f32 %v9943_v16, %v2282_v60  ;;  %v2385_v27 = vmax.f32 %v2291_v13, 0.0 }
 0x274   : > { %v2383_v24 = vmax.f32 %v2283_v17, 0.0  ;;  %v2420_v20 = vpack.c.bf16 %v2385_v27, %v2384_v56 }
 0x276   : > { %v2419_v0 = vpack.c.bf16 %v2383_v24, %v2382_v23 }
 0x278   : > { %7871 = vmatprep.mubr.msk.bf16.mxu0 %vm2461_vm2, %v2419_v0 }
 0x279   : > { %7872 = vmatmul.mubr.msk.bf16.gmra.mxu0 %vm2461_vm2, %v2420_v20 }
 0x27b   : > { %v7837_v7 = vpop.f32.mrf.mxu1 }
 0x27c   : > { %v2304_v37 = vadd.f32 %v7837_v7, %v9943_v16 }
 0x27d   : > { %v2295_v43 = vpop.f32.mrf.mxu1 }
 0x27e   : > { %v2296_v26 = vadd.f32 %v9943_v16, %v2295_v43  ;;  %v2388_v18 = vmax.f32 %v2304_v37, 0.0 }
 0x27f   : > { %v7838_v25 = vpop.f32.mrf.mxu1 }
 0x280   : > { %v2307_v31 = vadd.f32 %v7838_v25, %v9943_v16  ;;  %v2386_v10 = vmax.f32 %v2296_v26, 0.0 }
 0x281   : > { %v2298_v38 = vpop.f32.mrf.mxu1 }
 0x282   : > { %v2299_v3 = vadd.f32 %v9943_v16, %v2298_v38  ;;  %v2389_v5 = vmax.f32 %v2307_v31, 0.0 }
 0x284   : > { %v2387_v57 = vmax.f32 %v2299_v3, 0.0  ;;  %v2422_v40 = vpack.c.bf16 %v2389_v5, %v2388_v18  ;;  %v8244_v3 = vld [vmem:[%s11563_s9 + $0x8] ss:$0 sps:$4 sm:$0x11]   ;;  %v8245_v5 = vld [vmem:[%s11563_s9] sm:$0xff]  }
 0x285   : > { %8166 = vmatprep.subr.msk.bf16.mxu0 %vm3076_vm3, %v8244_v3  ;;  %v10004_v18 = vld [vmem:[%s11560_s6] ss:$0 sm:$0xff] }
 0x286   : > { %v2421_v9 = vpack.c.bf16 %v2387_v57, %v2386_v10  ;;  %v3078_v10 = vsel %vm3076_vm3, %v8244_v3, 0 }
 0x287   : > { %7934 = vmatpush3.bf16.msra.mxu0 %v3078_v10 }
 0x288   : > { %7875 = vmatprep.mubr.msk.bf16.mxu0 %vm2461_vm2, %v2421_v9  ;;  %7935 = vmatprep.subr.bf16.mxu0 %v8245_v5 }
 0x289   : > { %7876 = vmatmul.mubr.msk.bf16.gmra.mxu0 %vm2461_vm2, %v2422_v40 }
 0x28b   : > { %v7841_v33 = vpop.f32.mrf.mxu1  ;;  %7936 = vmatpush3.bf16.msra.mxu0 %v8245_v5 }
 0x28c   : > { %v2320_v34 = vadd.f32 %v7841_v33, %v9943_v16 }
 0x28d   : > { %v2311_v46 = vpop.f32.mrf.mxu1 }
 0x28e   : > { %v2312_v6 = vadd.f32 %v9943_v16, %v2311_v46  ;;  %v2392_v21 = vmax.f32 %v2320_v34, 0.0 }
 0x28f   : > { %v7842_v47 = vpop.f32.mrf.mxu1 }
 0x290   : > { %v2323_v22 = vadd.f32 %v7842_v47, %v9943_v16  ;;  %v2390_v51 = vmax.f32 %v2312_v6, 0.0 }
 0x291   : > { %v2314_v36 = vpop.f32.mrf.mxu1 }
 0x292   : > { %v2315_v30 = vadd.f32 %v9943_v16, %v2314_v36  ;;  %v2393_v19 = vmax.f32 %v2323_v22, 0.0 }
 0x294   : > { %v2391_v35 = vmax.f32 %v2315_v30, 0.0  ;;  %v2424_v42 = vpack.c.bf16 %v2393_v19, %v2392_v21 }
 0x296   : > { %v2423_v52 = vpack.c.bf16 %v2391_v35, %v2390_v51 }
 0x298   : > { %7879 = vmatprep.mubr.msk.bf16.mxu0 %vm2461_vm2, %v2423_v52 }
 0x299   : > { %7880 = vmatmul.mubr.msk.bf16.gmra.mxu0 %vm2461_vm2, %v2424_v42 }
 0x29b   : > { %v7845_v44 = vpop.f32.mrf.mxu1 }
 0x29c   : > { %v2336_v29 = vadd.f32 %v7845_v44, %v9943_v16 }
 0x29d   : > { %v2327_v28 = vpop.f32.mrf.mxu1 }
 0x29e   : > { %v2328_v48 = vadd.f32 %v9943_v16, %v2327_v28  ;;  %v2396_v32 = vmax.f32 %v2336_v29, 0.0 }
 0x29f   : > { %v7846_v55 = vpop.f32.mrf.mxu1 }
 0x2a0   : > { %v2339_v50 = vadd.f32 %v7846_v55, %v9943_v16  ;;  %v2394_v62 = vmax.f32 %v2328_v48, 0.0 }
 0x2a1   : > { %v2330_v54 = vpop.f32.mrf.mxu1 }
 0x2a2   : > { %v2331_v59 = vadd.f32 %v9943_v16, %v2330_v54  ;;  %v2397_v61 = vmax.f32 %v2339_v50, 0.0 }
 0x2a4   : > { %v2395_v39 = vmax.f32 %v2331_v59, 0.0  ;;  %v2426_v4 = vpack.c.bf16 %v2397_v61, %v2396_v32 }
 0x2a6   : > { %v2425_v1 = vpack.c.bf16 %v2395_v39, %v2394_v62 }
 0x2a8   : > { %7883 = vmatprep.mubr.msk.bf16.mxu0 %vm2461_vm2, %v2425_v1 }
 0x2a9   : > { %7884 = vmatmul.mubr.msk.bf16.gmra.mxu0 %vm2461_vm2, %v2426_v4 }
 0x2ab   : > { %v7849_v41 = vpop.f32.mrf.mxu1 }
 0x2ac   : > { %v2352_v49 = vadd.f32 %v7849_v41, %v9943_v16 }
 0x2ad   : > { %v2343_v2 = vpop.f32.mrf.mxu1 }
 0x2ae   : > { %v2344_v63 = vadd.f32 %v9943_v16, %v2343_v2  ;;  %v2400_v13 = vmax.f32 %v2352_v49, 0.0 }
 0x2af   : > { %v7850_v8 = vpop.f32.mrf.mxu1 }
 0x2b0   : > { %v2355_v11 = vadd.f32 %v7850_v8, %v9943_v16  ;;  %v2398_v58 = vmax.f32 %v2344_v63, 0.0 }
 0x2b1   : > { %v2346_v12 = vpop.f32.mrf.mxu1 }
 0x2b2   : > { %v2347_v45 = vadd.f32 %v9943_v16, %v2346_v12  ;;  %v2401_v15 = vmax.f32 %v2355_v11, 0.0 }
 0x2b4   : > { %v2399_v53 = vmax.f32 %v2347_v45, 0.0  ;;  %v2428_v60 = vpack.c.bf16 %v2401_v15, %v2400_v13 }
 0x2b6   : > { %v2427_v14 = vpack.c.bf16 %v2399_v53, %v2398_v58 }
 0x2b8   : > { %7887 = vmatprep.mubr.msk.bf16.mxu0 %vm2461_vm2, %v2427_v14 }
 0x2b9   : > { %7888 = vmatmul.mubr.msk.bf16.gmra.mxu0 %vm2461_vm2, %v2428_v60 }
 0x2bb   : > { %v7853_v17 = vpop.f32.mrf.mxu1 }
 0x2bc   : > { %v2368_v0 = vadd.f32 %v7853_v17, %v9943_v16 }
 0x2bd   : > { %v2359_v27 = vpop.f32.mrf.mxu1 }
 0x2be   : > { %v2360_v24 = vadd.f32 %v9943_v16, %v2359_v27  ;;  %v2404_v31 = vmax.f32 %v2368_v0, 0.0 }
 0x2bf   : > { %v7854_v23 = vpop.f32.mrf.mxu1 }
 0x2c0   : > { %v2371_v56 = vadd.f32 %v7854_v23, %v9943_v16  ;;  %v2402_v25 = vmax.f32 %v2360_v24, 0.0 }
 0x2c1   : > { %v2362_v20 = vpop.f32.mrf.mxu1 }
 0x2c2   : > { %v2363_v7 = vadd.f32 %v9943_v16, %v2362_v20  ;;  %v2405_v43 = vmax.f32 %v2371_v56, 0.0 }
 0x2c4   : > { %v2403_v26 = vmax.f32 %v2363_v7, 0.0  ;;  %v2430_v38 = vpack.c.bf16 %v2405_v43, %v2404_v31 }
 0x2c6   : > { %v2429_v37 = vpack.c.bf16 %v2403_v26, %v2402_v25 }
 0x2c8   : > { %7891 = vmatprep.mubr.msk.bf16.mxu0 %vm2461_vm2, %v2429_v37 }
 0x2c9   : > { %7892 = vmatmul.mubr.msk.bf16.gmra.mxu0 %vm2461_vm2, %v2430_v38 }
 0x319   : > { %v7865_v16 = vpop.f32.mrf.mxu0 }
 0x31a   : > { %v2553_v46 = vadd.f32 %v7865_v16, %v10004_v18 }
 0x31b   : > { %v2544_v57 = vpop.f32.mrf.mxu0 }
 0x31c   : > { %v2545_v40 = vadd.f32 %v10004_v18, %v2544_v57  ;;  %v2673_v30 = vmax.f32 %v2553_v46, 0.0 }
 0x31d   : > { %v7866_v9 = vpop.f32.mrf.mxu0 }
 0x31e   : > { %v2556_v33 = vadd.f32 %v7866_v9, %v10004_v18  ;;  %v2671_v34 = vmax.f32 %v2545_v40, 0.0 }
 0x31f   : > { %v2547_v47 = vpop.f32.mrf.mxu0 }
 0x320   : > { %v2548_v6 = vadd.f32 %v10004_v18, %v2547_v47  ;;  %v2674_v22 = vmax.f32 %v2556_v33, 0.0 }
 0x322   : > { %v2672_v36 = vmax.f32 %v2548_v6, 0.0  ;;  %v2710_v51 = vpack.c.bf16 %v2674_v22, %v2673_v30 }
 0x324   : > { %v2709_v19 = vpack.c.bf16 %v2672_v36, %v2671_v34 }
 0x326   : > { %7901 = vmatprep.mubr.msk.bf16.mxu1 %vm2746_vm4, %v2709_v19 }
 0x327   : > { %7902 = vmatmul.mubr.msk.bf16.vlgmr.msra.gmra.mxu1 %vm2746_vm4, %v2710_v51 }
 0x329   : > { %v7869_v35 = vpop.f32.mrf.mxu0 }
 0x32a   : > { %v2569_v28 = vadd.f32 %v7869_v35, %v10004_v18 }
 0x32b   : > { %v2560_v21 = vpop.f32.mrf.mxu0 }
 0x32c   : > { %v2561_v42 = vadd.f32 %v10004_v18, %v2560_v21  ;;  %v2677_v59 = vmax.f32 %v2569_v28, 0.0 }
 0x32d   : > { %v7870_v52 = vpop.f32.mrf.mxu0 }
 0x32e   : > { %v2572_v44 = vadd.f32 %v7870_v52, %v10004_v18  ;;  %v2675_v29 = vmax.f32 %v2561_v42, 0.0 }
 0x32f   : > { %v2563_v55 = vpop.f32.mrf.mxu0 }
 0x330   : > { %v2564_v48 = vadd.f32 %v10004_v18, %v2563_v55  ;;  %v2678_v50 = vmax.f32 %v2572_v44, 0.0 }
 0x332   : > { %v2676_v54 = vmax.f32 %v2564_v48, 0.0  ;;  %v2712_v62 = vpack.c.bf16 %v2678_v50, %v2677_v59 }
 0x334   : > { %v2711_v61 = vpack.c.bf16 %v2676_v54, %v2675_v29 }
 0x336   : > { %7905 = vmatprep.mubr.msk.bf16.mxu1 %vm2746_vm4, %v2711_v61 }
 0x337   : > { %7906 = vmatmul.mubr.msk.bf16.gmra.mxu1 %vm2746_vm4, %v2712_v62 }
 0x339   : > { %v7873_v39 = vpop.f32.mrf.mxu0 }
 0x33a   : > { %v2585_v2 = vadd.f32 %v7873_v39, %v10004_v18 }
 0x33b   : > { %v2576_v32 = vpop.f32.mrf.mxu0 }
 0x33c   : > { %v2577_v4 = vadd.f32 %v10004_v18, %v2576_v32  ;;  %v2681_v45 = vmax.f32 %v2585_v2, 0.0 }
 0x33d   : > { %v7874_v1 = vpop.f32.mrf.mxu0 }
 0x33e   : > { %v2588_v41 = vadd.f32 %v7874_v1, %v10004_v18  ;;  %v2679_v49 = vmax.f32 %v2577_v4, 0.0 }
 0x33f   : > { %v2579_v8 = vpop.f32.mrf.mxu0 }
 0x340   : > { %v2580_v63 = vadd.f32 %v10004_v18, %v2579_v8  ;;  %v2682_v11 = vmax.f32 %v2588_v41, 0.0 }
 0x342   : > { %v2680_v12 = vmax.f32 %v2580_v63, 0.0  ;;  %v2714_v58 = vpack.c.bf16 %v2682_v11, %v2681_v45 }
 0x344   : > { %v2713_v15 = vpack.c.bf16 %v2680_v12, %v2679_v49 }
 0x346   : > { %7909 = vmatprep.mubr.msk.bf16.mxu1 %vm2746_vm4, %v2713_v15 }
 0x347   : > { %7910 = vmatmul.mubr.msk.bf16.gmra.mxu1 %vm2746_vm4, %v2714_v58 }
 0x349   : > { %v7877_v53 = vpop.f32.mrf.mxu0 }
 0x34a   : > { %v2601_v27 = vadd.f32 %v7877_v53, %v10004_v18 }
 0x34b   : > { %v2592_v13 = vpop.f32.mrf.mxu0 }
 0x34c   : > { %v2593_v60 = vadd.f32 %v10004_v18, %v2592_v13  ;;  %v2685_v7 = vmax.f32 %v2601_v27, 0.0 }
 0x34d   : > { %v7878_v14 = vpop.f32.mrf.mxu0 }
 0x34e   : > { %v2604_v17 = vadd.f32 %v7878_v14, %v10004_v18  ;;  %v2683_v0 = vmax.f32 %v2593_v60, 0.0 }
 0x34f   : > { %v2595_v23 = vpop.f32.mrf.mxu0 }
 0x350   : > { %v2596_v24 = vadd.f32 %v10004_v18, %v2595_v23  ;;  %v2686_v56 = vmax.f32 %v2604_v17, 0.0 }
 0x352   : > { %v2684_v20 = vmax.f32 %v2596_v24, 0.0  ;;  %v2716_v25 = vpack.c.bf16 %v2686_v56, %v2685_v7  ;;  %v8246_v24 = vld [vmem:[%s11565_s11] sm:$0x1f]   ;;  %v9241_v56 = vmov 65535  }
 0x354   : > { %v2715_v43 = vpack.c.bf16 %v2684_v20, %v2683_v0  ;;  %v3354_v0 = vsel %vm3352_vm5, 4294967295, %v9241_v56 }
 0x356   : > { %7913 = vmatprep.mubr.msk.bf16.mxu1 %vm2746_vm4, %v2715_v43 }
 0x357   : > { %7914 = vmatmul.mubr.msk.bf16.gmra.mxu1 %vm2746_vm4, %v2716_v25  ;;  %v10060_v25 = vld [vmem:[%s11562_s8] ss:$0 sm:$0xff] }
 0x359   : > { %v7881_v26 = vpop.f32.mrf.mxu0 }
 0x35a   : > { %v2617_v5 = vadd.f32 %v7881_v26, %v10004_v18 }
 0x35b   : > { %v2608_v31 = vpop.f32.mrf.mxu0 }
 0x35c   : > { %v2609_v38 = vadd.f32 %v10004_v18, %v2608_v31  ;;  %v2689_v33 = vmax.f32 %v2617_v5, 0.0 }
 0x35d   : > { %v7882_v37 = vpop.f32.mrf.mxu0 }
 0x35e   : > { %v2620_v3 = vadd.f32 %v7882_v37, %v10004_v18  ;;  %v2687_v9 = vmax.f32 %v2609_v38, 0.0 }
 0x35f   : > { %v2611_v16 = vpop.f32.mrf.mxu0 }
 0x360   : > { %v2612_v10 = vadd.f32 %v10004_v18, %v2611_v16  ;;  %v2690_v57 = vmax.f32 %v2620_v3, 0.0 }
 0x362   : > { %v2688_v40 = vmax.f32 %v2612_v10, 0.0  ;;  %v2718_v47 = vpack.c.bf16 %v2690_v57, %v2689_v33 }
 0x364   : > { %v2717_v46 = vpack.c.bf16 %v2688_v40, %v2687_v9 }
 0x366   : > { %7917 = vmatprep.mubr.msk.bf16.mxu1 %vm2746_vm4, %v2717_v46 }
 0x367   : > { %7918 = vmatmul.mubr.msk.bf16.gmra.mxu1 %vm2746_vm4, %v2718_v47 }
 0x369   : > { %v7885_v6 = vpop.f32.mrf.mxu0 }
 0x36a   : > { %v2633_v19 = vadd.f32 %v7885_v6, %v10004_v18 }
 0x36b   : > { %v2624_v22 = vpop.f32.mrf.mxu0 }
 0x36c   : > { %v2625_v36 = vadd.f32 %v10004_v18, %v2624_v22  ;;  %v2693_v44 = vmax.f32 %v2633_v19, 0.0 }
 0x36d   : > { %v7886_v34 = vpop.f32.mrf.mxu0 }
 0x36e   : > { %v2636_v30 = vadd.f32 %v7886_v34, %v10004_v18  ;;  %v2691_v52 = vmax.f32 %v2625_v36, 0.0 }
 0x36f   : > { %v2627_v51 = vpop.f32.mrf.mxu0 }
 0x370   : > { %v2628_v35 = vadd.f32 %v10004_v18, %v2627_v51  ;;  %v2694_v21 = vmax.f32 %v2636_v30, 0.0 }
 0x372   : > { %v2692_v42 = vmax.f32 %v2628_v35, 0.0  ;;  %v2720_v55 = vpack.c.bf16 %v2694_v21, %v2693_v44 }
 0x374   : > { %v2719_v28 = vpack.c.bf16 %v2692_v42, %v2691_v52 }
 0x376   : > { %7921 = vmatprep.mubr.msk.bf16.mxu1 %vm2746_vm4, %v2719_v28 }
 0x377   : > { %7922 = vmatmul.mubr.msk.bf16.gmra.mxu1 %vm2746_vm4, %v2720_v55 }
 0x379   : > { %v7889_v48 = vpop.f32.mrf.mxu0 }
 0x37a   : > { %v2649_v61 = vadd.f32 %v7889_v48, %v10004_v18 }
 0x37b   : > { %v2640_v50 = vpop.f32.mrf.mxu0 }
 0x37c   : > { %v2641_v54 = vadd.f32 %v10004_v18, %v2640_v50  ;;  %v2697_v41 = vmax.f32 %v2649_v61, 0.0 }
 0x37d   : > { %v7890_v29 = vpop.f32.mrf.mxu0 }
 0x37e   : > { %v2652_v59 = vadd.f32 %v7890_v29, %v10004_v18  ;;  %v2695_v1 = vmax.f32 %v2641_v54, 0.0 }
 0x37f   : > { %v2643_v62 = vpop.f32.mrf.mxu0 }
 0x380   : > { %v2644_v39 = vadd.f32 %v10004_v18, %v2643_v62  ;;  %v2698_v32 = vmax.f32 %v2652_v59, 0.0 }
 0x382   : > { %v2696_v4 = vmax.f32 %v2644_v39, 0.0  ;;  %v2722_v8 = vpack.c.bf16 %v2698_v32, %v2697_v41 }
 0x384   : > { %v2721_v2 = vpack.c.bf16 %v2696_v4, %v2695_v1 }
 0x386   : > { %7925 = vmatprep.mubr.msk.bf16.mxu1 %vm2746_vm4, %v2721_v2 }
 0x387   : > { %7926 = vmatmul.mubr.msk.bf16.gmra.mxu1 %vm2746_vm4, %v2722_v8 }
 0x389   : > { %v7893_v63 = vpop.f32.mrf.mxu0 }
 0x38a   : > { %v2665_v15 = vadd.f32 %v7893_v63, %v10004_v18 }
 0x38b   : > { %v2656_v11 = vpop.f32.mrf.mxu0 }
 0x38c   : > { %v2657_v12 = vadd.f32 %v10004_v18, %v2656_v11  ;;  %v2701_v17 = vmax.f32 %v2665_v15, 0.0 }
 0x38d   : > { %v7894_v49 = vpop.f32.mrf.mxu0 }
 0x38e   : > { %v2668_v45 = vadd.f32 %v7894_v49, %v10004_v18  ;;  %v2699_v14 = vmax.f32 %v2657_v12, 0.0 }
 0x38f   : > { %v2659_v58 = vpop.f32.mrf.mxu0 }
 0x390   : > { %v2660_v53 = vadd.f32 %v10004_v18, %v2659_v58  ;;  %v2702_v13 = vmax.f32 %v2668_v45, 0.0  ;;  %v3355_v18 = vsel %vm3353_vm6, %v3354_v0, 0 }
 0x391   : > { %v3357_v7 = vand.u32 %v8246_v24, %v3355_v18 }
 0x392   : > { %v2700_v60 = vmax.f32 %v2660_v53, 0.0  ;;  %v2724_v23 = vpack.c.bf16 %v2702_v13, %v2701_v17 }
 0x393   : > { %7969 = vmatprep.subr.bf16.mxu1 %v3357_v7 }
 0x394   : > { %v2723_v27 = vpack.c.bf16 %v2700_v60, %v2699_v14  ;;  %7970 = vmatpush3.bf16.msra.mxu1 %v3357_v7 }
 0x396   : > { %7929 = vmatprep.mubr.msk.bf16.mxu1 %vm2746_vm4, %v2723_v27 }
 0x397   : > { %7930 = vmatmul.mubr.msk.bf16.gmra.mxu1 %vm2746_vm4, %v2724_v23 }
 0x3e7   : > { %v7903_v20 = vpop.f32.mrf.mxu1 }
 0x3e8   : > { %v2842_v38 = vadd.f32 %v7903_v20, %v10060_v25 }
 0x3e9   : > { %v2833_v43 = vpop.f32.mrf.mxu1 }
 0x3ea   : > { %v2834_v31 = vadd.f32 %v10060_v25, %v2833_v43  ;;  %v2962_v9 = vmax.f32 %v2842_v38, 0.0 }
 0x3eb   : > { %v7904_v26 = vpop.f32.mrf.mxu1 }
 0x3ec   : > { %v2845_v37 = vadd.f32 %v7904_v26, %v10060_v25  ;;  %v2960_v10 = vmax.f32 %v2834_v31, 0.0 }
 0x3ed   : > { %v2836_v3 = vpop.f32.mrf.mxu1 }
 0x3ee   : > { %v2837_v5 = vadd.f32 %v10060_v25, %v2836_v3  ;;  %v2963_v16 = vmax.f32 %v2845_v37, 0.0 }
 0x3f0   : > { %v2961_v57 = vmax.f32 %v2837_v5, 0.0  ;;  %v2997_v33 = vpack.c.bf16 %v2963_v16, %v2962_v9 }
 0x3f2   : > { %v2996_v40 = vpack.c.bf16 %v2961_v57, %v2960_v10 }
 0x3f4   : > { %7937 = vmatprep.mubr.msk.bf16.mxu0 %vm3027_vm7, %v2996_v40 }
 0x3f5   : > { %7938 = vmatmul.mubr.msk.bf16.vlgmr.msra.gmra.mxu0 %vm3027_vm7, %v2997_v33 }
 0x3f7   : > { %v7907_v46 = vpop.f32.mrf.mxu1 }
 0x3f8   : > { %v2858_v36 = vadd.f32 %v7907_v46, %v10060_v25 }
 0x3f9   : > { %v2849_v47 = vpop.f32.mrf.mxu1 }
 0x3fa   : > { %v2850_v22 = vadd.f32 %v10060_v25, %v2849_v47  ;;  %v2966_v52 = vmax.f32 %v2858_v36, 0.0 }
 0x3fb   : > { %v7908_v6 = vpop.f32.mrf.mxu1 }
 0x3fc   : > { %v2861_v34 = vadd.f32 %v7908_v6, %v10060_v25  ;;  %v2964_v35 = vmax.f32 %v2850_v22, 0.0 }
 0x3fd   : > { %v2852_v30 = vpop.f32.mrf.mxu1 }
 0x3fe   : > { %v2853_v19 = vadd.f32 %v10060_v25, %v2852_v30  ;;  %v2967_v51 = vmax.f32 %v2861_v34, 0.0 }
 0x400   : > { %v2965_v21 = vmax.f32 %v2853_v19, 0.0  ;;  %v2999_v44 = vpack.c.bf16 %v2967_v51, %v2966_v52 }
 0x402   : > { %v2998_v42 = vpack.c.bf16 %v2965_v21, %v2964_v35 }
 0x404   : > { %7941 = vmatprep.mubr.msk.bf16.mxu0 %vm3027_vm7, %v2998_v42 }
 0x405   : > { %7942 = vmatmul.mubr.msk.bf16.gmra.mxu0 %vm3027_vm7, %v2999_v44 }
 0x407   : > { %v7911_v28 = vpop.f32.mrf.mxu1 }
 0x408   : > { %v2874_v54 = vadd.f32 %v7911_v28, %v10060_v25 }
 0x409   : > { %v2865_v55 = vpop.f32.mrf.mxu1 }
 0x40a   : > { %v2866_v50 = vadd.f32 %v10060_v25, %v2865_v55  ;;  %v2970_v1 = vmax.f32 %v2874_v54, 0.0 }
 0x40b   : > { %v7912_v48 = vpop.f32.mrf.mxu1 }
 0x40c   : > { %v2877_v29 = vadd.f32 %v7912_v48, %v10060_v25  ;;  %v2968_v39 = vmax.f32 %v2866_v50, 0.0 }
 0x40d   : > { %v2868_v59 = vpop.f32.mrf.mxu1 }
 0x40e   : > { %v2869_v61 = vadd.f32 %v10060_v25, %v2868_v59  ;;  %v2971_v62 = vmax.f32 %v2877_v29, 0.0 }
 0x410   : > { %v2969_v32 = vmax.f32 %v2869_v61, 0.0  ;;  %v3001_v41 = vpack.c.bf16 %v2971_v62, %v2970_v1 }
 0x412   : > { %v3000_v4 = vpack.c.bf16 %v2969_v32, %v2968_v39 }
 0x414   : > { %7945 = vmatprep.mubr.msk.bf16.mxu0 %vm3027_vm7, %v3000_v4 }
 0x415   : > { %7946 = vmatmul.mubr.msk.bf16.gmra.mxu0 %vm3027_vm7, %v3001_v41 }
 0x417   : > { %v7915_v2 = vpop.f32.mrf.mxu1 }
 0x418   : > { %v2890_v12 = vadd.f32 %v7915_v2, %v10060_v25 }
 0x419   : > { %v2881_v8 = vpop.f32.mrf.mxu1 }
 0x41a   : > { %v2882_v11 = vadd.f32 %v10060_v25, %v2881_v8  ;;  %v2974_v14 = vmax.f32 %v2890_v12, 0.0 }
 0x41b   : > { %v7916_v63 = vpop.f32.mrf.mxu1 }
 0x41c   : > { %v2893_v49 = vadd.f32 %v7916_v63, %v10060_v25  ;;  %v2972_v53 = vmax.f32 %v2882_v11, 0.0 }
 0x41d   : > { %v2884_v45 = vpop.f32.mrf.mxu1 }
 0x41e   : > { %v2885_v15 = vadd.f32 %v10060_v25, %v2884_v45  ;;  %v2975_v58 = vmax.f32 %v2893_v49, 0.0 }
 0x420   : > { %v2973_v13 = vmax.f32 %v2885_v15, 0.0  ;;  %v3003_v17 = vpack.c.bf16 %v2975_v58, %v2974_v14  ;;  %v8247_v15 = vld [vmem:[%s11567_s13 + $0x8] ss:$0 sps:$4 sm:$0x11]   ;;  %v8248_v58 = vld [vmem:[%s11567_s13] sm:$0xff]  }
 0x421   : > { %8167 = vmatprep.subr.msk.bf16.mxu0 %vm3076_vm3, %v8247_v15  ;;  %v10121_v14 = vld [vmem:[%s11564_s10] ss:$0 sm:$0xff] }
 0x422   : > { %v3002_v60 = vpack.c.bf16 %v2973_v13, %v2972_v53 }
 0x424   : > { %7949 = vmatprep.mubr.msk.bf16.mxu0 %vm3027_vm7, %v3002_v60 }
 0x425   : > { %7950 = vmatmul.mubr.msk.bf16.gmra.mxu0 %vm3027_vm7, %v3003_v17 }
 0x427   : > { %v7919_v27 = vpop.f32.mrf.mxu1 }
 0x428   : > { %v2906_v20 = vadd.f32 %v7919_v27, %v10060_v25 }
 0x429   : > { %v2897_v23 = vpop.f32.mrf.mxu1 }
 0x42a   : > { %v2898_v56 = vadd.f32 %v10060_v25, %v2897_v23  ;;  %v2978_v37 = vmax.f32 %v2906_v20, 0.0 }
 0x42b   : > { %v7920_v24 = vpop.f32.mrf.mxu1 }
 0x42c   : > { %v2909_v0 = vadd.f32 %v7920_v24, %v10060_v25  ;;  %v2976_v26 = vmax.f32 %v2898_v56, 0.0 }
 0x42d   : > { %v2900_v18 = vpop.f32.mrf.mxu1 }
 0x42e   : > { %v2901_v7 = vadd.f32 %v10060_v25, %v2900_v18  ;;  %v2979_v43 = vmax.f32 %v2909_v0, 0.0 }
 0x430   : > { %v2977_v31 = vmax.f32 %v2901_v7, 0.0  ;;  %v3005_v3 = vpack.c.bf16 %v2979_v43, %v2978_v37 }
 0x432   : > { %v3004_v38 = vpack.c.bf16 %v2977_v31, %v2976_v26 }
 0x434   : > { %7953 = vmatprep.mubr.msk.bf16.mxu0 %vm3027_vm7, %v3004_v38 }
 0x435   : > { %7954 = vmatmul.mubr.msk.bf16.gmra.mxu0 %vm3027_vm7, %v3005_v3 }
 0x437   : > { %v7923_v5 = vpop.f32.mrf.mxu1 }
 0x438   : > { %v2922_v40 = vadd.f32 %v7923_v5, %v10060_v25 }
 0x439   : > { %v2913_v16 = vpop.f32.mrf.mxu1 }
 0x43a   : > { %v2914_v57 = vadd.f32 %v10060_v25, %v2913_v16  ;;  %v2982_v34 = vmax.f32 %v2922_v40, 0.0 }
 0x43b   : > { %v7924_v10 = vpop.f32.mrf.mxu1 }
 0x43c   : > { %v2925_v9 = vadd.f32 %v7924_v10, %v10060_v25  ;;  %v2980_v6 = vmax.f32 %v2914_v57, 0.0 }
 0x43d   : > { %v2916_v33 = vpop.f32.mrf.mxu1 }
 0x43e   : > { %v2917_v46 = vadd.f32 %v10060_v25, %v2916_v33  ;;  %v2983_v47 = vmax.f32 %v2925_v9, 0.0 }
 0x440   : > { %v2981_v22 = vmax.f32 %v2917_v46, 0.0  ;;  %v3007_v30 = vpack.c.bf16 %v2983_v47, %v2982_v34 }
 0x442   : > { %v3006_v36 = vpack.c.bf16 %v2981_v22, %v2980_v6 }
 0x444   : > { %7957 = vmatprep.mubr.msk.bf16.mxu0 %vm3027_vm7, %v3006_v36 }
 0x445   : > { %7958 = vmatmul.mubr.msk.bf16.gmra.mxu0 %vm3027_vm7, %v3007_v30 }
 0x447   : > { %v7927_v19 = vpop.f32.mrf.mxu1 }
 0x448   : > { %v2938_v42 = vadd.f32 %v7927_v19, %v10060_v25 }
 0x449   : > { %v2929_v51 = vpop.f32.mrf.mxu1 }
 0x44a   : > { %v2930_v21 = vadd.f32 %v10060_v25, %v2929_v51  ;;  %v2986_v29 = vmax.f32 %v2938_v42, 0.0 }
 0x44b   : > { %v7928_v35 = vpop.f32.mrf.mxu1 }
 0x44c   : > { %v2941_v52 = vadd.f32 %v7928_v35, %v10060_v25  ;;  %v2984_v48 = vmax.f32 %v2930_v21, 0.0 }
 0x44d   : > { %v2932_v44 = vpop.f32.mrf.mxu1 }
 0x44e   : > { %v2933_v28 = vadd.f32 %v10060_v25, %v2932_v44  ;;  %v2987_v55 = vmax.f32 %v2941_v52, 0.0 }
 0x450   : > { %v2985_v50 = vmax.f32 %v2933_v28, 0.0  ;;  %v3009_v59 = vpack.c.bf16 %v2987_v55, %v2986_v29 }
 0x452   : > { %v3008_v54 = vpack.c.bf16 %v2985_v50, %v2984_v48 }
 0x454   : > { %7961 = vmatprep.mubr.msk.bf16.mxu0 %vm3027_vm7, %v3008_v54 }
 0x455   : > { %7962 = vmatmul.mubr.msk.bf16.gmra.mxu0 %vm3027_vm7, %v3009_v59 }
 0x457   : > { %v7931_v61 = vpop.f32.mrf.mxu1 }
 0x458   : > { %v2954_v4 = vadd.f32 %v7931_v61, %v10060_v25 }
 0x459   : > { %v2945_v62 = vpop.f32.mrf.mxu1 }
 0x45a   : > { %v2946_v32 = vadd.f32 %v10060_v25, %v2945_v62  ;;  %v2990_v49 = vmax.f32 %v2954_v4, 0.0 }
 0x45b   : > { %v7932_v39 = vpop.f32.mrf.mxu1 }
 0x45c   : > { %v2957_v1 = vadd.f32 %v7932_v39, %v10060_v25  ;;  %v2988_v63 = vmax.f32 %v2946_v32, 0.0 }
 0x45d   : > { %v2948_v41 = vpop.f32.mrf.mxu1 }
 0x45e   : > { %v2949_v2 = vadd.f32 %v10060_v25, %v2948_v41  ;;  %v2991_v8 = vmax.f32 %v2957_v1, 0.0  ;;  %v3636_v25 = vsel %vm3076_vm3, %v8247_v15, 0 }
 0x45f   : > { %8004 = vmatpush3.bf16.msra.mxu0 %v3636_v25 }
 0x460   : > { %v2989_v11 = vmax.f32 %v2949_v2, 0.0  ;;  %v3011_v45 = vpack.c.bf16 %v2991_v8, %v2990_v49  ;;  %8005 = vmatprep.subr.bf16.mxu0 %v8248_v58 }
 0x462   : > { %v3010_v12 = vpack.c.bf16 %v2989_v11, %v2988_v63 }
 0x463   : > { %8006 = vmatpush3.bf16.msra.mxu0 %v8248_v58 }
 0x464   : > { %7965 = vmatprep.mubr.msk.bf16.mxu0 %vm3027_vm7, %v3010_v12 }
 0x465   : > { %7966 = vmatmul.mubr.msk.bf16.gmra.mxu0 %vm3027_vm7, %v3011_v45 }
 0x4b5   : > { %v7939_v53 = vpop.f32.mrf.mxu0 }
 0x4b6   : > { %v3123_v23 = vadd.f32 %v7939_v53, %v10121_v14 }
 0x4b7   : > { %v3114_v13 = vpop.f32.mrf.mxu0 }
 0x4b8   : > { %v3115_v17 = vadd.f32 %v10121_v14, %v3114_v13  ;;  %v3243_v7 = vmax.f32 %v3123_v23, 0.0 }
 0x4b9   : > { %v7940_v60 = vpop.f32.mrf.mxu0 }
 0x4ba   : > { %v3126_v27 = vadd.f32 %v7940_v60, %v10121_v14  ;;  %v3241_v20 = vmax.f32 %v3115_v17, 0.0 }
 0x4bb   : > { %v3117_v24 = vpop.f32.mrf.mxu0 }
 0x4bc   : > { %v3118_v56 = vadd.f32 %v10121_v14, %v3117_v24  ;;  %v3244_v0 = vmax.f32 %v3126_v27, 0.0 }
 0x4be   : > { %v3242_v18 = vmax.f32 %v3118_v56, 0.0  ;;  %v3277_v26 = vpack.c.bf16 %v3244_v0, %v3243_v7 }
 0x4c0   : > { %v3276_v43 = vpack.c.bf16 %v3242_v18, %v3241_v20 }
 0x4c2   : > { %7971 = vmatprep.mubr.msk.bf16.mxu1 %vm3303_vm8, %v3276_v43 }
 0x4c3   : > { %7972 = vmatmul.mubr.msk.bf16.vlgmr.msra.gmra.mxu1 %vm3303_vm8, %v3277_v26 }
 0x4c5   : > { %v7943_v31 = vpop.f32.mrf.mxu0 }
 0x4c6   : > { %v3139_v16 = vadd.f32 %v7943_v31, %v10121_v14 }
 0x4c7   : > { %v3130_v37 = vpop.f32.mrf.mxu0 }
 0x4c8   : > { %v3131_v3 = vadd.f32 %v10121_v14, %v3130_v37  ;;  %v3247_v46 = vmax.f32 %v3139_v16, 0.0 }
 0x4c9   : > { %v7944_v38 = vpop.f32.mrf.mxu0 }
 0x4ca   : > { %v3142_v5 = vadd.f32 %v7944_v38, %v10121_v14  ;;  %v3245_v40 = vmax.f32 %v3131_v3, 0.0 }
 0x4cb   : > { %v3133_v10 = vpop.f32.mrf.mxu0 }
 0x4cc   : > { %v3134_v57 = vadd.f32 %v10121_v14, %v3133_v10  ;;  %v3248_v9 = vmax.f32 %v3142_v5, 0.0 }
 0x4ce   : > { %v3246_v33 = vmax.f32 %v3134_v57, 0.0  ;;  %v3279_v6 = vpack.c.bf16 %v3248_v9, %v3247_v46 }
 0x4d0   : > { %v3278_v47 = vpack.c.bf16 %v3246_v33, %v3245_v40 }
 0x4d2   : > { %7975 = vmatprep.mubr.msk.bf16.mxu1 %vm3303_vm8, %v3278_v47 }
 0x4d3   : > { %7976 = vmatmul.mubr.msk.bf16.gmra.mxu1 %vm3303_vm8, %v3279_v6 }
 0x4d5   : > { %v7947_v22 = vpop.f32.mrf.mxu0 }
 0x4d6   : > { %v3155_v51 = vadd.f32 %v7947_v22, %v10121_v14 }
 0x4d7   : > { %v3146_v34 = vpop.f32.mrf.mxu0 }
 0x4d8   : > { %v3147_v30 = vadd.f32 %v10121_v14, %v3146_v34  ;;  %v3251_v28 = vmax.f32 %v3155_v51, 0.0 }
 0x4d9   : > { %v7948_v36 = vpop.f32.mrf.mxu0 }
 0x4da   : > { %v3158_v19 = vadd.f32 %v7948_v36, %v10121_v14  ;;  %v3249_v42 = vmax.f32 %v3147_v30, 0.0 }
 0x4db   : > { %v3149_v35 = vpop.f32.mrf.mxu0 }
 0x4dc   : > { %v3150_v21 = vadd.f32 %v10121_v14, %v3149_v35  ;;  %v3252_v52 = vmax.f32 %v3158_v19, 0.0 }
 0x4de   : > { %v3250_v44 = vmax.f32 %v3150_v21, 0.0  ;;  %v3281_v48 = vpack.c.bf16 %v3252_v52, %v3251_v28 }
 0x4e0   : > { %v3280_v55 = vpack.c.bf16 %v3250_v44, %v3249_v42 }
 0x4e2   : > { %7979 = vmatprep.mubr.msk.bf16.mxu1 %vm3303_vm8, %v3280_v55 }
 0x4e3   : > { %7980 = vmatmul.mubr.msk.bf16.gmra.mxu1 %vm3303_vm8, %v3281_v48 }
 0x4e5   : > { %v7951_v50 = vpop.f32.mrf.mxu0 }
 0x4e6   : > { %v3171_v62 = vadd.f32 %v7951_v50, %v10121_v14 }
 0x4e7   : > { %v3162_v29 = vpop.f32.mrf.mxu0 }
 0x4e8   : > { %v3163_v59 = vadd.f32 %v10121_v14, %v3162_v29  ;;  %v3255_v2 = vmax.f32 %v3171_v62, 0.0 }
 0x4e9   : > { %v7952_v54 = vpop.f32.mrf.mxu0 }
 0x4ea   : > { %v3174_v61 = vadd.f32 %v7952_v54, %v10121_v14  ;;  %v3253_v4 = vmax.f32 %v3163_v59, 0.0 }
 0x4eb   : > { %v3165_v39 = vpop.f32.mrf.mxu0 }
 0x4ec   : > { %v3166_v32 = vadd.f32 %v10121_v14, %v3165_v39  ;;  %v3256_v1 = vmax.f32 %v3174_v61, 0.0 }
 0x4ee   : > { %v3254_v41 = vmax.f32 %v3166_v32, 0.0  ;;  %v3283_v63 = vpack.c.bf16 %v3256_v1, %v3255_v2  ;;  %v8249_v32 = vld [vmem:[%s11569_s15 + $0x10] ss:$0 sps:$4 sm:$0x33]   ;;  %v8250_v1 = vld [vmem:[%s11569_s15 + $0x8] sm:$0xff]   ;;  %v8251_v2 = vld [vmem:[%s11569_s15] sm:$0xff]  }
 0x4ef   : > { %8168 = vmatprep.subr.msk.bf16.mxu1 %vm2795_vm1, %v8249_v32 }
 0x4f0   : > { %v3282_v8 = vpack.c.bf16 %v3254_v41, %v3253_v4 }
 0x4f2   : > { %7983 = vmatprep.mubr.msk.bf16.mxu1 %vm3303_vm8, %v3282_v8  ;;  %v10185_v8 = vld [vmem:[%s11566_s12] ss:$0 sm:$0xff] }
 0x4f3   : > { %7984 = vmatmul.mubr.msk.bf16.gmra.mxu1 %vm3303_vm8, %v3283_v63 }
 0x4f5   : > { %v7955_v11 = vpop.f32.mrf.mxu0 }
 0x4f6   : > { %v3187_v58 = vadd.f32 %v7955_v11, %v10121_v14 }
 0x4f7   : > { %v3178_v49 = vpop.f32.mrf.mxu0 }
 0x4f8   : > { %v3179_v45 = vadd.f32 %v10121_v14, %v3178_v49  ;;  %v3259_v27 = vmax.f32 %v3187_v58, 0.0 }
 0x4f9   : > { %v7956_v12 = vpop.f32.mrf.mxu0 }
 0x4fa   : > { %v3190_v15 = vadd.f32 %v7956_v12, %v10121_v14  ;;  %v3257_v60 = vmax.f32 %v3179_v45, 0.0 }
 0x4fb   : > { %v3181_v53 = vpop.f32.mrf.mxu0 }
 0x4fc   : > { %v3182_v25 = vadd.f32 %v10121_v14, %v3181_v53  ;;  %v3260_v13 = vmax.f32 %v3190_v15, 0.0 }
 0x4fe   : > { %v3258_v17 = vmax.f32 %v3182_v25, 0.0  ;;  %v3285_v24 = vpack.c.bf16 %v3260_v13, %v3259_v27 }
 0x500   : > { %v3284_v23 = vpack.c.bf16 %v3258_v17, %v3257_v60 }
 0x502   : > { %7987 = vmatprep.mubr.msk.bf16.mxu1 %vm3303_vm8, %v3284_v23 }
 0x503   : > { %7988 = vmatmul.mubr.msk.bf16.gmra.mxu1 %vm3303_vm8, %v3285_v24 }
 0x505   : > { %v7959_v56 = vpop.f32.mrf.mxu0 }
 0x506   : > { %v3203_v43 = vadd.f32 %v7959_v56, %v10121_v14 }
 0x507   : > { %v3194_v0 = vpop.f32.mrf.mxu0 }
 0x508   : > { %v3195_v18 = vadd.f32 %v10121_v14, %v3194_v0  ;;  %v3263_v5 = vmax.f32 %v3203_v43, 0.0 }
 0x509   : > { %v7960_v20 = vpop.f32.mrf.mxu0 }
 0x50a   : > { %v3206_v7 = vadd.f32 %v7960_v20, %v10121_v14  ;;  %v3261_v38 = vmax.f32 %v3195_v18, 0.0 }
 0x50b   : > { %v3197_v26 = vpop.f32.mrf.mxu0 }
 0x50c   : > { %v3198_v31 = vadd.f32 %v10121_v14, %v3197_v26  ;;  %v3264_v37 = vmax.f32 %v3206_v7, 0.0 }
 0x50e   : > { %v3262_v3 = vmax.f32 %v3198_v31, 0.0  ;;  %v3287_v10 = vpack.c.bf16 %v3264_v37, %v3263_v5 }
 0x510   : > { %v3286_v16 = vpack.c.bf16 %v3262_v3, %v3261_v38 }
 0x512   : > { %7991 = vmatprep.mubr.msk.bf16.mxu1 %vm3303_vm8, %v3286_v16 }
 0x513   : > { %7992 = vmatmul.mubr.msk.bf16.gmra.mxu1 %vm3303_vm8, %v3287_v10 }
 0x515   : > { %v7963_v57 = vpop.f32.mrf.mxu0 }
 0x516   : > { %v3219_v47 = vadd.f32 %v7963_v57, %v10121_v14 }
 0x517   : > { %v3210_v9 = vpop.f32.mrf.mxu0 }
 0x518   : > { %v3211_v33 = vadd.f32 %v10121_v14, %v3210_v9  ;;  %v3267_v19 = vmax.f32 %v3219_v47, 0.0 }
 0x519   : > { %v7964_v40 = vpop.f32.mrf.mxu0 }
 0x51a   : > { %v3222_v46 = vadd.f32 %v7964_v40, %v10121_v14  ;;  %v3265_v36 = vmax.f32 %v3211_v33, 0.0 }
 0x51b   : > { %v3213_v6 = vpop.f32.mrf.mxu0 }
 0x51c   : > { %v3214_v22 = vadd.f32 %v10121_v14, %v3213_v6  ;;  %v3268_v34 = vmax.f32 %v3222_v46, 0.0 }
 0x51e   : > { %v3266_v30 = vmax.f32 %v3214_v22, 0.0  ;;  %v3289_v35 = vpack.c.bf16 %v3268_v34, %v3267_v19 }
 0x520   : > { %v3288_v51 = vpack.c.bf16 %v3266_v30, %v3265_v36 }
 0x522   : > { %7995 = vmatprep.mubr.msk.bf16.mxu1 %vm3303_vm8, %v3288_v51 }
 0x523   : > { %7996 = vmatmul.mubr.msk.bf16.gmra.mxu1 %vm3303_vm8, %v3289_v35 }
 0x525   : > { %v7967_v21 = vpop.f32.mrf.mxu0 }
 0x526   : > { %v3235_v55 = vadd.f32 %v7967_v21, %v10121_v14 }
 0x527   : > { %v3226_v52 = vpop.f32.mrf.mxu0 }
 0x528   : > { %v3227_v44 = vadd.f32 %v10121_v14, %v3226_v52  ;;  %v3271_v61 = vmax.f32 %v3235_v55, 0.0 }
 0x529   : > { %v7968_v42 = vpop.f32.mrf.mxu0 }
 0x52a   : > { %v3238_v28 = vadd.f32 %v7968_v42, %v10121_v14  ;;  %v3269_v54 = vmax.f32 %v3227_v44, 0.0 }
 0x52b   : > { %v3229_v48 = vpop.f32.mrf.mxu0 }
 0x52c   : > { %v3230_v50 = vadd.f32 %v10121_v14, %v3229_v48  ;;  %v3272_v29 = vmax.f32 %v3238_v28, 0.0  ;;  %v3923_v14 = vsel %vm2795_vm1, %v8249_v32, 0 }
 0x52d   : > { %8040 = vmatpush3.bf16.msra.mxu1 %v3923_v14 }
 0x52e   : > { %v3270_v59 = vmax.f32 %v3230_v50, 0.0  ;;  %v3291_v39 = vpack.c.bf16 %v3272_v29, %v3271_v61  ;;  %8041 = vmatprep.subr.bf16.mxu1 %v8250_v1 }
 0x530   : > { %v3290_v62 = vpack.c.bf16 %v3270_v59, %v3269_v54 }
 0x531   : > { %8042 = vmatpush3.bf16.msra.mxu1 %v8250_v1 }
 0x532   : > { %7999 = vmatprep.mubr.msk.bf16.mxu1 %vm3303_vm8, %v3290_v62  ;;  %8043 = vmatprep.subr.bf16.mxu1 %v8251_v2 }
 0x533   : > { %8000 = vmatmul.mubr.msk.bf16.gmra.mxu1 %vm3303_vm8, %v3291_v39 }
 0x535   : > { %8044 = vmatpush3.bf16.msra.mxu1 %v8251_v2 }
 0x583   : > { %v7973_v4 = vpop.f32.mrf.mxu1 }
 0x584   : > { %v3402_v12 = vadd.f32 %v7973_v4, %v10185_v8 }
 0x585   : > { %v3393_v41 = vpop.f32.mrf.mxu1 }
 0x586   : > { %v3394_v11 = vadd.f32 %v10185_v8, %v3393_v41  ;;  %v3522_v13 = vmax.f32 %v3402_v12, 0.0 }
 0x587   : > { %v7974_v63 = vpop.f32.mrf.mxu1 }
 0x588   : > { %v3405_v49 = vadd.f32 %v7974_v63, %v10185_v8  ;;  %v3520_v53 = vmax.f32 %v3394_v11, 0.0 }
 0x589   : > { %v3396_v45 = vpop.f32.mrf.mxu1 }
 0x58a   : > { %v3397_v15 = vadd.f32 %v10185_v8, %v3396_v45  ;;  %v3523_v58 = vmax.f32 %v3405_v49, 0.0 }
 0x58c   : > { %v3521_v25 = vmax.f32 %v3397_v15, 0.0  ;;  %v3557_v17 = vpack.c.bf16 %v3523_v58, %v3522_v13 }
 0x58e   : > { %v3556_v60 = vpack.c.bf16 %v3521_v25, %v3520_v53 }
 0x590   : > { %8007 = vmatprep.mubr.msk.bf16.mxu0 %vm3027_vm7, %v3556_v60 }
 0x591   : > { %8008 = vmatmul.mubr.msk.bf16.vlgmr.msra.gmra.mxu0 %vm3027_vm7, %v3557_v17 }
 0x593   : > { %v7977_v27 = vpop.f32.mrf.mxu1 }
 0x594   : > { %v3418_v20 = vadd.f32 %v7977_v27, %v10185_v8 }
 0x595   : > { %v3409_v23 = vpop.f32.mrf.mxu1 }
 0x596   : > { %v3410_v56 = vadd.f32 %v10185_v8, %v3409_v23  ;;  %v3526_v37 = vmax.f32 %v3418_v20, 0.0 }
 0x597   : > { %v7978_v24 = vpop.f32.mrf.mxu1 }
 0x598   : > { %v3421_v0 = vadd.f32 %v7978_v24, %v10185_v8  ;;  %v3524_v26 = vmax.f32 %v3410_v56, 0.0 }
 0x599   : > { %v3412_v18 = vpop.f32.mrf.mxu1 }
 0x59a   : > { %v3413_v7 = vadd.f32 %v10185_v8, %v3412_v18  ;;  %v3527_v43 = vmax.f32 %v3421_v0, 0.0 }
 0x59c   : > { %v3525_v31 = vmax.f32 %v3413_v7, 0.0  ;;  %v3559_v3 = vpack.c.bf16 %v3527_v43, %v3526_v37 }
 0x59e   : > { %v3558_v38 = vpack.c.bf16 %v3525_v31, %v3524_v26 }
 0x5a0   : > { %8011 = vmatprep.mubr.msk.bf16.mxu0 %vm3027_vm7, %v3558_v38 }
 0x5a1   : > { %8012 = vmatmul.mubr.msk.bf16.gmra.mxu0 %vm3027_vm7, %v3559_v3 }
 0x5a3   : > { %v7981_v5 = vpop.f32.mrf.mxu1 }
 0x5a4   : > { %v3434_v40 = vadd.f32 %v7981_v5, %v10185_v8 }
 0x5a5   : > { %v3425_v16 = vpop.f32.mrf.mxu1 }
 0x5a6   : > { %v3426_v57 = vadd.f32 %v10185_v8, %v3425_v16  ;;  %v3530_v34 = vmax.f32 %v3434_v40, 0.0 }
 0x5a7   : > { %v7982_v10 = vpop.f32.mrf.mxu1 }
 0x5a8   : > { %v3437_v9 = vadd.f32 %v7982_v10, %v10185_v8  ;;  %v3528_v6 = vmax.f32 %v3426_v57, 0.0 }
 0x5a9   : > { %v3428_v33 = vpop.f32.mrf.mxu1 }
 0x5aa   : > { %v3429_v46 = vadd.f32 %v10185_v8, %v3428_v33  ;;  %v3531_v47 = vmax.f32 %v3437_v9, 0.0 }
 0x5ac   : > { %v3529_v22 = vmax.f32 %v3429_v46, 0.0  ;;  %v3561_v30 = vpack.c.bf16 %v3531_v47, %v3530_v34 }
 0x5ae   : > { %v3560_v36 = vpack.c.bf16 %v3529_v22, %v3528_v6 }
 0x5b0   : > { %8015 = vmatprep.mubr.msk.bf16.mxu0 %vm3027_vm7, %v3560_v36 }
 0x5b1   : > { %8016 = vmatmul.mubr.msk.bf16.gmra.mxu0 %vm3027_vm7, %v3561_v30 }
 0x5b3   : > { %v7985_v19 = vpop.f32.mrf.mxu1 }
 0x5b4   : > { %v3450_v42 = vadd.f32 %v7985_v19, %v10185_v8 }
 0x5b5   : > { %v3441_v51 = vpop.f32.mrf.mxu1 }
 0x5b6   : > { %v3442_v21 = vadd.f32 %v10185_v8, %v3441_v51  ;;  %v3534_v29 = vmax.f32 %v3450_v42, 0.0 }
 0x5b7   : > { %v7986_v35 = vpop.f32.mrf.mxu1 }
 0x5b8   : > { %v3453_v52 = vadd.f32 %v7986_v35, %v10185_v8  ;;  %v3532_v48 = vmax.f32 %v3442_v21, 0.0 }
 0x5b9   : > { %v3444_v44 = vpop.f32.mrf.mxu1 }
 0x5ba   : > { %v3445_v28 = vadd.f32 %v10185_v8, %v3444_v44  ;;  %v3535_v55 = vmax.f32 %v3453_v52, 0.0 }
 0x5bc   : > { %v3533_v50 = vmax.f32 %v3445_v28, 0.0  ;;  %v3563_v59 = vpack.c.bf16 %v3535_v55, %v3534_v29  ;;  %v8252_v28 = vld [vmem:[%s11571_s17 + $0x18] sm:$0xff]   ;;  %v8253_v55 = vld [vmem:[%s11571_s17 + $0x10] sm:$0xff]   ;;  %v10247_v29 = vld [vmem:[%s11568_s14] ss:$0 sm:$0xff] }
 0x5bd   : > { %8077 = vmatprep.subr.bf16.mxu0 %v8252_v28 }
 0x5be   : > { %v3562_v54 = vpack.c.bf16 %v3533_v50, %v3532_v48  ;;  %8078 = vmatpush3.bf16.msra.mxu0 %v8252_v28  ;;  %v8254_v50 = vld [vmem:[%s11571_s17 + $0x8] sm:$0xff]  }
 0x5bf   : > { %8079 = vmatprep.subr.bf16.mxu0 %v8253_v55 }
 0x5c0   : > { %8019 = vmatprep.mubr.msk.bf16.mxu0 %vm3027_vm7, %v3562_v54 }
 0x5c1   : > { %8020 = vmatmul.mubr.msk.bf16.gmra.mxu0 %vm3027_vm7, %v3563_v59 }
 0x5c2   : > { %8080 = vmatpush3.bf16.msra.mxu0 %v8253_v55 }
 0x5c3   : > { %v7989_v61 = vpop.f32.mrf.mxu1  ;;  %8081 = vmatprep.subr.bf16.mxu0 %v8254_v50 }
 0x5c4   : > { %v3466_v4 = vadd.f32 %v7989_v61, %v10185_v8 }
 0x5c5   : > { %v3457_v62 = vpop.f32.mrf.mxu1 }
 0x5c6   : > { %v3458_v32 = vadd.f32 %v10185_v8, %v3457_v62  ;;  %v3538_v49 = vmax.f32 %v3466_v4, 0.0  ;;  %8082 = vmatpush3.bf16.msra.mxu0 %v8254_v50 }
 0x5c7   : > { %v7990_v39 = vpop.f32.mrf.mxu1 }
 0x5c8   : > { %v3469_v1 = vadd.f32 %v7990_v39, %v10185_v8  ;;  %v3536_v63 = vmax.f32 %v3458_v32, 0.0  ;;  %v8255_v32 = vld [vmem:[%s11571_s17] sm:$0xff]  }
 0x5c9   : > { %v3460_v14 = vpop.f32.mrf.mxu1  ;;  %8083 = vmatprep.subr.bf16.mxu0 %v8255_v32 }
 0x5ca   : > { %v3461_v41 = vadd.f32 %v10185_v8, %v3460_v14  ;;  %v3539_v2 = vmax.f32 %v3469_v1, 0.0  ;;  %8084 = vmatpush3.bf16.msra.mxu0 %v8255_v32 }
 0x5cc   : > { %v3537_v11 = vmax.f32 %v3461_v41, 0.0  ;;  %v3565_v45 = vpack.c.bf16 %v3539_v2, %v3538_v49 }
 0x5ce   : > { %v3564_v12 = vpack.c.bf16 %v3537_v11, %v3536_v63 }
 0x5d0   : > { %8023 = vmatprep.mubr.msk.bf16.mxu0 %vm3027_vm7, %v3564_v12 }
 0x5d1   : > { %8024 = vmatmul.mubr.msk.bf16.gmra.mxu0 %vm3027_vm7, %v3565_v45 }
 0x5d3   : > { %v7993_v15 = vpop.f32.mrf.mxu1 }
 0x5d4   : > { %v3482_v60 = vadd.f32 %v7993_v15, %v10185_v8 }
 0x5d5   : > { %v3473_v58 = vpop.f32.mrf.mxu1 }
 0x5d6   : > { %v3474_v25 = vadd.f32 %v10185_v8, %v3473_v58  ;;  %v3542_v0 = vmax.f32 %v3482_v60, 0.0 }
 0x5d7   : > { %v7994_v53 = vpop.f32.mrf.mxu1 }
 0x5d8   : > { %v3485_v13 = vadd.f32 %v7994_v53, %v10185_v8  ;;  %v3540_v24 = vmax.f32 %v3474_v25, 0.0 }
 0x5d9   : > { %v3476_v17 = vpop.f32.mrf.mxu1 }
 0x5da   : > { %v3477_v27 = vadd.f32 %v10185_v8, %v3476_v17  ;;  %v3543_v23 = vmax.f32 %v3485_v13, 0.0 }
 0x5dc   : > { %v3541_v56 = vmax.f32 %v3477_v27, 0.0  ;;  %v3567_v18 = vpack.c.bf16 %v3543_v23, %v3542_v0 }
 0x5de   : > { %v3566_v20 = vpack.c.bf16 %v3541_v56, %v3540_v24 }
 0x5e0   : > { %8027 = vmatprep.mubr.msk.bf16.mxu0 %vm3027_vm7, %v3566_v20 }
 0x5e1   : > { %8028 = vmatmul.mubr.msk.bf16.gmra.mxu0 %vm3027_vm7, %v3567_v18 }
 0x5e3   : > { %v7997_v7 = vpop.f32.mrf.mxu1 }
 0x5e4   : > { %v3498_v38 = vadd.f32 %v7997_v7, %v10185_v8 }
 0x5e5   : > { %v3489_v43 = vpop.f32.mrf.mxu1 }
 0x5e6   : > { %v3490_v31 = vadd.f32 %v10185_v8, %v3489_v43  ;;  %v3546_v9 = vmax.f32 %v3498_v38, 0.0 }
 0x5e7   : > { %v7998_v26 = vpop.f32.mrf.mxu1 }
 0x5e8   : > { %v3501_v37 = vadd.f32 %v7998_v26, %v10185_v8  ;;  %v3544_v10 = vmax.f32 %v3490_v31, 0.0 }
 0x5e9   : > { %v3492_v3 = vpop.f32.mrf.mxu1 }
 0x5ea   : > { %v3493_v5 = vadd.f32 %v10185_v8, %v3492_v3  ;;  %v3547_v16 = vmax.f32 %v3501_v37, 0.0 }
 0x5ec   : > { %v3545_v57 = vmax.f32 %v3493_v5, 0.0  ;;  %v3569_v33 = vpack.c.bf16 %v3547_v16, %v3546_v9 }
 0x5ee   : > { %v3568_v40 = vpack.c.bf16 %v3545_v57, %v3544_v10 }
 0x5f0   : > { %8031 = vmatprep.mubr.msk.bf16.mxu0 %vm3027_vm7, %v3568_v40 }
 0x5f1   : > { %8032 = vmatmul.mubr.msk.bf16.gmra.mxu0 %vm3027_vm7, %v3569_v33 }
 0x5f3   : > { %v8001_v46 = vpop.f32.mrf.mxu1 }
 0x5f4   : > { %v3514_v36 = vadd.f32 %v8001_v46, %v10185_v8 }
 0x5f5   : > { %v3505_v47 = vpop.f32.mrf.mxu1 }
 0x5f6   : > { %v3506_v22 = vadd.f32 %v10185_v8, %v3505_v47  ;;  %v3550_v52 = vmax.f32 %v3514_v36, 0.0 }
 0x5f7   : > { %v8002_v6 = vpop.f32.mrf.mxu1 }
 0x5f8   : > { %v3517_v34 = vadd.f32 %v8002_v6, %v10185_v8  ;;  %v3548_v35 = vmax.f32 %v3506_v22, 0.0 }
 0x5f9   : > { %v3508_v30 = vpop.f32.mrf.mxu1 }
 0x5fa   : > { %v3509_v19 = vadd.f32 %v10185_v8, %v3508_v30  ;;  %v3551_v51 = vmax.f32 %v3517_v34, 0.0 }
 0x5fc   : > { %v3549_v21 = vmax.f32 %v3509_v19, 0.0  ;;  %v3571_v44 = vpack.c.bf16 %v3551_v51, %v3550_v52 }
 0x5fe   : > { %v3570_v42 = vpack.c.bf16 %v3549_v21, %v3548_v35 }
 0x600   : > { %8035 = vmatprep.mubr.msk.bf16.mxu0 %vm3027_vm7, %v3570_v42 }
 0x601   : > { %8036 = vmatmul.mubr.msk.bf16.gmra.mxu0 %vm3027_vm7, %v3571_v44 }
 0x651   : > { %v8009_v48 = vpop.f32.mrf.mxu0 }
 0x652   : > { %v3681_v62 = vadd.f32 %v8009_v48, %v10247_v29 }
 0x653   : > { %v3672_v8 = vpop.f32.mrf.mxu0 }
 0x654   : > { %v3673_v59 = vadd.f32 %v10247_v29, %v3672_v8  ;;  %v3801_v2 = vmax.f32 %v3681_v62, 0.0 }
 0x655   : > { %v8010_v54 = vpop.f32.mrf.mxu0 }
 0x656   : > { %v3684_v61 = vadd.f32 %v8010_v54, %v10247_v29  ;;  %v3799_v14 = vmax.f32 %v3673_v59, 0.0 }
 0x657   : > { %v3675_v39 = vpop.f32.mrf.mxu0 }
 0x658   : > { %v3676_v1 = vadd.f32 %v10247_v29, %v3675_v39  ;;  %v3802_v4 = vmax.f32 %v3684_v61, 0.0 }
 0x65a   : > { %v3800_v41 = vmax.f32 %v3676_v1, 0.0  ;;  %v3838_v11 = vpack.c.bf16 %v3802_v4, %v3801_v2 }
 0x65c   : > { %v3837_v63 = vpack.c.bf16 %v3800_v41, %v3799_v14 }
 0x65e   : > { %8045 = vmatprep.mubr.msk.bf16.mxu1 %vm2746_vm4, %v3837_v63 }
 0x65f   : > { %8046 = vmatmul.mubr.msk.bf16.vlgmr.msra.gmra.mxu1 %vm2746_vm4, %v3838_v11 }
 0x661   : > { %v8013_v49 = vpop.f32.mrf.mxu0 }
 0x662   : > { %v3697_v53 = vadd.f32 %v8013_v49, %v10247_v29 }
 0x663   : > { %v3688_v12 = vpop.f32.mrf.mxu0 }
 0x664   : > { %v3689_v15 = vadd.f32 %v10247_v29, %v3688_v12  ;;  %v3805_v23 = vmax.f32 %v3697_v53, 0.0 }
 0x665   : > { %v8014_v45 = vpop.f32.mrf.mxu0 }
 0x666   : > { %v3700_v58 = vadd.f32 %v8014_v45, %v10247_v29  ;;  %v3803_v17 = vmax.f32 %v3689_v15, 0.0 }
 0x667   : > { %v3691_v25 = vpop.f32.mrf.mxu0 }
 0x668   : > { %v3692_v13 = vadd.f32 %v10247_v29, %v3691_v25  ;;  %v3806_v60 = vmax.f32 %v3700_v58, 0.0 }
 0x66a   : > { %v3804_v27 = vmax.f32 %v3692_v13, 0.0  ;;  %v3840_v56 = vpack.c.bf16 %v3806_v60, %v3805_v23 }
 0x66c   : > { %v3839_v24 = vpack.c.bf16 %v3804_v27, %v3803_v17 }
 0x66e   : > { %8049 = vmatprep.mubr.msk.bf16.mxu1 %vm2746_vm4, %v3839_v24 }
 0x66f   : > { %8050 = vmatmul.mubr.msk.bf16.gmra.mxu1 %vm2746_vm4, %v3840_v56 }
 0x671   : > { %v8017_v0 = vpop.f32.mrf.mxu0 }
 0x672   : > { %v3713_v26 = vadd.f32 %v8017_v0, %v10247_v29 }
 0x673   : > { %v3704_v20 = vpop.f32.mrf.mxu0 }
 0x674   : > { %v3705_v7 = vadd.f32 %v10247_v29, %v3704_v20  ;;  %v3809_v16 = vmax.f32 %v3713_v26, 0.0 }
 0x675   : > { %v8018_v18 = vpop.f32.mrf.mxu0 }
 0x676   : > { %v3716_v43 = vadd.f32 %v8018_v18, %v10247_v29  ;;  %v3807_v3 = vmax.f32 %v3705_v7, 0.0 }
 0x677   : > { %v3707_v31 = vpop.f32.mrf.mxu0 }
 0x678   : > { %v3708_v37 = vadd.f32 %v10247_v29, %v3707_v31  ;;  %v3810_v38 = vmax.f32 %v3716_v43, 0.0 }
 0x67a   : > { %v3808_v5 = vmax.f32 %v3708_v37, 0.0  ;;  %v3842_v57 = vpack.c.bf16 %v3810_v38, %v3809_v16 }
 0x67c   : > { %v3841_v10 = vpack.c.bf16 %v3808_v5, %v3807_v3 }
 0x67e   : > { %8053 = vmatprep.mubr.msk.bf16.mxu1 %vm2746_vm4, %v3841_v10 }
 0x67f   : > { %8054 = vmatmul.mubr.msk.bf16.gmra.mxu1 %vm2746_vm4, %v3842_v57 }
 0x681   : > { %v8021_v9 = vpop.f32.mrf.mxu0 }
 0x682   : > { %v3729_v6 = vadd.f32 %v8021_v9, %v10247_v29 }
 0x683   : > { %v3720_v40 = vpop.f32.mrf.mxu0 }
 0x684   : > { %v3721_v46 = vadd.f32 %v10247_v29, %v3720_v40  ;;  %v3813_v51 = vmax.f32 %v3729_v6, 0.0 }
 0x685   : > { %v8022_v33 = vpop.f32.mrf.mxu0 }
 0x686   : > { %v3732_v47 = vadd.f32 %v8022_v33, %v10247_v29  ;;  %v3811_v30 = vmax.f32 %v3721_v46, 0.0 }
 0x687   : > { %v3723_v22 = vpop.f32.mrf.mxu0 }
 0x688   : > { %v3724_v34 = vadd.f32 %v10247_v29, %v3723_v22  ;;  %v3814_v36 = vmax.f32 %v3732_v47, 0.0 }
 0x68a   : > { %v3812_v19 = vmax.f32 %v3724_v34, 0.0  ;;  %v3844_v21 = vpack.c.bf16 %v3814_v36, %v3813_v51  ;;  %v8256_v34 = vld [vmem:[%s11573_s19 + $0x188] ss:$28 sps:$4 sm:$0xff]   ;;  %v8273_v51 = vld [vmem:[%s11573_s19 + $0x194] ss:$28 sps:$4 sm:$0xff]  }
 0x68b   : > { %v8258_v36 = vld [vmem:[%s11573_s19 + $0x18c] ss:$28 sps:$4 sm:$0xff]   ;;  %5012 = vmatprep.subr.bf16.mxu0 %v8273_v51 }
 0x68c   : > { %v3843_v35 = vpack.c.bf16 %v3812_v19, %v3811_v30  ;;  %4819 = vmatprep.subr.bf16.mxu1 %v8258_v36  ;;  %v8259_v19 = vld [vmem:[%s11573_s19 + $0x150] ss:$28 sps:$4 sm:$0xff]  }
 0x68d   : > { %4820 = vmatpush1.bf16.msra.mxu1 %v8256_v34 }
 0x68e   : > { %8057 = vmatprep.mubr.msk.bf16.mxu1 %vm2746_vm4, %v3843_v35 }
 0x68f   : > { %8058 = vmatmul.mubr.msk.bf16.gmra.mxu1 %vm2746_vm4, %v3844_v21  ;;  %v8264_v21 = vld [vmem:[%s11573_s19 + $0x11c] ss:$28 sps:$4 sm:$0xff]  }
 0x691   : > { %v8025_v52 = vpop.f32.mrf.mxu0 }
 0x692   : > { %v3745_v48 = vadd.f32 %v8025_v52, %v10247_v29  ;;  %v10321_v52 = vld [vmem:[%s11570_s16] ss:$0 sm:$0xff] }
 0x693   : > { %v3736_v42 = vpop.f32.mrf.mxu0 }
 0x694   : > { %v3737_v28 = vadd.f32 %v10247_v29, %v3736_v42  ;;  %v3817_v62 = vmax.f32 %v3745_v48, 0.0 }
 0x695   : > { %v8026_v44 = vpop.f32.mrf.mxu0 }
 0x696   : > { %v3748_v55 = vadd.f32 %v8026_v44, %v10247_v29  ;;  %v3815_v59 = vmax.f32 %v3737_v28, 0.0 }
 0x697   : > { %v3739_v8 = vpop.f32.mrf.mxu0 }
 0x698   : > { %v3740_v50 = vadd.f32 %v10247_v29, %v3739_v8  ;;  %v3818_v54 = vmax.f32 %v3748_v55, 0.0  ;;  %v8262_v55 = vld [vmem:[%s11573_s19 + $0x118] ss:$28 sps:$4 sm:$0xff]  }
 0x69a   : > { %v3816_v61 = vmax.f32 %v3740_v50, 0.0  ;;  %v3846_v32 = vpack.c.bf16 %v3818_v54, %v3817_v62  ;;  %v8267_v50 = vld [vmem:[%s11573_s19 + $0xe4] ss:$28 sps:$4 sm:$0xff]  }
 0x69c   : > { %v3845_v39 = vpack.c.bf16 %v3816_v61, %v3815_v59 }
 0x69e   : > { %8061 = vmatprep.mubr.msk.bf16.mxu1 %vm2746_vm4, %v3845_v39  ;;  %v8265_v39 = vld [vmem:[%s11573_s19 + $0xe0] ss:$28 sps:$4 sm:$0xff]  }
 0x69f   : > { %8062 = vmatmul.mubr.msk.bf16.gmra.mxu1 %vm2746_vm4, %v3846_v32 }
 0x6a1   : > { %v8029_v1 = vpop.f32.mrf.mxu0 }
 0x6a2   : > { %v3761_v63 = vadd.f32 %v8029_v1, %v10247_v29  ;;  %v8270_v1 = vld [vmem:[%s11573_s19 + $0xac] ss:$28 sps:$4 sm:$0xff]  }
 0x6a3   : > { %v3752_v4 = vpop.f32.mrf.mxu0 }
 0x6a4   : > { %v3753_v41 = vadd.f32 %v10247_v29, %v3752_v4  ;;  %v3821_v58 = vmax.f32 %v3761_v63, 0.0  ;;  %v8268_v63 = vld [vmem:[%s11573_s19 + $0xa8] ss:$28 sps:$4 sm:$0xff]  }
 0x6a5   : > { %v8030_v14 = vpop.f32.mrf.mxu0 }
 0x6a6   : > { %v3764_v2 = vadd.f32 %v8030_v14, %v10247_v29  ;;  %v3819_v45 = vmax.f32 %v3753_v41, 0.0  ;;  %v8271_v14 = vld [vmem:[%s11573_s19 + $0x190] ss:$28 sps:$4 sm:$0xff]  }
 0x6a7   : > { %v3755_v11 = vpop.f32.mrf.mxu0 }
 0x6a8   : > { %v3756_v49 = vadd.f32 %v10247_v29, %v3755_v11  ;;  %v3822_v12 = vmax.f32 %v3764_v2, 0.0  ;;  %v8276_v2 = vld [vmem:[%s11573_s19 + $0x15c] ss:$28 sps:$4 sm:$0xff]   ;;  %v8279_v11 = vld [vmem:[%s11573_s19 + $0x74] ss:$28 sps:$4 sm:$0xff]  }
 0x6aa   : > { %v3820_v15 = vmax.f32 %v3756_v49, 0.0  ;;  %v3848_v25 = vpack.c.bf16 %v3822_v12, %v3821_v58  ;;  %v8274_v49 = vld [vmem:[%s11573_s19 + $0x158] ss:$28 sps:$4 sm:$0xff]  }
 0x6ac   : > { %v3847_v53 = vpack.c.bf16 %v3820_v15, %v3819_v45  ;;  %v8282_v45 = vld [vmem:[%s11573_s19 + $0x124] ss:$28 sps:$4 sm:$0xff]   ;;  %v8277_v15 = vld [vmem:[%s11573_s19 + $0x70] ss:$28 sps:$4 sm:$0xff]  }
 0x6ae   : > { %8065 = vmatprep.mubr.msk.bf16.mxu1 %vm2746_vm4, %v3847_v53  ;;  %v8288_v53 = vld [vmem:[%s11573_s19 + $0x3c] ss:$28 sps:$4 sm:$0xff]  }
 0x6af   : > { %8066 = vmatmul.mubr.msk.bf16.gmra.mxu1 %vm2746_vm4, %v3848_v25  ;;  %v8280_v25 = vld [vmem:[%s11573_s19 + $0x120] ss:$28 sps:$4 sm:$0xff]  }
 0x6b1   : > { %v8033_v13 = vpop.f32.mrf.mxu0 }
 0x6b2   : > { %v3777_v24 = vadd.f32 %v8033_v13, %v10247_v29 }
 0x6b3   : > { %v3768_v60 = vpop.f32.mrf.mxu0 }
 0x6b4   : > { %v3769_v27 = vadd.f32 %v10247_v29, %v3768_v60  ;;  %v3825_v43 = vmax.f32 %v3777_v24, 0.0  ;;  %v8285_v60 = vld [vmem:[%s11573_s19 + $0xec] ss:$28 sps:$4 sm:$0xff]  }
 0x6b5   : > { %v8034_v17 = vpop.f32.mrf.mxu0 }
 0x6b6   : > { %v3780_v23 = vadd.f32 %v8034_v17, %v10247_v29  ;;  %v3823_v18 = vmax.f32 %v3769_v27, 0.0 }
 0x6b7   : > { %v3771_v56 = vpop.f32.mrf.mxu0 }
 0x6b8   : > { %v3772_v0 = vadd.f32 %v10247_v29, %v3771_v56  ;;  %v3826_v20 = vmax.f32 %v3780_v23, 0.0  ;;  %v8286_v23 = vld [vmem:[%s11573_s19 + $0x38] ss:$28 sps:$4 sm:$0xff]  }
 0x6ba   : > { %v3824_v7 = vmax.f32 %v3772_v0, 0.0  ;;  %v3850_v31 = vpack.c.bf16 %v3826_v20, %v3825_v43  ;;  %v8283_v20 = vld [vmem:[%s11573_s19 + $0xe8] ss:$28 sps:$4 sm:$0xff]  }
 0x6bc   : > { %v3849_v26 = vpack.c.bf16 %v3824_v7, %v3823_v18  ;;  %v8291_v7 = vld [vmem:[%s11573_s19 + $0xb4] ss:$28 sps:$4 sm:$0xff]  }
 0x6be   : > { %8069 = vmatprep.mubr.msk.bf16.mxu1 %vm2746_vm4, %v3849_v26 }
 0x6bf   : > { %8070 = vmatmul.mubr.msk.bf16.gmra.mxu1 %vm2746_vm4, %v3850_v31 }
 0x6c1   : > { %v8037_v37 = vpop.f32.mrf.mxu0 }
 0x6c2   : > { %v3793_v10 = vadd.f32 %v8037_v37, %v10247_v29 }
 0x6c3   : > { %v3784_v38 = vpop.f32.mrf.mxu0 }
 0x6c4   : > { %v3785_v5 = vadd.f32 %v10247_v29, %v3784_v38  ;;  %v3829_v47 = vmax.f32 %v3793_v10, 0.0  ;;  %v8289_v38 = vld [vmem:[%s11573_s19 + $0xb0] ss:$28 sps:$4 sm:$0xff]  }
 0x6c5   : > { %v8038_v3 = vpop.f32.mrf.mxu0 }
 0x6c6   : > { %v3796_v16 = vadd.f32 %v8038_v3, %v10247_v29  ;;  %v3827_v33 = vmax.f32 %v3785_v5, 0.0 }
 0x6c7   : > { %v3787_v57 = vpop.f32.mrf.mxu0 }
 0x6c8   : > { %v3788_v9 = vadd.f32 %v10247_v29, %v3787_v57  ;;  %v3830_v40 = vmax.f32 %v3796_v16, 0.0  ;;  %v8261_v29 = vld [vmem:[%s11573_s19 + $0x154] ss:$28 sps:$4 sm:$0xff]  }
 0x6c9   : > { %4821 = vmatprep.subr.bf16.mxu1 %v8261_v29 }
 0x6ca   : > { %v3828_v46 = vmax.f32 %v3788_v9, 0.0  ;;  %v3852_v22 = vpack.c.bf16 %v3830_v40, %v3829_v47  ;;  %4822 = vmatpush1.bf16.msra.mxu1 %v8259_v19 }
 0x6cb   : > { %4823 = vmatprep.subr.bf16.mxu1 %v8264_v21 }
 0x6cc   : > { %v3851_v6 = vpack.c.bf16 %v3828_v46, %v3827_v33 }
 0x6ce   : > { %8073 = vmatprep.mubr.msk.bf16.mxu1 %vm2746_vm4, %v3851_v6  ;;  %4824 = vmatpush1.bf16.msra.mxu1 %v8262_v55 }
 0x6cf   : > { %8074 = vmatmul.mubr.msk.bf16.gmra.mxu1 %vm2746_vm4, %v3852_v22  ;;  %4825 = vmatprep.subr.bf16.mxu1 %v8267_v50 }
 0x6d2   : > { %4826 = vmatpush1.bf16.msra.mxu1 %v8265_v39 }
 0x6d3   : > { %4827 = vmatprep.subr.bf16.mxu1 %v8270_v1 }
 0x6d6   : > { %4828 = vmatpush1.bf16.msra.mxu1 %v8268_v63 }
 0x6d7   : > { %4829 = vmatprep.subr.bf16.mxu1 %v8279_v11 }
 0x6da   : > { %4830 = vmatpush1.bf16.msra.mxu1 %v8277_v15  ;;  %v8294_v15 = vld [vmem:[%s11573_s19 + $0x7c] ss:$28 sps:$4 sm:$0xff]  }
 0x6db   : > { %4831 = vmatprep.subr.bf16.mxu1 %v8288_v53 }
 0x6de   : > { %4832 = vmatpush1.bf16.msra.mxu1 %v8286_v23 }
 0x71f   : > { %v8047_v30 = vpop.f32.mrf.mxu1 }
 0x720   : > { %v3968_v48 = vadd.f32 %v8047_v30, %v10321_v52 }
 0x721   : > { %v3959_v35 = vpop.f32.mrf.mxu1 }
 0x722   : > { %v3960_v44 = vadd.f32 %v10321_v52, %v3959_v35  ;;  %v4088_v32 = vmax.f32 %v3968_v48, 0.0 }
 0x723   : > { %v8048_v42 = vpop.f32.mrf.mxu1 }
 0x724   : > { %v3971_v28 = vadd.f32 %v8048_v42, %v10321_v52  ;;  %v4086_v61 = vmax.f32 %v3960_v44, 0.0 }
 0x725   : > { %v3962_v8 = vpop.f32.mrf.mxu1 }
 0x726   : > { %v3963_v54 = vadd.f32 %v10321_v52, %v3962_v8  ;;  %v4089_v59 = vmax.f32 %v3971_v28, 0.0 }
 0x728   : > { %v4087_v62 = vmax.f32 %v3963_v54, 0.0  ;;  %v4128_v41 = vpack.c.bf16 %v4089_v59, %v4088_v32 }
 0x72a   : > { %v4127_v4 = vpack.c.bf16 %v4087_v62, %v4086_v61 }
 0x72c   : > { %8085 = vmatprep.mubr.msk.bf16.mxu0 %vm2461_vm2, %v4127_v4 }
 0x72d   : > { %8086 = vmatmul.mubr.msk.bf16.vlgmr.msra.gmra.mxu0 %vm2461_vm2, %v4128_v41 }
 0x72e   : > { %5013 = vmatpush1.bf16.msra.mxu0 %v8271_v14 }
 0x72f   : > { %v8051_v12 = vpop.f32.mrf.mxu1  ;;  %5014 = vmatprep.subr.bf16.mxu0 %v8276_v2 }
 0x730   : > { %v3984_v24 = vadd.f32 %v8051_v12, %v10321_v52 }
 0x731   : > { %v3975_v58 = vpop.f32.mrf.mxu1 }
 0x732   : > { %5015 = vmatpush1.bf16.msra.mxu0 %v8274_v49  ;;  %v3976_v17 = vadd.f32 %v10321_v52, %v3975_v58  ;;  %v4092_v31 = vmax.f32 %v3984_v24, 0.0  ;;  %v8292_v58 = vld [vmem:[%s11573_s19 + $0x78] ss:$28 sps:$4 sm:$0xff]  }
 0x733   : > { %v8052_v13 = vpop.f32.mrf.mxu1  ;;  %5016 = vmatprep.subr.bf16.mxu0 %v8282_v45 }
 0x734   : > { %v3987_v27 = vadd.f32 %v8052_v13, %v10321_v52  ;;  %v4090_v43 = vmax.f32 %v3976_v17, 0.0  ;;  %v8300_v13 = vld [vmem:[%s11573_s19 + $0x44] ss:$28 sps:$4 sm:$0xff]  }
 0x735   : > { %v3978_v56 = vpop.f32.mrf.mxu1 }
 0x736   : > { %v3979_v0 = vadd.f32 %v10321_v52, %v3978_v56  ;;  %5017 = vmatpush1.bf16.msra.mxu0 %v8280_v25  ;;  %v4093_v18 = vmax.f32 %v3987_v27, 0.0 }
 0x737   : > { %5018 = vmatprep.subr.bf16.mxu0 %v8285_v60  ;;  %v8298_v60 = vld [vmem:[%s11573_s19 + $0x40] ss:$28 sps:$4 sm:$0xff]  }
 0x738   : > { %v4091_v26 = vmax.f32 %v3979_v0, 0.0  ;;  %v4130_v3 = vpack.c.bf16 %v4093_v18, %v4092_v31  ;;  %v8297_v0 = vld [vmem:[%s11573_s19 + $0x4] ss:$28 sps:$4 sm:$0xff]  }
 0x739   : > { %4833 = vmatprep.subr.bf16.mxu1 %v8297_v0  ;;  %v8310_v0 = vld [vmem:[%s11573_s19 + $0x128] ss:$28 sps:$4 sm:$0xff]  }
 0x73a   : > { %v4129_v37 = vpack.c.bf16 %v4091_v26, %v4090_v43  ;;  %5019 = vmatpush1.bf16.msra.mxu0 %v8283_v20  ;;  %v8303_v20 = vld [vmem:[%s11573_s19 + $0xc] ss:$28 sps:$4 sm:$0xff]  }
 0x73b   : > { %5020 = vmatprep.subr.bf16.mxu0 %v8291_v7  ;;  %v8295_v7 = vld [vmem:[%s11573_s19] ss:$28 sps:$4 sm:$0xff]   ;;  %v8301_v43 = vld [vmem:[%s11573_s19 + $0x8] ss:$28 sps:$4 sm:$0xff]  }
 0x73c   : > { %8089 = vmatprep.mubr.msk.bf16.mxu0 %vm2461_vm2, %v4129_v37  ;;  %4834 = vmatpush1.bf16.msra.mxu1 %v8295_v7  ;;  %v8315_v7 = vld [vmem:[%s11573_s19 + $0xf4] ss:$28 sps:$4 sm:$0xff]  }
 0x73d   : > { %8090 = vmatmul.mubr.msk.bf16.gmra.mxu0 %vm2461_vm2, %v4130_v3  ;;  %v9242_v3 = vmov 0  }
 0x73e   : > { %5021 = vmatpush1.bf16.msra.mxu0 %v8289_v38  ;;  %4851 = vmatprep.mubr.bf16.mxu1 %v9242_v3 }
 0x73f   : > { %v8055_v5 = vpop.f32.mrf.mxu1  ;;  %5022 = vmatprep.subr.bf16.mxu0 %v8294_v15 }
 0x740   : > { %v4000_v40 = vadd.f32 %v8055_v5, %v10321_v52 }
 0x741   : > { %v3991_v16 = vpop.f32.mrf.mxu1 }
 0x742   : > { %v3992_v57 = vadd.f32 %v10321_v52, %v3991_v16  ;;  %v4096_v34 = vmax.f32 %v4000_v40, 0.0  ;;  %5023 = vmatpush1.bf16.msra.mxu0 %v8292_v58  ;;  %v8306_v16 = vld [vmem:[%s11573_s19 + $0x19c] ss:$28 sps:$4 sm:$0xff]   ;;  %v8309_v58 = vld [vmem:[%s11573_s19 + $0x164] ss:$28 sps:$4 sm:$0xff]  }
 0x743   : > { %v8056_v10 = vpop.f32.mrf.mxu1  ;;  %5024 = vmatprep.subr.bf16.mxu0 %v8300_v13  ;;  %5205 = vmatprep.subr.bf16.mxu1 %v8306_v16  ;;  %v8307_v13 = vld [vmem:[%s11573_s19 + $0x160] ss:$28 sps:$4 sm:$0xff]  }
 0x744   : > { %v4003_v9 = vadd.f32 %v8056_v10, %v10321_v52  ;;  %v4094_v6 = vmax.f32 %v3992_v57, 0.0 }
 0x745   : > { %v3994_v33 = vpop.f32.mrf.mxu1 }
 0x746   : > { %v3995_v46 = vadd.f32 %v10321_v52, %v3994_v33  ;;  %v4097_v47 = vmax.f32 %v4003_v9, 0.0  ;;  %5025 = vmatpush1.bf16.msra.mxu0 %v8298_v60 }
 0x747   : > { %5026 = vmatprep.subr.bf16.mxu0 %v8303_v20  ;;  %v8327_v20 = vld [vmem:[%s11573_s19 + $0x130] ss:$28 sps:$4 sm:$0xff]  }
 0x748   : > { %v4095_v22 = vmax.f32 %v3995_v46, 0.0  ;;  %v4132_v29 = vpack.c.bf16 %v4097_v47, %v4096_v34 }
 0x74a   : > { %v4131_v36 = vpack.c.bf16 %v4095_v22, %v4094_v6  ;;  %5027 = vmatpush1.bf16.msra.mxu0 %v8301_v43 }
 0x74c   : > { %8093 = vmatprep.mubr.msk.bf16.mxu0 %vm2461_vm2, %v4131_v36 }
 0x74d   : > { %8094 = vmatmul.mubr.msk.bf16.gmra.mxu0 %vm2461_vm2, %v4132_v29 }
 0x74f   : > { %v8059_v30 = vpop.f32.mrf.mxu1 }
 0x750   : > { %v4016_v42 = vadd.f32 %v8059_v30, %v10321_v52 }
 0x751   : > { %v4007_v19 = vpop.f32.mrf.mxu1 }
 0x752   : > { %v4008_v35 = vadd.f32 %v10321_v52, %v4007_v19  ;;  %v4100_v50 = vmax.f32 %v4016_v42, 0.0 }
 0x753   : > { %v8060_v51 = vpop.f32.mrf.mxu1 }
 0x754   : > { %v4019_v21 = vadd.f32 %v8060_v51, %v10321_v52  ;;  %v4098_v48 = vmax.f32 %v4008_v35, 0.0 }
 0x755   : > { %v4010_v44 = vpop.f32.mrf.mxu1 }
 0x756   : > { %v4011_v28 = vadd.f32 %v10321_v52, %v4010_v44  ;;  %v4101_v55 = vmax.f32 %v4019_v21, 0.0 }
 0x758   : > { %v4099_v8 = vmax.f32 %v4011_v28, 0.0  ;;  %v4134_v59 = vpack.c.bf16 %v4101_v55, %v4100_v50 }
 0x75a   : > { %v4133_v54 = vpack.c.bf16 %v4099_v8, %v4098_v48 }
 0x75c   : > { %8097 = vmatprep.mubr.msk.bf16.mxu0 %vm2461_vm2, %v4133_v54 }
 0x75d   : > { %8098 = vmatmul.mubr.msk.bf16.gmra.mxu0 %vm2461_vm2, %v4134_v59 }
 0x75f   : > { %v8063_v61 = vpop.f32.mrf.mxu1 }
 0x760   : > { %v4032_v4 = vadd.f32 %v8063_v61, %v10321_v52 }
 0x761   : > { %v4023_v62 = vpop.f32.mrf.mxu1 }
 0x762   : > { %v4024_v32 = vadd.f32 %v10321_v52, %v4023_v62  ;;  %v4104_v49 = vmax.f32 %v4032_v4, 0.0 }
 0x763   : > { %v8064_v39 = vpop.f32.mrf.mxu1 }
 0x764   : > { %v4035_v1 = vadd.f32 %v8064_v39, %v10321_v52  ;;  %v4102_v63 = vmax.f32 %v4024_v32, 0.0  ;;  %v8319_v32 = vld [vmem:[%s11573_s19 + $0x1a0] ss:$28 sps:$4 sm:$0xff]  }
 0x765   : > { %v4026_v14 = vpop.f32.mrf.mxu1  ;;  %8117 = vmatprep.subr.bf16.mxu0 %v8319_v32 }
 0x766   : > { %v4027_v41 = vadd.f32 %v10321_v52, %v4026_v14  ;;  %v4105_v2 = vmax.f32 %v4035_v1, 0.0 }
 0x768   : > { %v4103_v11 = vmax.f32 %v4027_v41, 0.0  ;;  %v4136_v45 = vpack.c.bf16 %v4105_v2, %v4104_v49 }
 0x76a   : > { %v4135_v12 = vpack.c.bf16 %v4103_v11, %v4102_v63 }
 0x76c   : > { %8101 = vmatprep.mubr.msk.bf16.mxu0 %vm2461_vm2, %v4135_v12  ;;  %v8304_v12 = vld [vmem:[%s11573_s19 + $0x198] ss:$28 sps:$4 sm:$0xff]  }
 0x76d   : > { %8102 = vmatmul.mubr.msk.bf16.gmra.mxu0 %vm2461_vm2, %v4136_v45 }
 0x76f   : > { %v8067_v53 = vpop.f32.mrf.mxu1 }
 0x770   : > { %v4048_v24 = vadd.f32 %v8067_v53, %v10321_v52 }
 0x771   : > { %v4039_v25 = vpop.f32.mrf.mxu1 }
 0x772   : > { %v4040_v27 = vadd.f32 %v10321_v52, %v4039_v25  ;;  %v4108_v38 = vmax.f32 %v4048_v24, 0.0  ;;  %v8323_v25 = vld [vmem:[%s11573_s19 + $0x168] ss:$28 sps:$4 sm:$0xff]  }
 0x773   : > { %v8068_v17 = vpop.f32.mrf.mxu1 }
 0x774   : > { %v4051_v23 = vadd.f32 %v8068_v17, %v10321_v52  ;;  %v4106_v31 = vmax.f32 %v4040_v27, 0.0  ;;  %v8312_v17 = vld [vmem:[%s11573_s19 + $0x12c] ss:$28 sps:$4 sm:$0xff]  }
 0x775   : > { %v4042_v56 = vpop.f32.mrf.mxu1 }
 0x776   : > { %v4043_v18 = vadd.f32 %v10321_v52, %v4042_v56  ;;  %v4109_v26 = vmax.f32 %v4051_v23, 0.0 }
 0x778   : > { %v4107_v37 = vmax.f32 %v4043_v18, 0.0  ;;  %v4138_v10 = vpack.c.bf16 %v4109_v26, %v4108_v38  ;;  %v8328_v26 = vld [vmem:[%s11573_s19 + $0xf8] ss:$28 sps:$4 sm:$0xff]   ;;  %v8313_v38 = vld [vmem:[%s11573_s19 + $0xf0] ss:$28 sps:$4 sm:$0xff]  }
 0x77a   : > { %v4137_v5 = vpack.c.bf16 %v4107_v37, %v4106_v31 }
 0x77c   : > { %8105 = vmatprep.mubr.msk.bf16.mxu0 %vm2461_vm2, %v4137_v5  ;;  %v8318_v5 = vld [vmem:[%s11573_s19 + $0xbc] ss:$28 sps:$4 sm:$0xff]  }
 0x77d   : > { %8106 = vmatmul.mubr.msk.bf16.gmra.mxu0 %vm2461_vm2, %v4138_v10 }
 0x77f   : > { %v8071_v57 = vpop.f32.mrf.mxu1 }
 0x780   : > { %v4064_v47 = vadd.f32 %v8071_v57, %v10321_v52 }
 0x781   : > { %v4055_v9 = vpop.f32.mrf.mxu1 }
 0x782   : > { %v4056_v33 = vadd.f32 %v10321_v52, %v4055_v9  ;;  %v4112_v30 = vmax.f32 %v4064_v47, 0.0 }
 0x783   : > { %v8072_v40 = vpop.f32.mrf.mxu1 }
 0x784   : > { %v4067_v46 = vadd.f32 %v8072_v40, %v10321_v52  ;;  %v4110_v36 = vmax.f32 %v4056_v33, 0.0  ;;  %v8316_v40 = vld [vmem:[%s11573_s19 + $0xb8] ss:$28 sps:$4 sm:$0xff]   ;;  %v8332_v33 = vld [vmem:[%s11573_s19 + $0xc0] ss:$28 sps:$4 sm:$0xff]  }
 0x785   : > { %v4058_v6 = vpop.f32.mrf.mxu1 }
 0x786   : > { %v4059_v22 = vadd.f32 %v10321_v52, %v4058_v6  ;;  %v4113_v34 = vmax.f32 %v4067_v46, 0.0  ;;  %v8322_v46 = vld [vmem:[%s11573_s19 + $0x84] ss:$28 sps:$4 sm:$0xff]  }
 0x787   : > { %v8333_v6 = vld [vmem:[%s11573_s19 + $0x88] ss:$28 sps:$4 sm:$0xff]  }
 0x788   : > { %v4111_v29 = vmax.f32 %v4059_v22, 0.0  ;;  %v4140_v51 = vpack.c.bf16 %v4113_v34, %v4112_v30  ;;  %v8320_v34 = vld [vmem:[%s11573_s19 + $0x80] ss:$28 sps:$4 sm:$0xff]  }
 0x78a   : > { %v4139_v19 = vpack.c.bf16 %v4111_v29, %v4110_v36  ;;  %v8326_v29 = vld [vmem:[%s11573_s19 + $0x4c] ss:$28 sps:$4 sm:$0xff]  }
 0x78c   : > { %8109 = vmatprep.mubr.msk.bf16.mxu0 %vm2461_vm2, %v4139_v19 }
 0x78d   : > { %8110 = vmatmul.mubr.msk.bf16.gmra.mxu0 %vm2461_vm2, %v4140_v51 }
 0x78f   : > { %v8075_v35 = vpop.f32.mrf.mxu1 }
 0x790   : > { %v4080_v55 = vadd.f32 %v8075_v35, %v10321_v52  ;;  %v8324_v35 = vld [vmem:[%s11573_s19 + $0x48] ss:$28 sps:$4 sm:$0xff]  }
 0x791   : > { %v4071_v21 = vpop.f32.mrf.mxu1 }
 0x792   : > { %v4072_v44 = vadd.f32 %v10321_v52, %v4071_v21  ;;  %v4116_v61 = vmax.f32 %v4080_v55, 0.0  ;;  %v8334_v21 = vld [vmem:[%s11573_s19 + $0x50] ss:$28 sps:$4 sm:$0xff]   ;;  %v8335_v55 = vld [vmem:[%s11573_s19 + $0x18] ss:$28 sps:$4 sm:$0xff]  }
 0x793   : > { %v8076_v42 = vpop.f32.mrf.mxu1 }
 0x794   : > { %v4083_v28 = vadd.f32 %v8076_v42, %v10321_v52  ;;  %v4114_v54 = vmax.f32 %v4072_v44, 0.0  ;;  %v8331_v44 = vld [vmem:[%s11573_s19 + $0x14] ss:$28 sps:$4 sm:$0xff]  }
 0x795   : > { %v4074_v48 = vpop.f32.mrf.mxu1 }
 0x796   : > { %v4075_v8 = vadd.f32 %v10321_v52, %v4074_v48  ;;  %v4117_v50 = vmax.f32 %v4083_v28, 0.0  ;;  %v10460_v52 = vld [vmem:[%s11572_s18] ss:$0 sm:$0xff] }
 0x798   : > { %v4115_v59 = vmax.f32 %v4075_v8, 0.0  ;;  %v4142_v39 = vpack.c.bf16 %v4117_v50, %v4116_v61  ;;  %v8329_v50 = vld [vmem:[%s11573_s19 + $0x10] ss:$28 sps:$4 sm:$0xff]  }
 0x79a   : > { %v4141_v62 = vpack.c.bf16 %v4115_v59, %v4114_v54 }
 0x79c   : > { %8113 = vmatprep.mubr.msk.bf16.mxu0 %vm2461_vm2, %v4141_v62 }
 0x79d   : > { %8114 = vmatmul.mubr.msk.bf16.gmra.mxu0 %vm2461_vm2, %v4142_v39 }
 0x79e   : > { %5044 = vmatprep.mubr.bf16.mxu0 %v9242_v3 }
 0x7ed   : > { %v8087_v1 = vpop.f32.mrf.mxu0 }
 0x7ee   : > { %v4264_v53 = vadd.f32 %v8087_v1, %v10460_v52 }
 0x7ef   : > { %v4255_v4 = vpop.f32.mrf.mxu0 }
 0x7f0   : > { %v4256_v41 = vadd.f32 %v10460_v52, %v4255_v4  ;;  %v4384_v23 = vmax.f32 %v4264_v53, 0.0 }
 0x7f1   : > { %v8088_v14 = vpop.f32.mrf.mxu0 }
 0x7f2   : > { %v4382_v11 = vmax.f32 %v4256_v41, 0.0  ;;  %v4267_v45 = vadd.f32 %v8088_v14, %v10460_v52 }
 0x7f3   : > { %v4258_v2 = vpop.f32.mrf.mxu0 }
 0x7f4   : > { %v4259_v63 = vadd.f32 %v10460_v52, %v4258_v2  ;;  %v4385_v60 = vmax.f32 %v4267_v45, 0.0 }
 0x7f6   : > { %v4383_v49 = vmax.f32 %v4259_v63, 0.0  ;;  %v10487_v56 = vpack.c.bf16 %v4385_v60, %v4384_v23 }
 0x7f8   : > { %v10468_v15 = vpack.c.bf16 %v4383_v49, %v4382_v11 }
 0x7fa   : > { %4852 = vmatmul.mubr.bf16.vlgmr.msra.gmra.mxu1 %v10468_v15  ;;  %5045 = vmatmul.mubr.bf16.vlgmr.msra.gmra.mxu0 %v10468_v15 }
 0x7fb   : > { %5206 = vmatpush1.bf16.msra.mxu1 %v8304_v12  ;;  %4861 = vmatprep.mubr.bf16.mxu1 %v9242_v3 }
 0x7fc   : > { %5054 = vmatprep.mubr.bf16.mxu0 %v9242_v3  ;;  %5207 = vmatprep.subr.bf16.mxu1 %v8309_v58 }
 0x7fd   : > { %v8091_v27 = vpop.f32.mrf.mxu0  ;;  %8118 = vmatpush3.bf16.msra.mxu0 %v8319_v32 }
 0x7fe   : > { %8119 = vmatprep.subr.bf16.mxu0 %v8323_v25  ;;  %v4280_v47 = vadd.f32 %v8091_v27, %v10460_v52 }
 0x7ff   : > { %v4271_v24 = vpop.f32.mrf.mxu0  ;;  %5208 = vmatpush1.bf16.msra.mxu1 %v8307_v13 }
 0x800   : > { %5209 = vmatprep.subr.bf16.mxu1 %v8312_v17  ;;  %v4272_v43 = vadd.f32 %v10460_v52, %v4271_v24  ;;  %v4388_v30 = vmax.f32 %v4280_v47, 0.0 }
 0x801   : > { %v8092_v18 = vpop.f32.mrf.mxu0  ;;  %8120 = vmatpush3.bf16.msra.mxu0 %v8323_v25 }
 0x802   : > { %4862 = vmatmul.mubr.bf16.gmra.mxu1 %v10487_v56  ;;  %5055 = vmatmul.mubr.bf16.gmra.mxu0 %v10487_v56  ;;  %v4386_v16 = vmax.f32 %v4272_v43, 0.0  ;;  %v4283_v57 = vadd.f32 %v8092_v18, %v10460_v52 }
 0x803   : > { %v4274_v31 = vpop.f32.mrf.mxu0  ;;  %4871 = vmatprep.mubr.bf16.mxu1 %v9242_v3  ;;  %5064 = vmatprep.mubr.bf16.mxu0 %v9242_v3 }
 0x804   : > { %v4275_v37 = vadd.f32 %v10460_v52, %v4274_v31  ;;  %5210 = vmatpush1.bf16.msra.mxu1 %v8310_v0  ;;  %8121 = vmatprep.subr.bf16.mxu0 %v8327_v20  ;;  %v4389_v22 = vmax.f32 %v4283_v57, 0.0 }
 0x805   : > { %5211 = vmatprep.subr.bf16.mxu1 %v8315_v7  ;;  %8122 = vmatpush3.bf16.msra.mxu0 %v8327_v20 }
 0x806   : > { %v4387_v10 = vmax.f32 %v4275_v37, 0.0  ;;  %8123 = vmatprep.subr.bf16.mxu0 %v8328_v26  ;;  %v10539_v51 = vpack.c.bf16 %v4389_v22, %v4388_v30 }
 0x808   : > { %v10514_v9 = vpack.c.bf16 %v4387_v10, %v4386_v16  ;;  %5212 = vmatpush1.bf16.msra.mxu1 %v8313_v38 }
 0x809   : > { %5213 = vmatprep.subr.bf16.mxu1 %v8318_v5  ;;  %8124 = vmatpush3.bf16.msra.mxu0 %v8328_v26 }
 0x80a   : > { %4872 = vmatmul.mubr.bf16.gmra.mxu1 %v10514_v9  ;;  %5065 = vmatmul.mubr.bf16.gmra.mxu0 %v10514_v9 }
 0x80b   : > { %4881 = vmatprep.mubr.bf16.mxu1 %v9242_v3  ;;  %5074 = vmatprep.mubr.bf16.mxu0 %v9242_v3 }
 0x80c   : > { %5214 = vmatpush1.bf16.msra.mxu1 %v8316_v40  ;;  %8125 = vmatprep.subr.bf16.mxu0 %v8332_v33 }
 0x80d   : > { %v8095_v36 = vpop.f32.mrf.mxu0  ;;  %5215 = vmatprep.subr.bf16.mxu1 %v8322_v46  ;;  %8126 = vmatpush3.bf16.msra.mxu0 %v8332_v33 }
 0x80e   : > { %8127 = vmatprep.subr.bf16.mxu0 %v8333_v6  ;;  %v4296_v39 = vadd.f32 %v8095_v36, %v10460_v52 }
 0x80f   : > { %v4287_v19 = vpop.f32.mrf.mxu0 }
 0x810   : > { %5216 = vmatpush1.bf16.msra.mxu1 %v8320_v34  ;;  %v4288_v28 = vadd.f32 %v10460_v52, %v4287_v19  ;;  %v4392_v4 = vmax.f32 %v4296_v39, 0.0 }
 0x811   : > { %v8096_v42 = vpop.f32.mrf.mxu0  ;;  %5217 = vmatprep.subr.bf16.mxu1 %v8326_v29  ;;  %8128 = vmatpush3.bf16.msra.mxu0 %v8333_v6 }
 0x812   : > { %4882 = vmatmul.mubr.bf16.gmra.mxu1 %v10539_v51  ;;  %5075 = vmatmul.mubr.bf16.gmra.mxu0 %v10539_v51  ;;  %v4390_v54 = vmax.f32 %v4288_v28, 0.0  ;;  %v4299_v61 = vadd.f32 %v8096_v42, %v10460_v52 }
 0x813   : > { %v4290_v48 = vpop.f32.mrf.mxu0  ;;  %4891 = vmatprep.mubr.bf16.mxu1 %v9242_v3  ;;  %5084 = vmatprep.mubr.bf16.mxu0 %v9242_v3 }
 0x814   : > { %v4291_v8 = vadd.f32 %v10460_v52, %v4290_v48  ;;  %5218 = vmatpush1.bf16.msra.mxu1 %v8324_v35  ;;  %8129 = vmatprep.subr.bf16.mxu0 %v8334_v21  ;;  %v4393_v32 = vmax.f32 %v4299_v61, 0.0 }
 0x815   : > { %5219 = vmatprep.subr.bf16.mxu1 %v8331_v44  ;;  %8130 = vmatpush3.bf16.msra.mxu0 %v8334_v21 }
 0x816   : > { %v4391_v59 = vmax.f32 %v4291_v8, 0.0  ;;  %8131 = vmatprep.subr.bf16.mxu0 %v8335_v55  ;;  %v10570_v41 = vpack.c.bf16 %v4393_v32, %v4392_v4 }
 0x818   : > { %v10563_v62 = vpack.c.bf16 %v4391_v59, %v4390_v54  ;;  %5220 = vmatpush1.bf16.msra.mxu1 %v8329_v50 }
 0x819   : > { %8132 = vmatpush3.bf16.msra.mxu0 %v8335_v55 }
 0x81a   : > { %4892 = vmatmul.mubr.bf16.gmra.mxu1 %v10563_v62  ;;  %5085 = vmatmul.mubr.bf16.gmra.mxu0 %v10563_v62 }
 0x81b   : > { %4901 = vmatprep.mubr.bf16.mxu1 %v9242_v3  ;;  %5094 = vmatprep.mubr.bf16.mxu0 %v9242_v3 }
 0x81d   : > { %v8099_v1 = vpop.f32.mrf.mxu0 }
 0x81e   : > { %v4312_v25 = vadd.f32 %v8099_v1, %v10460_v52 }
 0x81f   : > { %v4303_v14 = vpop.f32.mrf.mxu0 }
 0x820   : > { %v4304_v63 = vadd.f32 %v10460_v52, %v4303_v14  ;;  %v4396_v17 = vmax.f32 %v4312_v25, 0.0 }
 0x821   : > { %v8100_v2 = vpop.f32.mrf.mxu0 }
 0x822   : > { %4902 = vmatmul.mubr.bf16.gmra.mxu1 %v10570_v41  ;;  %5095 = vmatmul.mubr.bf16.gmra.mxu0 %v10570_v41  ;;  %v4394_v12 = vmax.f32 %v4304_v63, 0.0  ;;  %v4315_v58 = vadd.f32 %v8100_v2, %v10460_v52 }
 0x823   : > { %v4306_v11 = vpop.f32.mrf.mxu0  ;;  %4911 = vmatprep.mubr.bf16.mxu1 %v9242_v3  ;;  %5104 = vmatprep.mubr.bf16.mxu0 %v9242_v3 }
 0x824   : > { %v4307_v49 = vadd.f32 %v10460_v52, %v4306_v11  ;;  %v4397_v13 = vmax.f32 %v4315_v58, 0.0 }
 0x826   : > { %v4395_v45 = vmax.f32 %v4307_v49, 0.0  ;;  %v10586_v23 = vpack.c.bf16 %v4397_v13, %v4396_v17 }
 0x828   : > { %v10579_v53 = vpack.c.bf16 %v4395_v45, %v4394_v12 }
 0x82a   : > { %4912 = vmatmul.mubr.bf16.gmra.mxu1 %v10579_v53  ;;  %5105 = vmatmul.mubr.bf16.gmra.mxu0 %v10579_v53 }
 0x82b   : > { %4921 = vmatprep.mubr.bf16.mxu1 %v9242_v3  ;;  %5114 = vmatprep.mubr.bf16.mxu0 %v9242_v3 }
 0x82d   : > { %v8103_v60 = vpop.f32.mrf.mxu0 }
 0x82e   : > { %v4328_v37 = vadd.f32 %v8103_v60, %v10460_v52 }
 0x82f   : > { %v4319_v27 = vpop.f32.mrf.mxu0 }
 0x830   : > { %v4320_v0 = vadd.f32 %v10460_v52, %v4319_v27  ;;  %v4400_v16 = vmax.f32 %v4328_v37, 0.0 }
 0x831   : > { %v8104_v24 = vpop.f32.mrf.mxu0 }
 0x832   : > { %4922 = vmatmul.mubr.bf16.gmra.mxu1 %v10586_v23  ;;  %5115 = vmatmul.mubr.bf16.gmra.mxu0 %v10586_v23  ;;  %v4398_v7 = vmax.f32 %v4320_v0, 0.0  ;;  %v4331_v26 = vadd.f32 %v8104_v24, %v10460_v52 }
 0x833   : > { %v4322_v20 = vpop.f32.mrf.mxu0  ;;  %4931 = vmatprep.mubr.bf16.mxu1 %v9242_v3  ;;  %5124 = vmatprep.mubr.bf16.mxu0 %v9242_v3 }
 0x834   : > { %v4323_v18 = vadd.f32 %v10460_v52, %v4322_v20  ;;  %v4401_v38 = vmax.f32 %v4331_v26, 0.0 }
 0x836   : > { %v4399_v43 = vmax.f32 %v4323_v18, 0.0  ;;  %v10602_v57 = vpack.c.bf16 %v4401_v38, %v4400_v16 }
 0x838   : > { %v10595_v31 = vpack.c.bf16 %v4399_v43, %v4398_v7 }
 0x83a   : > { %4932 = vmatmul.mubr.bf16.gmra.mxu1 %v10595_v31  ;;  %5125 = vmatmul.mubr.bf16.gmra.mxu0 %v10595_v31 }
 0x83b   : > { %4941 = vmatprep.mubr.bf16.mxu1 %v9242_v3  ;;  %5134 = vmatprep.mubr.bf16.mxu0 %v9242_v3 }
 0x83d   : > { %v8107_v5 = vpop.f32.mrf.mxu0 }
 0x83e   : > { %v4344_v29 = vadd.f32 %v8107_v5, %v10460_v52 }
 0x83f   : > { %v4335_v10 = vpop.f32.mrf.mxu0 }
 0x840   : > { %v4336_v33 = vadd.f32 %v10460_v52, %v4335_v10  ;;  %v4404_v35 = vmax.f32 %v4344_v29, 0.0 }
 0x841   : > { %v8108_v40 = vpop.f32.mrf.mxu0 }
 0x842   : > { %4942 = vmatmul.mubr.bf16.gmra.mxu1 %v10602_v57  ;;  %5135 = vmatmul.mubr.bf16.gmra.mxu0 %v10602_v57  ;;  %v4402_v6 = vmax.f32 %v4336_v33, 0.0  ;;  %v4347_v34 = vadd.f32 %v8108_v40, %v10460_v52 }
 0x843   : > { %v4338_v46 = vpop.f32.mrf.mxu0  ;;  %4951 = vmatprep.mubr.bf16.mxu1 %v9242_v3  ;;  %5144 = vmatprep.mubr.bf16.mxu0 %v9242_v3 }
 0x844   : > { %v4339_v47 = vadd.f32 %v10460_v52, %v4338_v46  ;;  %v4405_v30 = vmax.f32 %v4347_v34, 0.0 }
 0x846   : > { %v4403_v22 = vmax.f32 %v4339_v47, 0.0  ;;  %v10618_v42 = vpack.c.bf16 %v4405_v30, %v4404_v35 }
 0x848   : > { %v10611_v36 = vpack.c.bf16 %v4403_v22, %v4402_v6 }
 0x84a   : > { %4952 = vmatmul.mubr.bf16.gmra.mxu1 %v10611_v36  ;;  %5145 = vmatmul.mubr.bf16.gmra.mxu0 %v10611_v36 }
 0x84b   : > { %4961 = vmatprep.mubr.bf16.mxu1 %v9242_v3  ;;  %5154 = vmatprep.mubr.bf16.mxu0 %v9242_v3 }
 0x84d   : > { %v8111_v19 = vpop.f32.mrf.mxu0 }
 0x84e   : > { %v4360_v61 = vadd.f32 %v8111_v19, %v10460_v52 }
 0x84f   : > { %v4351_v21 = vpop.f32.mrf.mxu0 }
 0x850   : > { %v4352_v28 = vadd.f32 %v10460_v52, %v4351_v21  ;;  %v4408_v1 = vmax.f32 %v4360_v61, 0.0 }
 0x851   : > { %v8112_v44 = vpop.f32.mrf.mxu0 }
 0x852   : > { %4962 = vmatmul.mubr.bf16.gmra.mxu1 %v10618_v42  ;;  %5155 = vmatmul.mubr.bf16.gmra.mxu0 %v10618_v42  ;;  %v4406_v8 = vmax.f32 %v4352_v28, 0.0  ;;  %v4363_v54 = vadd.f32 %v8112_v44, %v10460_v52 }
 0x853   : > { %v4354_v55 = vpop.f32.mrf.mxu0  ;;  %4971 = vmatprep.mubr.bf16.mxu1 %v9242_v3  ;;  %5164 = vmatprep.mubr.bf16.mxu0 %v9242_v3 }
 0x854   : > { %v4355_v48 = vadd.f32 %v10460_v52, %v4354_v55  ;;  %v4409_v39 = vmax.f32 %v4363_v54, 0.0 }
 0x856   : > { %v4407_v50 = vmax.f32 %v4355_v48, 0.0  ;;  %v10634_v14 = vpack.c.bf16 %v4409_v39, %v4408_v1 }
 0x858   : > { %v10627_v59 = vpack.c.bf16 %v4407_v50, %v4406_v8 }
 0x85a   : > { %4972 = vmatmul.mubr.bf16.gmra.mxu1 %v10627_v59  ;;  %5165 = vmatmul.mubr.bf16.gmra.mxu0 %v10627_v59 }
 0x85b   : > { %4981 = vmatprep.mubr.bf16.mxu1 %v9242_v3  ;;  %5174 = vmatprep.mubr.bf16.mxu0 %v9242_v3 }
 0x85d   : > { %v8115_v32 = vpop.f32.mrf.mxu0 }
 0x85e   : > { %v4376_v13 = vadd.f32 %v8115_v32, %v10460_v52 }
 0x85f   : > { %v4367_v4 = vpop.f32.mrf.mxu0 }
 0x860   : > { %v4368_v63 = vadd.f32 %v10460_v52, %v4367_v4  ;;  %v4412_v17 = vmax.f32 %v4376_v13, 0.0 }
 0x861   : > { %v8116_v2 = vpop.f32.mrf.mxu0 }
 0x862   : > { %4982 = vmatmul.mubr.bf16.gmra.mxu1 %v10634_v14  ;;  %5175 = vmatmul.mubr.bf16.gmra.mxu0 %v10634_v14  ;;  %v4410_v12 = vmax.f32 %v4368_v63, 0.0  ;;  %v4379_v58 = vadd.f32 %v8116_v2, %v10460_v52 }
 0x863   : > { %v4370_v11 = vpop.f32.mrf.mxu0  ;;  %4991 = vmatprep.mubr.bf16.mxu1 %v9242_v3  ;;  %5184 = vmatprep.mubr.bf16.mxu0 %v9242_v3 }
 0x864   : > { %v4371_v49 = vadd.f32 %v10460_v52, %v4370_v11  ;;  %v4413_v60 = vmax.f32 %v4379_v58, 0.0  ;;  %v4496_v52 = vlaneseq }
 0x866   : > { %v4411_v45 = vmax.f32 %v4371_v49, 0.0  ;;  %v10650_v27 = vpack.c.bf16 %v4413_v60, %v4412_v17 }
 0x868   : > { %v10643_v25 = vpack.c.bf16 %v4411_v45, %v4410_v12 }
 0x86a   : > { %4992 = vmatmul.mubr.bf16.gmra.mxu1 %v10643_v25  ;;  %5185 = vmatmul.mubr.bf16.gmra.mxu0 %v10643_v25 }
 0x86b   : > { %5001 = vmatprep.mubr.bf16.mxu1 %v9242_v3  ;;  %5194 = vmatprep.mubr.bf16.mxu0 %v9242_v3 }
 0x872   : > { %5002 = vmatmul.mubr.bf16.gmra.mxu1 %v10650_v27  ;;  %5195 = vmatmul.mubr.bf16.gmra.mxu0 %v10650_v27 }
 0x873   : > { %8133 = vmatprep.mubr.bf16.mxu0 %v10468_v15  ;;  %5237 = vmatprep.mubr.bf16.mxu1 %v9242_v3 }
 0x87a   : > { %5238 = vmatmul.mubr.bf16.vlgmr.msra.gmra.mxu1 %v10468_v15  ;;  %8134 = vmatmul.mubr.bf16.vlgmr.msra.gmra.mxu0 %v10487_v56  ;;  %v10684_v15 = vshrl.u32 %v4496_v52, 7 }
 0x87b   : > { %8137 = vmatprep.mubr.bf16.mxu0 %v10514_v9  ;;  %5247 = vmatprep.mubr.bf16.mxu1 %v9242_v3 }
 0x882   : > { %5248 = vmatmul.mubr.bf16.gmra.mxu1 %v10487_v56  ;;  %8138 = vmatmul.mubr.bf16.gmra.mxu0 %v10539_v51  ;;  %v4498_v56 = vsub.s32 0, %v10684_v15 }
 0x883   : > { %8141 = vmatprep.mubr.bf16.mxu0 %v10563_v62  ;;  %5257 = vmatprep.mubr.bf16.mxu1 %v9242_v3 }
 0x88a   : > { %5258 = vmatmul.mubr.bf16.gmra.mxu1 %v10514_v9  ;;  %8142 = vmatmul.mubr.bf16.gmra.mxu0 %v10570_v41  ;;  %v4506_v9 = vsub.s32 2, %v10684_v15 }
 0x88b   : > { %8145 = vmatprep.mubr.bf16.mxu0 %v10579_v53  ;;  %5267 = vmatprep.mubr.bf16.mxu1 %v9242_v3 }
 0x892   : > { %5268 = vmatmul.mubr.bf16.gmra.mxu1 %v10539_v51  ;;  %8146 = vmatmul.mubr.bf16.gmra.mxu0 %v10586_v23  ;;  %v4478_v51 = vld [vmem:[%s11574_s20] sm:$0x7f] }
 0x893   : > { %8149 = vmatprep.mubr.bf16.mxu0 %v10595_v31  ;;  %5277 = vmatprep.mubr.bf16.mxu1 %v9242_v3  ;;  %v10698_v24 = vrot.slane %v4478_v51, %v4506_v9 }
 0x89a   : > { %5278 = vmatmul.mubr.bf16.gmra.mxu1 %v10563_v62  ;;  %8150 = vmatmul.mubr.bf16.gmra.mxu0 %v10602_v57  ;;  %v4502_v62 = vsub.s32 1, %v10684_v15 }
 0x89b   : > { %8153 = vmatprep.mubr.bf16.mxu0 %v10611_v36  ;;  %5287 = vmatprep.mubr.bf16.mxu1 %v9242_v3 }
 0x8a2   : > { %5288 = vmatmul.mubr.bf16.gmra.mxu1 %v10570_v41  ;;  %8154 = vmatmul.mubr.bf16.gmra.mxu0 %v10618_v42  ;;  %v4510_v41 = vsub.s32 3, %v10684_v15 }
 0x8a3   : > { %8157 = vmatprep.mubr.bf16.mxu0 %v10627_v59  ;;  %5297 = vmatprep.mubr.bf16.mxu1 %v9242_v3 }
 0x8a4   : > { %v10702_v0 = vrot.slane %v4478_v51, %v4510_v41 }
 0x8aa   : > { %5298 = vmatmul.mubr.bf16.gmra.mxu1 %v10579_v53  ;;  %8158 = vmatmul.mubr.bf16.gmra.mxu0 %v10634_v14  ;;  %v10696_v53 = vrot.slane %v4478_v51, %v4498_v56 }
 0x8ab   : > { %8161 = vmatprep.mubr.bf16.mxu0 %v10643_v25  ;;  %5307 = vmatprep.mubr.bf16.mxu1 %v9242_v3 }
 0x8b2   : > { %5308 = vmatmul.mubr.bf16.gmra.mxu1 %v10586_v23  ;;  %8162 = vmatmul.mubr.bf16.gmra.mxu0 %v10650_v27  ;;  %v10700_v23 = vrot.slane %v4478_v51, %v4502_v62 }
 0x8b3   : > { %5317 = vmatprep.mubr.bf16.mxu1 %v9242_v3 }
 0x8ba   : > { %v4853_v20 = vpop.f32.mrf.mxu1  ;;  %v5046_v18 = vpop.f32.mrf.mxu0  ;;  %5318 = vmatmul.mubr.bf16.gmra.mxu1 %v10595_v31 }
 0x8bb   : > { %v4854_v7 = vadd.f32 %v4853_v20, %v10696_v53  ;;  %v5047_v43 = vadd.f32 %v5046_v18, %v10698_v24  ;;  %5327 = vmatprep.mubr.bf16.mxu1 %v9242_v3 }
 0x8bc   : > { %v4855_v26 = vpop.f32.mrf.mxu1  ;;  %v5048_v37 = vpop.f32.mrf.mxu0 }
 0x8bd   : > { %v5559_v38 = vsub.f32 0.0, %v4854_v7  ;;  %v5561_v5 = vsub.f32 0.0, %v5047_v43  ;;  %v4856_v16 = vadd.f32 %v4855_v26, %v10700_v23  ;;  %v5049_v10 = vadd.f32 %v5048_v37, %v10702_v0 }
 0x8be   : > { %v4857_v40 = vpop.f32.mrf.mxu1  ;;  %v5050_v33 = vpop.f32.mrf.mxu0 }
 0x8bf   : > { %v5783_v46 = vmul.f32 1.442695, %v5559_v38  ;;  %v5787_v47 = vmul.f32 1.442695, %v5561_v5  ;;  %v5560_v6 = vsub.f32 0.0, %v4856_v16  ;;  %v5562_v31 = vsub.f32 0.0, %v5049_v10 }
 0x8c0   : > { %v4858_v22 = vadd.f32 %v4857_v40, %v10696_v53  ;;  %v5051_v34 = vadd.f32 %v5050_v33, %v10698_v24  ;;  %v4859_v29 = vpop.f32.mrf.mxu1  ;;  %v5052_v30 = vpop.f32.mrf.mxu0 }
 0x8c1   : > { %8336 = vpow2.f32 %v5783_v46  ;;  %v5785_v19 = vmul.f32 1.442695, %v5560_v6  ;;  %v5789_v35 = vmul.f32 1.442695, %v5562_v31  ;;  %v4860_v21 = vadd.f32 %v4859_v29, %v10700_v23 }
 0x8c2   : > { %8338 = vpow2.f32 %v5787_v47  ;;  %v5566_v44 = vsub.f32 0.0, %v4858_v22  ;;  %v5568_v28 = vsub.f32 0.0, %v5051_v34  ;;  %v5053_v55 = vadd.f32 %v5052_v30, %v10702_v0  ;;  %v4863_v48 = vpop.f32.mrf.mxu1  ;;  %v5056_v8 = vpop.f32.mrf.mxu0  ;;  %5328 = vmatmul.mubr.bf16.gmra.mxu1 %v10602_v57 }
 0x8c3   : > { %8340 = vpow2.f32 %v5785_v19  ;;  %v5567_v50 = vsub.f32 0.0, %v4860_v21  ;;  %v4864_v54 = vadd.f32 %v4863_v48, %v10696_v53  ;;  %v5057_v61 = vadd.f32 %v5056_v8, %v10698_v24  ;;  %5337 = vmatprep.mubr.bf16.mxu1 %v9242_v3 }
 0x8c4   : > { %8342 = vpow2.f32 %v5789_v35  ;;  %v5797_v39 = vmul.f32 1.442695, %v5566_v44  ;;  %v5801_v32 = vmul.f32 1.442695, %v5568_v28  ;;  %v5569_v1 = vsub.f32 0.0, %v5053_v55  ;;  %v4865_v4 = vpop.f32.mrf.mxu1  ;;  %v5058_v2 = vpop.f32.mrf.mxu0 }
 0x8c5   : > { %v5799_v63 = vmul.f32 1.442695, %v5567_v50  ;;  %v5573_v11 = vsub.f32 0.0, %v4864_v54  ;;  %v5575_v49 = vsub.f32 0.0, %v5057_v61  ;;  %v4866_v12 = vadd.f32 %v4865_v4, %v10700_v23 }
 0x8c6   : > { %8344 = vpow2.f32 %v5797_v39  ;;  %v5803_v57 = vmul.f32 1.442695, %v5569_v1  ;;  %v5059_v45 = vadd.f32 %v5058_v2, %v10702_v0  ;;  %v4867_v58 = vpop.f32.mrf.mxu1  ;;  %v5060_v13 = vpop.f32.mrf.mxu0 }
 0x8c7   : > { %8346 = vpow2.f32 %v5801_v32  ;;  %v5811_v60 = vmul.f32 1.442695, %v5573_v11  ;;  %v5815_v17 = vmul.f32 1.442695, %v5575_v49  ;;  %v5574_v52 = vsub.f32 0.0, %v4866_v12 }
 0x8c8   : > { %8348 = vpow2.f32 %v5799_v63  ;;  %v5576_v56 = vsub.f32 0.0, %v5059_v45  ;;  %v4868_v9 = vadd.f32 %v4867_v58, %v10696_v53  ;;  %v5061_v51 = vadd.f32 %v5060_v13, %v10698_v24  ;;  %v4869_v62 = vpop.f32.mrf.mxu1  ;;  %v5062_v41 = vpop.f32.mrf.mxu0 }
 0x8c9   : > { %8350 = vpow2.f32 %v5803_v57  ;;  %v5813_v20 = vmul.f32 1.442695, %v5574_v52  ;;  %v4870_v18 = vadd.f32 %v4869_v62, %v10700_v23  ;;  %v5063_v7 = vadd.f32 %v5062_v41, %v10702_v0 }
 0x8ca   : > { %8352 = vpow2.f32 %v5811_v60  ;;  %v5817_v43 = vmul.f32 1.442695, %v5576_v56  ;;  %v5580_v26 = vsub.f32 0.0, %v4868_v9  ;;  %v5582_v37 = vsub.f32 0.0, %v5061_v51  ;;  %v4873_v38 = vpop.f32.mrf.mxu1  ;;  %v5066_v5 = vpop.f32.mrf.mxu0  ;;  %5338 = vmatmul.mubr.bf16.gmra.mxu1 %v10611_v36 }
 0x8cb   : > { %8354 = vpow2.f32 %v5815_v17  ;;  %v5581_v16 = vsub.f32 0.0, %v4870_v18  ;;  %5347 = vmatprep.mubr.bf16.mxu1 %v9242_v3  ;;  %v5583_v6 = vsub.f32 0.0, %v5063_v7  ;;  %v4874_v48 = vadd.f32 %v4873_v38, %v10696_v53 }
 0x8cc   : > { %8356 = vpow2.f32 %v5813_v20  ;;  %v5825_v10 = vmul.f32 1.442695, %v5580_v26  ;;  %v5829_v40 = vmul.f32 1.442695, %v5582_v37  ;;  %v4875_v33 = vpop.f32.mrf.mxu1  ;;  %v5068_v46 = vpop.f32.mrf.mxu0  ;;  %v5067_v54 = vadd.f32 %v5066_v5, %v10698_v24 }
 0x8cd   : > { %8358 = vpow2.f32 %v5817_v43  ;;  %v5827_v47 = vmul.f32 1.442695, %v5581_v16  ;;  %v5831_v28 = vmul.f32 1.442695, %v5583_v6  ;;  %v5587_v49 = vsub.f32 0.0, %v4874_v48 }
 0x8ce   : > { %v8337_v31 = vpop.eup %8336  ;;  %8360 = vpow2.f32 %v5825_v10  ;;  %v4877_v22 = vpop.f32.mrf.mxu1  ;;  %v5589_v45 = vsub.f32 0.0, %v5067_v54  ;;  %v4876_v58 = vadd.f32 %v4875_v33, %v10700_v23  ;;  %v5069_v17 = vadd.f32 %v5068_v46, %v10702_v0 }
 0x8cf   : > { %v8339_v34 = vpop.eup %8338  ;;  %v6231_v29 = vadd.f32 1.0, %v8337_v31  ;;  %8362 = vpow2.f32 %v5829_v40  ;;  %v5070_v19 = vpop.f32.mrf.mxu0  ;;  %v4878_v62 = vadd.f32 %v4877_v22, %v10696_v53  ;;  %v5839_v18 = vmul.f32 1.442695, %v5587_v49 }
 0x8d0   : > { %v8341_v30 = vpop.eup %8340  ;;  %v6233_v36 = vadd.f32 1.0, %v8339_v34  ;;  %8364 = vpow2.f32 %v5827_v47  ;;  %v4879_v35 = vpop.f32.mrf.mxu1  ;;  %v5071_v7 = vadd.f32 %v5070_v19, %v10698_v24  ;;  %v5843_v38 = vmul.f32 1.442695, %v5589_v45 }
 0x8d1   : > { %v8343_v21 = vpop.eup %8342  ;;  %8366 = vrcp.f32 %v6231_v29  ;;  %v6232_v44 = vadd.f32 1.0, %v8341_v30  ;;  %v5072_v32 = vpop.f32.mrf.mxu0  ;;  %v5588_v5 = vsub.f32 0.0, %v4876_v58  ;;  %v5590_v40 = vsub.f32 0.0, %v5069_v17 }
 0x8d2   : > { %8368 = vrcp.f32 %v6233_v36  ;;  %v6234_v55 = vadd.f32 1.0, %v8343_v21  ;;  %v10727_v8 = vpop.f32.mrf.mxu1  ;;  %5348 = vmatmul.mubr.bf16.gmra.mxu1 %v10618_v42  ;;  %v5594_v31 = vsub.f32 0.0, %v4878_v62  ;;  %v5073_v22 = vadd.f32 %v5072_v32, %v10702_v0 }
 0x8d3   : > { %v8345_v50 = vpop.eup %8344  ;;  %8370 = vrcp.f32 %v6232_v44  ;;  %5357 = vmatprep.mubr.bf16.mxu1 %v9242_v3  ;;  %v5076_v52 = vpop.f32.mrf.mxu0  ;;  %v5596_v30 = vsub.f32 0.0, %v5071_v7  ;;  %v4884_v36 = vadd.f32 %v10727_v8, %v10696_v53  ;;  %v5841_v21 = vmul.f32 1.442695, %v5588_v5 }
 0x8d4   : > { %v8347_v61 = vpop.eup %8346  ;;  %8372 = vrcp.f32 %v6234_v55  ;;  %v6238_v39 = vadd.f32 1.0, %v8345_v50  ;;  %v10732_v1 = vpop.f32.mrf.mxu1  ;;  %v5077_v44 = vadd.f32 %v5076_v52, %v10698_v24  ;;  %v5845_v55 = vmul.f32 1.442695, %v5590_v40 }
 0x8d5   : > { %v8349_v4 = vpop.eup %8348  ;;  %v6240_v2 = vadd.f32 1.0, %v8347_v61  ;;  %8374 = vpow2.f32 %v5831_v28  ;;  %v5078_v33 = vpop.f32.mrf.mxu0  ;;  %v4886_v50 = vadd.f32 %v10732_v1, %v10700_v23  ;;  %v5597_v32 = vsub.f32 0.0, %v5073_v22 }
 0x8d6   : > { %v8351_v63 = vpop.eup %8350  ;;  %8376 = vrcp.f32 %v6238_v39  ;;  %v6239_v11 = vadd.f32 1.0, %v8349_v4  ;;  %v10734_v42 = vpop.f32.mrf.mxu1  ;;  %v5853_v39 = vmul.f32 1.442695, %v5594_v31  ;;  %v5079_v4 = vadd.f32 %v5078_v33, %v10702_v0 }
 0x8d7   : > { %v8353_v12 = vpop.eup %8352  ;;  %8378 = vrcp.f32 %v6240_v2  ;;  %v6241_v57 = vadd.f32 1.0, %v8351_v63  ;;  %v5080_v54 = vpop.f32.mrf.mxu0  ;;  %v5857_v63 = vmul.f32 1.442695, %v5596_v30  ;;  %v4888_v49 = vadd.f32 %v10734_v42, %v10696_v53 }
 0x8d8   : > { %v8355_v13 = vpop.eup %8354  ;;  %8380 = vrcp.f32 %v6239_v11  ;;  %v6245_v60 = vadd.f32 1.0, %v8353_v12  ;;  %v10738_v56 = vpop.f32.mrf.mxu1  ;;  %v5601_v11 = vsub.f32 0.0, %v4884_v36  ;;  %v5603_v45 = vsub.f32 0.0, %v5077_v44 }
 0x8d9   : > { %v8357_v9 = vpop.eup %8356  ;;  %8382 = vrcp.f32 %v6241_v57  ;;  %v6247_v51 = vadd.f32 1.0, %v8355_v13  ;;  %v5081_v58 = vadd.f32 %v5080_v54, %v10698_v24  ;;  %v5602_v17 = vsub.f32 0.0, %v4886_v50 }
 0x8da   : > { %v8359_v41 = vpop.eup %8358  ;;  %8384 = vrcp.f32 %v6245_v60  ;;  %v6246_v20 = vadd.f32 1.0, %v8357_v9  ;;  %v10742_v43 = vpop.f32.mrf.mxu1  ;;  %5358 = vmatmul.mubr.bf16.gmra.mxu1 %v10627_v59  ;;  %v4880_v59 = vadd.f32 %v4879_v35, %v10700_v23  ;;  %v4890_v42 = vadd.f32 %v10738_v56, %v10700_v23 }
 0x8db   : > { %v8361_v26 = vpop.eup %8360  ;;  %8386 = vrcp.f32 %v6247_v51  ;;  %v6248_v37 = vadd.f32 1.0, %v8359_v41  ;;  %5367 = vmatprep.mubr.bf16.mxu1 %v9242_v3  ;;  %v5859_v51 = vmul.f32 1.442695, %v5597_v32  ;;  %v5604_v62 = vsub.f32 0.0, %v5079_v4 }
 0x8dc   : > { %v8363_v16 = vpop.eup %8362  ;;  %8388 = vrcp.f32 %v6246_v20  ;;  %v6252_v10 = vadd.f32 1.0, %v8361_v26  ;;  %v10754_v46 = vpop.f32.mrf.mxu1  ;;  %v5595_v48 = vsub.f32 0.0, %v4880_v59  ;;  %v5867_v20 = vmul.f32 1.442695, %v5601_v11 }
 0x8dd   : > { %v8365_v47 = vpop.eup %8364  ;;  %8390 = vrcp.f32 %v6248_v37  ;;  %v6254_v6 = vadd.f32 1.0, %v8363_v16  ;;  %v5871_v56 = vmul.f32 1.442695, %v5603_v45  ;;  %v5610_v37 = vsub.f32 0.0, %v5081_v58 }
 0x8de   : > { %v8367_v34 = vpop.eup %8366  ;;  %8392 = vrcp.f32 %v6252_v10  ;;  %v6253_v29 = vadd.f32 1.0, %v8365_v47  ;;  %v10759_v19 = vpop.f32.mrf.mxu1  ;;  %v5855_v60 = vmul.f32 1.442695, %v5595_v48  ;;  %v5869_v5 = vmul.f32 1.442695, %v5602_v17 }
 0x8df   : > { %v8369_v35 = vpop.eup %8368  ;;  %6679 = vst [vmem:[%s10751_s27] sm:$0xff] %v8367_v34  ;;  %8394 = vrcp.f32 %v6254_v6  ;;  %v5609_v16 = vsub.f32 0.0, %v4890_v42  ;;  %v5873_v33 = vmul.f32 1.442695, %v5604_v62 }
 0x8e0   : > { %v8371_v28 = vpop.eup %8370  ;;  %6681 = vst [vmem:[%s10751_s27 + $0x10] sm:$0xff] %v8369_v35  ;;  %8396 = vrcp.f32 %v6253_v29  ;;  %v10766_v8 = vpop.f32.mrf.mxu1  ;;  %v5885_v29 = vmul.f32 1.442695, %v5610_v37 }
 0x8e1   : > { %v8373_v61 = vpop.eup %8372  ;;  %6680 = vst [vmem:[%s10751_s27 + $0x8] sm:$0xff] %v8371_v28  ;;  %8398 = vpow2.f32 %v5839_v18  ;;  %v5608_v18 = vsub.f32 0.0, %v4888_v49  ;;  %v5883_v36 = vmul.f32 1.442695, %v5609_v16  ;;  %v4894_v49 = vadd.f32 %v10742_v43, %v10696_v53 }
 0x8e2   : > { %v8375_v2 = vpop.eup %8374  ;;  %6682 = vst [vmem:[%s10751_s27 + $0x18] sm:$0xff] %v8373_v61  ;;  %8400 = vpow2.f32 %v5843_v38  ;;  %v10773_v1 = vpop.f32.mrf.mxu1  ;;  %5368 = vmatmul.mubr.bf16.gmra.mxu1 %v10634_v14 }
 0x8e3   : > { %v8377_v12 = vpop.eup %8376  ;;  %v6255_v57 = vadd.f32 1.0, %v8375_v2  ;;  %8402 = vpow2.f32 %v5841_v21  ;;  %5377 = vmatprep.mubr.bf16.mxu1 %v9242_v3  ;;  %v5082_v14 = vpop.f32.mrf.mxu0  ;;  %v5881_v31 = vmul.f32 1.442695, %v5608_v18  ;;  %v4896_v18 = vadd.f32 %v10754_v46, %v10700_v23 }
 0x8e4   : > { %v8379_v13 = vpop.eup %8378  ;;  %6686 = vst [vmem:[%s10751_s27 + $0x38] sm:$0xff] %v8377_v12  ;;  %8404 = vpow2.f32 %v5845_v55  ;;  %v10781_v52 = vpop.f32.mrf.mxu1  ;;  %v5083_v47 = vadd.f32 %v5082_v14, %v10702_v0 }
 0x8e5   : > { %v8381_v9 = vpop.eup %8380  ;;  %6688 = vst [vmem:[%s10751_s27 + $0x48] sm:$0xff] %v8379_v13  ;;  %8406 = vrcp.f32 %v6255_v57  ;;  %v5086_v10 = vpop.f32.mrf.mxu0 }
 0x8e6   : > { %v8383_v41 = vpop.eup %8382  ;;  %6687 = vst [vmem:[%s10751_s27 + $0x40] sm:$0xff] %v8381_v9  ;;  %8408 = vpow2.f32 %v5853_v39  ;;  %v10785_v7 = vpop.f32.mrf.mxu1  ;;  %v5611_v28 = vsub.f32 0.0, %v5083_v47  ;;  %v5087_v45 = vadd.f32 %v5086_v10, %v10698_v24 }
 0x8e7   : > { %v8385_v26 = vpop.eup %8384  ;;  %6689 = vst [vmem:[%s10751_s27 + $0x50] sm:$0xff] %v8383_v41  ;;  %8410 = vpow2.f32 %v5857_v63  ;;  %v5088_v35 = vpop.f32.mrf.mxu0 }
 0x8e8   : > { %v8387_v38 = vpop.eup %8386  ;;  %6693 = vst [vmem:[%s10751_s27 + $0x70] sm:$0xff] %v8385_v26  ;;  %8412 = vpow2.f32 %v5855_v60  ;;  %v10789_v40 = vpop.f32.mrf.mxu1  ;;  %v5887_v2 = vmul.f32 1.442695, %v5611_v28  ;;  %v5089_v37 = vadd.f32 %v5088_v35, %v10702_v0 }
 0x8e9   : > { %v8389_v59 = vpop.eup %8388  ;;  %6695 = vst [vmem:[%s10751_s27 + $0x80] sm:$0xff] %v8387_v38  ;;  %8414 = vpow2.f32 %v5859_v51  ;;  %v5090_v61 = vpop.f32.mrf.mxu0  ;;  %v5615_v51 = vsub.f32 0.0, %v4894_v49 }
 0x8ea   : > { %v8391_v6 = vpop.eup %8390  ;;  %6694 = vst [vmem:[%s10751_s27 + $0x78] sm:$0xff] %v8389_v59  ;;  %8416 = vpow2.f32 %v5867_v20  ;;  %v10794_v22 = vpop.f32.mrf.mxu1  ;;  %5378 = vmatmul.mubr.bf16.gmra.mxu1 %v10643_v25  ;;  %v5617_v20 = vsub.f32 0.0, %v5087_v45  ;;  %v4898_v59 = vadd.f32 %v10759_v19, %v10696_v53  ;;  %v5091_v46 = vadd.f32 %v5090_v61, %v10698_v24 }
 0x8eb   : > { %v8393_v34 = vpop.eup %8392  ;;  %6696 = vst [vmem:[%s10751_s27 + $0x88] sm:$0xff] %v8391_v6  ;;  %8418 = vpow2.f32 %v5871_v56  ;;  %5387 = vmatprep.mubr.bf16.mxu1 %v9242_v3  ;;  %v5092_v60 = vpop.f32.mrf.mxu0  ;;  %v5895_v6 = vmul.f32 1.442695, %v5615_v51  ;;  %v5618_v28 = vsub.f32 0.0, %v5089_v37  ;;  %v4900_v19 = vadd.f32 %v10766_v8, %v10700_v23 }
 0x8ec   : > { %v8395_v30 = vpop.eup %8394  ;;  %6700 = vst [vmem:[%s10751_s27 + $0xa8] sm:$0xff] %v8393_v34  ;;  %8420 = vpow2.f32 %v5869_v5  ;;  %v10800_v21 = vpop.f32.mrf.mxu1  ;;  %v5093_v61 = vadd.f32 %v5092_v60, %v10702_v0  ;;  %v4906_v60 = vadd.f32 %v10781_v52, %v10700_v23 }
 0x8ed   : > { %v8397_v44 = vpop.eup %8396  ;;  %6702 = vst [vmem:[%s10751_s27 + $0xb8] sm:$0xff] %v8395_v30  ;;  %8422 = vpow2.f32 %v5873_v33  ;;  %v5096_v38 = vpop.f32.mrf.mxu0  ;;  %v5899_v30 = vmul.f32 1.442695, %v5617_v20 }
 0x8ee   : > { %v8399_v55 = vpop.eup %8398  ;;  %6701 = vst [vmem:[%s10751_s27 + $0xb0] sm:$0xff] %v8397_v44  ;;  %8424 = vpow2.f32 %v5881_v31  ;;  %v10804_v25 = vpop.f32.mrf.mxu1 }
 0x8ef   : > { %v8401_v48 = vpop.eup %8400  ;;  %v6259_v50 = vadd.f32 1.0, %v8399_v55  ;;  %8426 = vpow2.f32 %v5885_v29  ;;  %v5098_v55 = vpop.f32.mrf.mxu0 }
 0x8f0   : > { %v8403_v3 = vpop.eup %8402  ;;  %v6261_v54 = vadd.f32 1.0, %v8401_v48  ;;  %8428 = vpow2.f32 %v5883_v36  ;;  %v10806_v39 = vpop.f32.mrf.mxu1  ;;  %v5616_v36 = vsub.f32 0.0, %v4896_v18  ;;  %v5099_v51 = vadd.f32 %v5098_v55, %v10702_v0 }
 0x8f1   : > { %v8405_v32 = vpop.eup %8404  ;;  %8430 = vrcp.f32 %v6259_v50  ;;  %v6260_v4 = vadd.f32 1.0, %v8403_v3  ;;  %v4908_v18 = vadd.f32 %v10785_v7, %v10696_v53 }
 0x8f2   : > { %v8407_v63 = vpop.eup %8406  ;;  %8432 = vrcp.f32 %v6261_v54  ;;  %v6262_v11 = vadd.f32 1.0, %v8405_v32  ;;  %v10810_v12 = vpop.f32.mrf.mxu1  ;;  %5388 = vmatmul.mubr.bf16.gmra.mxu1 %v10650_v27  ;;  %v5622_v54 = vsub.f32 0.0, %v4898_v59  ;;  %v5897_v49 = vmul.f32 1.442695, %v5616_v36 }
 0x8f3   : > { %v8409_v57 = vpop.eup %8408  ;;  %6703 = vst [vmem:[%s10751_s27 + $0xc0] sm:$0xff] %v8407_v63  ;;  %8434 = vrcp.f32 %v6260_v4  ;;  %v4904_v63 = vadd.f32 %v10773_v1, %v10696_v53  ;;  %v5630_v59 = vsub.f32 0.0, %v4906_v60  ;;  %v5636_v36 = vsub.f32 0.0, %v4908_v18 }
 0x8f4   : > { %v8411_v58 = vpop.eup %8410  ;;  %8436 = vrcp.f32 %v6262_v11  ;;  %v6266_v13 = vadd.f32 1.0, %v8409_v57  ;;  %v10815_v17 = vpop.f32.mrf.mxu1  ;;  %v5097_v57 = vadd.f32 %v5096_v38, %v10698_v24 }
 0x8f5   : > { %v8413_v42 = vpop.eup %8412  ;;  %v6268_v14 = vadd.f32 1.0, %v8411_v58  ;;  %8438 = vpow2.f32 %v5887_v2  ;;  %v5624_v2 = vsub.f32 0.0, %v5091_v46  ;;  %v5901_v58 = vmul.f32 1.442695, %v5618_v28 }
 0x8f6   : > { %v8415_v9 = vpop.eup %8414  ;;  %8440 = vrcp.f32 %v6266_v13  ;;  %v6267_v43 = vadd.f32 1.0, %v8413_v42  ;;  %v10817_v62 = vpop.f32.mrf.mxu1  ;;  %v5623_v13 = vsub.f32 0.0, %v4900_v19  ;;  %v5629_v20 = vsub.f32 0.0, %v4904_v63 }
 0x8f7   : > { %v8417_v27 = vpop.eup %8416  ;;  %8442 = vrcp.f32 %v6268_v14  ;;  %v6269_v41 = vadd.f32 1.0, %v8415_v9  ;;  %v5100_v42 = vpop.f32.mrf.mxu0  ;;  %v5909_v9 = vmul.f32 1.442695, %v5622_v54  ;;  %v5631_v37 = vsub.f32 0.0, %v5097_v57 }
 0x8f8   : > { %v8419_v26 = vpop.eup %8418  ;;  %8444 = vrcp.f32 %v6267_v43  ;;  %v6273_v56 = vadd.f32 1.0, %v8417_v27  ;;  %v10822_v5 = vpop.f32.mrf.mxu1  ;;  %v5625_v43 = vsub.f32 0.0, %v5093_v61  ;;  %v5101_v38 = vadd.f32 %v5100_v42, %v10698_v24 }
 0x8f9   : > { %v8421_v16 = vpop.eup %8420  ;;  %8446 = vrcp.f32 %v6269_v41  ;;  %v6275_v10 = vadd.f32 1.0, %v8419_v26  ;;  %v5913_v41 = vmul.f32 1.442695, %v5624_v2  ;;  %v5102_v7 = vpop.f32.mrf.mxu0  ;;  %v5925_v55 = vmul.f32 1.442695, %v5630_v59 }
 0x8fa   : > { %v8423_v33 = vpop.eup %8422  ;;  %8448 = vrcp.f32 %v6273_v56  ;;  %v6274_v47 = vadd.f32 1.0, %v8421_v16  ;;  %v10827_v31 = vpop.f32.mrf.mxu1  ;;  %v5915_v46 = vmul.f32 1.442695, %v5625_v43  ;;  %v5638_v28 = vsub.f32 0.0, %v5101_v38 }
 0x8fb   : > { %v8425_v34 = vpop.eup %8424  ;;  %8450 = vrcp.f32 %v6275_v10  ;;  %v6276_v29 = vadd.f32 1.0, %v8423_v33  ;;  %v5911_v10 = vmul.f32 1.442695, %v5623_v13  ;;  %v4910_v33 = vadd.f32 %v10789_v40, %v10700_v23 }
 0x8fc   : > { %v8427_v35 = vpop.eup %8426  ;;  %8452 = vrcp.f32 %v6274_v47  ;;  %v6280_v44 = vadd.f32 1.0, %v8425_v34  ;;  %v10831_v48 = vpop.f32.mrf.mxu1  ;;  %v5632_v34 = vsub.f32 0.0, %v5099_v51  ;;  %v5927_v40 = vmul.f32 1.442695, %v5631_v37 }
 0x8fd   : > { %v8429_v50 = vpop.eup %8428  ;;  %8454 = vrcp.f32 %v6276_v29  ;;  %v6282_v3 = vadd.f32 1.0, %v8427_v35  ;;  %v5937_v63 = vmul.f32 1.442695, %v5636_v36  ;;  %v5941_v57 = vmul.f32 1.442695, %v5638_v28 }
 0x8fe   : > { %v8431_v32 = vpop.eup %8430  ;;  %8456 = vrcp.f32 %v6280_v44  ;;  %v6281_v4 = vadd.f32 1.0, %v8429_v50  ;;  %v10836_v11 = vpop.f32.mrf.mxu1  ;;  %v5637_v50 = vsub.f32 0.0, %v4910_v33  ;;  %v4914_v59 = vadd.f32 %v10794_v22, %v10696_v53 }
 0x8ff   : > { %v8433_v8 = vpop.eup %8432  ;;  %6707 = vst [vmem:[%s10751_s27 + $0xe0] sm:$0xff] %v8431_v32  ;;  %8458 = vrcp.f32 %v6282_v3  ;;  %v5106_v3 = vpop.f32.mrf.mxu0  ;;  %v5929_v32 = vmul.f32 1.442695, %v5632_v34 }
 0x900   : > { %v8435_v45 = vpop.eup %8434  ;;  %6709 = vst [vmem:[%s10751_s27 + $0xf0] sm:$0xff] %v8433_v8  ;;  %8460 = vrcp.f32 %v6281_v4  ;;  %v10843_v1 = vpop.f32.mrf.mxu1  ;;  %v5103_v4 = vadd.f32 %v5102_v7, %v10702_v0  ;;  %v5107_v33 = vadd.f32 %v5106_v3, %v10698_v24 }
 0x901   : > { %v8437_v14 = vpop.eup %8436  ;;  %6708 = vst [vmem:[%s10751_s27 + $0xe8] sm:$0xff] %v8435_v45  ;;  %8462 = vpow2.f32 %v5895_v6  ;;  %v5108_v13 = vpop.f32.mrf.mxu0 }
 0x902   : > { %v8439_v27 = vpop.eup %8438  ;;  %6710 = vst [vmem:[%s10751_s27 + $0xf8] sm:$0xff] %v8437_v14  ;;  %8464 = vpow2.f32 %v5899_v30  ;;  %v10850_v52 = vpop.f32.mrf.mxu1  ;;  %v5923_v30 = vmul.f32 1.442695, %v5629_v20  ;;  %v5639_v42 = vsub.f32 0.0, %v5103_v4 }
 0x903   : > { %v8441_v26 = vpop.eup %8440  ;;  %v6283_v56 = vadd.f32 1.0, %v8439_v27  ;;  %8466 = vpow2.f32 %v5897_v49  ;;  %v5110_v20 = vpop.f32.mrf.mxu0 }
 0x904   : > { %v8443_v16 = vpop.eup %8442  ;;  %6714 = vst [vmem:[%s10751_s27 + $0x118] sm:$0xff] %v8441_v26  ;;  %8468 = vpow2.f32 %v5901_v58  ;;  %v10856_v47 = vpop.f32.mrf.mxu1  ;;  %v5939_v58 = vmul.f32 1.442695, %v5637_v50 }
 0x905   : > { %v8445_v6 = vpop.eup %8444  ;;  %6716 = vst [vmem:[%s10751_s27 + $0x128] sm:$0xff] %v8443_v16  ;;  %8470 = vrcp.f32 %v6283_v56  ;;  %v5943_v56 = vmul.f32 1.442695, %v5639_v42 }
 0x906   : > { %v8447_v29 = vpop.eup %8446  ;;  %6715 = vst [vmem:[%s10751_s27 + $0x120] sm:$0xff] %v8445_v6  ;;  %8472 = vpow2.f32 %v5909_v9  ;;  %v10860_v35 = vpop.f32.mrf.mxu1 }
 0x907   : > { %v8449_v44 = vpop.eup %8448  ;;  %6717 = vst [vmem:[%s10751_s27 + $0x130] sm:$0xff] %v8447_v29  ;;  %8474 = vpow2.f32 %v5913_v41 }
 0x908   : > { %v8451_v19 = vpop.eup %8450  ;;  %6721 = vst [vmem:[%s10751_s27 + $0x150] sm:$0xff] %v8449_v44  ;;  %8476 = vpow2.f32 %v5911_v10  ;;  %v10864_v54 = vpop.f32.mrf.mxu1 }
 0x909   : > { %v8453_v61 = vpop.eup %8452  ;;  %6723 = vst [vmem:[%s10751_s27 + $0x160] sm:$0xff] %v8451_v19  ;;  %8478 = vpow2.f32 %v5915_v46  ;;  %v5112_v46 = vpop.f32.mrf.mxu0  ;;  %v5643_v19 = vsub.f32 0.0, %v4914_v59 }
 0x90a   : > { %v8455_v2 = vpop.eup %8454  ;;  %6722 = vst [vmem:[%s10751_s27 + $0x158] sm:$0xff] %v8453_v61  ;;  %8480 = vpow2.f32 %v5923_v30  ;;  %v10869_v8 = vpop.f32.mrf.mxu1  ;;  %v5109_v61 = vadd.f32 %v5108_v13, %v10702_v0 }
 0x90b   : > { %v8457_v49 = vpop.eup %8456  ;;  %6724 = vst [vmem:[%s10751_s27 + $0x168] sm:$0xff] %v8455_v2  ;;  %8482 = vpow2.f32 %v5927_v40  ;;  %v4916_v40 = vadd.f32 %v10800_v21, %v10700_v23 }
 0x90c   : > { %v8459_v45 = vpop.eup %8458  ;;  %6728 = vst [vmem:[%s10751_s27 + $0x188] sm:$0xff] %v8457_v49  ;;  %8484 = vpow2.f32 %v5925_v55  ;;  %v10874_v14 = vpop.f32.mrf.mxu1  ;;  %v5645_v55 = vsub.f32 0.0, %v5107_v33  ;;  %v4924_v33 = vadd.f32 %v10810_v12, %v10696_v53 }
 0x90d   : > { %v8461_v60 = vpop.eup %8460  ;;  %6730 = vst [vmem:[%s10751_s27 + $0x198] sm:$0xff] %v8459_v45  ;;  %8486 = vpow2.f32 %v5929_v32  ;;  %v5116_v32 = vpop.f32.mrf.mxu0  ;;  %v5644_v45 = vsub.f32 0.0, %v4916_v40 }
 0x90e   : > { %v8463_v9 = vpop.eup %8462  ;;  %6729 = vst [vmem:[%s10751_s27 + $0x190] sm:$0xff] %v8461_v60  ;;  %8488 = vpow2.f32 %v5937_v63  ;;  %v10877_v37 = vpop.f32.mrf.mxu1  ;;  %v4918_v63 = vadd.f32 %v10804_v25, %v10696_v53  ;;  %v5955_v13 = vmul.f32 1.442695, %v5645_v55  ;;  %v4920_v25 = vadd.f32 %v10806_v39, %v10700_v23 }
 0x90f   : > { %v8465_v43 = vpop.eup %8464  ;;  %v6287_v51 = vadd.f32 1.0, %v8463_v9  ;;  %8490 = vpow2.f32 %v5941_v57  ;;  %v5951_v9 = vmul.f32 1.442695, %v5643_v19  ;;  %v5953_v39 = vmul.f32 1.442695, %v5644_v45 }
 0x910   : > { %v8467_v27 = vpop.eup %8466  ;;  %v6289_v41 = vadd.f32 1.0, %v8465_v43  ;;  %8492 = vpow2.f32 %v5939_v58  ;;  %v10883_v30 = vpop.f32.mrf.mxu1  ;;  %v5111_v58 = vadd.f32 %v5110_v20, %v10698_v24  ;;  %v5113_v20 = vadd.f32 %v5112_v46, %v10702_v0 }
 0x911   : > { %v8469_v18 = vpop.eup %8468  ;;  %8494 = vrcp.f32 %v6287_v51  ;;  %v6288_v26 = vadd.f32 1.0, %v8467_v27  ;;  %v5646_v27 = vsub.f32 0.0, %v5109_v61  ;;  %v4930_v45 = vadd.f32 %v10822_v5, %v10700_v23 }
 0x912   : > { %v8471_v38 = vpop.eup %8470  ;;  %8496 = vrcp.f32 %v6289_v41  ;;  %v6290_v16 = vadd.f32 1.0, %v8469_v18  ;;  %v10890_v49 = vpop.f32.mrf.mxu1  ;;  %v5652_v59 = vsub.f32 0.0, %v5111_v58 }
 0x913   : > { %v8473_v10 = vpop.eup %8472  ;;  %6731 = vst [vmem:[%s10751_s27 + $0x1a0] sm:$0xff] %v8471_v38  ;;  %8498 = vrcp.f32 %v6288_v26  ;;  %v5118_v41 = vpop.f32.mrf.mxu0  ;;  %v5957_v46 = vmul.f32 1.442695, %v5646_v27 }
 0x914   : > { %v8475_v7 = vpop.eup %8474  ;;  %8500 = vrcp.f32 %v6290_v16  ;;  %v6294_v6 = vadd.f32 1.0, %v8473_v10  ;;  %v10896_v38 = vpop.f32.mrf.mxu1 }
 0x915   : > { %v8477_v34 = vpop.eup %8476  ;;  %v6296_v29 = vadd.f32 1.0, %v8475_v7  ;;  %8502 = vpow2.f32 %v5943_v56  ;;  %v5650_v56 = vsub.f32 0.0, %v4918_v63 }
 0x916   : > { %v8479_v36 = vpop.eup %8478  ;;  %8504 = vrcp.f32 %v6294_v6  ;;  %v6295_v44 = vadd.f32 1.0, %v8477_v34  ;;  %v5117_v6 = vadd.f32 %v5116_v32, %v10698_v24  ;;  %v10907_v19 = vpop.f32.mrf.mxu1 }
 0x917   : > { %v8481_v28 = vpop.eup %8480  ;;  %8506 = vrcp.f32 %v6296_v29  ;;  %v6297_v22 = vadd.f32 1.0, %v8479_v36  ;;  %v5651_v29 = vsub.f32 0.0, %v4920_v25  ;;  %v4926_v36 = vadd.f32 %v10815_v17, %v10700_v23 }
 0x918   : > { %v8483_v50 = vpop.eup %8482  ;;  %8508 = vrcp.f32 %v6295_v44  ;;  %v6301_v3 = vadd.f32 1.0, %v8481_v28  ;;  %v5120_v44 = vpop.f32.mrf.mxu0  ;;  %v5965_v12 = vmul.f32 1.442695, %v5650_v56  ;;  %v5653_v28 = vsub.f32 0.0, %v5113_v20 }
 0x919   : > { %v8485_v4 = vpop.eup %8484  ;;  %8510 = vrcp.f32 %v6297_v22  ;;  %v6303_v2 = vadd.f32 1.0, %v8483_v50  ;;  %v5119_v22 = vadd.f32 %v5118_v41, %v10702_v0  ;;  %v5969_v50 = vmul.f32 1.442695, %v5652_v59 }
 0x91a   : > { %v8487_v21 = vpop.eup %8486  ;;  %8512 = vrcp.f32 %v6301_v3  ;;  %v6302_v57 = vadd.f32 1.0, %v8485_v4  ;;  %v5657_v3 = vsub.f32 0.0, %v4924_v33  ;;  %v4928_v17 = vadd.f32 %v10817_v62, %v10696_v53  ;;  %v5122_v58 = vpop.f32.mrf.mxu0 }
 0x91b   : > { %v8489_v60 = vpop.eup %8488  ;;  %8514 = vrcp.f32 %v6303_v2  ;;  %v6304_v42 = vadd.f32 1.0, %v8487_v21  ;;  %v5659_v4 = vsub.f32 0.0, %v5117_v6  ;;  %v5121_v2 = vadd.f32 %v5120_v44, %v10698_v24 }
 0x91c   : > { %v8491_v43 = vpop.eup %8490  ;;  %8516 = vrcp.f32 %v6302_v57  ;;  %v6308_v51 = vadd.f32 1.0, %v8489_v60  ;;  %v5967_v21 = vmul.f32 1.442695, %v5651_v29  ;;  %v5658_v57 = vsub.f32 0.0, %v4926_v36  ;;  %v5126_v56 = vpop.f32.mrf.mxu0 }
 0x91d   : > { %v8493_v18 = vpop.eup %8492  ;;  %8518 = vrcp.f32 %v6304_v42  ;;  %v6310_v26 = vadd.f32 1.0, %v8491_v43  ;;  %v5971_v62 = vmul.f32 1.442695, %v5653_v28  ;;  %v5660_v42 = vsub.f32 0.0, %v5119_v22 }
 0x91e   : > { %v8495_v16 = vpop.eup %8494  ;;  %8520 = vrcp.f32 %v6308_v51  ;;  %v6309_v10 = vadd.f32 1.0, %v8493_v18  ;;  %v5979_v43 = vmul.f32 1.442695, %v5657_v3  ;;  %v5664_v51 = vsub.f32 0.0, %v4928_v17  ;;  %v5128_v29 = vpop.f32.mrf.mxu0 }
 0x91f   : > { %v8497_v7 = vpop.eup %8496  ;;  %6735 = vst [vmem:[%s10751_s27 + $0x1c0] sm:$0xff] %v8495_v16  ;;  %8522 = vrcp.f32 %v6310_v26  ;;  %v5983_v5 = vmul.f32 1.442695, %v5659_v4  ;;  %v5666_v25 = vsub.f32 0.0, %v5121_v2  ;;  %v5981_v18 = vmul.f32 1.442695, %v5658_v57 }
 0x920   : > { %v8499_v34 = vpop.eup %8498  ;;  %6737 = vst [vmem:[%s10751_s27 + $0x1d0] sm:$0xff] %v8497_v7  ;;  %8524 = vrcp.f32 %v6309_v10  ;;  %v5665_v26 = vsub.f32 0.0, %v4930_v45  ;;  %v5985_v16 = vmul.f32 1.442695, %v5660_v42  ;;  %v5123_v10 = vadd.f32 %v5122_v58, %v10702_v0  ;;  %v5130_v3 = vpop.f32.mrf.mxu0 }
 0x921   : > { %v8501_v40 = vpop.eup %8500  ;;  %6736 = vst [vmem:[%s10751_s27 + $0x1c8] sm:$0xff] %v8499_v34  ;;  %8526 = vpow2.f32 %v5951_v9  ;;  %v10917_v9 = vpop.f32.mrf.mxu1  ;;  %v5993_v7 = vmul.f32 1.442695, %v5664_v51  ;;  %v5997_v6 = vmul.f32 1.442695, %v5666_v25  ;;  %v4934_v57 = vadd.f32 %v10827_v31, %v10696_v53 }
 0x922   : > { %v8503_v55 = vpop.eup %8502  ;;  %6738 = vst [vmem:[%s10751_s27 + $0x1d8] sm:$0xff] %v8501_v40  ;;  %8528 = vpow2.f32 %v5955_v13  ;;  %v5667_v44 = vsub.f32 0.0, %v5123_v10  ;;  %v5127_v45 = vadd.f32 %v5126_v56, %v10698_v24 }
 0x923   : > { %v8505_v61 = vpop.eup %8504  ;;  %v6311_v32 = vadd.f32 1.0, %v8503_v55  ;;  %8530 = vpow2.f32 %v5953_v39  ;;  %v10924_v59 = vpop.f32.mrf.mxu1 }
 0x924   : > { %v8507_v63 = vpop.eup %8506  ;;  %6742 = vst [vmem:[%s10751_s27 + $0x1f8] sm:$0xff] %v8505_v61  ;;  %8532 = vpow2.f32 %v5957_v46  ;;  %v5995_v46 = vmul.f32 1.442695, %v5665_v26 }
 0x925   : > { %v8509_v60 = vpop.eup %8508  ;;  %6744 = vst [vmem:[%s10751_s27 + $0x208] sm:$0xff] %v8507_v63  ;;  %8534 = vrcp.f32 %v6311_v32  ;;  %v10930_v40 = vpop.f32.mrf.mxu1  ;;  %v5999_v32 = vmul.f32 1.442695, %v5667_v44 }
 0x926   : > { %v8511_v13 = vpop.eup %8510  ;;  %6743 = vst [vmem:[%s10751_s27 + $0x200] sm:$0xff] %v8509_v60  ;;  %8536 = vpow2.f32 %v5965_v12 }
 0x927   : > { %v8513_v27 = vpop.eup %8512  ;;  %6745 = vst [vmem:[%s10751_s27 + $0x210] sm:$0xff] %v8511_v13  ;;  %8538 = vpow2.f32 %v5969_v50  ;;  %v10933_v4 = vpop.f32.mrf.mxu1 }
 0x928   : > { %v8515_v41 = vpop.eup %8514  ;;  %6749 = vst [vmem:[%s10751_s27 + $0x230] sm:$0xff] %v8513_v27  ;;  %8540 = vpow2.f32 %v5967_v21 }
 0x929   : > { %v8517_v20 = vpop.eup %8516  ;;  %6751 = vst [vmem:[%s10751_s27 + $0x240] sm:$0xff] %v8515_v41  ;;  %8542 = vpow2.f32 %v5971_v62  ;;  %v5132_v62 = vpop.f32.mrf.mxu0  ;;  %v5671_v41 = vsub.f32 0.0, %v4934_v57 }
 0x92a   : > { %v8519_v33 = vpop.eup %8518  ;;  %6750 = vst [vmem:[%s10751_s27 + $0x238] sm:$0xff] %v8517_v20  ;;  %8544 = vpow2.f32 %v5979_v43  ;;  %v4936_v43 = vadd.f32 %v10831_v48, %v10700_v23  ;;  %v10941_v51 = vpop.f32.mrf.mxu1  ;;  %v5129_v20 = vadd.f32 %v5128_v29, %v10702_v0 }
 0x92b   : > { %v8521_v39 = vpop.eup %8520  ;;  %6752 = vst [vmem:[%s10751_s27 + $0x248] sm:$0xff] %v8519_v33  ;;  %8546 = vpow2.f32 %v5983_v5 }
 0x92c   : > { %v8523_v34 = vpop.eup %8522  ;;  %6756 = vst [vmem:[%s10751_s27 + $0x268] sm:$0xff] %v8521_v39  ;;  %8548 = vpow2.f32 %v5981_v18  ;;  %v5673_v18 = vsub.f32 0.0, %v5127_v45  ;;  %v5672_v48 = vsub.f32 0.0, %v4936_v43 }
 0x92d   : > { %v8525_v36 = vpop.eup %8524  ;;  %6758 = vst [vmem:[%s10751_s27 + $0x278] sm:$0xff] %v8523_v34  ;;  %8550 = vpow2.f32 %v5985_v16  ;;  %v5136_v16 = vpop.f32.mrf.mxu0  ;;  %v4938_v34 = vadd.f32 %v10836_v11, %v10696_v53 }
 0x92e   : > { %v8527_v12 = vpop.eup %8526  ;;  %6757 = vst [vmem:[%s10751_s27 + $0x270] sm:$0xff] %v8525_v36  ;;  %8552 = vpow2.f32 %v5993_v7  ;;  %v10944_v7 = vpop.f32.mrf.mxu1  ;;  %v6011_v29 = vmul.f32 1.442695, %v5673_v18 }
 0x92f   : > { %v8529_v28 = vpop.eup %8528  ;;  %v6315_v22 = vadd.f32 1.0, %v8527_v12  ;;  %8554 = vpow2.f32 %v5997_v6  ;;  %v6007_v12 = vmul.f32 1.442695, %v5671_v41  ;;  %v5678_v57 = vsub.f32 0.0, %v4938_v34 }
 0x930   : > { %v8531_v55 = vpop.eup %8530  ;;  %v6317_v50 = vadd.f32 1.0, %v8529_v28  ;;  %8556 = vpow2.f32 %v5995_v46  ;;  %v5131_v46 = vadd.f32 %v5130_v3, %v10698_v24  ;;  %v5133_v3 = vadd.f32 %v5132_v62, %v10702_v0 }
 0x931   : > { %v8533_v17 = vpop.eup %8532  ;;  %8558 = vrcp.f32 %v6315_v22  ;;  %v6316_v61 = vadd.f32 1.0, %v8531_v55  ;;  %v5674_v55 = vsub.f32 0.0, %v5129_v20  ;;  %v4950_v34 = vadd.f32 %v10864_v54, %v10700_v23 }
 0x932   : > { %v8535_v2 = vpop.eup %8534  ;;  %8560 = vrcp.f32 %v6317_v50  ;;  %v6318_v63 = vadd.f32 1.0, %v8533_v17  ;;  %v4940_v50 = vadd.f32 %v10843_v1, %v10700_v23  ;;  %v5138_v17 = vpop.f32.mrf.mxu0  ;;  %v5680_v45 = vsub.f32 0.0, %v5131_v46 }
 0x933   : > { %v8537_v21 = vpop.eup %8536  ;;  %6759 = vst [vmem:[%s10751_s27 + $0x280] sm:$0xff] %v8535_v2  ;;  %8562 = vrcp.f32 %v6316_v61  ;;  %v10954_v2 = vpop.f32.mrf.mxu1  ;;  %v6009_v1 = vmul.f32 1.442695, %v5672_v48  ;;  %v6013_v62 = vmul.f32 1.442695, %v5674_v55 }
 0x934   : > { %v8539_v58 = vpop.eup %8538  ;;  %8564 = vrcp.f32 %v6318_v63  ;;  %v6322_v60 = vadd.f32 1.0, %v8537_v21  ;;  %v5140_v43 = vpop.f32.mrf.mxu0 }
 0x935   : > { %v8541_v42 = vpop.eup %8540  ;;  %v6324_v13 = vadd.f32 1.0, %v8539_v58  ;;  %8566 = vpow2.f32 %v5999_v32  ;;  %v4944_v32 = vadd.f32 %v10850_v52, %v10696_v53  ;;  %v5679_v52 = vsub.f32 0.0, %v4940_v50  ;;  %v10963_v41 = vpop.f32.mrf.mxu1 }
 0x936   : > { %v8543_v27 = vpop.eup %8542  ;;  %8568 = vrcp.f32 %v6322_v60  ;;  %v6323_v5 = vadd.f32 1.0, %v8541_v42  ;;  %v5137_v60 = vadd.f32 %v5136_v16, %v10698_v24  ;;  %v5142_v46 = vpop.f32.mrf.mxu0 }
 0x937   : > { %v8545_v25 = vpop.eup %8544  ;;  %8570 = vrcp.f32 %v6324_v13  ;;  %v6325_v31 = vadd.f32 1.0, %v8543_v27  ;;  %v4946_v13 = vadd.f32 %v10856_v47, %v10700_v23  ;;  %v4948_v47 = vadd.f32 %v10860_v35, %v10696_v53 }
 0x938   : > { %v8547_v26 = vpop.eup %8546  ;;  %8572 = vrcp.f32 %v6323_v5  ;;  %v6329_v56 = vadd.f32 1.0, %v8545_v25  ;;  %v5681_v5 = vsub.f32 0.0, %v5133_v3  ;;  %v5685_v25 = vsub.f32 0.0, %v4944_v32  ;;  %v5146_v3 = vpop.f32.mrf.mxu0 }
 0x939   : > { %v8549_v10 = vpop.eup %8548  ;;  %8574 = vrcp.f32 %v6325_v31  ;;  %v6331_v33 = vadd.f32 1.0, %v8547_v26  ;;  %v5139_v31 = vadd.f32 %v5138_v17, %v10702_v0  ;;  %v6021_v26 = vmul.f32 1.442695, %v5678_v57 }
 0x93a   : > { %v8551_v39 = vpop.eup %8550  ;;  %8576 = vrcp.f32 %v6329_v56  ;;  %v6330_v6 = vadd.f32 1.0, %v8549_v10  ;;  %v6025_v56 = vmul.f32 1.442695, %v5680_v45  ;;  %v5687_v10 = vsub.f32 0.0, %v5137_v60 }
 0x93b   : > { %v8553_v36 = vpop.eup %8552  ;;  %8578 = vrcp.f32 %v6331_v33  ;;  %v6332_v44 = vadd.f32 1.0, %v8551_v39  ;;  %v5141_v33 = vadd.f32 %v5140_v43, %v10698_v24  ;;  %v6023_v39 = vmul.f32 1.442695, %v5679_v52  ;;  %v5148_v52 = vpop.f32.mrf.mxu0 }
 0x93c   : > { %v8555_v28 = vpop.eup %8554  ;;  %8580 = vrcp.f32 %v6330_v6  ;;  %v6336_v22 = vadd.f32 1.0, %v8553_v36  ;;  %v5686_v6 = vsub.f32 0.0, %v4946_v13  ;;  %v6027_v35 = vmul.f32 1.442695, %v5681_v5 }
 0x93d   : > { %v8557_v61 = vpop.eup %8556  ;;  %8582 = vrcp.f32 %v6332_v44  ;;  %v6338_v11 = vadd.f32 1.0, %v8555_v28  ;;  %v5688_v44 = vsub.f32 0.0, %v5139_v31  ;;  %v6035_v28 = vmul.f32 1.442695, %v5685_v25 }
 0x93e   : > { %v8559_v63 = vpop.eup %8558  ;;  %8584 = vrcp.f32 %v6336_v22  ;;  %v6337_v21 = vadd.f32 1.0, %v8557_v61  ;;  %v5692_v22 = vsub.f32 0.0, %v4948_v47  ;;  %v6039_v54 = vmul.f32 1.442695, %v5687_v10 }
 0x93f   : > { %v8561_v58 = vpop.eup %8560  ;;  %6763 = vst [vmem:[%s10751_s27 + $0x2a0] sm:$0xff] %v8559_v63  ;;  %8586 = vrcp.f32 %v6338_v11  ;;  %v5694_v50 = vsub.f32 0.0, %v5141_v33  ;;  %v6037_v61 = vmul.f32 1.442695, %v5686_v6  ;;  %v5693_v11 = vsub.f32 0.0, %v4950_v34 }
 0x940   : > { %v8563_v42 = vpop.eup %8562  ;;  %6765 = vst [vmem:[%s10751_s27 + $0x2b0] sm:$0xff] %v8561_v58  ;;  %8588 = vrcp.f32 %v6337_v21  ;;  %v6041_v63 = vmul.f32 1.442695, %v5688_v44  ;;  %v5143_v21 = vadd.f32 %v5142_v46, %v10702_v0  ;;  %v6049_v58 = vmul.f32 1.442695, %v5692_v22 }
 0x941   : > { %v8565_v27 = vpop.eup %8564  ;;  %6764 = vst [vmem:[%s10751_s27 + $0x2a8] sm:$0xff] %v8563_v42  ;;  %8590 = vpow2.f32 %v6007_v12  ;;  %v10973_v12 = vpop.f32.mrf.mxu1  ;;  %v6053_v60 = vmul.f32 1.442695, %v5694_v50  ;;  %v5147_v34 = vadd.f32 %v5146_v3, %v10698_v24 }
 0x942   : > { %v8567_v18 = vpop.eup %8566  ;;  %6766 = vst [vmem:[%s10751_s27 + $0x2b8] sm:$0xff] %v8565_v27  ;;  %8592 = vpow2.f32 %v6011_v29  ;;  %v5695_v43 = vsub.f32 0.0, %v5143_v21 }
 0x943   : > { %v8569_v20 = vpop.eup %8568  ;;  %v6339_v16 = vadd.f32 1.0, %v8567_v18  ;;  %8594 = vpow2.f32 %v6009_v1  ;;  %v10980_v57 = vpop.f32.mrf.mxu1 }
 0x944   : > { %v8571_v48 = vpop.eup %8570  ;;  %6770 = vst [vmem:[%s10751_s27 + $0x2d8] sm:$0xff] %v8569_v20  ;;  %8596 = vpow2.f32 %v6013_v62  ;;  %v6051_v62 = vmul.f32 1.442695, %v5693_v11 }
 0x945   : > { %v8573_v36 = vpop.eup %8572  ;;  %6772 = vst [vmem:[%s10751_s27 + $0x2e8] sm:$0xff] %v8571_v48  ;;  %8598 = vrcp.f32 %v6339_v16  ;;  %v10986_v27 = vpop.f32.mrf.mxu1  ;;  %v6055_v16 = vmul.f32 1.442695, %v5695_v43 }
 0x946   : > { %v8575_v29 = vpop.eup %8574  ;;  %6771 = vst [vmem:[%s10751_s27 + $0x2e0] sm:$0xff] %v8573_v36  ;;  %8600 = vpow2.f32 %v6021_v26 }
 0x947   : > { %v8577_v55 = vpop.eup %8576  ;;  %6773 = vst [vmem:[%s10751_s27 + $0x2f0] sm:$0xff] %v8575_v29  ;;  %8602 = vpow2.f32 %v6025_v56  ;;  %v5150_v56 = vpop.f32.mrf.mxu0 }
 0x948   : > { %v8579_v17 = vpop.eup %8578  ;;  %6777 = vst [vmem:[%s10751_s27 + $0x310] sm:$0xff] %v8577_v55  ;;  %8604 = vpow2.f32 %v6023_v39  ;;  %v10989_v10 = vpop.f32.mrf.mxu1  ;;  %v4954_v39 = vadd.f32 %v10869_v8, %v10696_v53 }
 0x949   : > { %v8581_v32 = vpop.eup %8580  ;;  %6779 = vst [vmem:[%s10751_s27 + $0x320] sm:$0xff] %v8579_v17  ;;  %8606 = vpow2.f32 %v6027_v35  ;;  %v5152_v35 = vpop.f32.mrf.mxu0  ;;  %v5701_v17 = vsub.f32 0.0, %v5147_v34  ;;  %v4964_v34 = vadd.f32 %v10890_v49, %v10696_v53 }
 0x94a   : > { %v8583_v45 = vpop.eup %8582  ;;  %6778 = vst [vmem:[%s10751_s27 + $0x318] sm:$0xff] %v8581_v32  ;;  %8608 = vpow2.f32 %v6035_v28  ;;  %v10995_v28 = vpop.f32.mrf.mxu1  ;;  %v5149_v32 = vadd.f32 %v5148_v52, %v10702_v0 }
 0x94b   : > { %v8585_v1 = vpop.eup %8584  ;;  %6780 = vst [vmem:[%s10751_s27 + $0x328] sm:$0xff] %v8583_v45  ;;  %8610 = vpow2.f32 %v6039_v54  ;;  %v5699_v54 = vsub.f32 0.0, %v4954_v39 }
 0x94c   : > { %v8587_v42 = vpop.eup %8586  ;;  %6784 = vst [vmem:[%s10751_s27 + $0x348] sm:$0xff] %v8585_v1  ;;  %8612 = vpow2.f32 %v6037_v61  ;;  %v4956_v61 = vadd.f32 %v10874_v14, %v10700_v23  ;;  %v11002_v1 = vpop.f32.mrf.mxu1  ;;  %v5151_v14 = vadd.f32 %v5150_v56, %v10698_v24  ;;  %v5153_v56 = vadd.f32 %v5152_v35, %v10702_v0 }
 0x94d   : > { %v8589_v13 = vpop.eup %8588  ;;  %6786 = vst [vmem:[%s10751_s27 + $0x358] sm:$0xff] %v8587_v42  ;;  %8614 = vpow2.f32 %v6041_v63  ;;  %v5156_v63 = vpop.f32.mrf.mxu0 }
 0x94e   : > { %v8591_v5 = vpop.eup %8590  ;;  %6785 = vst [vmem:[%s10751_s27 + $0x350] sm:$0xff] %v8589_v13  ;;  %8616 = vpow2.f32 %v6049_v58  ;;  %v4958_v58 = vadd.f32 %v10877_v37, %v10696_v53  ;;  %v5700_v52 = vsub.f32 0.0, %v4956_v61  ;;  %v4960_v37 = vadd.f32 %v10883_v30, %v10700_v23 }
 0x94f   : > { %v8593_v25 = vpop.eup %8592  ;;  %v6343_v31 = vadd.f32 1.0, %v8591_v5  ;;  %8618 = vpow2.f32 %v6053_v60  ;;  %v6067_v5 = vmul.f32 1.442695, %v5701_v17 }
 0x950   : > { %v8595_v18 = vpop.eup %8594  ;;  %v6345_v26 = vadd.f32 1.0, %v8593_v25  ;;  %8620 = vpow2.f32 %v6051_v62  ;;  %v6063_v62 = vmul.f32 1.442695, %v5699_v54  ;;  %v6065_v30 = vmul.f32 1.442695, %v5700_v52 }
 0x951   : > { %v8597_v47 = vpop.eup %8596  ;;  %8622 = vrcp.f32 %v6343_v31  ;;  %v6344_v20 = vadd.f32 1.0, %v8595_v18  ;;  %v5702_v18 = vsub.f32 0.0, %v5149_v32 }
 0x952   : > { %v8599_v33 = vpop.eup %8598  ;;  %8624 = vrcp.f32 %v6345_v26  ;;  %v6346_v48 = vadd.f32 1.0, %v8597_v47  ;;  %v5158_v26 = vpop.f32.mrf.mxu0 }
 0x953   : > { %v8601_v6 = vpop.eup %8600  ;;  %6787 = vst [vmem:[%s10751_s27 + $0x360] sm:$0xff] %v8599_v33  ;;  %8626 = vrcp.f32 %v6344_v20  ;;  %v11008_v33 = vpop.f32.mrf.mxu1  ;;  %v6069_v35 = vmul.f32 1.442695, %v5702_v18 }
 0x954   : > { %v8603_v46 = vpop.eup %8602  ;;  %8628 = vrcp.f32 %v6346_v48  ;;  %v6350_v36 = vadd.f32 1.0, %v8601_v6  ;;  %v5708_v6 = vsub.f32 0.0, %v5151_v14 }
 0x955   : > { %v8605_v44 = vpop.eup %8604  ;;  %v6352_v29 = vadd.f32 1.0, %v8603_v46  ;;  %8630 = vpow2.f32 %v6055_v16  ;;  %v5706_v16 = vsub.f32 0.0, %v4958_v58  ;;  %v11019_v17 = vpop.f32.mrf.mxu1 }
 0x956   : > { %v8607_v22 = vpop.eup %8606  ;;  %8632 = vrcp.f32 %v6350_v36  ;;  %v6351_v55 = vadd.f32 1.0, %v8605_v44  ;;  %v5157_v36 = vadd.f32 %v5156_v63, %v10698_v24 }
 0x957   : > { %v8609_v50 = vpop.eup %8608  ;;  %8634 = vrcp.f32 %v6352_v29  ;;  %v6353_v8 = vadd.f32 1.0, %v8607_v22  ;;  %v5707_v29 = vsub.f32 0.0, %v4960_v37  ;;  %v4966_v22 = vadd.f32 %v10896_v38, %v10700_v23 }
 0x958   : > { %v8611_v11 = vpop.eup %8610  ;;  %8636 = vrcp.f32 %v6351_v55  ;;  %v6357_v3 = vadd.f32 1.0, %v8609_v50  ;;  %v5160_v55 = vpop.f32.mrf.mxu0  ;;  %v6077_v49 = vmul.f32 1.442695, %v5706_v16  ;;  %v5709_v50 = vsub.f32 0.0, %v5153_v56 }
 0x959   : > { %v8613_v21 = vpop.eup %8612  ;;  %8638 = vrcp.f32 %v6353_v8  ;;  %v6359_v45 = vadd.f32 1.0, %v8611_v11  ;;  %v5159_v8 = vadd.f32 %v5158_v26, %v10702_v0  ;;  %v6081_v11 = vmul.f32 1.442695, %v5708_v6 }
 0x95a   : > { %v8615_v60 = vpop.eup %8614  ;;  %8640 = vrcp.f32 %v6357_v3  ;;  %v6358_v42 = vadd.f32 1.0, %v8613_v21  ;;  %v5713_v3 = vsub.f32 0.0, %v4964_v34  ;;  %v4968_v38 = vadd.f32 %v10907_v19, %v10696_v53  ;;  %v5162_v14 = vpop.f32.mrf.mxu0 }
 0x95b   : > { %v8617_v13 = vpop.eup %8616  ;;  %8642 = vrcp.f32 %v6359_v45  ;;  %v6360_v43 = vadd.f32 1.0, %v8615_v60  ;;  %v5715_v21 = vsub.f32 0.0, %v5157_v36  ;;  %v5161_v45 = vadd.f32 %v5160_v55, %v10698_v24 }
 0x95c   : > { %v8619_v25 = vpop.eup %8618  ;;  %8644 = vrcp.f32 %v6358_v42  ;;  %v6364_v31 = vadd.f32 1.0, %v8617_v13  ;;  %v6079_v60 = vmul.f32 1.442695, %v5707_v29  ;;  %v5714_v42 = vsub.f32 0.0, %v4966_v22  ;;  %v5166_v16 = vpop.f32.mrf.mxu0 }
 0x95d   : > { %v8621_v47 = vpop.eup %8620  ;;  %8646 = vrcp.f32 %v6360_v43  ;;  %v6366_v20 = vadd.f32 1.0, %v8619_v25  ;;  %v6083_v19 = vmul.f32 1.442695, %v5709_v50  ;;  %v5716_v43 = vsub.f32 0.0, %v5159_v8 }
 0x95e   : > { %v8623_v48 = vpop.eup %8622  ;;  %8648 = vrcp.f32 %v6364_v31  ;;  %v6365_v39 = vadd.f32 1.0, %v8621_v47  ;;  %v6091_v25 = vmul.f32 1.442695, %v5713_v3  ;;  %v5720_v31 = vsub.f32 0.0, %v4968_v38  ;;  %v5168_v29 = vpop.f32.mrf.mxu0 }
 0x95f   : > { %v8625_v46 = vpop.eup %8624  ;;  %6791 = vst [vmem:[%s10751_s27 + $0x380] sm:$0xff] %v8623_v48  ;;  %8650 = vrcp.f32 %v6366_v20  ;;  %v5722_v37 = vsub.f32 0.0, %v5161_v45  ;;  %v6093_v47 = vmul.f32 1.442695, %v5714_v42  ;;  %v6097_v48 = vmul.f32 1.442695, %v5716_v43 }
 0x960   : > { %v8627_v44 = vpop.eup %8626  ;;  %6793 = vst [vmem:[%s10751_s27 + $0x390] sm:$0xff] %v8625_v46  ;;  %8652 = vrcp.f32 %v6365_v39  ;;  %v5163_v39 = vadd.f32 %v5162_v14, %v10702_v0  ;;  %v6105_v46 = vmul.f32 1.442695, %v5720_v31  ;;  %v5170_v3 = vpop.f32.mrf.mxu0  ;;  %v4974_v42 = vadd.f32 %v10924_v59, %v10696_v53 }
 0x961   : > { %v8629_v54 = vpop.eup %8628  ;;  %6792 = vst [vmem:[%s10751_s27 + $0x388] sm:$0xff] %v8627_v44  ;;  %8654 = vpow2.f32 %v6063_v62  ;;  %v4970_v62 = vadd.f32 %v10917_v9, %v10700_v23  ;;  %v6095_v9 = vmul.f32 1.442695, %v5715_v21  ;;  %v6109_v36 = vmul.f32 1.442695, %v5722_v37 }
 0x962   : > { %v8631_v61 = vpop.eup %8630  ;;  %6794 = vst [vmem:[%s10751_s27 + $0x398] sm:$0xff] %v8629_v54  ;;  %8656 = vpow2.f32 %v6067_v5  ;;  %v11029_v5 = vpop.f32.mrf.mxu1  ;;  %v5723_v55 = vsub.f32 0.0, %v5163_v39 }
 0x963   : > { %v8633_v32 = vpop.eup %8632  ;;  %v6367_v63 = vadd.f32 1.0, %v8631_v61  ;;  %8658 = vpow2.f32 %v6065_v30  ;;  %v5721_v20 = vsub.f32 0.0, %v4970_v62  ;;  %v5167_v62 = vadd.f32 %v5166_v16, %v10698_v24 }
 0x964   : > { %v8635_v58 = vpop.eup %8634  ;;  %6798 = vst [vmem:[%s10751_s27 + $0x3b8] sm:$0xff] %v8633_v32  ;;  %8660 = vpow2.f32 %v6069_v35  ;;  %v11036_v6 = vpop.f32.mrf.mxu1 }
 0x965   : > { %v8637_v13 = vpop.eup %8636  ;;  %6800 = vst [vmem:[%s10751_s27 + $0x3c8] sm:$0xff] %v8635_v58  ;;  %8662 = vrcp.f32 %v6367_v63  ;;  %v6107_v35 = vmul.f32 1.442695, %v5721_v20  ;;  %v6111_v63 = vmul.f32 1.442695, %v5723_v55 }
 0x966   : > { %v8639_v52 = vpop.eup %8638  ;;  %6799 = vst [vmem:[%s10751_s27 + $0x3c0] sm:$0xff] %v8637_v13  ;;  %8664 = vpow2.f32 %v6077_v49  ;;  %v11042_v54 = vpop.f32.mrf.mxu1 }
 0x967   : > { %v8641_v18 = vpop.eup %8640  ;;  %6801 = vst [vmem:[%s10751_s27 + $0x3d0] sm:$0xff] %v8639_v52  ;;  %8666 = vpow2.f32 %v6081_v11 }
 0x968   : > { %v8643_v26 = vpop.eup %8642  ;;  %6805 = vst [vmem:[%s10751_s27 + $0x3f0] sm:$0xff] %v8641_v18  ;;  %8668 = vpow2.f32 %v6079_v60  ;;  %v11045_v21 = vpop.f32.mrf.mxu1 }
 0x969   : > { %v8645_v56 = vpop.eup %8644  ;;  %6807 = vst [vmem:[%s10751_s27 + $0x400] sm:$0xff] %v8643_v26  ;;  %8670 = vpow2.f32 %v6083_v19  ;;  %v5172_v19 = vpop.f32.mrf.mxu0  ;;  %v5727_v26 = vsub.f32 0.0, %v4974_v42 }
 0x96a   : > { %v8647_v34 = vpop.eup %8646  ;;  %6806 = vst [vmem:[%s10751_s27 + $0x3f8] sm:$0xff] %v8645_v56  ;;  %8672 = vpow2.f32 %v6091_v25  ;;  %v11051_v25 = vpop.f32.mrf.mxu1  ;;  %v5169_v56 = vadd.f32 %v5168_v29, %v10702_v0 }
 0x96b   : > { %v8649_v30 = vpop.eup %8648  ;;  %6808 = vst [vmem:[%s10751_s27 + $0x408] sm:$0xff] %v8647_v34  ;;  %8674 = vpow2.f32 %v6095_v9  ;;  %v4976_v9 = vadd.f32 %v10930_v40, %v10700_v23 }
 0x96c   : > { %v8651_v44 = vpop.eup %8650  ;;  %6812 = vst [vmem:[%s10751_s27 + $0x428] sm:$0xff] %v8649_v30  ;;  %8676 = vpow2.f32 %v6093_v47  ;;  %v5729_v47 = vsub.f32 0.0, %v5167_v62  ;;  %v11058_v30 = vpop.f32.mrf.mxu1  ;;  %v4984_v62 = vadd.f32 %v10944_v7, %v10696_v53 }
 0x96d   : > { %v8653_v22 = vpop.eup %8652  ;;  %6814 = vst [vmem:[%s10751_s27 + $0x438] sm:$0xff] %v8651_v44  ;;  %8678 = vpow2.f32 %v6097_v48  ;;  %v5176_v48 = vpop.f32.mrf.mxu0  ;;  %v5728_v44 = vsub.f32 0.0, %v4976_v9 }
 0x96e   : > { %v8655_v49 = vpop.eup %8654  ;;  %6813 = vst [vmem:[%s10751_s27 + $0x430] sm:$0xff] %v8653_v22  ;;  %8680 = vpow2.f32 %v6105_v46  ;;  %v4978_v46 = vadd.f32 %v10933_v4, %v10696_v53  ;;  %v6123_v29 = vmul.f32 1.442695, %v5729_v47  ;;  %v4980_v4 = vadd.f32 %v10941_v51, %v10700_v23 }
 0x96f   : > { %v8657_v50 = vpop.eup %8656  ;;  %v6371_v8 = vadd.f32 1.0, %v8655_v49  ;;  %8682 = vpow2.f32 %v6109_v36  ;;  %v6119_v49 = vmul.f32 1.442695, %v5727_v26  ;;  %v6121_v51 = vmul.f32 1.442695, %v5728_v44 }
 0x970   : > { %v8659_v61 = vpop.eup %8658  ;;  %v6373_v11 = vadd.f32 1.0, %v8657_v50  ;;  %8684 = vpow2.f32 %v6107_v35  ;;  %v5171_v35 = vadd.f32 %v5170_v3, %v10698_v24  ;;  %v5173_v3 = vadd.f32 %v5172_v19, %v10702_v0 }
 0x971   : > { %v8661_v38 = vpop.eup %8660  ;;  %8686 = vrcp.f32 %v6371_v8  ;;  %v6372_v32 = vadd.f32 1.0, %v8659_v61  ;;  %v5730_v61 = vsub.f32 0.0, %v5169_v56  ;;  %v4990_v44 = vadd.f32 %v10973_v12, %v10700_v23 }
 0x972   : > { %v8663_v45 = vpop.eup %8662  ;;  %8688 = vrcp.f32 %v6373_v11  ;;  %v6374_v58 = vadd.f32 1.0, %v8661_v38  ;;  %v5178_v11 = vpop.f32.mrf.mxu0  ;;  %v5736_v42 = vsub.f32 0.0, %v5171_v35 }
 0x973   : > { %v8665_v60 = vpop.eup %8664  ;;  %6815 = vst [vmem:[%s10751_s27 + $0x440] sm:$0xff] %v8663_v45  ;;  %8690 = vrcp.f32 %v6372_v32  ;;  %v11064_v45 = vpop.f32.mrf.mxu1  ;;  %v6125_v19 = vmul.f32 1.442695, %v5730_v61 }
 0x974   : > { %v8667_v14 = vpop.eup %8666  ;;  %8692 = vrcp.f32 %v6374_v58  ;;  %v6378_v13 = vadd.f32 1.0, %v8665_v60 }
 0x975   : > { %v8669_v43 = vpop.eup %8668  ;;  %v6380_v52 = vadd.f32 1.0, %v8667_v14  ;;  %8694 = vpow2.f32 %v6111_v63  ;;  %v5734_v63 = vsub.f32 0.0, %v4978_v46  ;;  %v11075_v26 = vpop.f32.mrf.mxu1 }
 0x976   : > { %v8671_v31 = vpop.eup %8670  ;;  %8696 = vrcp.f32 %v6378_v13  ;;  %v6379_v18 = vadd.f32 1.0, %v8669_v43  ;;  %v5177_v13 = vadd.f32 %v5176_v48, %v10698_v24 }
 0x977   : > { %v8673_v37 = vpop.eup %8672  ;;  %8698 = vrcp.f32 %v6380_v52  ;;  %v6381_v59 = vadd.f32 1.0, %v8671_v31  ;;  %v5735_v52 = vsub.f32 0.0, %v4980_v4  ;;  %v4986_v31 = vadd.f32 %v10954_v2, %v10700_v23 }
 0x978   : > { %v8675_v20 = vpop.eup %8674  ;;  %8700 = vrcp.f32 %v6379_v18  ;;  %v6385_v16 = vadd.f32 1.0, %v8673_v37  ;;  %v5180_v18 = vpop.f32.mrf.mxu0  ;;  %v6133_v7 = vmul.f32 1.442695, %v5734_v63  ;;  %v5737_v37 = vsub.f32 0.0, %v5173_v3 }
 0x979   : > { %v8677_v39 = vpop.eup %8676  ;;  %8702 = vrcp.f32 %v6381_v59  ;;  %v6387_v34 = vadd.f32 1.0, %v8675_v20  ;;  %v5179_v59 = vadd.f32 %v5178_v11, %v10702_v0  ;;  %v6137_v20 = vmul.f32 1.442695, %v5736_v42 }
 0x97a   : > { %v8679_v40 = vpop.eup %8678  ;;  %8704 = vrcp.f32 %v6385_v16  ;;  %v6386_v36 = vadd.f32 1.0, %v8677_v39  ;;  %v5741_v16 = vsub.f32 0.0, %v4984_v62  ;;  %v4988_v2 = vadd.f32 %v10963_v41, %v10696_v53  ;;  %v5182_v35 = vpop.f32.mrf.mxu0 }
 0x97b   : > { %v8681_v22 = vpop.eup %8680  ;;  %8706 = vrcp.f32 %v6387_v34  ;;  %v6388_v55 = vadd.f32 1.0, %v8679_v40  ;;  %v5743_v39 = vsub.f32 0.0, %v5177_v13  ;;  %v5181_v34 = vadd.f32 %v5180_v18, %v10698_v24 }
 0x97c   : > { %v8683_v50 = vpop.eup %8682  ;;  %8708 = vrcp.f32 %v6386_v36  ;;  %v6392_v8 = vadd.f32 1.0, %v8681_v22  ;;  %v6135_v40 = vmul.f32 1.442695, %v5735_v52  ;;  %v5742_v36 = vsub.f32 0.0, %v4986_v31  ;;  %v5186_v63 = vpop.f32.mrf.mxu0 }
 0x97d   : > { %v8685_v38 = vpop.eup %8684  ;;  %8710 = vrcp.f32 %v6388_v55  ;;  %v6394_v32 = vadd.f32 1.0, %v8683_v50  ;;  %v6139_v41 = vmul.f32 1.442695, %v5737_v37  ;;  %v5744_v55 = vsub.f32 0.0, %v5179_v59 }
 0x97e   : > { %v8687_v58 = vpop.eup %8686  ;;  %8712 = vrcp.f32 %v6392_v8  ;;  %v6393_v60 = vadd.f32 1.0, %v8685_v38  ;;  %v6147_v50 = vmul.f32 1.442695, %v5741_v16  ;;  %v5748_v8 = vsub.f32 0.0, %v4988_v2  ;;  %v5188_v52 = vpop.f32.mrf.mxu0 }
 0x97f   : > { %v8689_v14 = vpop.eup %8688  ;;  %6819 = vst [vmem:[%s10751_s27 + $0x460] sm:$0xff] %v8687_v58  ;;  %8714 = vrcp.f32 %v6394_v32  ;;  %v6151_v12 = vmul.f32 1.442695, %v5743_v39  ;;  %v5750_v4 = vsub.f32 0.0, %v5181_v34  ;;  %v6149_v38 = vmul.f32 1.442695, %v5742_v36 }
 0x980   : > { %v8691_v43 = vpop.eup %8690  ;;  %6821 = vst [vmem:[%s10751_s27 + $0x470] sm:$0xff] %v8689_v14  ;;  %8716 = vrcp.f32 %v6393_v60  ;;  %v5749_v32 = vsub.f32 0.0, %v4990_v44  ;;  %v6153_v58 = vmul.f32 1.442695, %v5744_v55  ;;  %v5183_v60 = vadd.f32 %v5182_v35, %v10702_v0  ;;  %v5190_v16 = vpop.f32.mrf.mxu0 }
 0x981   : > { %v8693_v9 = vpop.eup %8692  ;;  %6820 = vst [vmem:[%s10751_s27 + $0x468] sm:$0xff] %v8691_v43  ;;  %8718 = vpow2.f32 %v6119_v49  ;;  %v11085_v49 = vpop.f32.mrf.mxu1  ;;  %v6161_v14 = vmul.f32 1.442695, %v5748_v8  ;;  %v6165_v13 = vmul.f32 1.442695, %v5750_v4  ;;  %v5187_v44 = vadd.f32 %v5186_v63, %v10698_v24 }
 0x982   : > { %v8695_v47 = vpop.eup %8694  ;;  %6822 = vst [vmem:[%s10751_s27 + $0x478] sm:$0xff] %v8693_v9  ;;  %8720 = vpow2.f32 %v6123_v29  ;;  %v5751_v18 = vsub.f32 0.0, %v5183_v60 }
 0x983   : > { %v8697_v56 = vpop.eup %8696  ;;  %v6395_v48 = vadd.f32 1.0, %v8695_v47  ;;  %8722 = vpow2.f32 %v6121_v51  ;;  %v11092_v42 = vpop.f32.mrf.mxu1 }
 0x984   : > { %v8699_v46 = vpop.eup %8698  ;;  %6826 = vst [vmem:[%s10751_s27 + $0x498] sm:$0xff] %v8697_v56  ;;  %8724 = vpow2.f32 %v6125_v19  ;;  %v6163_v19 = vmul.f32 1.442695, %v5749_v32 }
 0x985   : > { %v8701_v22 = vpop.eup %8700  ;;  %6828 = vst [vmem:[%s10751_s27 + $0x4a8] sm:$0xff] %v8699_v46  ;;  %8726 = vrcp.f32 %v6395_v48  ;;  %v11098_v9 = vpop.f32.mrf.mxu1  ;;  %v6167_v48 = vmul.f32 1.442695, %v5751_v18 }
 0x986   : > { %v8703_v29 = vpop.eup %8702  ;;  %6827 = vst [vmem:[%s10751_s27 + $0x4a0] sm:$0xff] %v8701_v22  ;;  %8728 = vpow2.f32 %v6133_v7 }
 0x987   : > { %v8705_v61 = vpop.eup %8704  ;;  %6829 = vst [vmem:[%s10751_s27 + $0x4b0] sm:$0xff] %v8703_v29  ;;  %8730 = vpow2.f32 %v6137_v20  ;;  %v11101_v39 = vpop.f32.mrf.mxu1 }
 0x988   : > { %v8707_v11 = vpop.eup %8706  ;;  %6833 = vst [vmem:[%s10751_s27 + $0x4d0] sm:$0xff] %v8705_v61  ;;  %8732 = vpow2.f32 %v6135_v40  ;;  %v4994_v40 = vadd.f32 %v10980_v57, %v10696_v53 }
 0x989   : > { %v8709_v3 = vpop.eup %8708  ;;  %6835 = vst [vmem:[%s10751_s27 + $0x4e0] sm:$0xff] %v8707_v11  ;;  %8734 = vpow2.f32 %v6139_v41  ;;  %v5192_v41 = vpop.f32.mrf.mxu0  ;;  %v5757_v11 = vsub.f32 0.0, %v5187_v44  ;;  %v5004_v44 = vadd.f32 %v11002_v1, %v10696_v53 }
 0x98a   : > { %v8711_v62 = vpop.eup %8710  ;;  %6834 = vst [vmem:[%s10751_s27 + $0x4d8] sm:$0xff] %v8709_v3  ;;  %8736 = vpow2.f32 %v6147_v50  ;;  %v11107_v50 = vpop.f32.mrf.mxu1  ;;  %v5189_v3 = vadd.f32 %v5188_v52, %v10702_v0 }
 0x98b   : > { %v8713_v51 = vpop.eup %8712  ;;  %6836 = vst [vmem:[%s10751_s27 + $0x4e8] sm:$0xff] %v8711_v62  ;;  %8738 = vpow2.f32 %v6151_v12  ;;  %v5755_v12 = vsub.f32 0.0, %v4994_v40 }
 0x98c   : > { %v8715_v43 = vpop.eup %8714  ;;  %6840 = vst [vmem:[%s10751_s27 + $0x508] sm:$0xff] %v8713_v51  ;;  %8740 = vpow2.f32 %v6149_v38  ;;  %v4996_v38 = vadd.f32 %v10986_v27, %v10700_v23  ;;  %v11114_v51 = vpop.f32.mrf.mxu1  ;;  %v5191_v27 = vadd.f32 %v5190_v16, %v10698_v24  ;;  %v5193_v16 = vadd.f32 %v5192_v41, %v10702_v0 }
 0x98d   : > { %v8717_v31 = vpop.eup %8716  ;;  %6842 = vst [vmem:[%s10751_s27 + $0x518] sm:$0xff] %v8715_v43  ;;  %8742 = vpow2.f32 %v6153_v58  ;;  %v5196_v58 = vpop.f32.mrf.mxu0 }
 0x98e   : > { %v8719_v7 = vpop.eup %8718  ;;  %6841 = vst [vmem:[%s10751_s27 + $0x510] sm:$0xff] %v8717_v31  ;;  %8744 = vpow2.f32 %v6161_v14  ;;  %v4998_v14 = vadd.f32 %v10989_v10, %v10696_v53  ;;  %v5756_v52 = vsub.f32 0.0, %v4996_v38  ;;  %v5000_v10 = vadd.f32 %v10995_v28, %v10700_v23 }
 0x98f   : > { %v8721_v37 = vpop.eup %8720  ;;  %v6399_v59 = vadd.f32 1.0, %v8719_v7  ;;  %8746 = vpow2.f32 %v6165_v13  ;;  %v6179_v7 = vmul.f32 1.442695, %v5757_v11 }
 0x990   : > { %v8723_v47 = vpop.eup %8722  ;;  %v6401_v20 = vadd.f32 1.0, %v8721_v37  ;;  %8748 = vpow2.f32 %v6163_v19  ;;  %v6175_v19 = vmul.f32 1.442695, %v5755_v12  ;;  %v6177_v28 = vmul.f32 1.442695, %v5756_v52 }
 0x991   : > { %v8725_v2 = vpop.eup %8724  ;;  %8750 = vrcp.f32 %v6399_v59  ;;  %v6400_v56 = vadd.f32 1.0, %v8723_v47  ;;  %v5758_v47 = vsub.f32 0.0, %v5189_v3 }
 0x992   : > { %v8727_v34 = vpop.eup %8726  ;;  %8752 = vrcp.f32 %v6401_v20  ;;  %v6402_v46 = vadd.f32 1.0, %v8725_v2  ;;  %v5198_v20 = vpop.f32.mrf.mxu0 }
 0x993   : > { %v8729_v36 = vpop.eup %8728  ;;  %6843 = vst [vmem:[%s10751_s27 + $0x520] sm:$0xff] %v8727_v34  ;;  %8754 = vrcp.f32 %v6400_v56  ;;  %v11120_v34 = vpop.f32.mrf.mxu1  ;;  %v6181_v41 = vmul.f32 1.442695, %v5758_v47 }
 0x994   : > { %v8731_v35 = vpop.eup %8730  ;;  %8756 = vrcp.f32 %v6402_v46  ;;  %v6406_v22 = vadd.f32 1.0, %v8729_v36  ;;  %v5764_v36 = vsub.f32 0.0, %v5191_v27 }
 0x995   : > { %v8733_v55 = vpop.eup %8732  ;;  %v6408_v29 = vadd.f32 1.0, %v8731_v35  ;;  %8758 = vpow2.f32 %v6167_v48  ;;  %v5762_v48 = vsub.f32 0.0, %v4998_v14  ;;  %v11131_v11 = vpop.f32.mrf.mxu1 }
 0x996   : > { %v8735_v8 = vpop.eup %8734  ;;  %8760 = vrcp.f32 %v6406_v22  ;;  %v6407_v61 = vadd.f32 1.0, %v8733_v55  ;;  %v5197_v22 = vadd.f32 %v5196_v58, %v10698_v24 }
 0x997   : > { %v8737_v4 = vpop.eup %8736  ;;  %8762 = vrcp.f32 %v6408_v29  ;;  %v6409_v57 = vadd.f32 1.0, %v8735_v8  ;;  %v5763_v29 = vsub.f32 0.0, %v5000_v10  ;;  %v5006_v8 = vadd.f32 %v11008_v33, %v10700_v23 }
 0x998   : > { %v8739_v32 = vpop.eup %8738  ;;  %8764 = vrcp.f32 %v6407_v61  ;;  %v6413_v63 = vadd.f32 1.0, %v8737_v4  ;;  %v5200_v61 = vpop.f32.mrf.mxu0  ;;  %v6189_v1 = vmul.f32 1.442695, %v5762_v48  ;;  %v5765_v4 = vsub.f32 0.0, %v5193_v16 }
 0x999   : > { %v8741_v60 = vpop.eup %8740  ;;  %8766 = vrcp.f32 %v6409_v57  ;;  %v6415_v62 = vadd.f32 1.0, %v8739_v32  ;;  %v5199_v57 = vadd.f32 %v5198_v20, %v10702_v0  ;;  %v6193_v32 = vmul.f32 1.442695, %v5764_v36 }
 0x99a   : > { %v8743_v13 = vpop.eup %8742  ;;  %8768 = vrcp.f32 %v6413_v63  ;;  %v6414_v43 = vadd.f32 1.0, %v8741_v60  ;;  %v5769_v63 = vsub.f32 0.0, %v5004_v44  ;;  %v5008_v33 = vadd.f32 %v11019_v17, %v10696_v53  ;;  %v5202_v27 = vpop.f32.mrf.mxu0 }
 0x99b   : > { %v8745_v31 = vpop.eup %8744  ;;  %8770 = vrcp.f32 %v6415_v62  ;;  %v6416_v18 = vadd.f32 1.0, %v8743_v13  ;;  %v5771_v60 = vsub.f32 0.0, %v5197_v22  ;;  %v5201_v62 = vadd.f32 %v5200_v61, %v10698_v24 }
 0x99c   : > { %v8747_v37 = vpop.eup %8746  ;;  %8772 = vrcp.f32 %v6414_v43  ;;  %v6420_v59 = vadd.f32 1.0, %v8745_v31  ;;  %v6191_v13 = vmul.f32 1.442695, %v5763_v29  ;;  %v5770_v43 = vsub.f32 0.0, %v5006_v8  ;;  %v8135_v20 = vpop.f32.mrf.mxu0 }
 0x99d   : > { %v8749_v2 = vpop.eup %8748  ;;  %8774 = vrcp.f32 %v6416_v18  ;;  %v6422_v56 = vadd.f32 1.0, %v8747_v37  ;;  %v6195_v53 = vmul.f32 1.442695, %v5765_v4  ;;  %v5772_v17 = vsub.f32 0.0, %v5199_v57  ;;  %v11141_v18 = vpop.f32.mrf.mxu1  ;;  %v9232_v4 = vld [vmem:[%s11574_s20] sm:$0x7f] }
 0x99e   : > { %v8751_v46 = vpop.eup %8750  ;;  %8776 = vrcp.f32 %v6420_v59  ;;  %v6421_v40 = vadd.f32 1.0, %v8749_v2  ;;  %v6203_v24 = vmul.f32 1.442695, %v5769_v63  ;;  %v5776_v52 = vsub.f32 0.0, %v5008_v33 }
 0x99f   : > { %v8753_v35 = vpop.eup %8752  ;;  %6847 = vst [vmem:[%s10751_s27 + $0x540] sm:$0xff] %v8751_v46  ;;  %8778 = vrcp.f32 %v6422_v56  ;;  %v6205_v47 = vmul.f32 1.442695, %v5770_v43  ;;  %v6209_v56 = vmul.f32 1.442695, %v5772_v17  ;;  %v5203_v48 = vadd.f32 %v5202_v27, %v10702_v0  ;;  %v11148_v16 = vpop.f32.mrf.mxu1 }
 0x9a0   : > { %v8755_v55 = vpop.eup %8754  ;;  %6849 = vst [vmem:[%s10751_s27 + $0x550] sm:$0xff] %v8753_v35  ;;  %8780 = vrcp.f32 %v6421_v40  ;;  %v6217_v40 = vmul.f32 1.442695, %v5776_v52  ;;  %v4514_v35 = vsub.s32 4, %v10684_v15  ;;  %v4522_v0 = vsub.s32 6, %v10684_v15 }
 0x9a1   : > { %v8757_v12 = vpop.eup %8756  ;;  %6848 = vst [vmem:[%s10751_s27 + $0x548] sm:$0xff] %v8755_v55  ;;  %8782 = vpow2.f32 %v6175_v19  ;;  %v5010_v19 = vadd.f32 %v11029_v5, %v10700_v23  ;;  %v6207_v23 = vmul.f32 1.442695, %v5771_v60  ;;  %v5778_v5 = vsub.f32 0.0, %v5201_v62  ;;  %v5432_v55 = vpop.f32.mrf.mxu0 }
 0x9a2   : > { %v8759_v38 = vpop.eup %8758  ;;  %6850 = vst [vmem:[%s10751_s27 + $0x558] sm:$0xff] %v8757_v12  ;;  %8784 = vpow2.f32 %v6179_v7  ;;  %v5779_v29 = vsub.f32 0.0, %v5203_v48  ;;  %v11156_v8 = vpop.f32.mrf.mxu1  ;;  %v11162_v57 = vrot.slane %v9232_v4, %v4514_v35  ;;  %v11165_v33 = vrot.slane %v9232_v4, %v4522_v0 }
 0x9a3   : > { %v8761_v3 = vpop.eup %8760  ;;  %v6423_v58 = vadd.f32 1.0, %v8759_v38  ;;  %8786 = vpow2.f32 %v6177_v28  ;;  %v5777_v10 = vsub.f32 0.0, %v5010_v19  ;;  %v6221_v44 = vmul.f32 1.442695, %v5778_v5 }
 0x9a4   : > { %v8763_v14 = vpop.eup %8762  ;;  %6854 = vst [vmem:[%s10751_s27 + $0x578] sm:$0xff] %v8761_v3  ;;  %8788 = vpow2.f32 %v6181_v41  ;;  %v4518_v38 = vsub.s32 5, %v10684_v15  ;;  %v8136_v3 = vpop.f32.mrf.mxu0  ;;  %v6223_v62 = vmul.f32 1.442695, %v5779_v29  ;;  %v5240_v15 = vadd.f32 %v11036_v6, %v11162_v57 }
 0x9a5   : > { %v8765_v31 = vpop.eup %8764  ;;  %6856 = vst [vmem:[%s10751_s27 + $0x588] sm:$0xff] %v8763_v14  ;;  %8790 = vrcp.f32 %v6423_v58  ;;  %v6219_v22 = vmul.f32 1.442695, %v5777_v10  ;;  %v11167_v14 = vpop.f32.mrf.mxu1  ;;  %v5441_v17 = vadd.f32 %v8135_v20, %v11165_v33 }
 0x9a6   : > { %v8767_v7 = vpop.eup %8766  ;;  %6855 = vst [vmem:[%s10751_s27 + $0x580] sm:$0xff] %v8765_v31  ;;  %8792 = vpow2.f32 %v6189_v1  ;;  %v11172_v27 = vrot.slane %v9232_v4, %v4518_v38  ;;  %v5563_v10 = vsub.f32 0.0, %v5240_v15 }
 0x9a7   : > { %v8769_v37 = vpop.eup %8768  ;;  %6857 = vst [vmem:[%s10751_s27 + $0x590] sm:$0xff] %v8767_v7  ;;  %8794 = vpow2.f32 %v6193_v32  ;;  %v5435_v7 = vpop.f32.mrf.mxu0  ;;  %v5579_v48 = vsub.f32 0.0, %v5441_v17 }
 0x9a8   : > { %v8771_v59 = vpop.eup %8770  ;;  %6861 = vst [vmem:[%s10751_s27 + $0x5b0] sm:$0xff] %v8769_v37  ;;  %8796 = vpow2.f32 %v6191_v13  ;;  %v11175_v37 = vpop.f32.mrf.mxu1  ;;  %v5791_v29 = vmul.f32 1.442695, %v5563_v10 }
 0x9a9   : > { %v8773_v2 = vpop.eup %8772  ;;  %6863 = vst [vmem:[%s10751_s27 + $0x5c0] sm:$0xff] %v8771_v59  ;;  %8798 = vpow2.f32 %v6195_v53  ;;  %v5433_v59 = vadd.f32 %v5432_v55, %v11165_v33  ;;  %v5444_v55 = vadd.f32 %v8136_v3, %v11165_v33  ;;  %v5823_v4 = vmul.f32 1.442695, %v5579_v48 }
 0x9aa   : > { %v8775_v46 = vpop.eup %8774  ;;  %6862 = vst [vmem:[%s10751_s27 + $0x5b8] sm:$0xff] %v8773_v2  ;;  %8800 = vpow2.f32 %v6203_v24  ;;  %v5242_v2 = vadd.f32 %v11042_v54, %v11172_v27  ;;  %v11182_v35 = vpop.f32.mrf.mxu1  ;;  %v5436_v3 = vadd.f32 %v5435_v7, %v11165_v33 }
 0x9ab   : > { %v8777_v36 = vpop.eup %8776  ;;  %6864 = vst [vmem:[%s10751_s27 + $0x5c8] sm:$0xff] %v8775_v46  ;;  %8802 = vpow2.f32 %v6207_v23  ;;  %v8139_v46 = vpop.f32.mrf.mxu0  ;;  %v5565_v0 = vsub.f32 0.0, %v5433_v59 }
 0x9ac   : > { %v8779_v28 = vpop.eup %8778  ;;  %6868 = vst [vmem:[%s10751_s27 + $0x5e8] sm:$0xff] %v8777_v36  ;;  %8804 = vpow2.f32 %v6205_v47 }
 0x9ad   : > { %v8781_v41 = vpop.eup %8780  ;;  %6870 = vst [vmem:[%s10751_s27 + $0x5f8] sm:$0xff] %v8779_v28  ;;  %8806 = vpow2.f32 %v6209_v56  ;;  %v5448_v38 = vpop.f32.mrf.mxu0  ;;  %v5795_v17 = vmul.f32 1.442695, %v5565_v0 }
 0x9ae   : > { %v8783_v61 = vpop.eup %8782  ;;  %6869 = vst [vmem:[%s10751_s27 + $0x5f0] sm:$0xff] %v8781_v41  ;;  %8808 = vpow2.f32 %v6217_v40  ;;  %v5449_v59 = vadd.f32 %v5448_v38, %v11165_v33 }
 0x9af   : > { %v8785_v12 = vpop.eup %8784  ;;  %v6427_v1 = vadd.f32 1.0, %v8783_v61  ;;  %8810 = vpow2.f32 %v6221_v44  ;;  %v5244_v44 = vadd.f32 %v11045_v21, %v11162_v57  ;;  %v5564_v61 = vsub.f32 0.0, %v5242_v2 }
 0x9b0   : > { %v8787_v32 = vpop.eup %8786  ;;  %v6429_v63 = vadd.f32 1.0, %v8785_v12  ;;  %8812 = vpow2.f32 %v6219_v22  ;;  %v5246_v21 = vadd.f32 %v11051_v25, %v11172_v27 }
 0x9b1   : > { %v8789_v58 = vpop.eup %8788  ;;  %8814 = vrcp.f32 %v6427_v1  ;;  %v6428_v60 = vadd.f32 1.0, %v8787_v32  ;;  %v5793_v25 = vmul.f32 1.442695, %v5564_v61 }
 0x9b2   : > { %v8791_v13 = vpop.eup %8790  ;;  %8816 = vrcp.f32 %v6429_v63  ;;  %v6430_v43 = vadd.f32 1.0, %v8789_v58  ;;  %v5570_v58 = vsub.f32 0.0, %v5244_v44  ;;  %v5571_v7 = vsub.f32 0.0, %v5246_v21 }
 0x9b3   : > { %v8793_v19 = vpop.eup %8792  ;;  %6871 = vst [vmem:[%s10751_s27 + $0x600] sm:$0xff] %v8791_v13  ;;  %8818 = vrcp.f32 %v6428_v60  ;;  %v11188_v60 = vpop.f32.mrf.mxu1 }
 0x9b4   : > { %v8795_v31 = vpop.eup %8794  ;;  %8820 = vrcp.f32 %v6430_v43  ;;  %v6434_v53 = vadd.f32 1.0, %v8793_v19  ;;  %v5586_v43 = vsub.f32 0.0, %v5444_v55  ;;  %v5250_v19 = vadd.f32 %v11058_v30, %v11162_v57 }
 0x9b5   : > { %v8797_v24 = vpop.eup %8796  ;;  %v6436_v52 = vadd.f32 1.0, %v8795_v31  ;;  %8822 = vpow2.f32 %v6223_v62  ;;  %v5457_v31 = vadd.f32 %v8139_v46, %v11165_v33  ;;  %v5805_v30 = vmul.f32 1.442695, %v5570_v58 }
 0x9b6   : > { %v8799_v23 = vpop.eup %8798  ;;  %8824 = vrcp.f32 %v6434_v53  ;;  %v6435_v5 = vadd.f32 1.0, %v8797_v24  ;;  %v5252_v24 = vadd.f32 %v11064_v45, %v11172_v27  ;;  %v5837_v10 = vmul.f32 1.442695, %v5586_v43 }
 0x9b7   : > { %v8801_v47 = vpop.eup %8800  ;;  %8826 = vrcp.f32 %v6436_v52  ;;  %v6437_v6 = vadd.f32 1.0, %v8799_v23  ;;  %v8140_v52 = vpop.f32.mrf.mxu0  ;;  %v5577_v2 = vsub.f32 0.0, %v5250_v19  ;;  %v5254_v45 = vadd.f32 %v11075_v26, %v11162_v57 }
 0x9b8   : > { %v8803_v56 = vpop.eup %8802  ;;  %8828 = vrcp.f32 %v6435_v5  ;;  %v6441_v20 = vadd.f32 1.0, %v8801_v47  ;;  %v5572_v5 = vsub.f32 0.0, %v5436_v3  ;;  %v11199_v47 = vpop.f32.mrf.mxu1  ;;  %v5607_v48 = vsub.f32 0.0, %v5457_v31 }
 0x9b9   : > { %v8805_v40 = vpop.eup %8804  ;;  %8830 = vrcp.f32 %v6437_v6  ;;  %v6443_v36 = vadd.f32 1.0, %v8803_v56  ;;  %v5460_v46 = vadd.f32 %v8140_v52, %v11165_v33  ;;  %v5578_v44 = vsub.f32 0.0, %v5252_v24 }
 0x9ba   : > { %v8807_v28 = vpop.eup %8806  ;;  %8832 = vrcp.f32 %v6441_v20  ;;  %v6442_v22 = vadd.f32 1.0, %v8805_v40  ;;  %v5809_v26 = vmul.f32 1.442695, %v5572_v5  ;;  %v5593_v55 = vsub.f32 0.0, %v5449_v59 }
 0x9bb   : > { %v8809_v54 = vpop.eup %8808  ;;  %8834 = vrcp.f32 %v6443_v36  ;;  %v6444_v41 = vadd.f32 1.0, %v8807_v28  ;;  %v5807_v36 = vmul.f32 1.442695, %v5571_v7  ;;  %v5256_v28 = vadd.f32 %v11085_v49, %v11172_v27 }
 0x9bc   : > { %v8811_v12 = vpop.eup %8810  ;;  %8836 = vrcp.f32 %v6442_v22  ;;  %v6448_v1 = vadd.f32 1.0, %v8809_v54  ;;  %v5451_v22 = vpop.f32.mrf.mxu0  ;;  %v5584_v61 = vsub.f32 0.0, %v5254_v45  ;;  %v5879_v49 = vmul.f32 1.442695, %v5607_v48 }
 0x9bd   : > { %v8813_v32 = vpop.eup %8812  ;;  %8838 = vrcp.f32 %v6444_v41  ;;  %v6450_v63 = vadd.f32 1.0, %v8811_v12  ;;  %v11209_v54 = vpop.f32.mrf.mxu1  ;;  %v5821_v21 = vmul.f32 1.442695, %v5578_v44  ;;  %v5585_v38 = vsub.f32 0.0, %v5256_v28 }
 0x9be   : > { %v8815_v62 = vpop.eup %8814  ;;  %8840 = vrcp.f32 %v6448_v1  ;;  %v6449_v13 = vadd.f32 1.0, %v8813_v32  ;;  %v5614_v1 = vsub.f32 0.0, %v5460_v46  ;;  %v8143_v32 = vpop.f32.mrf.mxu0  ;;  %v5851_v58 = vmul.f32 1.442695, %v5593_v55 }
 0x9bf   : > { %v8817_v15 = vpop.eup %8816  ;;  %6875 = vst [vmem:[%s10751_s27 + $0x620] sm:$0xff] %v8815_v62  ;;  %8842 = vrcp.f32 %v6450_v63  ;;  %v5452_v3 = vadd.f32 %v5451_v22, %v11165_v33  ;;  %v11216_v62 = vpop.f32.mrf.mxu1  ;;  %v5833_v43 = vmul.f32 1.442695, %v5584_v61  ;;  %v5835_v31 = vmul.f32 1.442695, %v5585_v38 }
 0x9c0   : > { %v8819_v53 = vpop.eup %8818  ;;  %6877 = vst [vmem:[%s10751_s27 + $0x630] sm:$0xff] %v8817_v15  ;;  %8844 = vrcp.f32 %v6449_v13  ;;  %v5893_v15 = vmul.f32 1.442695, %v5614_v1  ;;  %v5260_v46 = vadd.f32 %v11092_v42, %v11162_v57  ;;  %v5262_v1 = vadd.f32 %v11098_v9, %v11172_v27 }
 0x9c1   : > { %v8821_v23 = vpop.eup %8820  ;;  %6876 = vst [vmem:[%s10751_s27 + $0x628] sm:$0xff] %v8819_v53  ;;  %8846 = vpow2.f32 %v5791_v29  ;;  %v5819_v29 = vmul.f32 1.442695, %v5577_v2  ;;  %v5464_v53 = vpop.f32.mrf.mxu0  ;;  %v5600_v7 = vsub.f32 0.0, %v5452_v3  ;;  %v5264_v3 = vadd.f32 %v11101_v39, %v11162_v57 }
 0x9c2   : > { %v8823_v6 = vpop.eup %8822  ;;  %6878 = vst [vmem:[%s10751_s27 + $0x638] sm:$0xff] %v8821_v23  ;;  %8848 = vpow2.f32 %v5823_v4  ;;  %v11222_v24 = vpop.f32.mrf.mxu1  ;;  %v5591_v61 = vsub.f32 0.0, %v5260_v46  ;;  %v5465_v38 = vadd.f32 %v5464_v53, %v11165_v33  ;;  %v5592_v53 = vsub.f32 0.0, %v5262_v1 }
 0x9c3   : > { %v8825_v56 = vpop.eup %8824  ;;  %v6451_v20 = vadd.f32 1.0, %v8823_v6  ;;  %8850 = vpow2.f32 %v5793_v25  ;;  %v8144_v6 = vpop.f32.mrf.mxu0  ;;  %v5865_v45 = vmul.f32 1.442695, %v5600_v7  ;;  %v5266_v39 = vadd.f32 %v11107_v50, %v11172_v27 }
 0x9c4   : > { %v8827_v40 = vpop.eup %8826  ;;  %6882 = vst [vmem:[%s10751_s27 + $0x658] sm:$0xff] %v8825_v56  ;;  %8852 = vpow2.f32 %v5795_v17  ;;  %v11225_v56 = vpop.f32.mrf.mxu1  ;;  %v5476_v9 = vadd.f32 %v8144_v6, %v11165_v33  ;;  %v5270_v46 = vadd.f32 %v11114_v51, %v11162_v57  ;;  %v5849_v50 = vmul.f32 1.442695, %v5592_v53 }
 0x9c5   : > { %v8829_v0 = vpop.eup %8828  ;;  %6884 = vst [vmem:[%s10751_s27 + $0x668] sm:$0xff] %v8827_v40  ;;  %8854 = vrcp.f32 %v6451_v20  ;;  %v5467_v22 = vpop.f32.mrf.mxu0 }
 0x9c6   : > { %v8831_v41 = vpop.eup %8830  ;;  %6883 = vst [vmem:[%s10751_s27 + $0x660] sm:$0xff] %v8829_v0  ;;  %8856 = vpow2.f32 %v5805_v30  ;;  %v11231_v55 = vpop.f32.mrf.mxu1  ;;  %v5468_v6 = vadd.f32 %v5467_v22, %v11165_v33  ;;  %v5599_v22 = vsub.f32 0.0, %v5266_v39  ;;  %v5605_v1 = vsub.f32 0.0, %v5270_v46 }
 0x9c7   : > { %v8833_v12 = vpop.eup %8832  ;;  %6885 = vst [vmem:[%s10751_s27 + $0x670] sm:$0xff] %v8831_v41  ;;  %8858 = vpow2.f32 %v5837_v10 }
 0x9c8   : > { %v8835_v4 = vpop.eup %8834  ;;  %6889 = vst [vmem:[%s10751_s27 + $0x690] sm:$0xff] %v8833_v12  ;;  %8860 = vpow2.f32 %v5807_v36  ;;  %v5473_v36 = vadd.f32 %v8143_v32, %v11165_v33  ;;  %v8147_v32 = vpop.f32.mrf.mxu0 }
 0x9c9   : > { %v8837_v63 = vpop.eup %8836  ;;  %6891 = vst [vmem:[%s10751_s27 + $0x6a0] sm:$0xff] %v8835_v4  ;;  %8862 = vpow2.f32 %v5809_v26 }
 0x9ca   : > { %v8839_v13 = vpop.eup %8838  ;;  %6890 = vst [vmem:[%s10751_s27 + $0x698] sm:$0xff] %v8837_v63  ;;  %8864 = vpow2.f32 %v5819_v29 }
 0x9cb   : > { %v8841_v19 = vpop.eup %8840  ;;  %6892 = vst [vmem:[%s10751_s27 + $0x6a8] sm:$0xff] %v8839_v13  ;;  %8866 = vpow2.f32 %v5879_v49  ;;  %v5635_v49 = vsub.f32 0.0, %v5473_v36  ;;  %v11238_v13 = vpop.f32.mrf.mxu1  ;;  %v5489_v36 = vadd.f32 %v8147_v32, %v11165_v33 }
 0x9cc   : > { %v8843_v25 = vpop.eup %8842  ;;  %6896 = vst [vmem:[%s10751_s27 + $0x6c8] sm:$0xff] %v8841_v19  ;;  %8868 = vpow2.f32 %v5821_v21 }
 0x9cd   : > { %v8845_v17 = vpop.eup %8844  ;;  %6898 = vst [vmem:[%s10751_s27 + $0x6d8] sm:$0xff] %v8843_v25  ;;  %8870 = vpow2.f32 %v5851_v58 }
 0x9ce   : > { %v8847_v52 = vpop.eup %8846  ;;  %6897 = vst [vmem:[%s10751_s27 + $0x6d0] sm:$0xff] %v8845_v17  ;;  %8872 = vpow2.f32 %v5833_v43  ;;  %v5935_v17 = vmul.f32 1.442695, %v5635_v49 }
 0x9cf   : > { %v8849_v23 = vpop.eup %8848  ;;  %v6235_v30 = vadd.f32 1.0, %v8847_v52  ;;  %8874 = vpow2.f32 %v5893_v15  ;;  %v5847_v15 = vmul.f32 1.442695, %v5591_v61 }
 0x9d0   : > { %v8851_v5 = vpop.eup %8850  ;;  %v6251_v59 = vadd.f32 1.0, %v8849_v23  ;;  %8876 = vpow2.f32 %v5835_v31  ;;  %v5621_v23 = vsub.f32 0.0, %v5465_v38  ;;  %v5663_v38 = vsub.f32 0.0, %v5489_v36 }
 0x9d1   : > { %v8853_v10 = vpop.eup %8852  ;;  %8878 = vrcp.f32 %v6235_v30  ;;  %v6236_v2 = vadd.f32 1.0, %v8851_v5  ;;  %v5480_v30 = vpop.f32.mrf.mxu0 }
 0x9d2   : > { %v8855_v20 = vpop.eup %8854  ;;  %8880 = vrcp.f32 %v6251_v59  ;;  %v6237_v48 = vadd.f32 1.0, %v8853_v10  ;;  %v5598_v10 = vsub.f32 0.0, %v5264_v3  ;;  %v5481_v61 = vadd.f32 %v5480_v30, %v11165_v33 }
 0x9d3   : > { %v8857_v40 = vpop.eup %8856  ;;  %6899 = vst [vmem:[%s10751_s27 + $0x6e0] sm:$0xff] %v8855_v20  ;;  %8882 = vrcp.f32 %v6236_v2  ;;  %v11244_v2 = vpop.f32.mrf.mxu1 }
 0x9d4   : > { %v8859_v44 = vpop.eup %8858  ;;  %8884 = vrcp.f32 %v6237_v48  ;;  %v6242_v28 = vadd.f32 1.0, %v8857_v40  ;;  %v5642_v48 = vsub.f32 0.0, %v5476_v9  ;;  %v5861_v51 = vmul.f32 1.442695, %v5598_v10 }
 0x9d5   : > { %v8861_v0 = vpop.eup %8860  ;;  %v6258_v26 = vadd.f32 1.0, %v8859_v44  ;;  %8886 = vpow2.f32 %v5865_v45  ;;  %v5649_v9 = vsub.f32 0.0, %v5481_v61 }
 0x9d6   : > { %v8863_v41 = vpop.eup %8862  ;;  %8888 = vrcp.f32 %v6242_v28  ;;  %v6243_v29 = vadd.f32 1.0, %v8861_v0  ;;  %v5907_v28 = vmul.f32 1.442695, %v5621_v23  ;;  %v5272_v0 = vadd.f32 %v11120_v34, %v11172_v27 }
 0x9d7   : > { %v8865_v12 = vpop.eup %8864  ;;  %8890 = vrcp.f32 %v6258_v26  ;;  %v6244_v42 = vadd.f32 1.0, %v8863_v41  ;;  %v8148_v26 = vpop.f32.mrf.mxu0  ;;  %v5949_v49 = vmul.f32 1.442695, %v5642_v48  ;;  %v5274_v34 = vadd.f32 %v11131_v11, %v11162_v57 }
 0x9d8   : > { %v8867_v4 = vpop.eup %8866  ;;  %8892 = vrcp.f32 %v6243_v29  ;;  %v6249_v21 = vadd.f32 1.0, %v8865_v12  ;;  %v5628_v29 = vsub.f32 0.0, %v5468_v6  ;;  %v11256_v12 = vpop.f32.mrf.mxu1  ;;  %v5492_v32 = vadd.f32 %v8148_v26, %v11165_v33 }
 0x9d9   : > { %v8869_v63 = vpop.eup %8868  ;;  %8894 = vrcp.f32 %v6244_v42  ;;  %v6279_v58 = vadd.f32 1.0, %v8867_v4  ;;  %v5606_v3 = vsub.f32 0.0, %v5272_v0  ;;  %v5612_v53 = vsub.f32 0.0, %v5274_v34 }
 0x9da   : > { %v8871_v43 = vpop.eup %8870  ;;  %8896 = vrcp.f32 %v6249_v21  ;;  %v6250_v19 = vadd.f32 1.0, %v8869_v63  ;;  %v5921_v11 = vmul.f32 1.442695, %v5628_v29  ;;  %v5963_v10 = vmul.f32 1.442695, %v5649_v9 }
 0x9db   : > { %v8873_v25 = vpop.eup %8872  ;;  %8898 = vrcp.f32 %v6279_v58  ;;  %v6265_v31 = vadd.f32 1.0, %v8871_v43  ;;  %v5863_v58 = vmul.f32 1.442695, %v5599_v22  ;;  %v5276_v43 = vadd.f32 %v11141_v18, %v11172_v27 }
 0x9dc   : > { %v8875_v7 = vpop.eup %8874  ;;  %8900 = vrcp.f32 %v6250_v19  ;;  %v6256_v52 = vadd.f32 1.0, %v8873_v25  ;;  %v5483_v19 = vpop.f32.mrf.mxu0  ;;  %v5991_v18 = vmul.f32 1.442695, %v5663_v38  ;;  %v5877_v39 = vmul.f32 1.442695, %v5606_v3 }
 0x9dd   : > { %v8877_v5 = vpop.eup %8876  ;;  %8902 = vrcp.f32 %v6265_v31  ;;  %v6286_v59 = vadd.f32 1.0, %v8875_v7  ;;  %v11268_v25 = vpop.f32.mrf.mxu1  ;;  %v5613_v30 = vsub.f32 0.0, %v5276_v43  ;;  %v5484_v6 = vadd.f32 %v5483_v19, %v11165_v33 }
 0x9de   : > { %v8879_v45 = vpop.eup %8878  ;;  %8904 = vrcp.f32 %v6256_v52  ;;  %v6257_v20 = vadd.f32 1.0, %v8877_v5  ;;  %v5670_v52 = vsub.f32 0.0, %v5492_v32  ;;  %v8151_v5 = vpop.f32.mrf.mxu0  ;;  %v5889_v48 = vmul.f32 1.442695, %v5612_v53 }
 0x9df   : > { %v8881_v40 = vpop.eup %8880  ;;  %6683 = vst [vmem:[%s10751_s27 + $0x20] sm:$0xff] %v8879_v45  ;;  %8906 = vrcp.f32 %v6286_v59  ;;  %v11277_v45 = vpop.f32.mrf.mxu1  ;;  %v5891_v36 = vmul.f32 1.442695, %v5613_v30  ;;  %v5656_v22 = vsub.f32 0.0, %v5484_v6  ;;  %v5505_v43 = vadd.f32 %v8151_v5, %v11165_v33 }
 0x9e0   : > { %v8883_v44 = vpop.eup %8882  ;;  %6699 = vst.msk [vmem:[%s10751_s27 + $0xa0] sm:$0xff] %vm1401_vm0, %v8881_v40  ;;  %8908 = vrcp.f32 %v6257_v20  ;;  %v6005_v40 = vmul.f32 1.442695, %v5670_v52  ;;  %v5282_v53 = vadd.f32 %v11156_v8, %v11172_v27  ;;  %v5284_v6 = vadd.f32 %v11167_v14, %v11162_v57 }
 0x9e1   : > { %v8885_v41 = vpop.eup %8884  ;;  %6684 = vst [vmem:[%s10751_s27 + $0x28] sm:$0xff] %v8883_v44  ;;  %8910 = vpow2.f32 %v5847_v15  ;;  %v5496_v44 = vpop.f32.mrf.mxu0  ;;  %v5977_v34 = vmul.f32 1.442695, %v5656_v22  ;;  %v5691_v30 = vsub.f32 0.0, %v5505_v43  ;;  %v5286_v14 = vadd.f32 %v11175_v37, %v11172_v27 }
 0x9e2   : > { %v8887_v42 = vpop.eup %8886  ;;  %6685 = vst.msk [vmem:[%s10751_s27 + $0x30] sm:$0xff] %vm1401_vm0, %v8885_v41  ;;  %8912 = vpow2.f32 %v5935_v17  ;;  %v5875_v17 = vmul.f32 1.442695, %v5605_v1  ;;  %v11285_v0 = vpop.f32.mrf.mxu1  ;;  %v5497_v52 = vadd.f32 %v5496_v44, %v11165_v33 }
 0x9e3   : > { %v8889_v4 = vpop.eup %8888  ;;  %v6272_v21 = vadd.f32 1.0, %v8887_v42  ;;  %8914 = vpow2.f32 %v5849_v50  ;;  %v8152_v42 = vpop.f32.mrf.mxu0 }
 0x9e4   : > { %v8891_v63 = vpop.eup %8890  ;;  %6690 = vst [vmem:[%s10751_s27 + $0x58] sm:$0xff] %v8889_v4  ;;  %8916 = vpow2.f32 %v5907_v28  ;;  %v11288_v4 = vpop.f32.mrf.mxu1 }
 0x9e5   : > { %v8893_v15 = vpop.eup %8892  ;;  %6706 = vst.msk [vmem:[%s10751_s27 + $0xd8] sm:$0xff] %vm1401_vm0, %v8891_v63  ;;  %8918 = vrcp.f32 %v6272_v21  ;;  %v5280_v63 = vadd.f32 %v11148_v16, %v11162_v57  ;;  %v5499_v19 = vpop.f32.mrf.mxu0 }
 0x9e6   : > { %v8895_v31 = vpop.eup %8894  ;;  %6691 = vst [vmem:[%s10751_s27 + $0x60] sm:$0xff] %v8893_v15  ;;  %8920 = vpow2.f32 %v5861_v51  ;;  %v11295_v9 = vpop.f32.mrf.mxu1 }
 0x9e7   : > { %v8897_v7 = vpop.eup %8896  ;;  %6692 = vst.msk [vmem:[%s10751_s27 + $0x68] sm:$0xff] %vm1401_vm0, %v8895_v31  ;;  %8922 = vpow2.f32 %v5949_v49  ;;  %v8155_v5 = vpop.f32.mrf.mxu0 }
 0x9e8   : > { %v8899_v23 = vpop.eup %8898  ;;  %6697 = vst [vmem:[%s10751_s27 + $0x90] sm:$0xff] %v8897_v7  ;;  %8924 = vpow2.f32 %v5863_v58 }
 0x9e9   : > { %v8901_v59 = vpop.eup %8900  ;;  %6727 = vst.msk [vmem:[%s10751_s27 + $0x180] sm:$0xff] %vm1401_vm0, %v8899_v23  ;;  %8926 = vpow2.f32 %v5921_v11 }
 0x9ea   : > { %v8903_v20 = vpop.eup %8902  ;;  %6698 = vst [vmem:[%s10751_s27 + $0x98] sm:$0xff] %v8901_v59  ;;  %8928 = vpow2.f32 %v5875_v17 }
 0x9eb   : > { %v8905_v46 = vpop.eup %8904  ;;  %6713 = vst.msk [vmem:[%s10751_s27 + $0x110] sm:$0xff] %vm1401_vm0, %v8903_v20  ;;  %8930 = vpow2.f32 %v5991_v18  ;;  %v5619_v18 = vsub.f32 0.0, %v5280_v63  ;;  %v11302_v20 = vpop.f32.mrf.mxu1 }
 0x9ec   : > { %v8907_v50 = vpop.eup %8906  ;;  %6704 = vst [vmem:[%s10751_s27 + $0xc8] sm:$0xff] %v8905_v46  ;;  %8932 = vpow2.f32 %v5877_v39  ;;  %v5620_v46 = vsub.f32 0.0, %v5282_v53 }
 0x9ed   : > { %v8909_v28 = vpop.eup %8908  ;;  %6734 = vst.msk [vmem:[%s10751_s27 + $0x1b8] sm:$0xff] %vm1401_vm0, %v8907_v50  ;;  %8934 = vpow2.f32 %v5963_v10  ;;  %v5903_v44 = vmul.f32 1.442695, %v5619_v18 }
 0x9ee   : > { %v8911_v26 = vpop.eup %8910  ;;  %6705 = vst [vmem:[%s10751_s27 + $0xd0] sm:$0xff] %v8909_v28  ;;  %8936 = vpow2.f32 %v5889_v48  ;;  %v5677_v28 = vsub.f32 0.0, %v5497_v52  ;;  %v5905_v37 = vmul.f32 1.442695, %v5620_v46 }
 0x9ef   : > { %v8913_v41 = vpop.eup %8912  ;;  %v6263_v51 = vadd.f32 1.0, %v8911_v26  ;;  %8938 = vpow2.f32 %v6005_v40  ;;  %v5508_v40 = vadd.f32 %v8152_v42, %v11165_v33  ;;  %v5500_v42 = vadd.f32 %v5499_v19, %v11165_v33 }
 0x9f0   : > { %v8915_v29 = vpop.eup %8914  ;;  %v6307_v61 = vadd.f32 1.0, %v8913_v41  ;;  %8940 = vpow2.f32 %v5891_v36  ;;  %v6047_v41 = vmul.f32 1.442695, %v5691_v30  ;;  %v6019_v43 = vmul.f32 1.442695, %v5677_v28 }
 0x9f1   : > { %v8917_v49 = vpop.eup %8916  ;;  %8942 = vrcp.f32 %v6263_v51  ;;  %v6264_v1 = vadd.f32 1.0, %v8915_v29  ;;  %v5512_v51 = vpop.f32.mrf.mxu0  ;;  %v5627_v19 = vsub.f32 0.0, %v5286_v14 }
 0x9f2   : > { %v8919_v21 = vpop.eup %8918  ;;  %8944 = vrcp.f32 %v6307_v61  ;;  %v6293_v38 = vadd.f32 1.0, %v8917_v49  ;;  %v5626_v49 = vsub.f32 0.0, %v5284_v6  ;;  %v5513_v53 = vadd.f32 %v5512_v51, %v11165_v33 }
 0x9f3   : > { %v8921_v32 = vpop.eup %8920  ;;  %6720 = vst.msk [vmem:[%s10751_s27 + $0x148] sm:$0xff] %vm1401_vm0, %v8919_v21  ;;  %8946 = vrcp.f32 %v6264_v1  ;;  %v11308_v1 = vpop.f32.mrf.mxu1 }
 0x9f4   : > { %v8923_v58 = vpop.eup %8922  ;;  %8948 = vrcp.f32 %v6293_v38  ;;  %v6270_v3 = vadd.f32 1.0, %v8921_v32  ;;  %v5698_v38 = vsub.f32 0.0, %v5508_v40  ;;  %v5290_v32 = vadd.f32 %v11182_v35, %v11162_v57 }
 0x9f5   : > { %v8925_v15 = vpop.eup %8924  ;;  %v6314_v11 = vadd.f32 1.0, %v8923_v58  ;;  %8950 = vpow2.f32 %v5977_v34  ;;  %v5521_v58 = vadd.f32 %v8155_v5, %v11165_v33  ;;  %v5917_v35 = vmul.f32 1.442695, %v5626_v49 }
 0x9f6   : > { %v8927_v31 = vpop.eup %8926  ;;  %8952 = vrcp.f32 %v6270_v3  ;;  %v6271_v17 = vadd.f32 1.0, %v8925_v15  ;;  %v5292_v15 = vadd.f32 %v11188_v60, %v11172_v27  ;;  %v6061_v18 = vmul.f32 1.442695, %v5698_v38 }
 0x9f7   : > { %v8929_v7 = vpop.eup %8928  ;;  %8954 = vrcp.f32 %v6314_v11  ;;  %v6300_v16 = vadd.f32 1.0, %v8927_v31  ;;  %v8156_v11 = vpop.f32.mrf.mxu0  ;;  %v5633_v52 = vsub.f32 0.0, %v5290_v32  ;;  %v5294_v60 = vadd.f32 %v11199_v47, %v11162_v57 }
 0x9f8   : > { %v8931_v23 = vpop.eup %8930  ;;  %8956 = vrcp.f32 %v6271_v17  ;;  %v6277_v39 = vadd.f32 1.0, %v8929_v7  ;;  %v5684_v17 = vsub.f32 0.0, %v5500_v42  ;;  %v11320_v7 = vpop.f32.mrf.mxu1  ;;  %v5719_v30 = vsub.f32 0.0, %v5521_v58 }
 0x9f9   : > { %v8933_v59 = vpop.eup %8932  ;;  %8958 = vrcp.f32 %v6300_v16  ;;  %v6335_v10 = vadd.f32 1.0, %v8931_v23  ;;  %v5524_v5 = vadd.f32 %v8156_v11, %v11165_v33  ;;  %v5634_v6 = vsub.f32 0.0, %v5292_v15 }
 0x9fa   : > { %v8935_v8 = vpop.eup %8934  ;;  %8960 = vrcp.f32 %v6277_v39  ;;  %v6278_v48 = vadd.f32 1.0, %v8933_v59  ;;  %v6033_v47 = vmul.f32 1.442695, %v5684_v17  ;;  %v5705_v40 = vsub.f32 0.0, %v5513_v53 }
 0x9fb   : > { %v8937_v50 = vpop.eup %8936  ;;  %8962 = vrcp.f32 %v6335_v10  ;;  %v6321_v36 = vadd.f32 1.0, %v8935_v8  ;;  %v5919_v10 = vmul.f32 1.442695, %v5627_v19  ;;  %v5296_v8 = vadd.f32 %v11209_v54, %v11172_v27 }
 0x9fc   : > { %v8939_v22 = vpop.eup %8938  ;;  %8964 = vrcp.f32 %v6278_v48  ;;  %v6284_v26 = vadd.f32 1.0, %v8937_v50  ;;  %v5515_v48 = vpop.f32.mrf.mxu0  ;;  %v5640_v28 = vsub.f32 0.0, %v5294_v60  ;;  %v6103_v54 = vmul.f32 1.442695, %v5719_v30 }
 0x9fd   : > { %v8941_v29 = vpop.eup %8940  ;;  %8966 = vrcp.f32 %v6321_v36  ;;  %v6342_v61 = vadd.f32 1.0, %v8939_v22  ;;  %v11332_v50 = vpop.f32.mrf.mxu1  ;;  %v5933_v14 = vmul.f32 1.442695, %v5634_v6  ;;  %v5641_v51 = vsub.f32 0.0, %v5296_v8 }
 0x9fe   : > { %v8943_v34 = vpop.eup %8942  ;;  %8968 = vrcp.f32 %v6284_v26  ;;  %v6285_v21 = vadd.f32 1.0, %v8941_v29  ;;  %v5726_v26 = vsub.f32 0.0, %v5524_v5  ;;  %v8159_v29 = vpop.f32.mrf.mxu0  ;;  %v6075_v49 = vmul.f32 1.442695, %v5705_v40 }
 0x9ff   : > { %v8945_v63 = vpop.eup %8944  ;;  %6711 = vst [vmem:[%s10751_s27 + $0x100] sm:$0xff] %v8943_v34  ;;  %8970 = vrcp.f32 %v6342_v61  ;;  %v5516_v42 = vadd.f32 %v5515_v48, %v11165_v33  ;;  %v11341_v34 = vpop.f32.mrf.mxu1  ;;  %v5945_v38 = vmul.f32 1.442695, %v5640_v28  ;;  %v5947_v58 = vmul.f32 1.442695, %v5641_v51 }
 0xa00   : > { %v8947_v3 = vpop.eup %8946  ;;  %6755 = vst.msk [vmem:[%s10751_s27 + $0x260] sm:$0xff] %vm1401_vm0, %v8945_v63  ;;  %8972 = vrcp.f32 %v6285_v21  ;;  %v6117_v63 = vmul.f32 1.442695, %v5726_v26  ;;  %v5300_v5 = vadd.f32 %v11216_v62, %v11162_v57  ;;  %v5302_v26 = vadd.f32 %v11222_v24, %v11172_v27 }
 0xa01   : > { %v8949_v31 = vpop.eup %8948  ;;  %6712 = vst [vmem:[%s10751_s27 + $0x108] sm:$0xff] %v8947_v3  ;;  %8974 = vpow2.f32 %v5903_v44  ;;  %v5931_v44 = vmul.f32 1.442695, %v5633_v52  ;;  %v5528_v3 = vpop.f32.mrf.mxu0  ;;  %v5712_v19 = vsub.f32 0.0, %v5516_v42  ;;  %v5304_v42 = vadd.f32 %v11225_v56, %v11162_v57 }
 0xa02   : > { %v8951_v16 = vpop.eup %8950  ;;  %6741 = vst.msk [vmem:[%s10751_s27 + $0x1f0] sm:$0xff] %vm1401_vm0, %v8949_v31  ;;  %8976 = vpow2.f32 %v6047_v41  ;;  %v11349_v15 = vpop.f32.mrf.mxu1  ;;  %v5647_v28 = vsub.f32 0.0, %v5300_v5  ;;  %v5529_v51 = vadd.f32 %v5528_v3, %v11165_v33  ;;  %v5648_v3 = vsub.f32 0.0, %v5302_v26 }
 0xa03   : > { %v8953_v23 = vpop.eup %8952  ;;  %v6328_v39 = vadd.f32 1.0, %v8951_v16  ;;  %8978 = vpow2.f32 %v5905_v37  ;;  %v8160_v16 = vpop.f32.mrf.mxu0  ;;  %v6089_v60 = vmul.f32 1.442695, %v5712_v19  ;;  %v5306_v56 = vadd.f32 %v11231_v55, %v11172_v27 }
 0xa04   : > { %v8955_v59 = vpop.eup %8954  ;;  %6718 = vst [vmem:[%s10751_s27 + $0x138] sm:$0xff] %v8953_v23  ;;  %8980 = vpow2.f32 %v6019_v43  ;;  %v11352_v23 = vpop.f32.mrf.mxu1  ;;  %v5540_v24 = vadd.f32 %v8160_v16, %v11165_v33  ;;  %v5310_v5 = vadd.f32 %v11238_v13, %v11162_v57  ;;  %v5961_v55 = vmul.f32 1.442695, %v5648_v3 }
 0xa05   : > { %v8957_v46 = vpop.eup %8956  ;;  %6762 = vst.msk [vmem:[%s10751_s27 + $0x298] sm:$0xff] %vm1401_vm0, %v8955_v59  ;;  %8982 = vrcp.f32 %v6328_v39  ;;  %v5531_v48 = vpop.f32.mrf.mxu0 }
 0xa06   : > { %v8959_v36 = vpop.eup %8958  ;;  %6719 = vst [vmem:[%s10751_s27 + $0x140] sm:$0xff] %v8957_v46  ;;  %8984 = vpow2.f32 %v5917_v35  ;;  %v11359_v40 = vpop.f32.mrf.mxu1  ;;  %v5532_v16 = vadd.f32 %v5531_v48, %v11165_v33  ;;  %v5655_v48 = vsub.f32 0.0, %v5306_v56  ;;  %v5661_v26 = vsub.f32 0.0, %v5310_v5 }
 0xa07   : > { %v8961_v22 = vpop.eup %8960  ;;  %6748 = vst.msk [vmem:[%s10751_s27 + $0x228] sm:$0xff] %vm1401_vm0, %v8959_v36  ;;  %8986 = vpow2.f32 %v6061_v18 }
 0xa08   : > { %v8963_v41 = vpop.eup %8962  ;;  %6725 = vst [vmem:[%s10751_s27 + $0x170] sm:$0xff] %v8961_v22  ;;  %8988 = vpow2.f32 %v5919_v10  ;;  %v5537_v10 = vadd.f32 %v8159_v29, %v11165_v33  ;;  %v8163_v29 = vpop.f32.mrf.mxu0 }
 0xa09   : > { %v8965_v61 = vpop.eup %8964  ;;  %6783 = vst.msk [vmem:[%s10751_s27 + $0x340] sm:$0xff] %vm1401_vm0, %v8963_v41  ;;  %8990 = vpow2.f32 %v6033_v47 }
 0xa0a   : > { %v8967_v21 = vpop.eup %8966  ;;  %6726 = vst [vmem:[%s10751_s27 + $0x178] sm:$0xff] %v8965_v61  ;;  %8992 = vpow2.f32 %v5931_v44 }
 0xa0b   : > { %v8969_v32 = vpop.eup %8968  ;;  %6769 = vst.msk [vmem:[%s10751_s27 + $0x2d0] sm:$0xff] %vm1401_vm0, %v8967_v21  ;;  %8994 = vpow2.f32 %v6103_v54  ;;  %v5747_v54 = vsub.f32 0.0, %v5537_v10  ;;  %v11366_v21 = vpop.f32.mrf.mxu1  ;;  %v5553_v10 = vadd.f32 %v8163_v29, %v11165_v33 }
 0xa0c   : > { %v8971_v37 = vpop.eup %8970  ;;  %6732 = vst [vmem:[%s10751_s27 + $0x1a8] sm:$0xff] %v8969_v32  ;;  %8996 = vpow2.f32 %v5933_v14 }
 0xa0d   : > { %v8973_v43 = vpop.eup %8972  ;;  %6790 = vst.msk [vmem:[%s10751_s27 + $0x378] sm:$0xff] %vm1401_vm0, %v8971_v37  ;;  %8998 = vpow2.f32 %v6075_v49 }
 0xa0e   : > { %v8975_v11 = vpop.eup %8974  ;;  %6733 = vst [vmem:[%s10751_s27 + $0x1b0] sm:$0xff] %v8973_v43  ;;  %9000 = vpow2.f32 %v5945_v38  ;;  %v6159_v43 = vmul.f32 1.442695, %v5747_v54 }
 0xa0f   : > { %v8977_v31 = vpop.eup %8976  ;;  %v6291_v35 = vadd.f32 1.0, %v8975_v11  ;;  %9002 = vpow2.f32 %v6117_v63  ;;  %v5959_v63 = vmul.f32 1.442695, %v5647_v28 }
 0xa10   : > { %v8979_v17 = vpop.eup %8978  ;;  %v6363_v53 = vadd.f32 1.0, %v8977_v31  ;;  %9004 = vpow2.f32 %v5947_v58  ;;  %v5733_v31 = vsub.f32 0.0, %v5529_v51  ;;  %v5775_v51 = vsub.f32 0.0, %v5553_v10 }
 0xa11   : > { %v8981_v18 = vpop.eup %8980  ;;  %9006 = vrcp.f32 %v6291_v35  ;;  %v6292_v52 = vadd.f32 1.0, %v8979_v17  ;;  %v5544_v35 = vpop.f32.mrf.mxu0 }
 0xa12   : > { %v8983_v39 = vpop.eup %8982  ;;  %9008 = vrcp.f32 %v6363_v53  ;;  %v6349_v30 = vadd.f32 1.0, %v8981_v18  ;;  %v5654_v18 = vsub.f32 0.0, %v5304_v42  ;;  %v5545_v28 = vadd.f32 %v5544_v35, %v11165_v33 }
 0xa13   : > { %v8985_v59 = vpop.eup %8984  ;;  %6776 = vst.msk [vmem:[%s10751_s27 + $0x308] sm:$0xff] %vm1401_vm0, %v8983_v39  ;;  %9010 = vrcp.f32 %v6292_v52  ;;  %v11372_v52 = vpop.f32.mrf.mxu1 }
 0xa14   : > { %v8987_v6 = vpop.eup %8986  ;;  %9012 = vrcp.f32 %v6349_v30  ;;  %v6298_v8 = vadd.f32 1.0, %v8985_v59  ;;  %v5754_v30 = vsub.f32 0.0, %v5540_v24  ;;  %v5973_v13 = vmul.f32 1.442695, %v5654_v18 }
 0xa15   : > { %v8989_v46 = vpop.eup %8988  ;;  %v6370_v47 = vadd.f32 1.0, %v8987_v6  ;;  %9014 = vpow2.f32 %v6089_v60 }
 0xa16   : > { %v8991_v36 = vpop.eup %8990  ;;  %9016 = vrcp.f32 %v6298_v8  ;;  %v6299_v44 = vadd.f32 1.0, %v8989_v46  ;;  %v6131_v8 = vmul.f32 1.442695, %v5733_v31  ;;  %v5312_v46 = vadd.f32 %v11244_v2, %v11172_v27 }
 0xa17   : > { %v8993_v62 = vpop.eup %8992  ;;  %9018 = vrcp.f32 %v6370_v47  ;;  %v6356_v22 = vadd.f32 1.0, %v8991_v36  ;;  %v8164_v47 = vpop.f32.mrf.mxu0  ;;  %v6173_v54 = vmul.f32 1.442695, %v5754_v30  ;;  %v5314_v2 = vadd.f32 %v11256_v12, %v11162_v57 }
 0xa18   : > { %v8995_v41 = vpop.eup %8994  ;;  %9020 = vrcp.f32 %v6299_v44  ;;  %v6305_v14 = vadd.f32 1.0, %v8993_v62  ;;  %v5740_v44 = vsub.f32 0.0, %v5532_v16  ;;  %v11384_v62 = vpop.f32.mrf.mxu1  ;;  %v5556_v29 = vadd.f32 %v8164_v47, %v11165_v33 }
 0xa19   : > { %v8997_v61 = vpop.eup %8996  ;;  %9022 = vrcp.f32 %v6356_v22  ;;  %v6391_v49 = vadd.f32 1.0, %v8995_v41  ;;  %v5662_v42 = vsub.f32 0.0, %v5312_v46  ;;  %v5547_v3 = vpop.f32.mrf.mxu0 }
 0xa1a   : > { %v8999_v38 = vpop.eup %8998  ;;  %9024 = vrcp.f32 %v6305_v14  ;;  %v6306_v32 = vadd.f32 1.0, %v8997_v61  ;;  %v6145_v12 = vmul.f32 1.442695, %v5740_v44  ;;  %v11396_v24 = vpop.f32.mrf.mxu1  ;;  %v5548_v18 = vadd.f32 %v5547_v3, %v11165_v33 }
 0xa1b   : > { %v9001_v37 = vpop.eup %9000  ;;  %9026 = vrcp.f32 %v6391_v49  ;;  %v6377_v58 = vadd.f32 1.0, %v8999_v38  ;;  %v5975_v49 = vmul.f32 1.442695, %v5655_v48  ;;  %v5316_v38 = vadd.f32 %v11268_v25, %v11172_v27 }
 0xa1c   : > { %v9003_v19 = vpop.eup %9002  ;;  %9028 = vrcp.f32 %v6306_v32  ;;  %v6312_v11 = vadd.f32 1.0, %v9001_v37  ;;  %v6215_v25 = vmul.f32 1.442695, %v5775_v51  ;;  %v5989_v56 = vmul.f32 1.442695, %v5662_v42  ;;  %v11405_v16 = vpop.f32.mrf.mxu1 }
 0xa1d   : > { %v9005_v17 = vpop.eup %9004  ;;  %9030 = vrcp.f32 %v6377_v58  ;;  %v6398_v53 = vadd.f32 1.0, %v9003_v19  ;;  %v5987_v58 = vmul.f32 1.442695, %v5661_v26  ;;  %v5669_v35 = vsub.f32 0.0, %v5316_v38 }
 0xa1e   : > { %v9007_v60 = vpop.eup %9006  ;;  %9032 = vrcp.f32 %v6312_v11  ;;  %v6313_v39 = vadd.f32 1.0, %v9005_v17  ;;  %v5782_v11 = vsub.f32 0.0, %v5556_v29  ;;  %v5768_v33 = vsub.f32 0.0, %v5548_v18 }
 0xa1f   : > { %v9009_v59 = vpop.eup %9008  ;;  %6739 = vst [vmem:[%s10751_s27 + $0x1e0] sm:$0xff] %v9007_v60  ;;  %9034 = vrcp.f32 %v6398_v53  ;;  %v5326_v3 = vadd.f32 %v11295_v9, %v11172_v27 }
 0xa20   : > { %v9011_v6 = vpop.eup %9010  ;;  %6811 = vst.msk [vmem:[%s10751_s27 + $0x420] sm:$0xff] %vm1401_vm0, %v9009_v59  ;;  %9036 = vrcp.f32 %v6313_v39  ;;  %v6229_v5 = vmul.f32 1.442695, %v5782_v11  ;;  %v5330_v11 = vadd.f32 %v11302_v20, %v11162_v57  ;;  %v5334_v20 = vadd.f32 %v11320_v7, %v11162_v57 }
 0xa21   : > { %v9013_v36 = vpop.eup %9012  ;;  %6740 = vst [vmem:[%s10751_s27 + $0x1e8] sm:$0xff] %v9011_v6  ;;  %9038 = vpow2.f32 %v5959_v63  ;;  %v5761_v63 = vsub.f32 0.0, %v5545_v28  ;;  %v11413_v6 = vpop.f32.mrf.mxu1  ;;  %v6201_v28 = vmul.f32 1.442695, %v5768_v33 }
 0xa22   : > { %v9015_v22 = vpop.eup %9014  ;;  %6797 = vst.msk [vmem:[%s10751_s27 + $0x3b0] sm:$0xff] %vm1401_vm0, %v9013_v36  ;;  %9040 = vpow2.f32 %v6159_v43  ;;  %v5668_v43 = vsub.f32 0.0, %v5314_v2  ;;  %v5320_v2 = vadd.f32 %v11277_v45, %v11162_v57 }
 0xa23   : > { %v9017_v41 = vpop.eup %9016  ;;  %v6384_v14 = vadd.f32 1.0, %v9015_v22  ;;  %9042 = vpow2.f32 %v5961_v55  ;;  %v6187_v53 = vmul.f32 1.442695, %v5761_v63  ;;  %v6003_v55 = vmul.f32 1.442695, %v5669_v35  ;;  %v11416_v22 = vpop.f32.mrf.mxu1 }
 0xa24   : > { %v9019_v61 = vpop.eup %9018  ;;  %6746 = vst [vmem:[%s10751_s27 + $0x218] sm:$0xff] %v9017_v41  ;;  %9044 = vpow2.f32 %v6131_v8  ;;  %v6001_v39 = vmul.f32 1.442695, %v5668_v43 }
 0xa25   : > { %v9021_v32 = vpop.eup %9020  ;;  %6818 = vst.msk [vmem:[%s10751_s27 + $0x458] sm:$0xff] %vm1401_vm0, %v9019_v61  ;;  %9046 = vrcp.f32 %v6384_v14  ;;  %v5322_v14 = vadd.f32 %v11285_v0, %v11172_v27  ;;  %v11424_v42 = vpop.f32.mrf.mxu1 }
 0xa26   : > { %v9023_v37 = vpop.eup %9022  ;;  %6747 = vst [vmem:[%s10751_s27 + $0x220] sm:$0xff] %v9021_v32  ;;  %9048 = vpow2.f32 %v5973_v13 }
 0xa27   : > { %v9025_v19 = vpop.eup %9024  ;;  %6804 = vst.msk [vmem:[%s10751_s27 + $0x3e8] sm:$0xff] %vm1401_vm0, %v9023_v37  ;;  %9050 = vpow2.f32 %v6173_v54  ;;  %v5676_v37 = vsub.f32 0.0, %v5322_v14 }
 0xa28   : > { %v9027_v31 = vpop.eup %9026  ;;  %6753 = vst [vmem:[%s10751_s27 + $0x250] sm:$0xff] %v9025_v19  ;;  %9052 = vpow2.f32 %v5975_v49 }
 0xa29   : > { %v9029_v17 = vpop.eup %9028  ;;  %6839 = vst.msk [vmem:[%s10751_s27 + $0x500] sm:$0xff] %vm1401_vm0, %v9027_v31  ;;  %9054 = vpow2.f32 %v6145_v12  ;;  %v5675_v12 = vsub.f32 0.0, %v5320_v2  ;;  %v11432_v31 = vpop.f32.mrf.mxu1 }
 0xa2a   : > { %v9031_v60 = vpop.eup %9030  ;;  %6754 = vst [vmem:[%s10751_s27 + $0x258] sm:$0xff] %v9029_v17  ;;  %9056 = vpow2.f32 %v5987_v58  ;;  %v5324_v58 = vadd.f32 %v11288_v4, %v11162_v57  ;;  %v5332_v4 = vadd.f32 %v11308_v1, %v11172_v27  ;;  %v5336_v1 = vadd.f32 %v11332_v50, %v11172_v27 }
 0xa2b   : > { %v9033_v30 = vpop.eup %9032  ;;  %6825 = vst.msk [vmem:[%s10751_s27 + $0x490] sm:$0xff] %vm1401_vm0, %v9031_v60  ;;  %9058 = vpow2.f32 %v6215_v25  ;;  %v6015_v17 = vmul.f32 1.442695, %v5675_v12  ;;  %v6017_v60 = vmul.f32 1.442695, %v5676_v37  ;;  %v11440_v33 = vpop.f32.mrf.mxu1 }
 0xa2c   : > { %v9035_v59 = vpop.eup %9034  ;;  %6760 = vst [vmem:[%s10751_s27 + $0x288] sm:$0xff] %v9033_v30  ;;  %9060 = vpow2.f32 %v5989_v56  ;;  %v5682_v9 = vsub.f32 0.0, %v5324_v58  ;;  %v5697_v2 = vsub.f32 0.0, %v5336_v1 }
 0xa2d   : > { %v9037_v10 = vpop.eup %9036  ;;  %6846 = vst.msk [vmem:[%s10751_s27 + $0x538] sm:$0xff] %vm1401_vm0, %v9035_v59  ;;  %9062 = vpow2.f32 %v6187_v53  ;;  %v11454_v14 = vpop.f32.mrf.mxu1 }
 0xa2e   : > { %v9039_v8 = vpop.eup %9038  ;;  %6761 = vst [vmem:[%s10751_s27 + $0x290] sm:$0xff] %v9037_v10  ;;  %9064 = vpow2.f32 %v6001_v39  ;;  %v5689_v10 = vsub.f32 0.0, %v5330_v11  ;;  %v6029_v7 = vmul.f32 1.442695, %v5682_v9 }
 0xa2f   : > { %v9041_v48 = vpop.eup %9040  ;;  %v6319_v46 = vadd.f32 1.0, %v9039_v8  ;;  %9066 = vpow2.f32 %v6229_v5  ;;  %v5683_v5 = vsub.f32 0.0, %v5326_v3 }
 0xa30   : > { %v9043_v47 = vpop.eup %9042  ;;  %v6419_v36 = vadd.f32 1.0, %v9041_v48  ;;  %9068 = vpow2.f32 %v6003_v55 }
 0xa31   : > { %v9045_v13 = vpop.eup %9044  ;;  %9070 = vrcp.f32 %v6319_v46  ;;  %v6320_v44 = vadd.f32 1.0, %v9043_v47  ;;  %v5690_v46 = vsub.f32 0.0, %v5332_v4  ;;  %v5340_v47 = vadd.f32 %v11341_v34, %v11162_v57 }
 0xa32   : > { %v9047_v54 = vpop.eup %9046  ;;  %9072 = vrcp.f32 %v6419_v36  ;;  %v6405_v26 = vadd.f32 1.0, %v9045_v13  ;;  %v5342_v13 = vadd.f32 %v11349_v15, %v11172_v27  ;;  %v6031_v50 = vmul.f32 1.442695, %v5683_v5 }
 0xa33   : > { %v9049_v41 = vpop.eup %9048  ;;  %6832 = vst.msk [vmem:[%s10751_s27 + $0x4c8] sm:$0xff] %vm1401_vm0, %v9047_v54  ;;  %9074 = vrcp.f32 %v6320_v44  ;;  %v5344_v54 = vadd.f32 %v11352_v23, %v11162_v57  ;;  %v6043_v34 = vmul.f32 1.442695, %v5689_v10  ;;  %v5350_v23 = vadd.f32 %v11366_v21, %v11162_v57 }
 0xa34   : > { %v9051_v51 = vpop.eup %9050  ;;  %9076 = vrcp.f32 %v6405_v26  ;;  %v6326_v29 = vadd.f32 1.0, %v9049_v41  ;;  %v5346_v41 = vadd.f32 %v11359_v40, %v11172_v27  ;;  %v5352_v40 = vadd.f32 %v11372_v52, %v11172_v27 }
 0xa35   : > { %v9053_v61 = vpop.eup %9052  ;;  %v6426_v49 = vadd.f32 1.0, %v9051_v51  ;;  %9078 = vpow2.f32 %v6201_v28  ;;  %v5696_v28 = vsub.f32 0.0, %v5334_v20  ;;  %v6045_v51 = vmul.f32 1.442695, %v5690_v46 }
 0xa36   : > { %v9055_v38 = vpop.eup %9054  ;;  %9080 = vrcp.f32 %v6326_v29  ;;  %v6327_v32 = vadd.f32 1.0, %v9053_v61  ;;  %v5703_v29 = vsub.f32 0.0, %v5340_v47  ;;  %v6059_v21 = vmul.f32 1.442695, %v5697_v2 }
 0xa37   : > { %v9057_v45 = vpop.eup %9056  ;;  %9082 = vrcp.f32 %v6426_v49  ;;  %v6412_v63 = vadd.f32 1.0, %v9055_v38  ;;  %v5704_v38 = vsub.f32 0.0, %v5342_v13  ;;  %v6057_v12 = vmul.f32 1.442695, %v5696_v28 }
 0xa38   : > { %v9059_v0 = vpop.eup %9058  ;;  %9084 = vrcp.f32 %v6327_v32  ;;  %v6333_v43 = vadd.f32 1.0, %v9057_v45  ;;  %v5710_v45 = vsub.f32 0.0, %v5344_v54  ;;  %v5711_v58 = vsub.f32 0.0, %v5346_v41 }
 0xa39   : > { %v9061_v19 = vpop.eup %9060  ;;  %9086 = vrcp.f32 %v6412_v63  ;;  %v6447_v25 = vadd.f32 1.0, %v9059_v0  ;;  %v5354_v63 = vadd.f32 %v11384_v62, %v11162_v57  ;;  %v11467_v0 = vpop.f32.mrf.mxu1  ;;  %v6071_v52 = vmul.f32 1.442695, %v5703_v29 }
 0xa3a   : > { %v9063_v56 = vpop.eup %9062  ;;  %9088 = vrcp.f32 %v6333_v43  ;;  %v6334_v35 = vadd.f32 1.0, %v9061_v19  ;;  %v5717_v3 = vsub.f32 0.0, %v5350_v23  ;;  %v6073_v62 = vmul.f32 1.442695, %v5704_v38 }
 0xa3b   : > { %v9065_v53 = vpop.eup %9064  ;;  %9090 = vrcp.f32 %v6447_v25  ;;  %v6433_v18 = vadd.f32 1.0, %v9063_v56  ;;  %v5718_v25 = vsub.f32 0.0, %v5352_v40  ;;  %v6085_v56 = vmul.f32 1.442695, %v5710_v45 }
 0xa3c   : > { %v9067_v39 = vpop.eup %9066  ;;  %9092 = vrcp.f32 %v6334_v35  ;;  %v6340_v30 = vadd.f32 1.0, %v9065_v53  ;;  %v5724_v35 = vsub.f32 0.0, %v5354_v63  ;;  %v6087_v4 = vmul.f32 1.442695, %v5711_v58 }
 0xa3d   : > { %v9069_v59 = vpop.eup %9068  ;;  %9094 = vrcp.f32 %v6433_v18  ;;  %v6454_v55 = vadd.f32 1.0, %v9067_v39  ;;  %v5356_v53 = vadd.f32 %v11396_v24, %v11172_v27  ;;  %v11477_v18 = vpop.f32.mrf.mxu1  ;;  %v6099_v9 = vmul.f32 1.442695, %v5717_v3 }
 0xa3e   : > { %v9071_v8 = vpop.eup %9070  ;;  %9096 = vrcp.f32 %v6340_v30  ;;  %v6341_v48 = vadd.f32 1.0, %v9069_v59  ;;  %v6101_v30 = vmul.f32 1.442695, %v5718_v25  ;;  %v6113_v20 = vmul.f32 1.442695, %v5724_v35 }
 0xa3f   : > { %v9073_v36 = vpop.eup %9072  ;;  %6767 = vst [vmem:[%s10751_s27 + $0x2c0] sm:$0xff] %v9071_v8  ;;  %9098 = vrcp.f32 %v6454_v55  ;;  %v5725_v24 = vsub.f32 0.0, %v5356_v53  ;;  %v11485_v55 = vpop.f32.mrf.mxu1  ;;  %v5360_v28 = vadd.f32 %v11405_v16, %v11162_v57  ;;  %v5364_v40 = vadd.f32 %v11416_v22, %v11162_v57 }
 0xa40   : > { %v9075_v44 = vpop.eup %9074  ;;  %6867 = vst.msk [vmem:[%s10751_s27 + $0x5e0] sm:$0xff] %vm1401_vm0, %v9073_v36  ;;  %9100 = vrcp.f32 %v6341_v48  ;;  %v5372_v22 = vadd.f32 %v11440_v33, %v11172_v27  ;;  %v5376_v33 = vadd.f32 %v11467_v0, %v11172_v27 }
 0xa41   : > { %v9077_v26 = vpop.eup %9076  ;;  %6768 = vst [vmem:[%s10751_s27 + $0x2c8] sm:$0xff] %v9075_v44  ;;  %9102 = vpow2.f32 %v6015_v17  ;;  %v11488_v13 = vpop.f32.mrf.mxu1  ;;  %v5738_v25 = vsub.f32 0.0, %v5364_v40 }
 0xa42   : > { %v9079_v15 = vpop.eup %9078  ;;  %6853 = vst.msk [vmem:[%s10751_s27 + $0x570] sm:$0xff] %vm1401_vm0, %v9077_v26  ;;  %9104 = vpow2.f32 %v6017_v60  ;;  %v5362_v26 = vadd.f32 %v11413_v6, %v11172_v27 }
 0xa43   : > { %v9081_v61 = vpop.eup %9080  ;;  %v6440_v49 = vadd.f32 1.0, %v9079_v15  ;;  %9106 = vpow2.f32 %v6029_v7  ;;  %v6115_v7 = vmul.f32 1.442695, %v5725_v24 }
 0xa44   : > { %v9083_v32 = vpop.eup %9082  ;;  %6774 = vst [vmem:[%s10751_s27 + $0x2f8] sm:$0xff] %v9081_v61  ;;  %9108 = vpow2.f32 %v6031_v50  ;;  %v5731_v61 = vsub.f32 0.0, %v5360_v28  ;;  %v5732_v38 = vsub.f32 0.0, %v5362_v26 }
 0xa45   : > { %v9085_v37 = vpop.eup %9084  ;;  %6874 = vst.msk [vmem:[%s10751_s27 + $0x618] sm:$0xff] %vm1401_vm0, %v9083_v32  ;;  %9110 = vrcp.f32 %v6440_v49 }
 0xa46   : > { %v9087_v43 = vpop.eup %9086  ;;  %6775 = vst [vmem:[%s10751_s27 + $0x300] sm:$0xff] %v9085_v37  ;;  %9112 = vpow2.f32 %v6043_v34  ;;  %v5370_v37 = vadd.f32 %v11432_v31, %v11162_v57  ;;  %v5374_v31 = vadd.f32 %v11454_v14, %v11162_v57  ;;  %v6141_v14 = vmul.f32 1.442695, %v5738_v25 }
 0xa47   : > { %v9089_v19 = vpop.eup %9088  ;;  %6860 = vst.msk [vmem:[%s10751_s27 + $0x5a8] sm:$0xff] %vm1401_vm0, %v9087_v43  ;;  %9114 = vpow2.f32 %v6045_v51  ;;  %v5385_v51 = vpop.f32.mrf.mxu1 }
 0xa48   : > { %v9091_v11 = vpop.eup %9090  ;;  %6781 = vst [vmem:[%s10751_s27 + $0x330] sm:$0xff] %v9089_v19  ;;  %9116 = vpow2.f32 %v6057_v12  ;;  %v5366_v12 = vadd.f32 %v11424_v42, %v11172_v27  ;;  %v5752_v24 = vsub.f32 0.0, %v5374_v31 }
 0xa49   : > { %v9093_v17 = vpop.eup %9092  ;;  %6895 = vst.msk [vmem:[%s10751_s27 + $0x6c0] sm:$0xff] %vm1401_vm0, %v9091_v11  ;;  %9118 = vpow2.f32 %v6059_v21  ;;  %v5389_v21 = vpop.f32.mrf.mxu1 }
 0xa4a   : > { %v9095_v60 = vpop.eup %9094  ;;  %6782 = vst [vmem:[%s10751_s27 + $0x338] sm:$0xff] %v9093_v17  ;;  %9120 = vpow2.f32 %v6071_v52  ;;  %v6127_v52 = vmul.f32 1.442695, %v5731_v61  ;;  %v6169_v26 = vmul.f32 1.442695, %v5752_v24 }
 0xa4b   : > { %v9097_v39 = vpop.eup %9096  ;;  %6881 = vst.msk [vmem:[%s10751_s27 + $0x650] sm:$0xff] %vm1401_vm0, %v9095_v60  ;;  %9122 = vpow2.f32 %v6073_v62  ;;  %v6129_v62 = vmul.f32 1.442695, %v5732_v38  ;;  %v5391_v53 = vpop.f32.mrf.mxu1 }
 0xa4c   : > { %v9099_v5 = vpop.eup %9098  ;;  %6788 = vst [vmem:[%s10751_s27 + $0x368] sm:$0xff] %v9097_v39  ;;  %9124 = vpow2.f32 %v6085_v56  ;;  %v5739_v56 = vsub.f32 0.0, %v5366_v12  ;;  %v5746_v39 = vsub.f32 0.0, %v5372_v22  ;;  %v5392_v28 = vadd.f32 %v5391_v53, %v11172_v27 }
 0xa4d   : > { %v9101_v59 = vpop.eup %9100  ;;  %6902 = vst.msk [vmem:[%s10751_s27 + $0x6f8] sm:$0xff] %vm1401_vm0, %v9099_v5  ;;  %9126 = vpow2.f32 %v6087_v4  ;;  %v5745_v4 = vsub.f32 0.0, %v5370_v37 }
 0xa4e   : > { %v9103_v10 = vpop.eup %9102  ;;  %6789 = vst [vmem:[%s10751_s27 + $0x370] sm:$0xff] %v9101_v59  ;;  %9128 = vpow2.f32 %v6099_v9  ;;  %v6143_v0 = vmul.f32 1.442695, %v5739_v56  ;;  %v5774_v40 = vsub.f32 0.0, %v5392_v28 }
 0xa4f   : > { %v9105_v1 = vpop.eup %9104  ;;  %v6347_v8 = vadd.f32 1.0, %v9103_v10  ;;  %9130 = vpow2.f32 %v6101_v30  ;;  %v5380_v30 = vadd.f32 %v11477_v18, %v11162_v57  ;;  %v5384_v10 = vadd.f32 %v11488_v13, %v11162_v57 }
 0xa50   : > { %v9107_v48 = vpop.eup %9106  ;;  %v6348_v46 = vadd.f32 1.0, %v9105_v1  ;;  %9132 = vpow2.f32 %v6113_v20  ;;  %v5382_v20 = vadd.f32 %v11485_v55, %v11172_v27  ;;  %v6155_v18 = vmul.f32 1.442695, %v5745_v4 }
 0xa51   : > { %v9109_v47 = vpop.eup %9108  ;;  %9134 = vrcp.f32 %v6347_v8  ;;  %v6354_v36 = vadd.f32 1.0, %v9107_v48  ;;  %v5753_v8 = vsub.f32 0.0, %v5376_v33  ;;  %v5386_v48 = vadd.f32 %v5385_v51, %v11172_v27 }
 0xa52   : > { %v9111_v44 = vpop.eup %9110  ;;  %9136 = vrcp.f32 %v6348_v46  ;;  %v6355_v50 = vadd.f32 1.0, %v9109_v47  ;;  %v5393_v46 = vpop.f32.mrf.mxu1  ;;  %v6157_v55 = vmul.f32 1.442695, %v5746_v39  ;;  %v5760_v13 = vsub.f32 0.0, %v5382_v20 }
 0xa53   : > { %v9113_v54 = vpop.eup %9112  ;;  %6888 = vst.msk [vmem:[%s10751_s27 + $0x688] sm:$0xff] %vm1401_vm0, %v9111_v44  ;;  %9138 = vrcp.f32 %v6354_v36  ;;  %v5759_v36 = vsub.f32 0.0, %v5380_v30  ;;  %v5767_v51 = vsub.f32 0.0, %v5386_v48 }
 0xa54   : > { %v9115_v34 = vpop.eup %9114  ;;  %9140 = vrcp.f32 %v6355_v50  ;;  %v6361_v2 = vadd.f32 1.0, %v9113_v54  ;;  %v6185_v38 = vmul.f32 1.442695, %v5760_v13 }
 0xa55   : > { %v9117_v41 = vpop.eup %9116  ;;  %v6362_v15 = vadd.f32 1.0, %v9115_v34  ;;  %9142 = vpow2.f32 %v6115_v7  ;;  %v5390_v7 = vadd.f32 %v5389_v21, %v11162_v57  ;;  %v5766_v34 = vsub.f32 0.0, %v5384_v10 }
 0xa56   : > { %v9119_v29 = vpop.eup %9118  ;;  %9144 = vrcp.f32 %v6361_v2  ;;  %v6368_v23 = vadd.f32 1.0, %v9117_v41  ;;  %v5394_v2 = vadd.f32 %v5393_v46, %v11162_v57 }
 0xa57   : > { %v9121_v49 = vpop.eup %9120  ;;  %9146 = vrcp.f32 %v6362_v15  ;;  %v6369_v16 = vadd.f32 1.0, %v9119_v29  ;;  %v6171_v15 = vmul.f32 1.442695, %v5753_v8  ;;  %v5773_v61 = vsub.f32 0.0, %v5390_v7 }
 0xa58   : > { %v9123_v32 = vpop.eup %9122  ;;  %9148 = vrcp.f32 %v6368_v23  ;;  %v6375_v6 = vadd.f32 1.0, %v9121_v49  ;;  %v6183_v23 = vmul.f32 1.442695, %v5759_v36  ;;  %v5395_v49 = vpop.f32.mrf.mxu1 }
 0xa59   : > { %v9125_v45 = vpop.eup %9124  ;;  %9150 = vrcp.f32 %v6369_v16  ;;  %v6376_v63 = vadd.f32 1.0, %v9123_v32  ;;  %v6197_v32 = vmul.f32 1.442695, %v5766_v34  ;;  %v6211_v21 = vmul.f32 1.442695, %v5773_v61 }
 0xa5a   : > { %v9127_v58 = vpop.eup %9126  ;;  %9152 = vrcp.f32 %v6375_v6  ;;  %v6382_v43 = vadd.f32 1.0, %v9125_v45  ;;  %v5780_v6 = vsub.f32 0.0, %v5394_v2  ;;  %v6199_v45 = vmul.f32 1.442695, %v5767_v51 }
 0xa5b   : > { %v9129_v3 = vpop.eup %9128  ;;  %9154 = vrcp.f32 %v6376_v63  ;;  %v6383_v19 = vadd.f32 1.0, %v9127_v58  ;;  %v5396_v63 = vadd.f32 %v5395_v49, %v11172_v27 }
 0xa5c   : > { %v9131_v42 = vpop.eup %9130  ;;  %9156 = vrcp.f32 %v6382_v43  ;;  %v6389_v11 = vadd.f32 1.0, %v9129_v3  ;;  %v6213_v43 = vmul.f32 1.442695, %v5774_v40  ;;  %v6225_v22 = vmul.f32 1.442695, %v5780_v6 }
 0xa5d   : > { %v9133_v35 = vpop.eup %9132  ;;  %9158 = vrcp.f32 %v6383_v19  ;;  %v6390_v17 = vadd.f32 1.0, %v9131_v42  ;;  %v5781_v19 = vsub.f32 0.0, %v5396_v63 }
 0xa5e   : > { %v9135_v60 = vpop.eup %9134  ;;  %9160 = vrcp.f32 %v6389_v11  ;;  %v6396_v9 = vadd.f32 1.0, %v9133_v35 }
 0xa5f   : > { %v9137_v5 = vpop.eup %9136  ;;  %6795 = vst [vmem:[%s10751_s27 + $0x3a0] sm:$0xff] %v9135_v60  ;;  %9162 = vrcp.f32 %v6390_v17  ;;  %v6227_v35 = vmul.f32 1.442695, %v5781_v19 }
 0xa60   : > { %v9139_v59 = vpop.eup %9138  ;;  %6796 = vst [vmem:[%s10751_s27 + $0x3a8] sm:$0xff] %v9137_v5  ;;  %9164 = vrcp.f32 %v6396_v9 }
 0xa61   : > { %v9141_v1 = vpop.eup %9140  ;;  %6802 = vst [vmem:[%s10751_s27 + $0x3d8] sm:$0xff] %v9139_v59  ;;  %9166 = vpow2.f32 %v6127_v52 }
 0xa62   : > { %v9143_v47 = vpop.eup %9142  ;;  %6803 = vst [vmem:[%s10751_s27 + $0x3e0] sm:$0xff] %v9141_v1  ;;  %9168 = vpow2.f32 %v6129_v62 }
 0xa63   : > { %v9145_v44 = vpop.eup %9144  ;;  %v6397_v50 = vadd.f32 1.0, %v9143_v47  ;;  %9170 = vpow2.f32 %v6141_v14 }
 0xa64   : > { %v9147_v54 = vpop.eup %9146  ;;  %6809 = vst [vmem:[%s10751_s27 + $0x410] sm:$0xff] %v9145_v44  ;;  %9172 = vpow2.f32 %v6143_v0 }
 0xa65   : > { %v9149_v41 = vpop.eup %9148  ;;  %6810 = vst [vmem:[%s10751_s27 + $0x418] sm:$0xff] %v9147_v54  ;;  %9174 = vrcp.f32 %v6397_v50 }
 0xa66   : > { %v9151_v29 = vpop.eup %9150  ;;  %6816 = vst [vmem:[%s10751_s27 + $0x448] sm:$0xff] %v9149_v41  ;;  %9176 = vpow2.f32 %v6155_v18 }
 0xa67   : > { %v9153_v16 = vpop.eup %9152  ;;  %6817 = vst [vmem:[%s10751_s27 + $0x450] sm:$0xff] %v9151_v29  ;;  %9178 = vpow2.f32 %v6157_v55 }
 0xa68   : > { %v9155_v57 = vpop.eup %9154  ;;  %6823 = vst [vmem:[%s10751_s27 + $0x480] sm:$0xff] %v9153_v16  ;;  %9180 = vpow2.f32 %v6169_v26 }
 0xa69   : > { %v9157_v12 = vpop.eup %9156  ;;  %6824 = vst [vmem:[%s10751_s27 + $0x488] sm:$0xff] %v9155_v57  ;;  %9182 = vpow2.f32 %v6171_v15 }
 0xa6a   : > { %v9159_v37 = vpop.eup %9158  ;;  %6830 = vst [vmem:[%s10751_s27 + $0x4b8] sm:$0xff] %v9157_v12  ;;  %9184 = vpow2.f32 %v6183_v23 }
 0xa6b   : > { %v9161_v58 = vpop.eup %9160  ;;  %6831 = vst [vmem:[%s10751_s27 + $0x4c0] sm:$0xff] %v9159_v37  ;;  %9186 = vpow2.f32 %v6185_v38 }
 0xa6c   : > { %v9163_v52 = vpop.eup %9162  ;;  %6837 = vst [vmem:[%s10751_s27 + $0x4f0] sm:$0xff] %v9161_v58  ;;  %9188 = vpow2.f32 %v6197_v32 }
 0xa6d   : > { %v9165_v3 = vpop.eup %9164  ;;  %6838 = vst [vmem:[%s10751_s27 + $0x4f8] sm:$0xff] %v9163_v52  ;;  %9190 = vpow2.f32 %v6199_v45 }
 0xa6e   : > { %v9167_v62 = vpop.eup %9166  ;;  %6844 = vst [vmem:[%s10751_s27 + $0x528] sm:$0xff] %v9165_v3  ;;  %9192 = vpow2.f32 %v6211_v21 }
 0xa6f   : > { %v9169_v27 = vpop.eup %9168  ;;  %v6403_v25 = vadd.f32 1.0, %v9167_v62  ;;  %9194 = vpow2.f32 %v6213_v43 }
 0xa70   : > { %v9171_v42 = vpop.eup %9170  ;;  %v6404_v11 = vadd.f32 1.0, %v9169_v27  ;;  %9196 = vpow2.f32 %v6225_v22 }
 0xa71   : > { %v9173_v56 = vpop.eup %9172  ;;  %9198 = vrcp.f32 %v6403_v25  ;;  %v6410_v31 = vadd.f32 1.0, %v9171_v42 }
 0xa72   : > { %v9175_v17 = vpop.eup %9174  ;;  %9200 = vrcp.f32 %v6404_v11  ;;  %v6411_v4 = vadd.f32 1.0, %v9173_v56 }
 0xa73   : > { %v9177_v33 = vpop.eup %9176  ;;  %6845 = vst [vmem:[%s10751_s27 + $0x530] sm:$0xff] %v9175_v17  ;;  %9202 = vrcp.f32 %v6410_v31 }
 0xa74   : > { %v9179_v53 = vpop.eup %9178  ;;  %9204 = vrcp.f32 %v6411_v4  ;;  %v6417_v60 = vadd.f32 1.0, %v9177_v33 }
 0xa75   : > { %v9181_v9 = vpop.eup %9180  ;;  %v6418_v39 = vadd.f32 1.0, %v9179_v53  ;;  %9206 = vpow2.f32 %v6227_v35 }
 0xa76   : > { %v9183_v30 = vpop.eup %9182  ;;  %9208 = vrcp.f32 %v6417_v60  ;;  %v6424_v5 = vadd.f32 1.0, %v9181_v9 }
 0xa77   : > { %v9185_v14 = vpop.eup %9184  ;;  %9210 = vrcp.f32 %v6418_v39  ;;  %v6425_v20 = vadd.f32 1.0, %v9183_v30 }
 0xa78   : > { %v9187_v59 = vpop.eup %9186  ;;  %9212 = vrcp.f32 %v6424_v5  ;;  %v6431_v0 = vadd.f32 1.0, %v9185_v14 }
 0xa79   : > { %v9189_v24 = vpop.eup %9188  ;;  %9214 = vrcp.f32 %v6425_v20  ;;  %v6432_v10 = vadd.f32 1.0, %v9187_v59 }
 0xa7a   : > { %v9191_v1 = vpop.eup %9190  ;;  %9216 = vrcp.f32 %v6431_v0  ;;  %v6438_v18 = vadd.f32 1.0, %v9189_v24 }
 0xa7b   : > { %v9193_v8 = vpop.eup %9192  ;;  %9218 = vrcp.f32 %v6432_v10  ;;  %v6439_v48 = vadd.f32 1.0, %v9191_v1 }
 0xa7c   : > { %v9195_v46 = vpop.eup %9194  ;;  %9220 = vrcp.f32 %v6438_v18  ;;  %v6445_v47 = vadd.f32 1.0, %v9193_v8 }
 0xa7d   : > { %v9197_v55 = vpop.eup %9196  ;;  %9222 = vrcp.f32 %v6439_v48  ;;  %v6446_v36 = vadd.f32 1.0, %v9195_v46 }
 0xa7e   : > { %v9199_v7 = vpop.eup %9198  ;;  %9224 = vrcp.f32 %v6445_v47  ;;  %v6452_v44 = vadd.f32 1.0, %v9197_v55 }
 0xa7f   : > { %v9201_v50 = vpop.eup %9200  ;;  %6851 = vst [vmem:[%s10751_s27 + $0x560] sm:$0xff] %v9199_v7  ;;  %9226 = vrcp.f32 %v6446_v36 }
 0xa80   : > { %v9203_v13 = vpop.eup %9202  ;;  %6852 = vst [vmem:[%s10751_s27 + $0x568] sm:$0xff] %v9201_v50  ;;  %9228 = vrcp.f32 %v6452_v44 }
 0xa81   : > { %v9205_v28 = vpop.eup %9204  ;;  %6858 = vst [vmem:[%s10751_s27 + $0x598] sm:$0xff] %v9203_v13 }
 0xa82   : > { %v9207_v54 = vpop.eup %9206  ;;  %6859 = vst [vmem:[%s10751_s27 + $0x5a0] sm:$0xff] %v9205_v28 }
 0xa83   : > { %v9209_v26 = vpop.eup %9208  ;;  %v6453_v34 = vadd.f32 1.0, %v9207_v54 }
 0xa84   : > { %v9211_v2 = vpop.eup %9210  ;;  %6865 = vst [vmem:[%s10751_s27 + $0x5d0] sm:$0xff] %v9209_v26 }
 0xa85   : > { %v9213_v41 = vpop.eup %9212  ;;  %6866 = vst [vmem:[%s10751_s27 + $0x5d8] sm:$0xff] %v9211_v2  ;;  %9230 = vrcp.f32 %v6453_v34 }
 0xa86   : > { %v9215_v15 = vpop.eup %9214  ;;  %6872 = vst [vmem:[%s10751_s27 + $0x608] sm:$0xff] %v9213_v41 }
 0xa87   : > { %v9217_v51 = vpop.eup %9216  ;;  %6873 = vst [vmem:[%s10751_s27 + $0x610] sm:$0xff] %v9215_v15 }
 0xa88   : > { %v9219_v29 = vpop.eup %9218  ;;  %6879 = vst [vmem:[%s10751_s27 + $0x640] sm:$0xff] %v9217_v51 }
 0xa89   : > { %v9221_v23 = vpop.eup %9220  ;;  %6880 = vst [vmem:[%s10751_s27 + $0x648] sm:$0xff] %v9219_v29 }
 0xa8a   : > { %v9223_v61 = vpop.eup %9222  ;;  %6886 = vst [vmem:[%s10751_s27 + $0x678] sm:$0xff] %v9221_v23 }
 0xa8b   : > { %v9225_v49 = vpop.eup %9224  ;;  %6887 = vst [vmem:[%s10751_s27 + $0x680] sm:$0xff] %v9223_v61 }
 0xa8c   : > { %v9227_v16 = vpop.eup %9226  ;;  %6893 = vst [vmem:[%s10751_s27 + $0x6b0] sm:$0xff] %v9225_v49 }
 0xa8d   : > { %v9229_v38 = vpop.eup %9228  ;;  %6894 = vst [vmem:[%s10751_s27 + $0x6b8] sm:$0xff] %v9227_v16 }
 0xa8e   : > { %6900 = vst [vmem:[%s10751_s27 + $0x6e8] sm:$0xff] %v9229_v38 }
 0xa92   : > { %v9231_v40 = vpop.eup %9230 }
 0xa93   : > { %6901 = vst [vmem:[%s10751_s27 + $0x6f0] sm:$0xff] %v9231_v40 }
 0xa94 PF: > { %s31_s2 = sadd.s32 1, %s9239_s2  }
 0xa95   : > { %p28_p4 = scmp.ge.s32.totalorder %s31_s2, 4  }
 0xa97   :  { %30 = sbr.rel (!%p28_p4) target bundleno = 7 (0x7), region = 134 }

</bundles_post_ra>
